<compile_context>
chip_gen: v7x
topology: tpu7x:2x2x1
jax: 0.10.0
libtpu: 0.0.40
codegen_flags: <defaults>
</compile_context>

<pallas_src>
import functools

import jax
import jax.numpy as jnp
from jax import lax
from jax.experimental import pallas as pl
from jax.experimental.pallas import tpu as pltpu

LRELU_SLOPE = 0.1
DILATIONS = (1, 3, 5)
KERNEL_SIZE = 3
# Recompute halo per side: each stage is conv(dilation=d) followed by conv(dilation=1).
HALO = sum(d + 1 for d in DILATIONS)          # = 12

_CompilerParams = getattr(pltpu, "CompilerParams", None)
if _CompilerParams is None:                    # very old jax fallback
    _CompilerParams = getattr(pltpu, "TPUCompilerParams")


def _leaky_relu(x, slope=LRELU_SLOPE):
    return jnp.where(x >= 0, x, slope * x)


def _vmem_limit_bytes():
    """Per-generation scoped-VMEM limit: 3/4 of physical, capped at 96 MiB."""
    try:
        cap = int(pltpu.get_tpu_info().vmem_capacity_bytes)
        return min((cap * 3) // 4, 96 * 1024 * 1024)
    except Exception:
        return 48 * 1024 * 1024               # safe on v5e / v6e / v7x


def _const_spec(shape, buffered):
    """BlockSpec for a weight/bias held resident across the whole grid."""
    ndim = len(shape)
    kwargs = {}
    if buffered and hasattr(pl, "Buffered"):
        kwargs["pipeline_mode"] = pl.Buffered(1)   # constant index_map -> 1 buffer
    return pl.BlockSpec(shape, lambda b, t: (0,) * ndim, **kwargs)


def _make_kernel(t_total, t_tile, w_rows, channels):
    """Per-(batch, time-tile) kernel.  In-kernel layout is (time, channels)."""
    C = channels
    W = w_rows                                  # t_tile + 2 * HALO

    def conv3(a, w_ref, b_ref, conv_idx, d):
        """'same' K=3 dilated conv as 3 accumulating matmuls on rolled taps.

        a:     (W, C) f32, already leaky_relu'd and boundary-masked.
        w_ref: (3, K, C_in, C_out) bf16.   b_ref: (3, 1, C) f32.
        Wrapped rows from the roll only pollute the discarded HALO region.
        """
        a_l = pltpu.roll(a, d, axis=0).astype(jnp.bfloat16)       # tap 0: row i - d
        a_c = a.astype(jnp.bfloat16)                              # tap 1: row i
        a_r = pltpu.roll(a, W - d, axis=0).astype(jnp.bfloat16)   # tap 2: row i + d
        acc = jnp.dot(a_l, w_ref[conv_idx, 0], preferred_element_type=jnp.float32)
        acc = acc + jnp.dot(a_c, w_ref[conv_idx, 1], preferred_element_type=jnp.float32)
        acc = acc + jnp.dot(a_r, w_ref[conv_idx, 2], preferred_element_type=jnp.float32)
        return acc + b_ref[conv_idx]

    def kernel(x_hbm, w1_ref, b1_ref, w2_ref, b2_ref, o_ref, xbuf, sem):
        b = pl.program_id(0)
        t = pl.program_id(1)
        n_t = pl.num_programs(1)

        def window_copy(tt, slot):
            # Overlapping (W, C) window of the halo-padded bf16 activation in HBM.
            return pltpu.make_async_copy(
                x_hbm.at[b, pl.ds(tt * t_tile, W), :], xbuf.at[slot], sem.at[slot])

        @pl.when(t == 0)                       # prime the first window of this batch row
        def _():
            window_copy(0, 0).start()

        @pl.when(t + 1 < n_t)                  # prefetch next window (double buffer)
        def _():
            window_copy(t + 1, (t + 1) % 2).start()

        slot = t % 2
        window_copy(t, slot).wait()

        x = xbuf[slot].astype(jnp.float32)     # (W, C) residual carried in f32

        # Global time index of each local row; rows outside [0, T) must look like zeros
        # to every conv (reproduces torch's per-conv zero padding at sequence ends).
        row = lax.broadcasted_iota(jnp.int32, (W, 1), 0)
        g = t * t_tile + row - HALO
        valid = jnp.logical_and(g >= 0, g < t_total)

        for i, d in enumerate(DILATIONS):
            a = jnp.where(valid, _leaky_relu(x), 0.0)
            xt = conv3(a, w1_ref, b1_ref, i, d)           # dilated conv
            a = jnp.where(valid, _leaky_relu(xt), 0.0)
            xt = conv3(a, w2_ref, b2_ref, i, 1)           # dilation-1 conv
            x = xt + x                                    # residual

        # Only the centre t_tile rows are exact; the halo is recompute scratch.
        o_ref[0] = x[HALO:HALO + t_tile].astype(o_ref.dtype)

    return kernel


@functools.partial(jax.jit, static_argnames=("t_tile", "buffered_weights"))
def _resblock1_pallas(x_ncw, w1, b1, w2, b2, *, t_tile, buffered_weights):
    B, C, T = x_ncw.shape
    K = KERNEL_SIZE
    H = HALO
    n_t = T // t_tile
    W = t_tile + 2 * H

    # One fused pass: NCW -> NWC (channels on lanes), bf16 at the kernel boundary
    # (halves input DMA + VMEM), zero-pad time by the halo so every DMA window is
    # in-bounds.  No overlapping-tile materialization.
    x_nwc = jnp.transpose(x_ncw, (0, 2, 1)).astype(jnp.bfloat16)
    xp = jnp.pad(x_nwc, ((0, 0), (H, H), (0, 0)))                 # (B, T + 2H, C)

    # torch (conv, C_out, C_in, K) -> (conv, K, C_in, C_out), bf16 for the MXU.
    w1f = jnp.transpose(w1, (0, 3, 2, 1)).astype(jnp.bfloat16)    # (3, K, C, C)
    w2f = jnp.transpose(w2, (0, 3, 2, 1)).astype(jnp.bfloat16)
    b1r = b1.reshape(3, 1, C).astype(jnp.float32)
    b2r = b2.reshape(3, 1, C).astype(jnp.float32)

    kernel = _make_kernel(T, t_tile, W, C)

    out = pl.pallas_call(
        kernel,
        out_shape=jax.ShapeDtypeStruct((B, T, C), jnp.float32),
        grid=(B, n_t),
        in_specs=[
            pl.BlockSpec(memory_space=pl.ANY),                    # padded x: manual DMA
            _const_spec((3, K, C, C), buffered_weights),          # convs1 weights (bf16)
            _const_spec((3, 1, C), buffered_weights),             # convs1 bias
            _const_spec((3, K, C, C), buffered_weights),          # convs2 weights (bf16)
            _const_spec((3, 1, C), buffered_weights),             # convs2 bias
        ],
        out_specs=pl.BlockSpec((1, t_tile, C), lambda b, t: (b, t, 0)),
        scratch_shapes=[
            pltpu.VMEM((2, W, C), jnp.bfloat16),                  # double-buffered window
            pltpu.SemaphoreType.DMA((2,)),
        ],
        compiler_params=_CompilerParams(
            dimension_semantics=("parallel", "arbitrary"),
            vmem_limit_bytes=_vmem_limit_bytes(),
        ),
    )(xp, w1f, b1r, w2f, b2r)

    return jnp.transpose(out, (0, 2, 1))                          # back to (B, C, T)


def resblock1_forward(x_ncw, w1, b1, w2, b2, *, t_tile=None):
    """x_ncw: (B, C, T) like PyTorch.  w1, w2: (3, C, C, K) effective (post weight /
    spectral norm) conv weights in torch Conv1d layout.  b1, b2: (3, C)."""
    _, _, T = x_ncw.shape
    if t_tile is None:
        t_tile = T
        # Biggest tile that divides T while keeping >= 2 time tiles (amortises per-step
        # cost, keeps halo recompute small, and gives megacore parts >=2 steps at B=1).
        for cand in (2048, 1024, 512, 256, 128, 64, 32, 16, 8):
            if cand <= T // 2 and T % cand == 0:
                t_tile = cand
                break
    assert T % t_tile == 0, "T must be divisible by t_tile"
    assert t_tile == T or t_tile % 8 == 0, "t_tile must be a multiple of 8 (sublanes)"

    try:
        return _resblock1_pallas(x_ncw, w1, b1, w2, b2,
                                 t_tile=t_tile, buffered_weights=True)
    except Exception:
        # pl.Buffered(1) (single-buffered resident weights) unsupported on this
        # jax/libtpu combo -> fall back to default double-buffered weight specs.
        return _resblock1_pallas(x_ncw, w1, b1, w2, b2,
                                 t_tile=t_tile, buffered_weights=False)


# ----- pure-JAX reference (correctness check only) ---------------------------------

def _conv1d_ref(x_ncw, w_oik, b, dilation):
    out = lax.conv_general_dilated(
        x_ncw, w_oik, window_strides=(1,),
        padding=[(dilation, dilation)], rhs_dilation=(dilation,),
        dimension_numbers=("NCH", "OIH", "NCH"),
        precision=lax.Precision.HIGHEST)
    return out + b.reshape(1, -1, 1)


def resblock1_ref(x, w1, b1, w2, b2):
    for i, d in enumerate(DILATIONS):
        xt = jnp.where(x >= 0, x, LRELU_SLOPE * x)
        xt = _conv1d_ref(xt, w1[i], b1[i], d)
        xt = jnp.where(xt >= 0, xt, LRELU_SLOPE * xt)
        xt = _conv1d_ref(xt, w2[i], b2[i], 1)
        x = xt + x
    return x


if __name__ == "__main__":
    # Small but representative: 2 time tiles (exercises the halo / mask / prefetch
    # paths), lane-dense channel count.
    B, C, T = 2, 128, 256
    K = KERNEL_SIZE

    key = jax.random.PRNGKey(0)
    kx, kw1, kw2, kb1, kb2 = jax.random.split(key, 5)

    x = jax.random.normal(kx, (B, C, T), jnp.float32)
    # Effective (post weight-norm) conv params, init_weights-style normal(0, 0.01).
    w1 = 0.01 * jax.random.normal(kw1, (3, C, C, K), jnp.float32)  # (conv, Cout, Cin, K)
    w2 = 0.01 * jax.random.normal(kw2, (3, C, C, K), jnp.float32)
    b1 = 0.01 * jax.random.normal(kb1, (3, C), jnp.float32)
    b2 = 0.01 * jax.random.normal(kb2, (3, C), jnp.float32)

    y = jax.block_until_ready(resblock1_forward(x, w1, b1, w2, b2, t_tile=128))
    y_ref = resblock1_ref(x, w1, b1, w2, b2)

    assert y.shape == x.shape
    max_err = float(jnp.max(jnp.abs(y - y_ref)))
    # bf16 activation at the kernel boundary + bf16 matmul operands (f32 accumulation).
    assert jnp.allclose(y, y_ref, rtol=2e-2, atol=1e-2), f"max abs err = {max_err}"
    print("KERNEL_OK")
</pallas_src>

<mosaic_0001>
module attributes {stable_mosaic.version = 11 : i64} {
  func.func @kernel(%arg0: i32, %arg1: i32, %arg2: memref<2x280x128xbf16, #tpu.memory_space<any>>, %arg3: memref<3x3x128x128xbf16, #tpu.memory_space<vmem>>, %arg4: memref<3x1x128xf32, #tpu.memory_space<vmem>>, %arg5: memref<3x3x128x128xbf16, #tpu.memory_space<vmem>>, %arg6: memref<3x1x128xf32, #tpu.memory_space<vmem>>, %arg7: memref<1x128x128xf32, #tpu.memory_space<vmem>>, %arg8: memref<2x152x128xbf16, #tpu.memory_space<vmem>>, %arg9: memref<2x!tpu.dma_semaphore, #tpu.memory_space<semaphore_mem>>) attributes {dimension_semantics = [#tpu.dimension_semantics<parallel>, #tpu.dimension_semantics<arbitrary>], iteration_bounds = array<i64: 2, 2>, scalar_prefetch = 0 : i64, scratch_operands = 2 : i64, tpu.core_type = #tpu.core_type<tc>, window_params = [{}, {pipeline_mode = #tpu.pipeline_mode<synchronous>, transform_indices = @transform_1, window_bounds = array<i64: 3, 3, 128, 128>}, {pipeline_mode = #tpu.pipeline_mode<synchronous>, transform_indices = @transform_2, window_bounds = array<i64: 3, 1, 128>}, {pipeline_mode = #tpu.pipeline_mode<synchronous>, transform_indices = @transform_3, window_bounds = array<i64: 3, 3, 128, 128>}, {pipeline_mode = #tpu.pipeline_mode<synchronous>, transform_indices = @transform_4, window_bounds = array<i64: 3, 1, 128>}, {transform_indices = @transform_5, window_bounds = array<i64: 1, 128, 128>}]} {
    %c0_i32 = arith.constant 0 : i32
    %0 = arith.cmpi eq, %arg1, %c0_i32 : i32
    %1 = arith.extui %0 : i1 to i32
    %c0_i32_0 = arith.constant 0 : i32
    %2 = arith.cmpi ne, %1, %c0_i32_0 : i32
    scf.if %2 {
      %c0_i32_147 = arith.constant 0 : i32
      %c0_i32_148 = arith.constant 0 : i32
      %c0_i32_149 = arith.constant 0 : i32
      %c0_i32_150 = arith.constant 0 : i32
      %220 = tpu.memref_slice %arg2[%arg0, %c0_i32_149, %c0_i32_150] : memref<2x280x128xbf16, #tpu.memory_space<any>> -> memref<1x152x128xbf16, #tpu.memory_space<any>>
      %221 = tpu.memref_squeeze %220 : memref<1x152x128xbf16, #tpu.memory_space<any>> -> memref<152x128xbf16, #tpu.memory_space<any>>
      %c0_i32_151 = arith.constant 0 : i32
      %c0_i32_152 = arith.constant 0 : i32
      %222 = tpu.memref_slice %arg8[%c0_i32_147, %c0_i32_151, %c0_i32_152] : memref<2x152x128xbf16, #tpu.memory_space<vmem>> -> memref<1x152x128xbf16, #tpu.memory_space<vmem>>
      %223 = tpu.memref_squeeze %222 : memref<1x152x128xbf16, #tpu.memory_space<vmem>> -> memref<152x128xbf16, #tpu.memory_space<vmem>>
      %224 = tpu.memref_slice %arg9[%c0_i32_148] : memref<2x!tpu.dma_semaphore, #tpu.memory_space<semaphore_mem>> -> memref<1x!tpu.dma_semaphore, #tpu.memory_space<semaphore_mem>>
      %225 = tpu.memref_squeeze %224 : memref<1x!tpu.dma_semaphore, #tpu.memory_space<semaphore_mem>> -> memref<!tpu.dma_semaphore, #tpu.memory_space<semaphore_mem>>
      tpu.enqueue_dma source(%221 : memref<152x128xbf16, #tpu.memory_space<any>>) target(%223 : memref<152x128xbf16, #tpu.memory_space<vmem>>) target_semaphore(%225 : memref<!tpu.dma_semaphore, #tpu.memory_space<semaphore_mem>>)
    } else {
    }
    %c1_i32 = arith.constant 1 : i32
    %3 = arith.addi %arg1, %c1_i32 : i32
    %c2_i32 = arith.constant 2 : i32
    %4 = arith.cmpi slt, %3, %c2_i32 : i32
    %5 = arith.extui %4 : i1 to i32
    %c0_i32_1 = arith.constant 0 : i32
    %6 = arith.cmpi ne, %5, %c0_i32_1 : i32
    scf.if %6 {
      %c1_i32_147 = arith.constant 1 : i32
      %220 = arith.addi %arg1, %c1_i32_147 : i32
      %c1_i32_148 = arith.constant 1 : i32
      %221 = arith.addi %arg1, %c1_i32_148 : i32
      %c2_i32_149 = arith.constant 2 : i32
      %c0_i32_150 = arith.constant 0 : i32
      %222 = arith.cmpi eq, %c2_i32_149, %c0_i32_150 : i32
      %c1_i32_151 = arith.constant 1 : i32
      %223 = arith.select %222, %c1_i32_151, %c2_i32_149 : i32
      %224 = arith.remsi %221, %223 : i32
      %c0_i32_152 = arith.constant 0 : i32
      %225 = arith.cmpi ne, %224, %c0_i32_152 : i32
      %c0_i32_153 = arith.constant 0 : i32
      %226 = arith.cmpi slt, %224, %c0_i32_153 : i32
      %c0_i32_154 = arith.constant 0 : i32
      %227 = arith.cmpi slt, %223, %c0_i32_154 : i32
      %228 = arith.xori %226, %227 : i1
      %229 = arith.andi %228, %225 : i1
      %230 = arith.addi %224, %223 : i32
      %231 = arith.select %229, %230, %224 : i32
      %c128_i32_155 = arith.constant 128 : i32
      %232 = arith.muli %220, %c128_i32_155 : i32
      %c0_i32_156 = arith.constant 0 : i32
      %233 = tpu.memref_slice %arg2[%arg0, %232, %c0_i32_156] : memref<2x280x128xbf16, #tpu.memory_space<any>> -> memref<1x152x128xbf16, #tpu.memory_space<any>>
      %234 = tpu.memref_squeeze %233 : memref<1x152x128xbf16, #tpu.memory_space<any>> -> memref<152x128xbf16, #tpu.memory_space<any>>
      %c0_i32_157 = arith.constant 0 : i32
      %c0_i32_158 = arith.constant 0 : i32
      %235 = tpu.memref_slice %arg8[%231, %c0_i32_157, %c0_i32_158] : memref<2x152x128xbf16, #tpu.memory_space<vmem>> -> memref<1x152x128xbf16, #tpu.memory_space<vmem>>
      %236 = tpu.memref_squeeze %235 : memref<1x152x128xbf16, #tpu.memory_space<vmem>> -> memref<152x128xbf16, #tpu.memory_space<vmem>>
      %237 = tpu.memref_slice %arg9[%231] : memref<2x!tpu.dma_semaphore, #tpu.memory_space<semaphore_mem>> -> memref<1x!tpu.dma_semaphore, #tpu.memory_space<semaphore_mem>>
      %238 = tpu.memref_squeeze %237 : memref<1x!tpu.dma_semaphore, #tpu.memory_space<semaphore_mem>> -> memref<!tpu.dma_semaphore, #tpu.memory_space<semaphore_mem>>
      tpu.enqueue_dma source(%234 : memref<152x128xbf16, #tpu.memory_space<any>>) target(%236 : memref<152x128xbf16, #tpu.memory_space<vmem>>) target_semaphore(%238 : memref<!tpu.dma_semaphore, #tpu.memory_space<semaphore_mem>>)
    } else {
    }
    %c2_i32_2 = arith.constant 2 : i32
    %c0_i32_3 = arith.constant 0 : i32
    %7 = arith.cmpi eq, %c2_i32_2, %c0_i32_3 : i32
    %c1_i32_4 = arith.constant 1 : i32
    %8 = arith.select %7, %c1_i32_4, %c2_i32_2 : i32
    %9 = arith.remsi %arg1, %8 : i32
    %c0_i32_5 = arith.constant 0 : i32
    %10 = arith.cmpi ne, %9, %c0_i32_5 : i32
    %c0_i32_6 = arith.constant 0 : i32
    %11 = arith.cmpi slt, %9, %c0_i32_6 : i32
    %c0_i32_7 = arith.constant 0 : i32
    %12 = arith.cmpi slt, %8, %c0_i32_7 : i32
    %13 = arith.xori %11, %12 : i1
    %14 = arith.andi %13, %10 : i1
    %15 = arith.addi %9, %8 : i32
    %16 = arith.select %14, %15, %9 : i32
    %c128_i32 = arith.constant 128 : i32
    %17 = arith.muli %arg1, %c128_i32 : i32
    %c0_i32_8 = arith.constant 0 : i32
    %18 = tpu.memref_slice %arg2[%arg0, %17, %c0_i32_8] : memref<2x280x128xbf16, #tpu.memory_space<any>> -> memref<1x152x128xbf16, #tpu.memory_space<any>>
    %19 = tpu.memref_squeeze %18 : memref<1x152x128xbf16, #tpu.memory_space<any>> -> memref<152x128xbf16, #tpu.memory_space<any>>
    %c0_i32_9 = arith.constant 0 : i32
    %c0_i32_10 = arith.constant 0 : i32
    %20 = tpu.memref_slice %arg8[%16, %c0_i32_9, %c0_i32_10] : memref<2x152x128xbf16, #tpu.memory_space<vmem>> -> memref<1x152x128xbf16, #tpu.memory_space<vmem>>
    %21 = tpu.memref_squeeze %20 : memref<1x152x128xbf16, #tpu.memory_space<vmem>> -> memref<152x128xbf16, #tpu.memory_space<vmem>>
    %22 = tpu.memref_slice %arg9[%16] : memref<2x!tpu.dma_semaphore, #tpu.memory_space<semaphore_mem>> -> memref<1x!tpu.dma_semaphore, #tpu.memory_space<semaphore_mem>>
    %23 = tpu.memref_squeeze %22 : memref<1x!tpu.dma_semaphore, #tpu.memory_space<semaphore_mem>> -> memref<!tpu.dma_semaphore, #tpu.memory_space<semaphore_mem>>
    tpu.wait_dma2 semaphore(%23 : memref<!tpu.dma_semaphore, #tpu.memory_space<semaphore_mem>>) src(%19 : memref<152x128xbf16, #tpu.memory_space<any>>) dst(%21 : memref<152x128xbf16, #tpu.memory_space<vmem>>)
    %24 = arith.index_cast %16 : i32 to index
    %c0 = arith.constant 0 : index
    %c0_11 = arith.constant 0 : index
    %25 = vector.load %arg8[%24, %c0, %c0_11] : memref<2x152x128xbf16, #tpu.memory_space<vmem>>, vector<1x152x128xbf16>
    %26 = vector.shape_cast %25 : vector<1x152x128xbf16> to vector<152x128xbf16>
    %27 = arith.extf %26 : vector<152x128xbf16> to vector<152x128xf32>
    %28 = tpu.iota {dimensions = array<i32: 0>} : vector<152x1xi32>
    %c128_i32_12 = arith.constant 128 : i32
    %29 = arith.muli %arg1, %c128_i32_12 : i32
    %30 = vector.broadcast %29 : i32 to vector<152x1xi32>
    %31 = arith.addi %30, %28 : vector<152x1xi32>
    %c12_i32 = arith.constant 12 : i32
    %32 = vector.broadcast %c12_i32 : i32 to vector<152x1xi32>
    %33 = arith.subi %31, %32 : vector<152x1xi32>
    %c0_i32_13 = arith.constant 0 : i32
    %34 = vector.broadcast %c0_i32_13 : i32 to vector<152x1xi32>
    %35 = arith.cmpi sge, %33, %34 : vector<152x1xi32>
    %c256_i32 = arith.constant 256 : i32
    %36 = vector.broadcast %c256_i32 : i32 to vector<152x1xi32>
    %37 = arith.cmpi slt, %33, %36 : vector<152x1xi32>
    %38 = arith.andi %35, %37 : vector<152x1xi1>
    %cst = arith.constant 0.000000e+00 : f32
    %39 = vector.broadcast %cst : f32 to vector<152x128xf32>
    %40 = arith.cmpf oge, %27, %39 : vector<152x128xf32>
    %cst_14 = arith.constant 1.000000e-01 : f32
    %41 = vector.broadcast %cst_14 : f32 to vector<152x128xf32>
    %42 = arith.mulf %41, %27 : vector<152x128xf32>
    %43 = arith.select %40, %27, %42 : vector<152x128xi1>, vector<152x128xf32>
    %cst_15 = arith.constant 0.000000e+00 : f32
    %44 = vector.shape_cast %38 : vector<152x1xi1> to vector<152x1xi1>
    %45 = vector.broadcast %44 : vector<152x1xi1> to vector<152x128xi1>
    %46 = vector.broadcast %cst_15 : f32 to vector<152x128xf32>
    %47 = arith.select %45, %43, %46 : vector<152x128xi1>, vector<152x128xf32>
    %c1_i32_16 = arith.constant 1 : i32
    %48 = tpu.dynamic_rotate %47 by %c1_i32_16 dim 0 : vector<152x128xf32>, i32 -> vector<152x128xf32>
    %49 = arith.truncf %48 : vector<152x128xf32> to vector<152x128xbf16>
    %50 = arith.truncf %47 : vector<152x128xf32> to vector<152x128xbf16>
    %c151_i32 = arith.constant 151 : i32
    %51 = tpu.dynamic_rotate %47 by %c151_i32 dim 0 : vector<152x128xf32>, i32 -> vector<152x128xf32>
    %52 = arith.truncf %51 : vector<152x128xf32> to vector<152x128xbf16>
    %c0_17 = arith.constant 0 : index
    %c0_18 = arith.constant 0 : index
    %c0_19 = arith.constant 0 : index
    %c0_20 = arith.constant 0 : index
    %53 = vector.load %arg3[%c0_17, %c0_18, %c0_19, %c0_20] : memref<3x3x128x128xbf16, #tpu.memory_space<vmem>>, vector<1x1x128x128xbf16>
    %54 = vector.shape_cast %53 : vector<1x1x128x128xbf16> to vector<128x128xbf16>
    %cst_21 = arith.constant dense<0.000000e+00> : vector<152x128xf32>
    %55 = tpu.matmul %49, %54, %cst_21 {dimension_numbers = #tpu.dot_dimension_numbers<[1], [0], [0], [1], [0, 0, 1, 1], [], []>} : vector<152x128xbf16>, vector<128x128xbf16>, vector<152x128xf32> -> vector<152x128xf32>
    %c0_22 = arith.constant 0 : index
    %c1 = arith.constant 1 : index
    %c0_23 = arith.constant 0 : index
    %c0_24 = arith.constant 0 : index
    %56 = vector.load %arg3[%c0_22, %c1, %c0_23, %c0_24] : memref<3x3x128x128xbf16, #tpu.memory_space<vmem>>, vector<1x1x128x128xbf16>
    %57 = vector.shape_cast %56 : vector<1x1x128x128xbf16> to vector<128x128xbf16>
    %cst_25 = arith.constant dense<0.000000e+00> : vector<152x128xf32>
    %58 = tpu.matmul %50, %57, %cst_25 {dimension_numbers = #tpu.dot_dimension_numbers<[1], [0], [0], [1], [0, 0, 1, 1], [], []>} : vector<152x128xbf16>, vector<128x128xbf16>, vector<152x128xf32> -> vector<152x128xf32>
    %59 = arith.addf %55, %58 : vector<152x128xf32>
    %c0_26 = arith.constant 0 : index
    %c2 = arith.constant 2 : index
    %c0_27 = arith.constant 0 : index
    %c0_28 = arith.constant 0 : index
    %60 = vector.load %arg3[%c0_26, %c2, %c0_27, %c0_28] : memref<3x3x128x128xbf16, #tpu.memory_space<vmem>>, vector<1x1x128x128xbf16>
    %61 = vector.shape_cast %60 : vector<1x1x128x128xbf16> to vector<128x128xbf16>
    %cst_29 = arith.constant dense<0.000000e+00> : vector<152x128xf32>
    %62 = tpu.matmul %52, %61, %cst_29 {dimension_numbers = #tpu.dot_dimension_numbers<[1], [0], [0], [1], [0, 0, 1, 1], [], []>} : vector<152x128xbf16>, vector<128x128xbf16>, vector<152x128xf32> -> vector<152x128xf32>
    %63 = arith.addf %59, %62 : vector<152x128xf32>
    %c0_30 = arith.constant 0 : index
    %c0_31 = arith.constant 0 : index
    %c0_32 = arith.constant 0 : index
    %64 = vector.load %arg4[%c0_30, %c0_31, %c0_32] : memref<3x1x128xf32, #tpu.memory_space<vmem>>, vector<1x1x128xf32>
    %65 = vector.shape_cast %64 : vector<1x1x128xf32> to vector<1x128xf32>
    %66 = vector.broadcast %65 : vector<1x128xf32> to vector<152x128xf32>
    %67 = arith.addf %63, %66 : vector<152x128xf32>
    %cst_33 = arith.constant 0.000000e+00 : f32
    %68 = vector.broadcast %cst_33 : f32 to vector<152x128xf32>
    %69 = arith.cmpf oge, %67, %68 : vector<152x128xf32>
    %cst_34 = arith.constant 1.000000e-01 : f32
    %70 = vector.broadcast %cst_34 : f32 to vector<152x128xf32>
    %71 = arith.mulf %70, %67 : vector<152x128xf32>
    %72 = arith.select %69, %67, %71 : vector<152x128xi1>, vector<152x128xf32>
    %cst_35 = arith.constant 0.000000e+00 : f32
    %73 = vector.shape_cast %38 : vector<152x1xi1> to vector<152x1xi1>
    %74 = vector.broadcast %73 : vector<152x1xi1> to vector<152x128xi1>
    %75 = vector.broadcast %cst_35 : f32 to vector<152x128xf32>
    %76 = arith.select %74, %72, %75 : vector<152x128xi1>, vector<152x128xf32>
    %c1_i32_36 = arith.constant 1 : i32
    %77 = tpu.dynamic_rotate %76 by %c1_i32_36 dim 0 : vector<152x128xf32>, i32 -> vector<152x128xf32>
    %78 = arith.truncf %77 : vector<152x128xf32> to vector<152x128xbf16>
    %79 = arith.truncf %76 : vector<152x128xf32> to vector<152x128xbf16>
    %c151_i32_37 = arith.constant 151 : i32
    %80 = tpu.dynamic_rotate %76 by %c151_i32_37 dim 0 : vector<152x128xf32>, i32 -> vector<152x128xf32>
    %81 = arith.truncf %80 : vector<152x128xf32> to vector<152x128xbf16>
    %c0_38 = arith.constant 0 : index
    %c0_39 = arith.constant 0 : index
    %c0_40 = arith.constant 0 : index
    %c0_41 = arith.constant 0 : index
    %82 = vector.load %arg5[%c0_38, %c0_39, %c0_40, %c0_41] : memref<3x3x128x128xbf16, #tpu.memory_space<vmem>>, vector<1x1x128x128xbf16>
    %83 = vector.shape_cast %82 : vector<1x1x128x128xbf16> to vector<128x128xbf16>
    %cst_42 = arith.constant dense<0.000000e+00> : vector<152x128xf32>
    %84 = tpu.matmul %78, %83, %cst_42 {dimension_numbers = #tpu.dot_dimension_numbers<[1], [0], [0], [1], [0, 0, 1, 1], [], []>} : vector<152x128xbf16>, vector<128x128xbf16>, vector<152x128xf32> -> vector<152x128xf32>
    %c0_43 = arith.constant 0 : index
    %c1_44 = arith.constant 1 : index
    %c0_45 = arith.constant 0 : index
    %c0_46 = arith.constant 0 : index
    %85 = vector.load %arg5[%c0_43, %c1_44, %c0_45, %c0_46] : memref<3x3x128x128xbf16, #tpu.memory_space<vmem>>, vector<1x1x128x128xbf16>
    %86 = vector.shape_cast %85 : vector<1x1x128x128xbf16> to vector<128x128xbf16>
    %cst_47 = arith.constant dense<0.000000e+00> : vector<152x128xf32>
    %87 = tpu.matmul %79, %86, %cst_47 {dimension_numbers = #tpu.dot_dimension_numbers<[1], [0], [0], [1], [0, 0, 1, 1], [], []>} : vector<152x128xbf16>, vector<128x128xbf16>, vector<152x128xf32> -> vector<152x128xf32>
    %88 = arith.addf %84, %87 : vector<152x128xf32>
    %c0_48 = arith.constant 0 : index
    %c2_49 = arith.constant 2 : index
    %c0_50 = arith.constant 0 : index
    %c0_51 = arith.constant 0 : index
    %89 = vector.load %arg5[%c0_48, %c2_49, %c0_50, %c0_51] : memref<3x3x128x128xbf16, #tpu.memory_space<vmem>>, vector<1x1x128x128xbf16>
    %90 = vector.shape_cast %89 : vector<1x1x128x128xbf16> to vector<128x128xbf16>
    %cst_52 = arith.constant dense<0.000000e+00> : vector<152x128xf32>
    %91 = tpu.matmul %81, %90, %cst_52 {dimension_numbers = #tpu.dot_dimension_numbers<[1], [0], [0], [1], [0, 0, 1, 1], [], []>} : vector<152x128xbf16>, vector<128x128xbf16>, vector<152x128xf32> -> vector<152x128xf32>
    %92 = arith.addf %88, %91 : vector<152x128xf32>
    %c0_53 = arith.constant 0 : index
    %c0_54 = arith.constant 0 : index
    %c0_55 = arith.constant 0 : index
    %93 = vector.load %arg6[%c0_53, %c0_54, %c0_55] : memref<3x1x128xf32, #tpu.memory_space<vmem>>, vector<1x1x128xf32>
    %94 = vector.shape_cast %93 : vector<1x1x128xf32> to vector<1x128xf32>
    %95 = vector.broadcast %94 : vector<1x128xf32> to vector<152x128xf32>
    %96 = arith.addf %92, %95 : vector<152x128xf32>
    %97 = arith.addf %96, %27 : vector<152x128xf32>
    %cst_56 = arith.constant 0.000000e+00 : f32
    %98 = vector.broadcast %cst_56 : f32 to vector<152x128xf32>
    %99 = arith.cmpf oge, %97, %98 : vector<152x128xf32>
    %cst_57 = arith.constant 1.000000e-01 : f32
    %100 = vector.broadcast %cst_57 : f32 to vector<152x128xf32>
    %101 = arith.mulf %100, %97 : vector<152x128xf32>
    %102 = arith.select %99, %97, %101 : vector<152x128xi1>, vector<152x128xf32>
    %cst_58 = arith.constant 0.000000e+00 : f32
    %103 = vector.shape_cast %38 : vector<152x1xi1> to vector<152x1xi1>
    %104 = vector.broadcast %103 : vector<152x1xi1> to vector<152x128xi1>
    %105 = vector.broadcast %cst_58 : f32 to vector<152x128xf32>
    %106 = arith.select %104, %102, %105 : vector<152x128xi1>, vector<152x128xf32>
    %c3_i32 = arith.constant 3 : i32
    %107 = tpu.dynamic_rotate %106 by %c3_i32 dim 0 : vector<152x128xf32>, i32 -> vector<152x128xf32>
    %108 = arith.truncf %107 : vector<152x128xf32> to vector<152x128xbf16>
    %109 = arith.truncf %106 : vector<152x128xf32> to vector<152x128xbf16>
    %c149_i32 = arith.constant 149 : i32
    %110 = tpu.dynamic_rotate %106 by %c149_i32 dim 0 : vector<152x128xf32>, i32 -> vector<152x128xf32>
    %111 = arith.truncf %110 : vector<152x128xf32> to vector<152x128xbf16>
    %c1_59 = arith.constant 1 : index
    %c0_60 = arith.constant 0 : index
    %c0_61 = arith.constant 0 : index
    %c0_62 = arith.constant 0 : index
    %112 = vector.load %arg3[%c1_59, %c0_60, %c0_61, %c0_62] : memref<3x3x128x128xbf16, #tpu.memory_space<vmem>>, vector<1x1x128x128xbf16>
    %113 = vector.shape_cast %112 : vector<1x1x128x128xbf16> to vector<128x128xbf16>
    %cst_63 = arith.constant dense<0.000000e+00> : vector<152x128xf32>
    %114 = tpu.matmul %108, %113, %cst_63 {dimension_numbers = #tpu.dot_dimension_numbers<[1], [0], [0], [1], [0, 0, 1, 1], [], []>} : vector<152x128xbf16>, vector<128x128xbf16>, vector<152x128xf32> -> vector<152x128xf32>
    %c1_64 = arith.constant 1 : index
    %c1_65 = arith.constant 1 : index
    %c0_66 = arith.constant 0 : index
    %c0_67 = arith.constant 0 : index
    %115 = vector.load %arg3[%c1_64, %c1_65, %c0_66, %c0_67] : memref<3x3x128x128xbf16, #tpu.memory_space<vmem>>, vector<1x1x128x128xbf16>
    %116 = vector.shape_cast %115 : vector<1x1x128x128xbf16> to vector<128x128xbf16>
    %cst_68 = arith.constant dense<0.000000e+00> : vector<152x128xf32>
    %117 = tpu.matmul %109, %116, %cst_68 {dimension_numbers = #tpu.dot_dimension_numbers<[1], [0], [0], [1], [0, 0, 1, 1], [], []>} : vector<152x128xbf16>, vector<128x128xbf16>, vector<152x128xf32> -> vector<152x128xf32>
    %118 = arith.addf %114, %117 : vector<152x128xf32>
    %c1_69 = arith.constant 1 : index
    %c2_70 = arith.constant 2 : index
    %c0_71 = arith.constant 0 : index
    %c0_72 = arith.constant 0 : index
    %119 = vector.load %arg3[%c1_69, %c2_70, %c0_71, %c0_72] : memref<3x3x128x128xbf16, #tpu.memory_space<vmem>>, vector<1x1x128x128xbf16>
    %120 = vector.shape_cast %119 : vector<1x1x128x128xbf16> to vector<128x128xbf16>
    %cst_73 = arith.constant dense<0.000000e+00> : vector<152x128xf32>
    %121 = tpu.matmul %111, %120, %cst_73 {dimension_numbers = #tpu.dot_dimension_numbers<[1], [0], [0], [1], [0, 0, 1, 1], [], []>} : vector<152x128xbf16>, vector<128x128xbf16>, vector<152x128xf32> -> vector<152x128xf32>
    %122 = arith.addf %118, %121 : vector<152x128xf32>
    %c1_74 = arith.constant 1 : index
    %c0_75 = arith.constant 0 : index
    %c0_76 = arith.constant 0 : index
    %123 = vector.load %arg4[%c1_74, %c0_75, %c0_76] : memref<3x1x128xf32, #tpu.memory_space<vmem>>, vector<1x1x128xf32>
    %124 = vector.shape_cast %123 : vector<1x1x128xf32> to vector<1x128xf32>
    %125 = vector.broadcast %124 : vector<1x128xf32> to vector<152x128xf32>
    %126 = arith.addf %122, %125 : vector<152x128xf32>
    %cst_77 = arith.constant 0.000000e+00 : f32
    %127 = vector.broadcast %cst_77 : f32 to vector<152x128xf32>
    %128 = arith.cmpf oge, %126, %127 : vector<152x128xf32>
    %cst_78 = arith.constant 1.000000e-01 : f32
    %129 = vector.broadcast %cst_78 : f32 to vector<152x128xf32>
    %130 = arith.mulf %129, %126 : vector<152x128xf32>
    %131 = arith.select %128, %126, %130 : vector<152x128xi1>, vector<152x128xf32>
    %cst_79 = arith.constant 0.000000e+00 : f32
    %132 = vector.shape_cast %38 : vector<152x1xi1> to vector<152x1xi1>
    %133 = vector.broadcast %132 : vector<152x1xi1> to vector<152x128xi1>
    %134 = vector.broadcast %cst_79 : f32 to vector<152x128xf32>
    %135 = arith.select %133, %131, %134 : vector<152x128xi1>, vector<152x128xf32>
    %c1_i32_80 = arith.constant 1 : i32
    %136 = tpu.dynamic_rotate %135 by %c1_i32_80 dim 0 : vector<152x128xf32>, i32 -> vector<152x128xf32>
    %137 = arith.truncf %136 : vector<152x128xf32> to vector<152x128xbf16>
    %138 = arith.truncf %135 : vector<152x128xf32> to vector<152x128xbf16>
    %c151_i32_81 = arith.constant 151 : i32
    %139 = tpu.dynamic_rotate %135 by %c151_i32_81 dim 0 : vector<152x128xf32>, i32 -> vector<152x128xf32>
    %140 = arith.truncf %139 : vector<152x128xf32> to vector<152x128xbf16>
    %c1_82 = arith.constant 1 : index
    %c0_83 = arith.constant 0 : index
    %c0_84 = arith.constant 0 : index
    %c0_85 = arith.constant 0 : index
    %141 = vector.load %arg5[%c1_82, %c0_83, %c0_84, %c0_85] : memref<3x3x128x128xbf16, #tpu.memory_space<vmem>>, vector<1x1x128x128xbf16>
    %142 = vector.shape_cast %141 : vector<1x1x128x128xbf16> to vector<128x128xbf16>
    %cst_86 = arith.constant dense<0.000000e+00> : vector<152x128xf32>
    %143 = tpu.matmul %137, %142, %cst_86 {dimension_numbers = #tpu.dot_dimension_numbers<[1], [0], [0], [1], [0, 0, 1, 1], [], []>} : vector<152x128xbf16>, vector<128x128xbf16>, vector<152x128xf32> -> vector<152x128xf32>
    %c1_87 = arith.constant 1 : index
    %c1_88 = arith.constant 1 : index
    %c0_89 = arith.constant 0 : index
    %c0_90 = arith.constant 0 : index
    %144 = vector.load %arg5[%c1_87, %c1_88, %c0_89, %c0_90] : memref<3x3x128x128xbf16, #tpu.memory_space<vmem>>, vector<1x1x128x128xbf16>
    %145 = vector.shape_cast %144 : vector<1x1x128x128xbf16> to vector<128x128xbf16>
    %cst_91 = arith.constant dense<0.000000e+00> : vector<152x128xf32>
    %146 = tpu.matmul %138, %145, %cst_91 {dimension_numbers = #tpu.dot_dimension_numbers<[1], [0], [0], [1], [0, 0, 1, 1], [], []>} : vector<152x128xbf16>, vector<128x128xbf16>, vector<152x128xf32> -> vector<152x128xf32>
    %147 = arith.addf %143, %146 : vector<152x128xf32>
    %c1_92 = arith.constant 1 : index
    %c2_93 = arith.constant 2 : index
    %c0_94 = arith.constant 0 : index
    %c0_95 = arith.constant 0 : index
    %148 = vector.load %arg5[%c1_92, %c2_93, %c0_94, %c0_95] : memref<3x3x128x128xbf16, #tpu.memory_space<vmem>>, vector<1x1x128x128xbf16>
    %149 = vector.shape_cast %148 : vector<1x1x128x128xbf16> to vector<128x128xbf16>
    %cst_96 = arith.constant dense<0.000000e+00> : vector<152x128xf32>
    %150 = tpu.matmul %140, %149, %cst_96 {dimension_numbers = #tpu.dot_dimension_numbers<[1], [0], [0], [1], [0, 0, 1, 1], [], []>} : vector<152x128xbf16>, vector<128x128xbf16>, vector<152x128xf32> -> vector<152x128xf32>
    %151 = arith.addf %147, %150 : vector<152x128xf32>
    %c1_97 = arith.constant 1 : index
    %c0_98 = arith.constant 0 : index
    %c0_99 = arith.constant 0 : index
    %152 = vector.load %arg6[%c1_97, %c0_98, %c0_99] : memref<3x1x128xf32, #tpu.memory_space<vmem>>, vector<1x1x128xf32>
    %153 = vector.shape_cast %152 : vector<1x1x128xf32> to vector<1x128xf32>
    %154 = vector.broadcast %153 : vector<1x128xf32> to vector<152x128xf32>
    %155 = arith.addf %151, %154 : vector<152x128xf32>
    %156 = arith.addf %155, %97 : vector<152x128xf32>
    %cst_100 = arith.constant 0.000000e+00 : f32
    %157 = vector.broadcast %cst_100 : f32 to vector<152x128xf32>
    %158 = arith.cmpf oge, %156, %157 : vector<152x128xf32>
    %cst_101 = arith.constant 1.000000e-01 : f32
    %159 = vector.broadcast %cst_101 : f32 to vector<152x128xf32>
    %160 = arith.mulf %159, %156 : vector<152x128xf32>
    %161 = arith.select %158, %156, %160 : vector<152x128xi1>, vector<152x128xf32>
    %cst_102 = arith.constant 0.000000e+00 : f32
    %162 = vector.shape_cast %38 : vector<152x1xi1> to vector<152x1xi1>
    %163 = vector.broadcast %162 : vector<152x1xi1> to vector<152x128xi1>
    %164 = vector.broadcast %cst_102 : f32 to vector<152x128xf32>
    %165 = arith.select %163, %161, %164 : vector<152x128xi1>, vector<152x128xf32>
    %c5_i32 = arith.constant 5 : i32
    %166 = tpu.dynamic_rotate %165 by %c5_i32 dim 0 : vector<152x128xf32>, i32 -> vector<152x128xf32>
    %167 = arith.truncf %166 : vector<152x128xf32> to vector<152x128xbf16>
    %168 = arith.truncf %165 : vector<152x128xf32> to vector<152x128xbf16>
    %c147_i32 = arith.constant 147 : i32
    %169 = tpu.dynamic_rotate %165 by %c147_i32 dim 0 : vector<152x128xf32>, i32 -> vector<152x128xf32>
    %170 = arith.truncf %169 : vector<152x128xf32> to vector<152x128xbf16>
    %c2_103 = arith.constant 2 : index
    %c0_104 = arith.constant 0 : index
    %c0_105 = arith.constant 0 : index
    %c0_106 = arith.constant 0 : index
    %171 = vector.load %arg3[%c2_103, %c0_104, %c0_105, %c0_106] : memref<3x3x128x128xbf16, #tpu.memory_space<vmem>>, vector<1x1x128x128xbf16>
    %172 = vector.shape_cast %171 : vector<1x1x128x128xbf16> to vector<128x128xbf16>
    %cst_107 = arith.constant dense<0.000000e+00> : vector<152x128xf32>
    %173 = tpu.matmul %167, %172, %cst_107 {dimension_numbers = #tpu.dot_dimension_numbers<[1], [0], [0], [1], [0, 0, 1, 1], [], []>} : vector<152x128xbf16>, vector<128x128xbf16>, vector<152x128xf32> -> vector<152x128xf32>
    %c2_108 = arith.constant 2 : index
    %c1_109 = arith.constant 1 : index
    %c0_110 = arith.constant 0 : index
    %c0_111 = arith.constant 0 : index
    %174 = vector.load %arg3[%c2_108, %c1_109, %c0_110, %c0_111] : memref<3x3x128x128xbf16, #tpu.memory_space<vmem>>, vector<1x1x128x128xbf16>
    %175 = vector.shape_cast %174 : vector<1x1x128x128xbf16> to vector<128x128xbf16>
    %cst_112 = arith.constant dense<0.000000e+00> : vector<152x128xf32>
    %176 = tpu.matmul %168, %175, %cst_112 {dimension_numbers = #tpu.dot_dimension_numbers<[1], [0], [0], [1], [0, 0, 1, 1], [], []>} : vector<152x128xbf16>, vector<128x128xbf16>, vector<152x128xf32> -> vector<152x128xf32>
    %177 = arith.addf %173, %176 : vector<152x128xf32>
    %c2_113 = arith.constant 2 : index
    %c2_114 = arith.constant 2 : index
    %c0_115 = arith.constant 0 : index
    %c0_116 = arith.constant 0 : index
    %178 = vector.load %arg3[%c2_113, %c2_114, %c0_115, %c0_116] : memref<3x3x128x128xbf16, #tpu.memory_space<vmem>>, vector<1x1x128x128xbf16>
    %179 = vector.shape_cast %178 : vector<1x1x128x128xbf16> to vector<128x128xbf16>
    %cst_117 = arith.constant dense<0.000000e+00> : vector<152x128xf32>
    %180 = tpu.matmul %170, %179, %cst_117 {dimension_numbers = #tpu.dot_dimension_numbers<[1], [0], [0], [1], [0, 0, 1, 1], [], []>} : vector<152x128xbf16>, vector<128x128xbf16>, vector<152x128xf32> -> vector<152x128xf32>
    %181 = arith.addf %177, %180 : vector<152x128xf32>
    %c2_118 = arith.constant 2 : index
    %c0_119 = arith.constant 0 : index
    %c0_120 = arith.constant 0 : index
    %182 = vector.load %arg4[%c2_118, %c0_119, %c0_120] : memref<3x1x128xf32, #tpu.memory_space<vmem>>, vector<1x1x128xf32>
    %183 = vector.shape_cast %182 : vector<1x1x128xf32> to vector<1x128xf32>
    %184 = vector.broadcast %183 : vector<1x128xf32> to vector<152x128xf32>
    %185 = arith.addf %181, %184 : vector<152x128xf32>
    %cst_121 = arith.constant 0.000000e+00 : f32
    %186 = vector.broadcast %cst_121 : f32 to vector<152x128xf32>
    %187 = arith.cmpf oge, %185, %186 : vector<152x128xf32>
    %cst_122 = arith.constant 1.000000e-01 : f32
    %188 = vector.broadcast %cst_122 : f32 to vector<152x128xf32>
    %189 = arith.mulf %188, %185 : vector<152x128xf32>
    %190 = arith.select %187, %185, %189 : vector<152x128xi1>, vector<152x128xf32>
    %cst_123 = arith.constant 0.000000e+00 : f32
    %191 = vector.shape_cast %38 : vector<152x1xi1> to vector<152x1xi1>
    %192 = vector.broadcast %191 : vector<152x1xi1> to vector<152x128xi1>
    %193 = vector.broadcast %cst_123 : f32 to vector<152x128xf32>
    %194 = arith.select %192, %190, %193 : vector<152x128xi1>, vector<152x128xf32>
    %c1_i32_124 = arith.constant 1 : i32
    %195 = tpu.dynamic_rotate %194 by %c1_i32_124 dim 0 : vector<152x128xf32>, i32 -> vector<152x128xf32>
    %196 = arith.truncf %195 : vector<152x128xf32> to vector<152x128xbf16>
    %197 = arith.truncf %194 : vector<152x128xf32> to vector<152x128xbf16>
    %c151_i32_125 = arith.constant 151 : i32
    %198 = tpu.dynamic_rotate %194 by %c151_i32_125 dim 0 : vector<152x128xf32>, i32 -> vector<152x128xf32>
    %199 = arith.truncf %198 : vector<152x128xf32> to vector<152x128xbf16>
    %c2_126 = arith.constant 2 : index
    %c0_127 = arith.constant 0 : index
    %c0_128 = arith.constant 0 : index
    %c0_129 = arith.constant 0 : index
    %200 = vector.load %arg5[%c2_126, %c0_127, %c0_128, %c0_129] : memref<3x3x128x128xbf16, #tpu.memory_space<vmem>>, vector<1x1x128x128xbf16>
    %201 = vector.shape_cast %200 : vector<1x1x128x128xbf16> to vector<128x128xbf16>
    %cst_130 = arith.constant dense<0.000000e+00> : vector<152x128xf32>
    %202 = tpu.matmul %196, %201, %cst_130 {dimension_numbers = #tpu.dot_dimension_numbers<[1], [0], [0], [1], [0, 0, 1, 1], [], []>} : vector<152x128xbf16>, vector<128x128xbf16>, vector<152x128xf32> -> vector<152x128xf32>
    %c2_131 = arith.constant 2 : index
    %c1_132 = arith.constant 1 : index
    %c0_133 = arith.constant 0 : index
    %c0_134 = arith.constant 0 : index
    %203 = vector.load %arg5[%c2_131, %c1_132, %c0_133, %c0_134] : memref<3x3x128x128xbf16, #tpu.memory_space<vmem>>, vector<1x1x128x128xbf16>
    %204 = vector.shape_cast %203 : vector<1x1x128x128xbf16> to vector<128x128xbf16>
    %cst_135 = arith.constant dense<0.000000e+00> : vector<152x128xf32>
    %205 = tpu.matmul %197, %204, %cst_135 {dimension_numbers = #tpu.dot_dimension_numbers<[1], [0], [0], [1], [0, 0, 1, 1], [], []>} : vector<152x128xbf16>, vector<128x128xbf16>, vector<152x128xf32> -> vector<152x128xf32>
    %206 = arith.addf %202, %205 : vector<152x128xf32>
    %c2_136 = arith.constant 2 : index
    %c2_137 = arith.constant 2 : index
    %c0_138 = arith.constant 0 : index
    %c0_139 = arith.constant 0 : index
    %207 = vector.load %arg5[%c2_136, %c2_137, %c0_138, %c0_139] : memref<3x3x128x128xbf16, #tpu.memory_space<vmem>>, vector<1x1x128x128xbf16>
    %208 = vector.shape_cast %207 : vector<1x1x128x128xbf16> to vector<128x128xbf16>
    %cst_140 = arith.constant dense<0.000000e+00> : vector<152x128xf32>
    %209 = tpu.matmul %199, %208, %cst_140 {dimension_numbers = #tpu.dot_dimension_numbers<[1], [0], [0], [1], [0, 0, 1, 1], [], []>} : vector<152x128xbf16>, vector<128x128xbf16>, vector<152x128xf32> -> vector<152x128xf32>
    %210 = arith.addf %206, %209 : vector<152x128xf32>
    %c2_141 = arith.constant 2 : index
    %c0_142 = arith.constant 0 : index
    %c0_143 = arith.constant 0 : index
    %211 = vector.load %arg6[%c2_141, %c0_142, %c0_143] : memref<3x1x128xf32, #tpu.memory_space<vmem>>, vector<1x1x128xf32>
    %212 = vector.shape_cast %211 : vector<1x1x128xf32> to vector<1x128xf32>
    %213 = vector.broadcast %212 : vector<1x128xf32> to vector<152x128xf32>
    %214 = arith.addf %210, %213 : vector<152x128xf32>
    %215 = arith.addf %214, %156 : vector<152x128xf32>
    %216 = vector.extract_strided_slice %215 {offsets = [12, 0], sizes = [128, 128], strides = [1, 1]} : vector<152x128xf32> to vector<128x128xf32>
    %c0_144 = arith.constant 0 : index
    %c0_145 = arith.constant 0 : index
    %c0_146 = arith.constant 0 : index
    %217 = vector.load %arg7[%c0_144, %c0_145, %c0_146] : memref<1x128x128xf32, #tpu.memory_space<vmem>>, vector<1x128x128xf32>
    %218 = vector.shape_cast %217 : vector<1x128x128xf32> to vector<128x128xf32>
    %219 = vector.shape_cast %216 : vector<128x128xf32> to vector<1x128x128xf32>
    tpu.vector_store %arg7[%c0_144, %c0_145, %c0_146], %219 {strides = array<i32>} : memref<1x128x128xf32, #tpu.memory_space<vmem>>, vector<1x128x128xf32>,
    return
  }
  func.func @transform_1(%arg0: i32, %arg1: i32) -> (i32, i32, i32, i32) {
    %c0_i32 = arith.constant 0 : i32
    %c0_i32_0 = arith.constant 0 : i32
    %c0_i32_1 = arith.constant 0 : i32
    %c0_i32_2 = arith.constant 0 : i32
    %c0_i32_3 = arith.constant 0 : i32
    return %c0_i32, %c0_i32_0, %c0_i32_1, %c0_i32_2 : i32, i32, i32, i32
  }
  func.func @transform_2(%arg0: i32, %arg1: i32) -> (i32, i32, i32) {
    %c0_i32 = arith.constant 0 : i32
    %c0_i32_0 = arith.constant 0 : i32
    %c0_i32_1 = arith.constant 0 : i32
    %c0_i32_2 = arith.constant 0 : i32
    return %c0_i32, %c0_i32_0, %c0_i32_1 : i32, i32, i32
  }
  func.func @transform_3(%arg0: i32, %arg1: i32) -> (i32, i32, i32, i32) {
    %c0_i32 = arith.constant 0 : i32
    %c0_i32_0 = arith.constant 0 : i32
    %c0_i32_1 = arith.constant 0 : i32
    %c0_i32_2 = arith.constant 0 : i32
    %c0_i32_3 = arith.constant 0 : i32
    return %c0_i32, %c0_i32_0, %c0_i32_1, %c0_i32_2 : i32, i32, i32, i32
  }
  func.func @transform_4(%arg0: i32, %arg1: i32) -> (i32, i32, i32) {
    %c0_i32 = arith.constant 0 : i32
    %c0_i32_0 = arith.constant 0 : i32
    %c0_i32_1 = arith.constant 0 : i32
    %c0_i32_2 = arith.constant 0 : i32
    return %c0_i32, %c0_i32_0, %c0_i32_1 : i32, i32, i32
  }
  func.func @transform_5(%arg0: i32, %arg1: i32) -> (i32, i32, i32) {
    %c0_i32 = arith.constant 0 : i32
    %c0_i32_0 = arith.constant 0 : i32
    return %arg0, %arg1, %c0_i32 : i32, i32, i32
  }
}

module attributes {stable_mosaic.version = 11 : i64} {
  func.func @kernel(%arg0: i32, %arg1: i32, %arg2: memref<2x280x128xbf16, #tpu.memory_space<any>>, %arg3: memref<3x3x128x128xbf16, #tpu.memory_space<vmem>>, %arg4: memref<3x1x128xf32, #tpu.memory_space<vmem>>, %arg5: memref<3x3x128x128xbf16, #tpu.memory_space<vmem>>, %arg6: memref<3x1x128xf32, #tpu.memory_space<vmem>>, %arg7: memref<1x128x128xf32, #tpu.memory_space<vmem>>, %arg8: memref<2x152x128xbf16, #tpu.memory_space<vmem>>, %arg9: memref<2x!tpu.dma_semaphore, #tpu.memory_space<semaphore_mem>>) attributes {dimension_semantics = [#tpu.dimension_semantics<parallel>, #tpu.dimension_semantics<arbitrary>], iteration_bounds = array<i64: 2, 2>, scalar_prefetch = 0 : i64, scratch_operands = 2 : i64, tpu.core_type = #tpu.core_type<tc>, window_params = [{}, {pipeline_mode = #tpu.pipeline_mode<synchronous>, transform_indices = @transform_1, window_bounds = array<i64: 3, 3, 128, 128>}, {pipeline_mode = #tpu.pipeline_mode<synchronous>, transform_indices = @transform_2, window_bounds = array<i64: 3, 1, 128>}, {pipeline_mode = #tpu.pipeline_mode<synchronous>, transform_indices = @transform_3, window_bounds = array<i64: 3, 3, 128, 128>}, {pipeline_mode = #tpu.pipeline_mode<synchronous>, transform_indices = @transform_4, window_bounds = array<i64: 3, 1, 128>}, {transform_indices = @transform_5, window_bounds = array<i64: 1, 128, 128>}]} {
    %c0_i32 = arith.constant 0 : i32
    %0 = arith.cmpi eq, %arg1, %c0_i32 : i32
    %1 = arith.extui %0 : i1 to i32
    %c0_i32_0 = arith.constant 0 : i32
    %2 = arith.cmpi ne, %1, %c0_i32_0 : i32
    scf.if %2 {
      %c0_i32_147 = arith.constant 0 : i32
      %c0_i32_148 = arith.constant 0 : i32
      %c0_i32_149 = arith.constant 0 : i32
      %c0_i32_150 = arith.constant 0 : i32
      %220 = tpu.memref_slice %arg2[%arg0, %c0_i32_149, %c0_i32_150] : memref<2x280x128xbf16, #tpu.memory_space<any>> -> memref<1x152x128xbf16, #tpu.memory_space<any>>
      %221 = tpu.memref_squeeze %220 : memref<1x152x128xbf16, #tpu.memory_space<any>> -> memref<152x128xbf16, #tpu.memory_space<any>>
      %c0_i32_151 = arith.constant 0 : i32
      %c0_i32_152 = arith.constant 0 : i32
      %222 = tpu.memref_slice %arg8[%c0_i32_147, %c0_i32_151, %c0_i32_152] : memref<2x152x128xbf16, #tpu.memory_space<vmem>> -> memref<1x152x128xbf16, #tpu.memory_space<vmem>>
      %223 = tpu.memref_squeeze %222 : memref<1x152x128xbf16, #tpu.memory_space<vmem>> -> memref<152x128xbf16, #tpu.memory_space<vmem>>
      %224 = tpu.memref_slice %arg9[%c0_i32_148] : memref<2x!tpu.dma_semaphore, #tpu.memory_space<semaphore_mem>> -> memref<1x!tpu.dma_semaphore, #tpu.memory_space<semaphore_mem>>
      %225 = tpu.memref_squeeze %224 : memref<1x!tpu.dma_semaphore, #tpu.memory_space<semaphore_mem>> -> memref<!tpu.dma_semaphore, #tpu.memory_space<semaphore_mem>>
      tpu.enqueue_dma source(%221 : memref<152x128xbf16, #tpu.memory_space<any>>) target(%223 : memref<152x128xbf16, #tpu.memory_space<vmem>>) target_semaphore(%225 : memref<!tpu.dma_semaphore, #tpu.memory_space<semaphore_mem>>)
    } else {
    }
    %c1_i32 = arith.constant 1 : i32
    %3 = arith.addi %arg1, %c1_i32 : i32
    %c2_i32 = arith.constant 2 : i32
    %4 = arith.cmpi slt, %3, %c2_i32 : i32
    %5 = arith.extui %4 : i1 to i32
    %c0_i32_1 = arith.constant 0 : i32
    %6 = arith.cmpi ne, %5, %c0_i32_1 : i32
    scf.if %6 {
      %c1_i32_147 = arith.constant 1 : i32
      %220 = arith.addi %arg1, %c1_i32_147 : i32
      %c1_i32_148 = arith.constant 1 : i32
      %221 = arith.addi %arg1, %c1_i32_148 : i32
      %c2_i32_149 = arith.constant 2 : i32
      %c0_i32_150 = arith.constant 0 : i32
      %222 = arith.cmpi eq, %c2_i32_149, %c0_i32_150 : i32
      %c1_i32_151 = arith.constant 1 : i32
      %223 = arith.select %222, %c1_i32_151, %c2_i32_149 : i32
      %224 = arith.remsi %221, %223 : i32
      %c0_i32_152 = arith.constant 0 : i32
      %225 = arith.cmpi ne, %224, %c0_i32_152 : i32
      %c0_i32_153 = arith.constant 0 : i32
      %226 = arith.cmpi slt, %224, %c0_i32_153 : i32
      %c0_i32_154 = arith.constant 0 : i32
      %227 = arith.cmpi slt, %223, %c0_i32_154 : i32
      %228 = arith.xori %226, %227 : i1
      %229 = arith.andi %228, %225 : i1
      %230 = arith.addi %224, %223 : i32
      %231 = arith.select %229, %230, %224 : i32
      %c128_i32_155 = arith.constant 128 : i32
      %232 = arith.muli %220, %c128_i32_155 : i32
      %c0_i32_156 = arith.constant 0 : i32
      %233 = tpu.memref_slice %arg2[%arg0, %232, %c0_i32_156] : memref<2x280x128xbf16, #tpu.memory_space<any>> -> memref<1x152x128xbf16, #tpu.memory_space<any>>
      %234 = tpu.memref_squeeze %233 : memref<1x152x128xbf16, #tpu.memory_space<any>> -> memref<152x128xbf16, #tpu.memory_space<any>>
      %c0_i32_157 = arith.constant 0 : i32
      %c0_i32_158 = arith.constant 0 : i32
      %235 = tpu.memref_slice %arg8[%231, %c0_i32_157, %c0_i32_158] : memref<2x152x128xbf16, #tpu.memory_space<vmem>> -> memref<1x152x128xbf16, #tpu.memory_space<vmem>>
      %236 = tpu.memref_squeeze %235 : memref<1x152x128xbf16, #tpu.memory_space<vmem>> -> memref<152x128xbf16, #tpu.memory_space<vmem>>
      %237 = tpu.memref_slice %arg9[%231] : memref<2x!tpu.dma_semaphore, #tpu.memory_space<semaphore_mem>> -> memref<1x!tpu.dma_semaphore, #tpu.memory_space<semaphore_mem>>
      %238 = tpu.memref_squeeze %237 : memref<1x!tpu.dma_semaphore, #tpu.memory_space<semaphore_mem>> -> memref<!tpu.dma_semaphore, #tpu.memory_space<semaphore_mem>>
      tpu.enqueue_dma source(%234 : memref<152x128xbf16, #tpu.memory_space<any>>) target(%236 : memref<152x128xbf16, #tpu.memory_space<vmem>>) target_semaphore(%238 : memref<!tpu.dma_semaphore, #tpu.memory_space<semaphore_mem>>)
    } else {
    }
    %c2_i32_2 = arith.constant 2 : i32
    %c0_i32_3 = arith.constant 0 : i32
    %7 = arith.cmpi eq, %c2_i32_2, %c0_i32_3 : i32
    %c1_i32_4 = arith.constant 1 : i32
    %8 = arith.select %7, %c1_i32_4, %c2_i32_2 : i32
    %9 = arith.remsi %arg1, %8 : i32
    %c0_i32_5 = arith.constant 0 : i32
    %10 = arith.cmpi ne, %9, %c0_i32_5 : i32
    %c0_i32_6 = arith.constant 0 : i32
    %11 = arith.cmpi slt, %9, %c0_i32_6 : i32
    %c0_i32_7 = arith.constant 0 : i32
    %12 = arith.cmpi slt, %8, %c0_i32_7 : i32
    %13 = arith.xori %11, %12 : i1
    %14 = arith.andi %13, %10 : i1
    %15 = arith.addi %9, %8 : i32
    %16 = arith.select %14, %15, %9 : i32
    %c128_i32 = arith.constant 128 : i32
    %17 = arith.muli %arg1, %c128_i32 : i32
    %c0_i32_8 = arith.constant 0 : i32
    %18 = tpu.memref_slice %arg2[%arg0, %17, %c0_i32_8] : memref<2x280x128xbf16, #tpu.memory_space<any>> -> memref<1x152x128xbf16, #tpu.memory_space<any>>
    %19 = tpu.memref_squeeze %18 : memref<1x152x128xbf16, #tpu.memory_space<any>> -> memref<152x128xbf16, #tpu.memory_space<any>>
    %c0_i32_9 = arith.constant 0 : i32
    %c0_i32_10 = arith.constant 0 : i32
    %20 = tpu.memref_slice %arg8[%16, %c0_i32_9, %c0_i32_10] : memref<2x152x128xbf16, #tpu.memory_space<vmem>> -> memref<1x152x128xbf16, #tpu.memory_space<vmem>>
    %21 = tpu.memref_squeeze %20 : memref<1x152x128xbf16, #tpu.memory_space<vmem>> -> memref<152x128xbf16, #tpu.memory_space<vmem>>
    %22 = tpu.memref_slice %arg9[%16] : memref<2x!tpu.dma_semaphore, #tpu.memory_space<semaphore_mem>> -> memref<1x!tpu.dma_semaphore, #tpu.memory_space<semaphore_mem>>
    %23 = tpu.memref_squeeze %22 : memref<1x!tpu.dma_semaphore, #tpu.memory_space<semaphore_mem>> -> memref<!tpu.dma_semaphore, #tpu.memory_space<semaphore_mem>>
    tpu.wait_dma2 semaphore(%23 : memref<!tpu.dma_semaphore, #tpu.memory_space<semaphore_mem>>) src(%19 : memref<152x128xbf16, #tpu.memory_space<any>>) dst(%21 : memref<152x128xbf16, #tpu.memory_space<vmem>>)
    %24 = arith.index_cast %16 : i32 to index
    %c0 = arith.constant 0 : index
    %c0_11 = arith.constant 0 : index
    %25 = vector.load %arg8[%24, %c0, %c0_11] : memref<2x152x128xbf16, #tpu.memory_space<vmem>>, vector<1x152x128xbf16>
    %26 = vector.shape_cast %25 : vector<1x152x128xbf16> to vector<152x128xbf16>
    %27 = arith.extf %26 : vector<152x128xbf16> to vector<152x128xf32>
    %28 = tpu.iota {dimensions = array<i32: 0>} : vector<152x1xi32>
    %c128_i32_12 = arith.constant 128 : i32
    %29 = arith.muli %arg1, %c128_i32_12 : i32
    %30 = vector.broadcast %29 : i32 to vector<152x1xi32>
    %31 = arith.addi %30, %28 : vector<152x1xi32>
    %c12_i32 = arith.constant 12 : i32
    %32 = vector.broadcast %c12_i32 : i32 to vector<152x1xi32>
    %33 = arith.subi %31, %32 : vector<152x1xi32>
    %c0_i32_13 = arith.constant 0 : i32
    %34 = vector.broadcast %c0_i32_13 : i32 to vector<152x1xi32>
    %35 = arith.cmpi sge, %33, %34 : vector<152x1xi32>
    %c256_i32 = arith.constant 256 : i32
    %36 = vector.broadcast %c256_i32 : i32 to vector<152x1xi32>
    %37 = arith.cmpi slt, %33, %36 : vector<152x1xi32>
    %38 = arith.andi %35, %37 : vector<152x1xi1>
    %cst = arith.constant 0.000000e+00 : f32
    %39 = vector.broadcast %cst : f32 to vector<152x128xf32>
    %40 = arith.cmpf oge, %27, %39 : vector<152x128xf32>
    %cst_14 = arith.constant 1.000000e-01 : f32
    %41 = vector.broadcast %cst_14 : f32 to vector<152x128xf32>
    %42 = arith.mulf %41, %27 : vector<152x128xf32>
    %43 = arith.select %40, %27, %42 : vector<152x128xi1>, vector<152x128xf32>
    %cst_15 = arith.constant 0.000000e+00 : f32
    %44 = vector.shape_cast %38 : vector<152x1xi1> to vector<152x1xi1>
    %45 = vector.broadcast %44 : vector<152x1xi1> to vector<152x128xi1>
    %46 = vector.broadcast %cst_15 : f32 to vector<152x128xf32>
    %47 = arith.select %45, %43, %46 : vector<152x128xi1>, vector<152x128xf32>
    %c1_i32_16 = arith.constant 1 : i32
    %48 = tpu.dynamic_rotate %47 by %c1_i32_16 dim 0 : vector<152x128xf32>, i32 -> vector<152x128xf32>
    %49 = arith.truncf %48 : vector<152x128xf32> to vector<152x128xbf16>
    %50 = arith.truncf %47 : vector<152x128xf32> to vector<152x128xbf16>
    %c151_i32 = arith.constant 151 : i32
    %51 = tpu.dynamic_rotate %47 by %c151_i32 dim 0 : vector<152x128xf32>, i32 -> vector<152x128xf32>
    %52 = arith.truncf %51 : vector<152x128xf32> to vector<152x128xbf16>
    %c0_17 = arith.constant 0 : index
    %c0_18 = arith.constant 0 : index
    %c0_19 = arith.constant 0 : index
    %c0_20 = arith.constant 0 : index
    %53 = vector.load %arg3[%c0_17, %c0_18, %c0_19, %c0_20] : memref<3x3x128x128xbf16, #tpu.memory_space<vmem>>, vector<1x1x128x128xbf16>
    %54 = vector.shape_cast %53 : vector<1x1x128x128xbf16> to vector<128x128xbf16>
    %cst_21 = arith.constant dense<0.000000e+00> : vector<152x128xf32>
    %55 = tpu.matmul %49, %54, %cst_21 {dimension_numbers = #tpu.dot_dimension_numbers<[1], [0], [0], [1], [0, 0, 1, 1], [], []>} : vector<152x128xbf16>, vector<128x128xbf16>, vector<152x128xf32> -> vector<152x128xf32>
    %c0_22 = arith.constant 0 : index
    %c1 = arith.constant 1 : index
    %c0_23 = arith.constant 0 : index
    %c0_24 = arith.constant 0 : index
    %56 = vector.load %arg3[%c0_22, %c1, %c0_23, %c0_24] : memref<3x3x128x128xbf16, #tpu.memory_space<vmem>>, vector<1x1x128x128xbf16>
    %57 = vector.shape_cast %56 : vector<1x1x128x128xbf16> to vector<128x128xbf16>
    %cst_25 = arith.constant dense<0.000000e+00> : vector<152x128xf32>
    %58 = tpu.matmul %50, %57, %cst_25 {dimension_numbers = #tpu.dot_dimension_numbers<[1], [0], [0], [1], [0, 0, 1, 1], [], []>} : vector<152x128xbf16>, vector<128x128xbf16>, vector<152x128xf32> -> vector<152x128xf32>
    %59 = arith.addf %55, %58 : vector<152x128xf32>
    %c0_26 = arith.constant 0 : index
    %c2 = arith.constant 2 : index
    %c0_27 = arith.constant 0 : index
    %c0_28 = arith.constant 0 : index
    %60 = vector.load %arg3[%c0_26, %c2, %c0_27, %c0_28] : memref<3x3x128x128xbf16, #tpu.memory_space<vmem>>, vector<1x1x128x128xbf16>
    %61 = vector.shape_cast %60 : vector<1x1x128x128xbf16> to vector<128x128xbf16>
    %cst_29 = arith.constant dense<0.000000e+00> : vector<152x128xf32>
    %62 = tpu.matmul %52, %61, %cst_29 {dimension_numbers = #tpu.dot_dimension_numbers<[1], [0], [0], [1], [0, 0, 1, 1], [], []>} : vector<152x128xbf16>, vector<128x128xbf16>, vector<152x128xf32> -> vector<152x128xf32>
    %63 = arith.addf %59, %62 : vector<152x128xf32>
    %c0_30 = arith.constant 0 : index
    %c0_31 = arith.constant 0 : index
    %c0_32 = arith.constant 0 : index
    %64 = vector.load %arg4[%c0_30, %c0_31, %c0_32] : memref<3x1x128xf32, #tpu.memory_space<vmem>>, vector<1x1x128xf32>
    %65 = vector.shape_cast %64 : vector<1x1x128xf32> to vector<1x128xf32>
    %66 = vector.broadcast %65 : vector<1x128xf32> to vector<152x128xf32>
    %67 = arith.addf %63, %66 : vector<152x128xf32>
    %cst_33 = arith.constant 0.000000e+00 : f32
    %68 = vector.broadcast %cst_33 : f32 to vector<152x128xf32>
    %69 = arith.cmpf oge, %67, %68 : vector<152x128xf32>
    %cst_34 = arith.constant 1.000000e-01 : f32
    %70 = vector.broadcast %cst_34 : f32 to vector<152x128xf32>
    %71 = arith.mulf %70, %67 : vector<152x128xf32>
    %72 = arith.select %69, %67, %71 : vector<152x128xi1>, vector<152x128xf32>
    %cst_35 = arith.constant 0.000000e+00 : f32
    %73 = vector.shape_cast %38 : vector<152x1xi1> to vector<152x1xi1>
    %74 = vector.broadcast %73 : vector<152x1xi1> to vector<152x128xi1>
    %75 = vector.broadcast %cst_35 : f32 to vector<152x128xf32>
    %76 = arith.select %74, %72, %75 : vector<152x128xi1>, vector<152x128xf32>
    %c1_i32_36 = arith.constant 1 : i32
    %77 = tpu.dynamic_rotate %76 by %c1_i32_36 dim 0 : vector<152x128xf32>, i32 -> vector<152x128xf32>
    %78 = arith.truncf %77 : vector<152x128xf32> to vector<152x128xbf16>
    %79 = arith.truncf %76 : vector<152x128xf32> to vector<152x128xbf16>
    %c151_i32_37 = arith.constant 151 : i32
    %80 = tpu.dynamic_rotate %76 by %c151_i32_37 dim 0 : vector<152x128xf32>, i32 -> vector<152x128xf32>
    %81 = arith.truncf %80 : vector<152x128xf32> to vector<152x128xbf16>
    %c0_38 = arith.constant 0 : index
    %c0_39 = arith.constant 0 : index
    %c0_40 = arith.constant 0 : index
    %c0_41 = arith.constant 0 : index
    %82 = vector.load %arg5[%c0_38, %c0_39, %c0_40, %c0_41] : memref<3x3x128x128xbf16, #tpu.memory_space<vmem>>, vector<1x1x128x128xbf16>
    %83 = vector.shape_cast %82 : vector<1x1x128x128xbf16> to vector<128x128xbf16>
    %cst_42 = arith.constant dense<0.000000e+00> : vector<152x128xf32>
    %84 = tpu.matmul %78, %83, %cst_42 {dimension_numbers = #tpu.dot_dimension_numbers<[1], [0], [0], [1], [0, 0, 1, 1], [], []>} : vector<152x128xbf16>, vector<128x128xbf16>, vector<152x128xf32> -> vector<152x128xf32>
    %c0_43 = arith.constant 0 : index
    %c1_44 = arith.constant 1 : index
    %c0_45 = arith.constant 0 : index
    %c0_46 = arith.constant 0 : index
    %85 = vector.load %arg5[%c0_43, %c1_44, %c0_45, %c0_46] : memref<3x3x128x128xbf16, #tpu.memory_space<vmem>>, vector<1x1x128x128xbf16>
    %86 = vector.shape_cast %85 : vector<1x1x128x128xbf16> to vector<128x128xbf16>
    %cst_47 = arith.constant dense<0.000000e+00> : vector<152x128xf32>
    %87 = tpu.matmul %79, %86, %cst_47 {dimension_numbers = #tpu.dot_dimension_numbers<[1], [0], [0], [1], [0, 0, 1, 1], [], []>} : vector<152x128xbf16>, vector<128x128xbf16>, vector<152x128xf32> -> vector<152x128xf32>
    %88 = arith.addf %84, %87 : vector<152x128xf32>
    %c0_48 = arith.constant 0 : index
    %c2_49 = arith.constant 2 : index
    %c0_50 = arith.constant 0 : index
    %c0_51 = arith.constant 0 : index
    %89 = vector.load %arg5[%c0_48, %c2_49, %c0_50, %c0_51] : memref<3x3x128x128xbf16, #tpu.memory_space<vmem>>, vector<1x1x128x128xbf16>
    %90 = vector.shape_cast %89 : vector<1x1x128x128xbf16> to vector<128x128xbf16>
    %cst_52 = arith.constant dense<0.000000e+00> : vector<152x128xf32>
    %91 = tpu.matmul %81, %90, %cst_52 {dimension_numbers = #tpu.dot_dimension_numbers<[1], [0], [0], [1], [0, 0, 1, 1], [], []>} : vector<152x128xbf16>, vector<128x128xbf16>, vector<152x128xf32> -> vector<152x128xf32>
    %92 = arith.addf %88, %91 : vector<152x128xf32>
    %c0_53 = arith.constant 0 : index
    %c0_54 = arith.constant 0 : index
    %c0_55 = arith.constant 0 : index
    %93 = vector.load %arg6[%c0_53, %c0_54, %c0_55] : memref<3x1x128xf32, #tpu.memory_space<vmem>>, vector<1x1x128xf32>
    %94 = vector.shape_cast %93 : vector<1x1x128xf32> to vector<1x128xf32>
    %95 = vector.broadcast %94 : vector<1x128xf32> to vector<152x128xf32>
    %96 = arith.addf %92, %95 : vector<152x128xf32>
    %97 = arith.addf %96, %27 : vector<152x128xf32>
    %cst_56 = arith.constant 0.000000e+00 : f32
    %98 = vector.broadcast %cst_56 : f32 to vector<152x128xf32>
    %99 = arith.cmpf oge, %97, %98 : vector<152x128xf32>
    %cst_57 = arith.constant 1.000000e-01 : f32
    %100 = vector.broadcast %cst_57 : f32 to vector<152x128xf32>
    %101 = arith.mulf %100, %97 : vector<152x128xf32>
    %102 = arith.select %99, %97, %101 : vector<152x128xi1>, vector<152x128xf32>
    %cst_58 = arith.constant 0.000000e+00 : f32
    %103 = vector.shape_cast %38 : vector<152x1xi1> to vector<152x1xi1>
    %104 = vector.broadcast %103 : vector<152x1xi1> to vector<152x128xi1>
    %105 = vector.broadcast %cst_58 : f32 to vector<152x128xf32>
    %106 = arith.select %104, %102, %105 : vector<152x128xi1>, vector<152x128xf32>
    %c3_i32 = arith.constant 3 : i32
    %107 = tpu.dynamic_rotate %106 by %c3_i32 dim 0 : vector<152x128xf32>, i32 -> vector<152x128xf32>
    %108 = arith.truncf %107 : vector<152x128xf32> to vector<152x128xbf16>
    %109 = arith.truncf %106 : vector<152x128xf32> to vector<152x128xbf16>
    %c149_i32 = arith.constant 149 : i32
    %110 = tpu.dynamic_rotate %106 by %c149_i32 dim 0 : vector<152x128xf32>, i32 -> vector<152x128xf32>
    %111 = arith.truncf %110 : vector<152x128xf32> to vector<152x128xbf16>
    %c1_59 = arith.constant 1 : index
    %c0_60 = arith.constant 0 : index
    %c0_61 = arith.constant 0 : index
    %c0_62 = arith.constant 0 : index
    %112 = vector.load %arg3[%c1_59, %c0_60, %c0_61, %c0_62] : memref<3x3x128x128xbf16, #tpu.memory_space<vmem>>, vector<1x1x128x128xbf16>
    %113 = vector.shape_cast %112 : vector<1x1x128x128xbf16> to vector<128x128xbf16>
    %cst_63 = arith.constant dense<0.000000e+00> : vector<152x128xf32>
    %114 = tpu.matmul %108, %113, %cst_63 {dimension_numbers = #tpu.dot_dimension_numbers<[1], [0], [0], [1], [0, 0, 1, 1], [], []>} : vector<152x128xbf16>, vector<128x128xbf16>, vector<152x128xf32> -> vector<152x128xf32>
    %c1_64 = arith.constant 1 : index
    %c1_65 = arith.constant 1 : index
    %c0_66 = arith.constant 0 : index
    %c0_67 = arith.constant 0 : index
    %115 = vector.load %arg3[%c1_64, %c1_65, %c0_66, %c0_67] : memref<3x3x128x128xbf16, #tpu.memory_space<vmem>>, vector<1x1x128x128xbf16>
    %116 = vector.shape_cast %115 : vector<1x1x128x128xbf16> to vector<128x128xbf16>
    %cst_68 = arith.constant dense<0.000000e+00> : vector<152x128xf32>
    %117 = tpu.matmul %109, %116, %cst_68 {dimension_numbers = #tpu.dot_dimension_numbers<[1], [0], [0], [1], [0, 0, 1, 1], [], []>} : vector<152x128xbf16>, vector<128x128xbf16>, vector<152x128xf32> -> vector<152x128xf32>
    %118 = arith.addf %114, %117 : vector<152x128xf32>
    %c1_69 = arith.constant 1 : index
    %c2_70 = arith.constant 2 : index
    %c0_71 = arith.constant 0 : index
    %c0_72 = arith.constant 0 : index
    %119 = vector.load %arg3[%c1_69, %c2_70, %c0_71, %c0_72] : memref<3x3x128x128xbf16, #tpu.memory_space<vmem>>, vector<1x1x128x128xbf16>
    %120 = vector.shape_cast %119 : vector<1x1x128x128xbf16> to vector<128x128xbf16>
    %cst_73 = arith.constant dense<0.000000e+00> : vector<152x128xf32>
    %121 = tpu.matmul %111, %120, %cst_73 {dimension_numbers = #tpu.dot_dimension_numbers<[1], [0], [0], [1], [0, 0, 1, 1], [], []>} : vector<152x128xbf16>, vector<128x128xbf16>, vector<152x128xf32> -> vector<152x128xf32>
    %122 = arith.addf %118, %121 : vector<152x128xf32>
    %c1_74 = arith.constant 1 : index
    %c0_75 = arith.constant 0 : index
    %c0_76 = arith.constant 0 : index
    %123 = vector.load %arg4[%c1_74, %c0_75, %c0_76] : memref<3x1x128xf32, #tpu.memory_space<vmem>>, vector<1x1x128xf32>
    %124 = vector.shape_cast %123 : vector<1x1x128xf32> to vector<1x128xf32>
    %125 = vector.broadcast %124 : vector<1x128xf32> to vector<152x128xf32>
    %126 = arith.addf %122, %125 : vector<152x128xf32>
    %cst_77 = arith.constant 0.000000e+00 : f32
    %127 = vector.broadcast %cst_77 : f32 to vector<152x128xf32>
    %128 = arith.cmpf oge, %126, %127 : vector<152x128xf32>
    %cst_78 = arith.constant 1.000000e-01 : f32
    %129 = vector.broadcast %cst_78 : f32 to vector<152x128xf32>
    %130 = arith.mulf %129, %126 : vector<152x128xf32>
    %131 = arith.select %128, %126, %130 : vector<152x128xi1>, vector<152x128xf32>
    %cst_79 = arith.constant 0.000000e+00 : f32
    %132 = vector.shape_cast %38 : vector<152x1xi1> to vector<152x1xi1>
    %133 = vector.broadcast %132 : vector<152x1xi1> to vector<152x128xi1>
    %134 = vector.broadcast %cst_79 : f32 to vector<152x128xf32>
    %135 = arith.select %133, %131, %134 : vector<152x128xi1>, vector<152x128xf32>
    %c1_i32_80 = arith.constant 1 : i32
    %136 = tpu.dynamic_rotate %135 by %c1_i32_80 dim 0 : vector<152x128xf32>, i32 -> vector<152x128xf32>
    %137 = arith.truncf %136 : vector<152x128xf32> to vector<152x128xbf16>
    %138 = arith.truncf %135 : vector<152x128xf32> to vector<152x128xbf16>
    %c151_i32_81 = arith.constant 151 : i32
    %139 = tpu.dynamic_rotate %135 by %c151_i32_81 dim 0 : vector<152x128xf32>, i32 -> vector<152x128xf32>
    %140 = arith.truncf %139 : vector<152x128xf32> to vector<152x128xbf16>
    %c1_82 = arith.constant 1 : index
    %c0_83 = arith.constant 0 : index
    %c0_84 = arith.constant 0 : index
    %c0_85 = arith.constant 0 : index
    %141 = vector.load %arg5[%c1_82, %c0_83, %c0_84, %c0_85] : memref<3x3x128x128xbf16, #tpu.memory_space<vmem>>, vector<1x1x128x128xbf16>
    %142 = vector.shape_cast %141 : vector<1x1x128x128xbf16> to vector<128x128xbf16>
    %cst_86 = arith.constant dense<0.000000e+00> : vector<152x128xf32>
    %143 = tpu.matmul %137, %142, %cst_86 {dimension_numbers = #tpu.dot_dimension_numbers<[1], [0], [0], [1], [0, 0, 1, 1], [], []>} : vector<152x128xbf16>, vector<128x128xbf16>, vector<152x128xf32> -> vector<152x128xf32>
    %c1_87 = arith.constant 1 : index
    %c1_88 = arith.constant 1 : index
    %c0_89 = arith.constant 0 : index
    %c0_90 = arith.constant 0 : index
    %144 = vector.load %arg5[%c1_87, %c1_88, %c0_89, %c0_90] : memref<3x3x128x128xbf16, #tpu.memory_space<vmem>>, vector<1x1x128x128xbf16>
    %145 = vector.shape_cast %144 : vector<1x1x128x128xbf16> to vector<128x128xbf16>
    %cst_91 = arith.constant dense<0.000000e+00> : vector<152x128xf32>
    %146 = tpu.matmul %138, %145, %cst_91 {dimension_numbers = #tpu.dot_dimension_numbers<[1], [0], [0], [1], [0, 0, 1, 1], [], []>} : vector<152x128xbf16>, vector<128x128xbf16>, vector<152x128xf32> -> vector<152x128xf32>
    %147 = arith.addf %143, %146 : vector<152x128xf32>
    %c1_92 = arith.constant 1 : index
    %c2_93 = arith.constant 2 : index
    %c0_94 = arith.constant 0 : index
    %c0_95 = arith.constant 0 : index
    %148 = vector.load %arg5[%c1_92, %c2_93, %c0_94, %c0_95] : memref<3x3x128x128xbf16, #tpu.memory_space<vmem>>, vector<1x1x128x128xbf16>
    %149 = vector.shape_cast %148 : vector<1x1x128x128xbf16> to vector<128x128xbf16>
    %cst_96 = arith.constant dense<0.000000e+00> : vector<152x128xf32>
    %150 = tpu.matmul %140, %149, %cst_96 {dimension_numbers = #tpu.dot_dimension_numbers<[1], [0], [0], [1], [0, 0, 1, 1], [], []>} : vector<152x128xbf16>, vector<128x128xbf16>, vector<152x128xf32> -> vector<152x128xf32>
    %151 = arith.addf %147, %150 : vector<152x128xf32>
    %c1_97 = arith.constant 1 : index
    %c0_98 = arith.constant 0 : index
    %c0_99 = arith.constant 0 : index
    %152 = vector.load %arg6[%c1_97, %c0_98, %c0_99] : memref<3x1x128xf32, #tpu.memory_space<vmem>>, vector<1x1x128xf32>
    %153 = vector.shape_cast %152 : vector<1x1x128xf32> to vector<1x128xf32>
    %154 = vector.broadcast %153 : vector<1x128xf32> to vector<152x128xf32>
    %155 = arith.addf %151, %154 : vector<152x128xf32>
    %156 = arith.addf %155, %97 : vector<152x128xf32>
    %cst_100 = arith.constant 0.000000e+00 : f32
    %157 = vector.broadcast %cst_100 : f32 to vector<152x128xf32>
    %158 = arith.cmpf oge, %156, %157 : vector<152x128xf32>
    %cst_101 = arith.constant 1.000000e-01 : f32
    %159 = vector.broadcast %cst_101 : f32 to vector<152x128xf32>
    %160 = arith.mulf %159, %156 : vector<152x128xf32>
    %161 = arith.select %158, %156, %160 : vector<152x128xi1>, vector<152x128xf32>
    %cst_102 = arith.constant 0.000000e+00 : f32
    %162 = vector.shape_cast %38 : vector<152x1xi1> to vector<152x1xi1>
    %163 = vector.broadcast %162 : vector<152x1xi1> to vector<152x128xi1>
    %164 = vector.broadcast %cst_102 : f32 to vector<152x128xf32>
    %165 = arith.select %163, %161, %164 : vector<152x128xi1>, vector<152x128xf32>
    %c5_i32 = arith.constant 5 : i32
    %166 = tpu.dynamic_rotate %165 by %c5_i32 dim 0 : vector<152x128xf32>, i32 -> vector<152x128xf32>
    %167 = arith.truncf %166 : vector<152x128xf32> to vector<152x128xbf16>
    %168 = arith.truncf %165 : vector<152x128xf32> to vector<152x128xbf16>
    %c147_i32 = arith.constant 147 : i32
    %169 = tpu.dynamic_rotate %165 by %c147_i32 dim 0 : vector<152x128xf32>, i32 -> vector<152x128xf32>
    %170 = arith.truncf %169 : vector<152x128xf32> to vector<152x128xbf16>
    %c2_103 = arith.constant 2 : index
    %c0_104 = arith.constant 0 : index
    %c0_105 = arith.constant 0 : index
    %c0_106 = arith.constant 0 : index
    %171 = vector.load %arg3[%c2_103, %c0_104, %c0_105, %c0_106] : memref<3x3x128x128xbf16, #tpu.memory_space<vmem>>, vector<1x1x128x128xbf16>
    %172 = vector.shape_cast %171 : vector<1x1x128x128xbf16> to vector<128x128xbf16>
    %cst_107 = arith.constant dense<0.000000e+00> : vector<152x128xf32>
    %173 = tpu.matmul %167, %172, %cst_107 {dimension_numbers = #tpu.dot_dimension_numbers<[1], [0], [0], [1], [0, 0, 1, 1], [], []>} : vector<152x128xbf16>, vector<128x128xbf16>, vector<152x128xf32> -> vector<152x128xf32>
    %c2_108 = arith.constant 2 : index
    %c1_109 = arith.constant 1 : index
    %c0_110 = arith.constant 0 : index
    %c0_111 = arith.constant 0 : index
    %174 = vector.load %arg3[%c2_108, %c1_109, %c0_110, %c0_111] : memref<3x3x128x128xbf16, #tpu.memory_space<vmem>>, vector<1x1x128x128xbf16>
    %175 = vector.shape_cast %174 : vector<1x1x128x128xbf16> to vector<128x128xbf16>
    %cst_112 = arith.constant dense<0.000000e+00> : vector<152x128xf32>
    %176 = tpu.matmul %168, %175, %cst_112 {dimension_numbers = #tpu.dot_dimension_numbers<[1], [0], [0], [1], [0, 0, 1, 1], [], []>} : vector<152x128xbf16>, vector<128x128xbf16>, vector<152x128xf32> -> vector<152x128xf32>
    %177 = arith.addf %173, %176 : vector<152x128xf32>
    %c2_113 = arith.constant 2 : index
    %c2_114 = arith.constant 2 : index
    %c0_115 = arith.constant 0 : index
    %c0_116 = arith.constant 0 : index
    %178 = vector.load %arg3[%c2_113, %c2_114, %c0_115, %c0_116] : memref<3x3x128x128xbf16, #tpu.memory_space<vmem>>, vector<1x1x128x128xbf16>
    %179 = vector.shape_cast %178 : vector<1x1x128x128xbf16> to vector<128x128xbf16>
    %cst_117 = arith.constant dense<0.000000e+00> : vector<152x128xf32>
    %180 = tpu.matmul %170, %179, %cst_117 {dimension_numbers = #tpu.dot_dimension_numbers<[1], [0], [0], [1], [0, 0, 1, 1], [], []>} : vector<152x128xbf16>, vector<128x128xbf16>, vector<152x128xf32> -> vector<152x128xf32>
    %181 = arith.addf %177, %180 : vector<152x128xf32>
    %c2_118 = arith.constant 2 : index
    %c0_119 = arith.constant 0 : index
    %c0_120 = arith.constant 0 : index
    %182 = vector.load %arg4[%c2_118, %c0_119, %c0_120] : memref<3x1x128xf32, #tpu.memory_space<vmem>>, vector<1x1x128xf32>
    %183 = vector.shape_cast %182 : vector<1x1x128xf32> to vector<1x128xf32>
    %184 = vector.broadcast %183 : vector<1x128xf32> to vector<152x128xf32>
    %185 = arith.addf %181, %184 : vector<152x128xf32>
    %cst_121 = arith.constant 0.000000e+00 : f32
    %186 = vector.broadcast %cst_121 : f32 to vector<152x128xf32>
    %187 = arith.cmpf oge, %185, %186 : vector<152x128xf32>
    %cst_122 = arith.constant 1.000000e-01 : f32
    %188 = vector.broadcast %cst_122 : f32 to vector<152x128xf32>
    %189 = arith.mulf %188, %185 : vector<152x128xf32>
    %190 = arith.select %187, %185, %189 : vector<152x128xi1>, vector<152x128xf32>
    %cst_123 = arith.constant 0.000000e+00 : f32
    %191 = vector.shape_cast %38 : vector<152x1xi1> to vector<152x1xi1>
    %192 = vector.broadcast %191 : vector<152x1xi1> to vector<152x128xi1>
    %193 = vector.broadcast %cst_123 : f32 to vector<152x128xf32>
    %194 = arith.select %192, %190, %193 : vector<152x128xi1>, vector<152x128xf32>
    %c1_i32_124 = arith.constant 1 : i32
    %195 = tpu.dynamic_rotate %194 by %c1_i32_124 dim 0 : vector<152x128xf32>, i32 -> vector<152x128xf32>
    %196 = arith.truncf %195 : vector<152x128xf32> to vector<152x128xbf16>
    %197 = arith.truncf %194 : vector<152x128xf32> to vector<152x128xbf16>
    %c151_i32_125 = arith.constant 151 : i32
    %198 = tpu.dynamic_rotate %194 by %c151_i32_125 dim 0 : vector<152x128xf32>, i32 -> vector<152x128xf32>
    %199 = arith.truncf %198 : vector<152x128xf32> to vector<152x128xbf16>
    %c2_126 = arith.constant 2 : index
    %c0_127 = arith.constant 0 : index
    %c0_128 = arith.constant 0 : index
    %c0_129 = arith.constant 0 : index
    %200 = vector.load %arg5[%c2_126, %c0_127, %c0_128, %c0_129] : memref<3x3x128x128xbf16, #tpu.memory_space<vmem>>, vector<1x1x128x128xbf16>
    %201 = vector.shape_cast %200 : vector<1x1x128x128xbf16> to vector<128x128xbf16>
    %cst_130 = arith.constant dense<0.000000e+00> : vector<152x128xf32>
    %202 = tpu.matmul %196, %201, %cst_130 {dimension_numbers = #tpu.dot_dimension_numbers<[1], [0], [0], [1], [0, 0, 1, 1], [], []>} : vector<152x128xbf16>, vector<128x128xbf16>, vector<152x128xf32> -> vector<152x128xf32>
    %c2_131 = arith.constant 2 : index
    %c1_132 = arith.constant 1 : index
    %c0_133 = arith.constant 0 : index
    %c0_134 = arith.constant 0 : index
    %203 = vector.load %arg5[%c2_131, %c1_132, %c0_133, %c0_134] : memref<3x3x128x128xbf16, #tpu.memory_space<vmem>>, vector<1x1x128x128xbf16>
    %204 = vector.shape_cast %203 : vector<1x1x128x128xbf16> to vector<128x128xbf16>
    %cst_135 = arith.constant dense<0.000000e+00> : vector<152x128xf32>
    %205 = tpu.matmul %197, %204, %cst_135 {dimension_numbers = #tpu.dot_dimension_numbers<[1], [0], [0], [1], [0, 0, 1, 1], [], []>} : vector<152x128xbf16>, vector<128x128xbf16>, vector<152x128xf32> -> vector<152x128xf32>
    %206 = arith.addf %202, %205 : vector<152x128xf32>
    %c2_136 = arith.constant 2 : index
    %c2_137 = arith.constant 2 : index
    %c0_138 = arith.constant 0 : index
    %c0_139 = arith.constant 0 : index
    %207 = vector.load %arg5[%c2_136, %c2_137, %c0_138, %c0_139] : memref<3x3x128x128xbf16, #tpu.memory_space<vmem>>, vector<1x1x128x128xbf16>
    %208 = vector.shape_cast %207 : vector<1x1x128x128xbf16> to vector<128x128xbf16>
    %cst_140 = arith.constant dense<0.000000e+00> : vector<152x128xf32>
    %209 = tpu.matmul %199, %208, %cst_140 {dimension_numbers = #tpu.dot_dimension_numbers<[1], [0], [0], [1], [0, 0, 1, 1], [], []>} : vector<152x128xbf16>, vector<128x128xbf16>, vector<152x128xf32> -> vector<152x128xf32>
    %210 = arith.addf %206, %209 : vector<152x128xf32>
    %c2_141 = arith.constant 2 : index
    %c0_142 = arith.constant 0 : index
    %c0_143 = arith.constant 0 : index
    %211 = vector.load %arg6[%c2_141, %c0_142, %c0_143] : memref<3x1x128xf32, #tpu.memory_space<vmem>>, vector<1x1x128xf32>
    %212 = vector.shape_cast %211 : vector<1x1x128xf32> to vector<1x128xf32>
    %213 = vector.broadcast %212 : vector<1x128xf32> to vector<152x128xf32>
    %214 = arith.addf %210, %213 : vector<152x128xf32>
    %215 = arith.addf %214, %156 : vector<152x128xf32>
    %216 = vector.extract_strided_slice %215 {offsets = [12, 0], sizes = [128, 128], strides = [1, 1]} : vector<152x128xf32> to vector<128x128xf32>
    %c0_144 = arith.constant 0 : index
    %c0_145 = arith.constant 0 : index
    %c0_146 = arith.constant 0 : index
    %217 = vector.load %arg7[%c0_144, %c0_145, %c0_146] : memref<1x128x128xf32, #tpu.memory_space<vmem>>, vector<1x128x128xf32>
    %218 = vector.shape_cast %217 : vector<1x128x128xf32> to vector<128x128xf32>
    %219 = vector.shape_cast %216 : vector<128x128xf32> to vector<1x128x128xf32>
    tpu.vector_store %arg7[%c0_144, %c0_145, %c0_146], %219 {strides = array<i32>} : memref<1x128x128xf32, #tpu.memory_space<vmem>>, vector<1x128x128xf32>,
    return
  }
  func.func @transform_1(%arg0: i32, %arg1: i32) -> (i32, i32, i32, i32) {
    %c0_i32 = arith.constant 0 : i32
    %c0_i32_0 = arith.constant 0 : i32
    %c0_i32_1 = arith.constant 0 : i32
    %c0_i32_2 = arith.constant 0 : i32
    %c0_i32_3 = arith.constant 0 : i32
    return %c0_i32, %c0_i32_0, %c0_i32_1, %c0_i32_2 : i32, i32, i32, i32
  }
  func.func @transform_2(%arg0: i32, %arg1: i32) -> (i32, i32, i32) {
    %c0_i32 = arith.constant 0 : i32
    %c0_i32_0 = arith.constant 0 : i32
    %c0_i32_1 = arith.constant 0 : i32
    %c0_i32_2 = arith.constant 0 : i32
    return %c0_i32, %c0_i32_0, %c0_i32_1 : i32, i32, i32
  }
  func.func @transform_3(%arg0: i32, %arg1: i32) -> (i32, i32, i32, i32) {
    %c0_i32 = arith.constant 0 : i32
    %c0_i32_0 = arith.constant 0 : i32
    %c0_i32_1 = arith.constant 0 : i32
    %c0_i32_2 = arith.constant 0 : i32
    %c0_i32_3 = arith.constant 0 : i32
    return %c0_i32, %c0_i32_0, %c0_i32_1, %c0_i32_2 : i32, i32, i32, i32
  }
  func.func @transform_4(%arg0: i32, %arg1: i32) -> (i32, i32, i32) {
    %c0_i32 = arith.constant 0 : i32
    %c0_i32_0 = arith.constant 0 : i32
    %c0_i32_1 = arith.constant 0 : i32
    %c0_i32_2 = arith.constant 0 : i32
    return %c0_i32, %c0_i32_0, %c0_i32_1 : i32, i32, i32
  }
  func.func @transform_5(%arg0: i32, %arg1: i32) -> (i32, i32, i32) {
    %c0_i32 = arith.constant 0 : i32
    %c0_i32_0 = arith.constant 0 : i32
    return %arg0, %arg1, %c0_i32 : i32, i32, i32
  }
}

</mosaic_0001>

<bundles_post_ra>
// kernel: _resblock1_pallas.1
= control target key start
LH: loop header
LB: loop body
LE: loop exit
PB: predicated region body
PF: predicated region fallthrough
CT: control target
= control target key end

     0   :  { %s7430_s18 = smov 0   ;;  %s7432_s19 = smov 0   ;;  %s10841_s0 = inlined_call_operand.vmem [shape: bf16[2,280,128], index: 0, kind: input, shape index: {}]   ;;  %s10842_s1 = inlined_call_operand.vmem [shape: bf16[3,3,128,128], index: 1, kind: input, shape index: {}]   ;;  %s10843_s2 = inlined_call_operand.vmem [shape: f32[3,1,128], index: 2, kind: input, shape index: {}]   ;;  %s10844_s3 = inlined_call_operand.vmem [shape: bf16[3,3,128,128], index: 3, kind: input, shape index: {}]   ;;  %s10845_s4 = inlined_call_operand.vmem [shape: f32[3,1,128], index: 4, kind: input, shape index: {}]   ;;  %s10846_s5 = inlined_call_operand.vmem [shape: f32[2,256,128], index: 5, kind: output, shape index: {}]  }
   0x1   :  { %s7434_s20 = smov 0   ;;  %s7436_s21 = smov 0  }
   0x2   :  { %s7438_s22 = smov 0  }
   0x3 LB: > { %s24_s23 = sadd.s32 1, %s7390_s20  ;;  %s27_s24 = sadd.s32 1, %s7394_s21  ;;  %s7398_s22 = sphi %s7438_s22, %s15_s22   ;;  %s7394_s21 = sphi %s7436_s21, %s11701_s21   ;;  %s7390_s20 = sphi %s7434_s20, %s11700_s20   ;;  %s7386_s19 = sphi %s7432_s19, %s11699_s19   ;;  %s7382_s18 = sphi %s7430_s18, %s11698_s18  }
   0x4   : > { %p25_p0 = scmp.ge.s32.totalorder %s24_s23, 2  ;;  %p5335_p1 = scmp.ge.s32.totalorder %s7398_s22, 1 }
   0x5   : > { %p167_p2 = scmp.lt.s32.totalorder %s7398_s22, 5 }
   0x6   : > { %s11703_s23 = smov (%p25_p0, %s24_s23), 0  ;;  %s11705_s24 = smov (!%p25_p0, %s27_s24), %s7394_s21 }
   0x7   : > { %p168_p3 = pnand %p5335_p1, %p167_p2  ;;  %p29_p4 = scmp.ge.s32.totalorder %s11705_s24, 2 }
   0x9   : > { %s11707_s24 = smov (%p29_p4, %s11705_s24), 0  ;;  %171 = sbr.rel (%p168_p3) target bundleno = 1998 (0x7ce), region = 36 }
  0x10   : > { %s5336_s25 = sshll.u32 %s7382_s18, 4  ;;  %p193_p5 = scmp.lt.s32.totalorder %s7386_s19, 1 }
  0x11   : > { %p195_p6 = scmp.lt.s32.totalorder %s5336_s25, 31  ;;  %p5339_p7 = scmp.ne.s32.totalorder %s7382_s18, 0 }
  0x12   : > { %s194_s26 = scalar_select %p193_p5, %s7386_s19, 1 }
  0x13   : > { %s11709_s25 = smov (!%p195_p6, %s5336_s25), 31  ;;  %206 = sbr.rel (%p5339_p7) target bundleno = 30 (0x1e), region = 40 }
  0x14   : > { %s5337_s27 = sshll.u32 %s194_s26, 5  ;;  %s5969_s8 = smul.u32 (!%p5339_p7), 140, %s7386_s19 }
  0x15   : > { %s198_s28 = sadd.s32 %s5337_s27, %s11709_s25 }
  0x16   : > { %s5338_s29 = sshll.u32 %s198_s28, 3  ;;  %s209_s11 = scalar_lea.vmem (!%p5339_p7), %s10841_s0, %s5969_s8 }
  0x17   : > { %s7470_s7 = scalar_lea.vmem %s10846_s5, %s5338_s29  ;;  %v247_v0 = vld [vmem:[%s209_s11] sm:$0xff] (!%p5339_p7)  ;;  %v249_v1 = vld [vmem:[%s209_s11 + $0x8] sm:$0xff] (!%p5339_p7)  ;;  %v251_v2 = vld [vmem:[%s209_s11 + $0x10] sm:$0xff] (!%p5339_p7) }
  0x18   : > { %248 = vst [vmem:[#allocation2] sm:$0xff] (!%p5339_p7), %v247_v0  ;;  %250 = vst [vmem:[#allocation2 + $0x8] sm:$0xff] (!%p5339_p7), %v249_v1  ;;  %v253_v3 = vld [vmem:[%s209_s11 + $0x18] sm:$0xff] (!%p5339_p7)  ;;  %v255_v4 = vld [vmem:[%s209_s11 + $0x20] sm:$0xff] (!%p5339_p7) }
  0x19   : > { %252 = vst [vmem:[#allocation2 + $0x10] sm:$0xff] (!%p5339_p7), %v251_v2  ;;  %v257_v5 = vld [vmem:[%s209_s11 + $0x28] sm:$0xff] (!%p5339_p7)  ;;  %254 = vst [vmem:[#allocation2 + $0x18] sm:$0xff] (!%p5339_p7), %v253_v3  ;;  %v259_v6 = vld [vmem:[%s209_s11 + $0x30] sm:$0xff] (!%p5339_p7) }
  0x1a   : > { %256 = vst [vmem:[#allocation2 + $0x20] sm:$0xff] %v255_v4  ;;  %258 = vst [vmem:[#allocation2 + $0x28] sm:$0xff] %v257_v5  ;;  %v261_v7 = vld [vmem:[%s209_s11 + $0x38] sm:$0xff]  ;;  %v263_v8 = vld [vmem:[%s209_s11 + $0x40] sm:$0xff] }
  0x1b   : > { %260 = vst [vmem:[#allocation2 + $0x30] sm:$0xff] %v259_v6  ;;  %262 = vst [vmem:[#allocation2 + $0x38] sm:$0xff] %v261_v7  ;;  %v5341_v9 = vld [vmem:[%s209_s11 + $0x48] sm:$0xf] }
  0x1c   : > { %264 = vst [vmem:[#allocation2 + $0x40] sm:$0xff] %v263_v8  ;;  %275 = vst [vmem:[#allocation2 + $0x48] sm:$0xf] %v5341_v9 }
  0x1d   : > { %279 = vsyncadd [#allocation3], 1216 }
  0x1e PF: > { %s280_s12 = sadd.s32 1, %s7382_s18 }
  0x1f   : > { %p5342_p8 = scmp.ge.s32.totalorder %s280_s12, 2 }
  0x20   : > { %p285_p9 = scmp.lt.s32.totalorder (!%p5342_p8), %s280_s12, 0  ;;  %s286_s13 = ssub.s32 (!%p5342_p8), 0, %s280_s12 }
  0x21   : > { %284 = sbr.rel (%p5342_p8) target bundleno = 53 (0x35), region = 81  ;;  %s5343_s14 = smin.u32 (!%p5342_p8), %s286_s13, %s280_s12 }
  0x22   : > { %s5970_s15 = sshll.u32 (!%p5342_p8), %s7382_s18, 7  ;;  %s288_s16 = sand.u32 (!%p5342_p8), 1, %s5343_s14  }
  0x23   : > { %s5971_s17 = sadd.s32 (!%p5342_p8), 128, %s5970_s15  ;;  %s289_s25 = ssub.s32 (!%p5342_p8), 0, %s288_s16 }
  0x24   : > { %s298_s26 = sshra.s32 (!%p5342_p8), %s5971_s17, 3  ;;  %s300_s27 = smul.u32 (!%p5342_p8), 35, %s7386_s19 }
  0x26   : > { %s301_s29 = sadd.s32 (!%p5342_p8), %s300_s27, %s298_s26 }
  0x27   : > { %s5347_s30 = sshll.u32 (!%p5342_p8), %s301_s29, 2 }
  0x28   : > { %s11711_s25 = smov (!%p285_p9, %s289_s25), %s288_s16  ;;  %s303_s9 = scalar_lea.vmem %s10841_s0, %s5347_s30 }
  0x29   : > { %p5345_p10 = scmp.lt.s32.totalorder %s11711_s25, 0  ;;  %s295_s28 = sadd.s32 2, %s11711_s25  ;;  %v345_v10 = vld [vmem:[%s303_s9] sm:$0xff]  ;;  %v347_v11 = vld [vmem:[%s303_s9 + $0x8] sm:$0xff]  ;;  %v349_v12 = vld [vmem:[%s303_s9 + $0x10] sm:$0xff] }
  0x2a   : > { %v351_v13 = vld [vmem:[%s303_s9 + $0x18] sm:$0xff]  ;;  %v353_v14 = vld [vmem:[%s303_s9 + $0x20] sm:$0xff]  ;;  %v355_v15 = vld [vmem:[%s303_s9 + $0x28] sm:$0xff] }
  0x2b   : > { %s11713_s28 = smov (!%p5345_p10, %s295_s28), %s11711_s25  ;;  %v357_v16 = vld [vmem:[%s303_s9 + $0x30] sm:$0xff]  ;;  %v359_v17 = vld [vmem:[%s303_s9 + $0x38] sm:$0xff]  ;;  %v361_v18 = vld [vmem:[%s303_s9 + $0x40] sm:$0xff] }
  0x2c   : > { %s5972_s10 = smul.u32 76, %s11713_s28  ;;  %v5349_v19 = vld [vmem:[%s303_s9 + $0x48] sm:$0xf]  ;;  %s307_s19 = scalar_lea.sflag [#allocation3], %s11713_s28 }
  0x2e   : > { %s306_s11 = scalar_lea.vmem [#allocation2], %s5972_s10 }
  0x2f   : > { %346 = vst [vmem:[%s306_s11] sm:$0xff] %v345_v10  ;;  %348 = vst [vmem:[%s306_s11 + $0x8] sm:$0xff] %v347_v11 }
  0x30   : > { %350 = vst [vmem:[%s306_s11 + $0x10] sm:$0xff] %v349_v12  ;;  %352 = vst [vmem:[%s306_s11 + $0x18] sm:$0xff] %v351_v13 }
  0x31   : > { %354 = vst [vmem:[%s306_s11 + $0x20] sm:$0xff] %v353_v14  ;;  %356 = vst [vmem:[%s306_s11 + $0x28] sm:$0xff] %v355_v15 }
  0x32   : > { %358 = vst [vmem:[%s306_s11 + $0x30] sm:$0xff] %v357_v16  ;;  %360 = vst [vmem:[%s306_s11 + $0x38] sm:$0xff] %v359_v17 }
  0x33   : > { %362 = vst [vmem:[%s306_s11 + $0x40] sm:$0xff] %v361_v18  ;;  %5350 = vst [vmem:[%s306_s11 + $0x48] sm:$0xf] %v5349_v19 }
  0x34   : > { %377 = vsyncadd %s307_s19, 1216 }
  0x35 PF: > { %p378_p11 = scmp.lt.s32.totalorder %s7382_s18, 0  ;;  %s379_s12 = ssub.s32 0, %s7382_s18 }
  0x36   : > { %s5351_s13 = smin.u32 %s7382_s18, %s379_s12  ;;  %s5354_s14 = sshll.u32 %s7382_s18, 7 }
  0x37   : > { %s381_s15 = sand.u32 1, %s5351_s13  }
  0x38   : > { %s382_s16 = ssub.s32 0, %s381_s15 }
  0x39   : > { %s11715_s16 = smov (!%p378_p11, %s382_s16), %s381_s15 }
  0x3a   : > { %p5353_p12 = scmp.lt.s32.totalorder %s11715_s16, 0  ;;  %s388_s17 = sadd.s32 2, %s11715_s16 }
  0x3c   : > { %s11717_s17 = smov (!%p5353_p12, %s388_s17), %s11715_s16 }
  0x3d   : > { %s5973_s25 = smul.u32 76, %s11717_s17  ;;  %s394_s27 = scalar_lea.sflag [#allocation3], %s11717_s17 }
  0x3f   : > { %s7487_s26 = scalar_lea.vmem [#allocation2], %s5973_s25 }
  0x40   : > { %7378 = dma.done.wait %s394_s27, 1216 }
  0x41   : > { %7379 = vsyncadd %s394_s27, 4294966080  ;;  %v437_v20 = vlaneseq  ;;  %v7491_v22 = vstv %s5354_s14  ;;  %v7214_v26 = vld [vmem:[%s10842_s1 + $0x40] sm:$0xff]   ;;  %v7215_v28 = vld [vmem:[%s10842_s1 + $0x48] sm:$0xff]   ;;  %v11058_v46 = vmov 0  ;;  %v11061_v48 = vmov 0 }
  0x42   : > { %6342 = vmatprep.subr.bf16.mxu0 %v7214_v26  ;;  %v7216_v33 = vld [vmem:[%s10842_s1 + $0x50] sm:$0xff]   ;;  %v7217_v38 = vld [vmem:[%s10842_s1 + $0x58] sm:$0xff]   ;;  %v7218_v55 = vld [vmem:[%s10842_s1 + $0x60] sm:$0xff]   ;;  %v11064_v60 = vmov 0  ;;  %v11068_v10 = vmov 0  ;;  %v11071_v15 = vmov 0 }
  0x43   : > { %v7489_v21 = vshrl.u32 %v437_v20, 7  ;;  %6343 = vmatpush3.bf16.msra.mxu0 %v7214_v26  ;;  %v5975_v39 = vld [vmem:[%s7487_s26] sm:$0xff]   ;;  %v6010_v40 = vld [vmem:[%s7487_s26 + $0x8] sm:$0xff]   ;;  %v6011_v2 = vld [vmem:[%s7487_s26 + $0x10] sm:$0xff]  }
  0x44   : > { %6344 = vmatprep.subr.bf16.mxu0 %v7215_v28  ;;  %v7520_v44 = vunpack.c.l.bf16 %v5975_v39  ;;  %v7522_v45 = vunpack.c.h.bf16 %v5975_v39  ;;  %v7529_v47 = vunpack.c.l.bf16 %v6010_v40  ;;  %v7535_v49 = vunpack.c.h.bf16 %v6010_v40  ;;  %v7219_v4 = vld [vmem:[%s10842_s1 + $0x68] sm:$0xff]   ;;  %v7220_v12 = vld [vmem:[%s10842_s1 + $0x70] sm:$0xff]  }
  0x45   : > { %v439_v23 = vadd.s32 8, %v7489_v21  ;;  %v458_v24 = vadd.s32 %v7491_v22, %v7489_v21  ;;  %v440_v27 = vadd.s32 16, %v7489_v21  ;;  %v441_v30 = vadd.s32 24, %v7489_v21  ;;  %v6012_v7 = vld [vmem:[%s7487_s26 + $0x18] sm:$0xff]   ;;  %v6017_v13 = vld [vmem:[%s7487_s26 + $0x40] sm:$0xff]  }
  0x46   : > { %v442_v32 = vadd.s32 32, %v7489_v21  ;;  %v443_v35 = vadd.s32 40, %v7489_v21  ;;  %v444_v36 = vadd.s32 48, %v7489_v21  ;;  %11056 = vst [vmem:[#allocation7_spill] sm:$0xff] %v7520_v44  ;;  %11057 = vst [vmem:[#allocation8_spill] sm:$0xff] %v7522_v45  ;;  %v445_v51 = vadd.s32 56, %v7489_v21 }
  0x47   : > { %v459_v25 = vadd.s32 %v7491_v22, %v439_v23  ;;  %v5356_v29 = vadd.s32 4294967284, %v458_v24  ;;  %v460_v34 = vadd.s32 %v7491_v22, %v440_v27  ;;  %v461_v37 = vadd.s32 %v7491_v22, %v441_v30  ;;  %6345 = vmatpush3.bf16.msra.mxu0 %v7215_v28  ;;  %11060 = vst [vmem:[#allocation9_spill] sm:$0xff] %v7529_v47  ;;  %v6013_v24 = vld [vmem:[%s7487_s26 + $0x20] sm:$0xff]  }
  0x48   : > { %6346 = vmatprep.subr.bf16.mxu0 %v7216_v33  ;;  %v462_v42 = vadd.s32 %v7491_v22, %v442_v32  ;;  %v463_v43 = vadd.s32 %v7491_v22, %v443_v35  ;;  %11063 = vst [vmem:[#allocation10_spill] sm:$0xff] %v7535_v49  ;;  %v464_v52 = vadd.s32 %v7491_v22, %v444_v36  ;;  %vm553_vm6 = vcmp.ge.f32.partialorder %v7520_v44, 0.0  ;;  %v7221_v36 = vld [vmem:[%s10842_s1 + $0x78] sm:$0xff]  }
  0x49   : > { %v5357_v31 = vadd.s32 4294967284, %v459_v25  ;;  %vm496_vm0 = vcmp.ge.s32.totalorder %v5356_v29, 0  ;;  %vm515_vm1 = vcmp.lt.s32.totalorder %v5356_v29, 256  ;;  %v5358_v41 = vadd.s32 4294967284, %v460_v34 }
  0x4a   : > { %vm7525_vm4 = vmand %vm496_vm0, %vm515_vm1  ;;  %v5359_v50 = vadd.s32 4294967284, %v461_v37  ;;  %vm554_vm7 = vcmp.ge.f32.partialorder %v7522_v45, 0.0  ;;  %v572_v53 = vmul.f32 0.1, %v7520_v44  ;;  %v573_v54 = vmul.f32 0.1, %v7522_v45 }
  0x4b   : > { %vm497_vm2 = vcmp.ge.s32.totalorder %v5357_v31, 0  ;;  %vm516_vm3 = vcmp.lt.s32.totalorder %v5357_v31, 256  ;;  %v11059_v46 = vsel %vm7525_vm4, 4294967295, %v11058_v46  ;;  %6347 = vmatpush3.bf16.msra.mxu0 %v7216_v33  ;;  %vm498_vm8 = vcmp.ge.s32.totalorder %v5358_v41, 0 }
  0x4c   : > { %vm7531_vm5 = vmand %vm497_vm2, %vm516_vm3  ;;  %6348 = vmatprep.subr.bf16.mxu0 %v7217_v38  ;;  %vm517_vm9 = vcmp.lt.s32.totalorder %v5358_v41, 256  ;;  %v5360_v56 = vadd.s32 4294967284, %v462_v42  ;;  %v5361_v57 = vadd.s32 4294967284, %v463_v43  ;;  %v591_v58 = vsel %vm553_vm6, %v7520_v44, %v572_v53  ;;  %v6014_v53 = vld [vmem:[%s7487_s26 + $0x28] sm:$0xff]  }
  0x4d   : > { %v11062_v48 = vsel %vm7531_vm5, 4294967295, %v11061_v48  ;;  %v592_v59 = vsel %vm554_vm7, %v7522_v45, %v573_v54  ;;  %vm7552_vm10 = vmpackc.low %vm7531_vm5, %vm7525_vm4  ;;  %vm555_vm11 = vcmp.ge.f32.partialorder %v7529_v47, 0.0  ;;  %v574_v61 = vmul.f32 0.1, %v7529_v47  ;;  %v7222_v54 = vld [vmem:[%s10842_s1] sm:$0xff]  }
  0x4e   : > { %v11065_v60 = vsel %vm7552_vm10, 4294967295, %v11064_v60  ;;  %v7560_v62 = vsel %vm7525_vm4, %v591_v58, 0.0  ;;  %v7564_v63 = vsel %vm7531_vm5, %v592_v59, 0.0  ;;  %v5400_v0 = vpack.c.bf16 %v592_v59, %v591_v58  ;;  %vm7584_vm1 = vmand %vm498_vm8, %vm517_vm9 }
  0x4f   : > { %v575_v1 = vmul.f32 0.1, %v7535_v49  ;;  %6349 = vmatpush3.bf16.msra.mxu0 %v7217_v38  ;;  %vm499_vm12 = vcmp.ge.s32.totalorder %v5359_v50, 0  ;;  %vm518_vm13 = vcmp.lt.s32.totalorder %v5359_v50, 256  ;;  %vm556_vm14 = vcmp.ge.f32.partialorder %v7535_v49, 0.0 }
  0x50   : > { %v465_v3 = vadd.s32 %v7491_v22, %v445_v51  ;;  %6350 = vmatprep.subr.bf16.mxu0 %v7218_v55  ;;  %6358 = vmatprep.mubr.msk.bf16.mxu0 %vm7552_vm10, %v5400_v0  ;;  %v7575_v5 = vunpack.c.l.bf16 %v6011_v2  ;;  %v7577_v6 = vunpack.c.h.bf16 %v6011_v2  ;;  %vm500_vm15 = vcmp.ge.s32.totalorder %v5360_v56, 0  ;;  %vm7600_vm3 = vmand %vm499_vm12, %vm518_vm13 }
  0x51   : > { %vm501_vm0 = vcmp.ge.s32.totalorder %v5361_v57, 0  ;;  %v11069_v10 = vsel %vm7584_vm1, 4294967295, %v11068_v10  ;;  %v7591_v11 = vsel %vm555_vm11, %v7529_v47, %v574_v61  ;;  %vm519_vm2 = vcmp.lt.s32.totalorder %v5360_v56, 256 }
  0x52   : > { %11066 = vst [vmem:[#allocation11_spill] sm:$0xff] %v7575_v5  ;;  %11067 = vst [vmem:[#allocation12_spill] sm:$0xff] %v7577_v6  ;;  %v11072_v15 = vsel %vm7600_vm3, 4294967295, %v11071_v15  ;;  %v7607_v16 = vsel %vm556_vm14, %v7535_v49, %v575_v1  ;;  %v7612_v17 = vsel %vm7584_vm1, %v7591_v11, 0.0  ;;  %v576_v19 = vmul.f32 0.1, %v7575_v5 }
  0x53   : > { %11070 = vst [vmem:[#allocation13_spill] sm:$0xff] %v11069_v10  ;;  %11073 = vst [vmem:[#allocation14_spill] sm:$0xff] %v11072_v15  ;;  %6351 = vmatpush3.bf16.msra.mxu0 %v7218_v55  ;;  %v7617_v18 = vsel %vm7600_vm3, %v7607_v16, 0.0  ;;  %v577_v20 = vmul.f32 0.1, %v7577_v6  ;;  %v7621_v23 = vunpack.c.l.bf16 %v6012_v7  ;;  %vm557_vm6 = vcmp.ge.f32.partialorder %v7575_v5, 0.0 }
  0x54   : > { %6352 = vmatprep.subr.bf16.mxu0 %v7219_v4  ;;  %vm558_vm7 = vcmp.ge.f32.partialorder %v7577_v6, 0.0  ;;  %vm520_vm8 = vcmp.lt.s32.totalorder %v5361_v57, 256  ;;  %v7627_v26 = vunpack.c.h.bf16 %v6012_v7  ;;  %v5362_v27 = vadd.s32 4294967284, %v464_v52  ;;  %vm7635_vm9 = vmand %vm500_vm15, %vm519_vm2 }
  0x55   : > { %11074 = vst [vmem:[#allocation15_spill] sm:$0xff] %v7621_v23  ;;  %v5363_v30 = vadd.s32 4294967284, %v465_v3  ;;  %v7631_v31 = vunpack.c.l.bf16 %v6013_v24  ;;  %v11077_v32 = vmov 0  ;;  %v7640_v33 = vsel %vm557_vm6, %v7575_v5, %v576_v19  ;;  %vm7653_vm12 = vmand %vm501_vm0, %vm520_vm8 }
  0x56   : > { %11075 = vst [vmem:[#allocation16_spill] sm:$0xff] %v7627_v26  ;;  %v11078_v32 = vsel %vm7635_vm9, 4294967295, %v11077_v32  ;;  %v7643_v34 = vsel %vm558_vm7, %v7577_v6, %v577_v20  ;;  %vm559_vm11 = vcmp.ge.f32.partialorder %v7621_v23, 0.0  ;;  %v7646_v35 = vunpack.c.h.bf16 %v6013_v24 }
  0x57   : > { %11076 = vst [vmem:[#allocation17_spill] sm:$0xff] %v7631_v31  ;;  %6353 = vmatpush3.bf16.msra.mxu0 %v7219_v4  ;;  %11079 = vst [vmem:[#allocation18_spill] sm:$0xff] %v11078_v32  ;;  %v11081_v37 = vmov 0  ;;  %v7660_v38 = vsel %vm7635_vm9, %v7640_v33, 0.0  ;;  %v578_v39 = vmul.f32 0.1, %v7621_v23  ;;  %v5403_v55 = vpack.c.bf16 %v7607_v16, %v7591_v11 }
  0x58   : > { %11080 = vst [vmem:[#allocation19_spill] sm:$0xff] %v7646_v35  ;;  %6354 = vmatprep.subr.bf16.mxu0 %v7220_v12  ;;  %v11082_v37 = vsel %vm7653_vm12, 4294967295, %v11081_v37  ;;  %v446_v40 = vadd.s32 64, %v7489_v21  ;;  %v447_v41 = vadd.s32 72, %v7489_v21  ;;  %v7668_v42 = vsel %vm7653_vm12, %v7643_v34, 0.0  ;;  %v6015_v16 = vld [vmem:[%s7487_s26 + $0x30] sm:$0xff]  }
  0x59   : > { %11083 = vst [vmem:[#allocation20_spill] sm:$0xff] %v11082_v37  ;;  %vm502_vm13 = vcmp.ge.s32.totalorder %v5362_v27, 0  ;;  %vm560_vm14 = vcmp.ge.f32.partialorder %v7627_v26, 0.0  ;;  %vm521_vm15 = vcmp.lt.s32.totalorder %v5362_v27, 256  ;;  %v579_v50 = vmul.f32 0.1, %v7627_v26 }
  0x5a   : > { %v466_v51 = vadd.s32 %v7491_v22, %v446_v40  ;;  %v467_v52 = vadd.s32 %v7491_v22, %v447_v41  ;;  %vm503_vm0 = vcmp.ge.s32.totalorder %v5363_v30, 0  ;;  %vm522_vm2 = vcmp.lt.s32.totalorder %v5363_v30, 256  ;;  %vm7690_vm8 = vmand %vm502_vm13, %vm521_vm15  ;;  %v7223_v30 = vld [vmem:[%s10842_s1 + $0x8] sm:$0xff]   ;;  %v7224_v41 = vld [vmem:[%s10842_s1 + $0x10] sm:$0xff]  }
  0x5b   : > { %6355 = vmatpush3.bf16.msra.mxu0 %v7220_v12  ;;  %v7686_v56 = vsel %vm559_vm11, %v7621_v23, %v578_v39  ;;  %v11084_v59 = vmov 0  ;;  %v7694_v61 = vunpack.c.l.bf16 %v6014_v53  ;;  %v7696_v0 = vunpack.c.h.bf16 %v6014_v53  ;;  %vm7700_vm7 = vmand %vm503_vm0, %vm522_vm2  ;;  %v6016_v53 = vld [vmem:[%s7487_s26 + $0x38] sm:$0xff]  }
  0x5c   : > { %6356 = vmatprep.subr.bf16.mxu0 %v7221_v36  ;;  %v5364_v57 = vadd.s32 4294967284, %v466_v51  ;;  %v5365_v58 = vadd.s32 4294967284, %v467_v52  ;;  %v11085_v59 = vsel %vm7690_vm8, 4294967295, %v11084_v59  ;;  %v448_v1 = vadd.s32 80, %v7489_v21  ;;  %vm7721_vm11 = vmpackc.low %vm7600_vm3, %vm7584_vm1 }
  0x5d   : > { %11086 = vst [vmem:[#allocation21_spill] sm:$0xff] %v11085_v59  ;;  %11087 = vst [vmem:[#allocation22_spill] sm:$0xff] %v7694_v61  ;;  %v449_v2 = vadd.s32 88, %v7489_v21  ;;  %v11089_v3 = vmov 0  ;;  %v7707_v4 = vsel %vm560_vm14, %v7627_v26, %v579_v50  ;;  %v7712_v7 = vsel %vm7690_vm8, %v7686_v56, 0.0 }
  0x5e   : > { %11088 = vst [vmem:[#allocation23_spill] sm:$0xff] %v7696_v0  ;;  %v11090_v3 = vsel %vm7700_vm7, 4294967295, %v11089_v3  ;;  %v580_v11 = vmul.f32 0.1, %v7631_v31  ;;  %v581_v12 = vmul.f32 0.1, %v7646_v35  ;;  %v5406_v20 = vpack.c.bf16 %v7643_v34, %v7640_v33  ;;  %vm7740_vm14 = vmpackc.low %vm7653_vm12, %vm7635_vm9 }
  0x5f   : > { %11091 = vst [vmem:[#allocation24_spill] sm:$0xff] %v11090_v3  ;;  %6357 = vmatpush3.bf16.msra.mxu0 %v7221_v36  ;;  %v11092_v19 = vmov 0  ;;  %v7730_v24 = vsel %vm7700_vm7, %v7707_v4, 0.0  ;;  %v468_v27 = vadd.s32 %v7491_v22, %v448_v1  ;;  %v11094_v33 = vmov 0 }
  0x60   : > { %v11093_v19 = vsel %vm7721_vm11, 4294967295, %v11092_v19  ;;  %6378 = vmatprep.subr.bf16.mxu0 %v7222_v54  ;;  %v11095_v33 = vsel %vm7740_vm14, 4294967295, %v11094_v33  ;;  %vm523_vm0 = vcmp.lt.s32.totalorder %v5364_v57, 256  ;;  %v469_v34 = vadd.s32 %v7491_v22, %v449_v2 }
  0x61   : > { %v5366_v36 = vadd.s32 4294967284, %v468_v27  ;;  %v7747_v39 = vunpack.c.l.bf16 %v6015_v16  ;;  %v5409_v40 = vpack.c.bf16 %v7707_v4, %v7686_v56  ;;  %v7756_v50 = vunpack.c.h.bf16 %v6015_v16 }
  0x62   : > { %6359 = vmatmul.mubr.msk.bf16.vlgmr.msra.gmra.mrb[0].mxu0 %vm7721_vm11, %v5403_v55  ;;  %v450_v51 = vadd.s32 96, %v7489_v21  ;;  %v451_v52 = vadd.s32 104, %v7489_v21  ;;  %vm11098_vm13 = vcmp.ge.s32.totalorder %v5364_v57, 0  ;;  %v11099_v55 = vmov 0 }
  0x63   : > { %11096 = vst [vmem:[#allocation25_spill] sm:$0xff] %v7747_v39  ;;  %11097 = vst [vmem:[#allocation26_spill] sm:$0xff] %v7756_v50  ;;  %6379 = vmatpush3.bf16.msra.mxu0 %v7222_v54  ;;  %6362 = vmatprep.mubr.msk.bf16.mxu0 %vm7740_vm14, %v5406_v20  ;;  %vm11102_vm15 = vcmp.ge.f32.partialorder %v7631_v31, 0.0  ;;  %vm11103_vm2 = vcmp.ge.f32.partialorder %v7646_v35, 0.0  ;;  %v582_v54 = vmul.f32 0.1, %v7694_v61  ;;  %v7828_v43 = vunpack.c.h.bf16 %v6016_v53 }
  0x64   : > { %vm7765_vm6 = vmand %vm11098_vm13, %vm523_vm0  ;;  %v599_v56 = vsel %vm11102_vm15, %v7631_v31, %v580_v11  ;;  %v7775_v1 = vsel %vm11103_vm2, %v7646_v35, %v581_v12  ;;  %v583_v2 = vmul.f32 0.1, %v7696_v0  ;;  %6380 = vmatprep.subr.bf16.mxu0 %v7223_v30  ;;  %v5367_v4 = vadd.s32 4294967284, %v469_v34  ;;  %v7225_v34 = vld [vmem:[%s10842_s1 + $0x18] sm:$0xff]  }
  0x65   : > { %v11100_v55 = vsel %vm7765_vm6, 4294967295, %v11099_v55  ;;  %v7781_v57 = vsel %vm7765_vm6, %v599_v56, 0.0  ;;  %v470_v16 = vadd.s32 %v7491_v22, %v450_v51  ;;  %v471_v20 = vadd.s32 %v7491_v22, %v451_v52  ;;  %11116 = vst [vmem:[#allocation30_spill] sm:$0xff] %v7828_v43 }
  0x66   : > { %11101 = vst [vmem:[#allocation27_spill] sm:$0xff] %v11100_v55  ;;  %vm11104_vm13 = vcmp.lt.s32.totalorder %v5365_v58, 256  ;;  %vm11105_vm15 = vcmp.ge.s32.totalorder %v5365_v58, 0  ;;  %v11106_v11 = vmov 0  ;;  %v584_v12 = vmul.f32 0.1, %v7747_v39 }
  0x67   : > { %vm7787_vm0 = vmand %vm11105_vm15, %vm11104_vm13  ;;  %v5412_v27 = vpack.c.bf16 %v7775_v1, %v599_v56  ;;  %v5368_v51 = vadd.s32 4294967284, %v470_v16  ;;  %v5369_v52 = vadd.s32 4294967284, %v471_v20  ;;  %v585_v58 = vmul.f32 0.1, %v7756_v50  ;;  %6381 = vmatpush3.bf16.msra.mxu0 %v7223_v30 }
  0x68   : > { %v11107_v11 = vsel %vm7787_vm0, 4294967295, %v11106_v11  ;;  %vm7802_vm13 = vmpackc.low %vm7700_vm7, %vm7690_vm8  ;;  %v11109_v29 = vmov 0  ;;  %vm11111_vm15 = vcmp.ge.f32.partialorder %v7694_v61, 0.0  ;;  %v7812_v16 = vunpack.c.l.bf16 %v6016_v53  ;;  %6382 = vmatprep.subr.bf16.mxu0 %v7224_v41 }
  0x69   : > { %11108 = vst [vmem:[#allocation28_spill] sm:$0xff] %v11107_v11  ;;  %v11110_v29 = vsel %vm7802_vm13, 4294967295, %v11109_v29  ;;  %v7809_v56 = vsel %vm11111_vm15, %v7694_v61, %v582_v54  ;;  %v452_v20 = vadd.s32 112, %v7489_v21  ;;  %vm7819_vm2 = vmpackc.low %vm7787_vm0, %vm7765_vm6  ;;  %v11113_v30 = vmov 0 }
  0x6a   : > { %11112 = vst [vmem:[#allocation29_spill] sm:$0xff] %v7812_v16  ;;  %v11114_v30 = vsel %vm7819_vm2, 4294967295, %v11113_v30  ;;  %vm11115_vm15 = vcmp.ge.f32.partialorder %v7696_v0, 0.0  ;;  %v453_v14 = vadd.s32 120, %v7489_v21  ;;  %6363 = vmatmul.mubr.msk.bf16.gmra.mrb[4].mxu0 %vm7802_vm13, %v5409_v40  ;;  %vm11117_vm14 = vcmp.lt.s32.totalorder %v5366_v36, 256  ;;  %v7226_v40 = vld [vmem:[%s10842_s1 + $0x20] sm:$0xff]  }
  0x6b   : > { %v7826_v54 = vsel %vm11115_vm15, %v7696_v0, %v583_v2  ;;  %v472_v25 = vadd.s32 %v7491_v22, %v452_v20  ;;  %vm11118_vm10 = vcmp.ge.s32.totalorder %v5366_v36, 0  ;;  %v11119_v28 = vmov 0  ;;  %6383 = vmatpush3.bf16.msra.mxu0 %v7224_v41  ;;  %6366 = vmatprep.mubr.msk.bf16.mxu0 %vm7819_vm2, %v5412_v27  ;;  %v417_v41 = vld [vmem:[%s7487_s26 + $0x48] sm:$0xf] }
  0x6c   : > { %vm7837_vm6 = vmand %vm11118_vm10, %vm11117_vm14  ;;  %vm509_vm15 = vcmp.ge.s32.totalorder %v5369_v52, 0  ;;  %vm528_vm7 = vcmp.lt.s32.totalorder %v5369_v52, 256  ;;  %vm11122_vm11 = vcmp.ge.f32.partialorder %v7747_v39, 0.0  ;;  %vm11123_vm12 = vcmp.ge.f32.partialorder %v7756_v50, 0.0  ;;  %6384 = vmatprep.subr.bf16.mxu0 %v7225_v34 }
  0x6d   : > { %v11120_v28 = vsel %vm7837_vm6, 4294967295, %v11119_v28  ;;  %v7844_v53 = vsel %vm11122_vm11, %v7747_v39, %v584_v12  ;;  %v7849_v2 = vsel %vm11123_vm12, %v7756_v50, %v585_v58  ;;  %vm11124_vm10 = vcmp.lt.s32.totalorder %v5367_v4, 256  ;;  %vm7881_vm2 = vmand %vm509_vm15, %vm528_vm7 }
  0x6e   : > { %11121 = vst [vmem:[#allocation31_spill] sm:$0xff] %v11120_v28  ;;  %vm11125_vm14 = vcmp.ge.s32.totalorder %v5367_v4, 0  ;;  %v11126_v36 = vmov 0  ;;  %v473_v12 = vadd.s32 %v7491_v22, %v453_v14  ;;  %v5370_v20 = vadd.s32 4294967284, %v472_v25 }
  0x6f   : > { %vm7855_vm13 = vmand %vm11125_vm14, %vm11124_vm10  ;;  %v586_v58 = vmul.f32 0.1, %v7812_v16  ;;  %v7864_v8 = vunpack.c.l.bf16 %v6017_v13  ;;  %v5415_v4 = vpack.c.bf16 %v7826_v54, %v7809_v56  ;;  %vm11130_vm12 = vcmp.lt.s32.totalorder %v5368_v51, 256  ;;  %6385 = vmatpush3.bf16.msra.mxu0 %v7225_v34  ;;  %v7227_v34 = vld [vmem:[%s10842_s1 + $0x28] sm:$0xff]  }
  0x70   : > { %v11127_v36 = vsel %vm7855_vm13, 4294967295, %v11126_v36  ;;  %vm11131_vm11 = vcmp.ge.s32.totalorder %v5368_v51, 0  ;;  %v11132_v27 = vmov 0  ;;  %v7876_v9 = vunpack.c.h.bf16 %v6017_v13  ;;  %vm7895_vm7 = vmpackc.low %vm7855_vm13, %vm7837_vm6  ;;  %6386 = vmatprep.subr.bf16.mxu0 %v7226_v40 }
  0x71   : > { %11128 = vst [vmem:[#allocation32_spill] sm:$0xff] %v11127_v36  ;;  %11129 = vst [vmem:[#allocation33_spill] sm:$0xff] %v7864_v8  ;;  %v454_v14 = vadd.s32 128, %v7489_v21  ;;  %v11136_v25 = vmov 0  ;;  %v5418_v50 = vpack.c.bf16 %v7849_v2, %v7844_v53  ;;  %v5371_v51 = vadd.s32 4294967284, %v473_v12 }
  0x72   : > { %vm7871_vm10 = vmand %vm11131_vm11, %vm11130_vm12  ;;  %11135 = vst [vmem:[#allocation35_spill] sm:$0xff] %v7876_v9  ;;  %v11137_v25 = vsel %vm7881_vm2, 4294967295, %v11136_v25  ;;  %v587_v39 = vmul.f32 0.1, %v7828_v43  ;;  %v455_v13 = vadd.s32 136, %v7489_v21  ;;  %v11139_v52 = vmov 0  ;;  %6367 = vmatmul.mubr.msk.bf16.gmra.mrb[8].mxu0 %vm7895_vm7, %v5415_v4 }
  0x73   : > { %v11133_v27 = vsel %vm7871_vm10, 4294967295, %v11132_v27  ;;  %11138 = vst [vmem:[#allocation36_spill] sm:$0xff] %v11137_v25  ;;  %v474_v35 = vadd.s32 %v7491_v22, %v454_v14  ;;  %v11140_v52 = vsel %vm7895_vm7, 4294967295, %v11139_v52  ;;  %v588_v12 = vmul.f32 0.1, %v7864_v8  ;;  %vm7906_vm14 = vmpackc.low %vm7881_vm2, %vm7871_vm10  ;;  %6387 = vmatpush3.bf16.msra.mxu0 %v7226_v40 }
  0x74   : > { %11134 = vst [vmem:[#allocation34_spill] sm:$0xff] %v11133_v27  ;;  %11141 = vst [vmem:[#allocation37_spill] sm:$0xff] %v11140_v52  ;;  %v11142_v14 = vmov 0  ;;  %v475_v0 = vadd.s32 %v7491_v22, %v455_v13  ;;  %v589_v61 = vmul.f32 0.1, %v7876_v9  ;;  %v7915_v6 = vunpack.c.l.bf16 %v417_v41  ;;  %6370 = vmatprep.mubr.msk.bf16.mxu0 %vm7906_vm14, %v5418_v50  ;;  %6388 = vmatprep.subr.bf16.mxu0 %v7227_v34 }
  0x75   : > { %v11143_v14 = vsel %vm7906_vm14, 4294967295, %v11142_v14  ;;  %v5372_v31 = vadd.s32 4294967284, %v474_v35  ;;  %v456_v26 = vadd.s32 144, %v7489_v21  ;;  %vm11146_vm12 = vcmp.lt.s32.totalorder %v5370_v20, 256 }
  0x76   : > { %11144 = vst [vmem:[#allocation38_spill] sm:$0xff] %v11143_v14  ;;  %11145 = vst [vmem:[#allocation39_spill] sm:$0xff] %v7915_v6  ;;  %vm11147_vm15 = vcmp.ge.s32.totalorder %v5370_v20, 0  ;;  %v11148_v5 = vmov 0  ;;  %vm11151_vm8 = vcmp.ge.f32.partialorder %v7812_v16, 0.0  ;;  %v5373_v13 = vadd.s32 4294967284, %v475_v0 }
  0x77   : > { %vm7923_vm9 = vmand %vm11147_vm15, %vm11146_vm12  ;;  %v605_v35 = vsel %vm11151_vm8, %v7812_v16, %v586_v58  ;;  %vm512_vm5 = vcmp.ge.s32.totalorder %v5372_v31, 0  ;;  %vm531_vm3 = vcmp.lt.s32.totalorder %v5372_v31, 256  ;;  %v7933_v41 = vsel %vm7787_vm0, %v7775_v1, 0.0  ;;  %v7228_v31 = vld [vmem:[%s10842_s1 + $0x30] sm:$0xff]   ;;  %6389 = vmatpush3.bf16.msra.mxu0 %v7227_v34 }
  0x78   : > { %v11149_v5 = vsel %vm7923_vm9, 4294967295, %v11148_v5  ;;  %vm11152_vm12 = vcmp.lt.s32.totalorder %v5371_v51, 256  ;;  %vm11153_vm15 = vcmp.ge.s32.totalorder %v5371_v51, 0  ;;  %v11154_v20 = vmov 0  ;;  %6390 = vmatprep.subr.bf16.mxu0 %v7228_v31 }
  0x79   : > { %11150 = vst [vmem:[#allocation40_spill] sm:$0xff] %v11149_v5  ;;  %vm7939_vm11 = vmand %vm11153_vm15, %vm11152_vm12  ;;  %vm11157_vm8 = vcmp.ge.f32.partialorder %v7828_v43, 0.0  ;;  %vm11158_vm7 = vcmp.ge.f32.partialorder %v7864_v8, 0.0  ;;  %v476_v50 = vadd.s32 %v7491_v22, %v456_v26  ;;  %vm513_vm14 = vcmp.ge.s32.totalorder %v5373_v13, 0 }
  0x7a   : > { %v11155_v20 = vsel %vm7939_vm11, 4294967295, %v11154_v20  ;;  %v606_v0 = vsel %vm11157_vm8, %v7828_v43, %v587_v39  ;;  %v607_v1 = vsel %vm11158_vm7, %v7864_v8, %v588_v12  ;;  %vm532_vm12 = vcmp.lt.s32.totalorder %v5373_v13, 256  ;;  %vm7953_vm15 = vmand %vm512_vm5, %vm531_vm3 }
  0x7b   : > { %11156 = vst [vmem:[#allocation41_spill] sm:$0xff] %v11155_v20  ;;  %v11159_v40 = vmov 0  ;;  %vm11162_vm8 = vcmp.ge.f32.partialorder %v7876_v9, 0.0  ;;  %v590_v58 = vmul.f32 0.1, %v7915_v6  ;;  %vm7961_vm0 = vmand %vm513_vm14, %vm532_vm12  ;;  %v11163_v4 = vmov 0  ;;  %6391 = vmatpush3.bf16.msra.mxu0 %v7228_v31 }
  0x7c   : > { %v11160_v40 = vsel %vm7953_vm15, 4294967295, %v11159_v40  ;;  %v608_v39 = vsel %vm11162_vm8, %v7876_v9, %v589_v61  ;;  %v11164_v4 = vsel %vm7961_vm0, 4294967295, %v11163_v4  ;;  %v5374_v51 = vadd.s32 4294967284, %v476_v50  ;;  %vm7980_vm5 = vmpackc.low %vm7939_vm11, %vm7923_vm9  ;;  %v7230_v31 = vld [vmem:[%s10842_s1 + $0x80] sm:$0xff]  }
  0x7d   : > { %11161 = vst [vmem:[#allocation42_spill] sm:$0xff] %v11160_v40  ;;  %11165 = vst [vmem:[#allocation43_spill] sm:$0xff] %v11164_v4  ;;  %vm571_vm7 = vcmp.ge.f32.partialorder %v7915_v6, 0.0  ;;  %v7969_v22 = vsel %vm7837_vm6, %v7809_v56, 0.0  ;;  %v7974_v26 = vsel %vm7855_vm13, %v7826_v54, 0.0  ;;  %v11166_v61 = vmov 0 }
  0x7e   : > { %v11167_v61 = vsel %vm7980_vm5, 4294967295, %v11166_v61  ;;  %v5421_v12 = vpack.c.bf16 %v606_v0, %v605_v35  ;;  %v7987_v13 = vsel %vm7871_vm10, %v7844_v53, 0.0  ;;  %vm7993_vm3 = vmpackc.low %vm7961_vm0, %vm7953_vm15  ;;  %v11169_v56 = vmov 0 }
  0x7f   : > { %11168 = vst [vmem:[#allocation44_spill] sm:$0xff] %v11167_v61  ;;  %v11170_v56 = vsel %vm7993_vm3, 4294967295, %v11169_v56  ;;  %v5424_v54 = vpack.c.bf16 %v608_v39, %v607_v1  ;;  %vm514_vm14 = vcmp.ge.s32.totalorder %v5374_v51, 0  ;;  %vm533_vm12 = vcmp.lt.s32.totalorder %v5374_v51, 256 }
  0x80   : > { %11171 = vst [vmem:[#allocation45_spill] sm:$0xff] %v11170_v56  ;;  %v8000_v50 = vsel %vm7881_vm2, %v7849_v2, 0.0  ;;  %v8004_v53 = vsel %vm7923_vm9, %v605_v35, 0.0  ;;  %v8008_v34 = vsel %vm7939_vm11, %v606_v0, 0.0  ;;  %vm8010_vm8 = vmand %vm514_vm14, %vm533_vm12  ;;  %v11172_v9 = vmov 0  ;;  %v7229_v2 = vld [vmem:[%s10842_s1 + $0x38] sm:$0xff]   ;;  %6371 = vmatmul.mubr.msk.bf16.gmra.mrb[12].mxu0 %vm7980_vm5, %v5421_v12 }
  0x81   : > { %v11173_v9 = vsel %vm8010_vm8, 4294967295, %v11172_v9  ;;  %v609_v51 = vsel %vm571_vm7, %v7915_v6, %v590_v58  ;;  %v8022_v35 = vsel %vm7953_vm15, %v607_v1, 0.0  ;;  %v671_v43 = vrot.slane %v7660_v38, 7  ;;  %6374 = vmatprep.mubr.msk.bf16.mxu0 %vm7993_vm3, %v5424_v54  ;;  %6392 = vmatprep.subr.bf16.mxu0 %v7229_v2  ;;  %vm8062_vm12 = vmpackc.low %vm8010_vm8, %vm8010_vm8 }
  0x82   : > { %11174 = vst [vmem:[#allocation46_spill] sm:$0xff] %v11173_v9  ;;  %v8026_v0 = vsel %vm8010_vm8, %v609_v51, 0.0  ;;  %v8034_v58 = vsel %vm7961_vm0, %v608_v39, 0.0  ;;  %v11175_v1 = vrot.slane %v7564_v63, 7  ;;  %v11176_v6 = vrot.slane %v7560_v62, 7  ;;  %6393 = vmatpush3.bf16.msra.mxu0 %v7229_v2 }
  0x83   : > { %vm11177_vm7 = vcmp.lt.s32.totalorder %v7489_v21, 1  ;;  %v672_v12 = vrot.slane %v7668_v42, 7  ;;  %v11179_v23 = vrot.slane %v8026_v0, 7  ;;  %v673_v54 = vrot.slane %v7712_v7, 7  ;;  %6414 = vmatprep.subr.bf16.mxu0 %v7230_v31 }
  0x84   : > { %v704_v16 = vsel %vm11177_vm7, %v11176_v6, %v11175_v1  ;;  %v11178_v8 = vmov %v11176_v6  ;;  %vm11180_vm14 = vmmov %vm11177_vm7  ;;  %v674_v45 = vrot.slane %v7730_v24, 7  ;;  %v675_v6 = vrot.slane %v7781_v57, 7 }
  0x85   : > { %v705_v39 = vsel %vm11180_vm14, %v11179_v23, %v11178_v8  ;;  %v676_v1 = vrot.slane %v7933_v41, 7  ;;  %v677_v49 = vrot.slane %v7969_v22, 7  ;;  %v5427_v44 = vpack.c.bf16 %v609_v51, %v609_v51  ;;  %vm11188_vm14 = vmmov %vm11177_vm7 }
  0x86   : > { %v11181_v8 = vmov 0  ;;  %v706_v23 = vpack.c.bf16 %v704_v16, %v705_v39  ;;  %v678_v47 = vrot.slane %v7974_v26, 7  ;;  %v679_v56 = vrot.slane %v7987_v13, 7  ;;  %vm11189_vm3 = vmmov %vm11177_vm7 }
  0x87   : > { %v11182_v8 = vsel %vm8062_vm12, 4294967295, %v11181_v8  ;;  %v11184_v2 = vrot.slane %v7617_v18, 7  ;;  %v11185_v16 = vrot.slane %v7612_v17, 7  ;;  %v11187_v4 = vrot.slane %v7564_v63, 7 }
  0x88   : > { %11183 = vst [vmem:[#allocation47_spill] sm:$0xff] %v11182_v8  ;;  %6375 = vmatmul.mubr.msk.bf16.gmra.mrb[16].mxu0 %vm8062_vm12, %v5427_v44  ;;  %v700_v40 = vsel %vm11189_vm3, %v671_v43, %v672_v12  ;;  %vm11191_vm12 = vmmov %vm11189_vm3  ;;  %v684_v51 = vrot.slane %v8034_v58, 7  ;;  %v736_v52 = vrot.slane %v7969_v22, 1  ;;  %v738_v8 = vrot.slane %v7987_v13, 1 }
  0x89   : > { %6394 = vmatprep.mubr.bf16.mxu0 %v706_v23  ;;  %v702_v39 = vsel %vm11177_vm7, %v11185_v16, %v11184_v2  ;;  %v11186_v9 = vmov %v11185_v16  ;;  %v11190_v44 = vmov %v11184_v2  ;;  %v739_v16 = vrot.slane %v8000_v50, 1  ;;  %vm11193_vm7 = vmmov %vm11189_vm3 }
  0x8a   : > { %v703_v61 = vsel %vm11188_vm14, %v11187_v4, %v11186_v9  ;;  %v701_v23 = vsel %vm11191_vm12, %v11190_v44, %v671_v43  ;;  %v7231_v43 = vld [vmem:[%s10842_s1 + $0x88] sm:$0xff]   ;;  %v740_v14 = vrot.slane %v8004_v53, 1  ;;  %v744_v44 = vrot.slane %v8026_v0, 1  ;;  %vm11192_vm12 = vmmov %vm11189_vm3 }
  0x8b   : > { %v707_v25 = vpack.c.bf16 %v702_v39, %v703_v61  ;;  %v708_v2 = vpack.c.bf16 %v700_v40, %v701_v23  ;;  %v7232_v61 = vld [vmem:[%s10842_s1 + $0x90] sm:$0xff]   ;;  %v698_v40 = vsel %vm11189_vm3, %v673_v54, %v674_v45  ;;  %v699_v23 = vsel %vm11192_vm12, %v672_v12, %v673_v54  ;;  %vm11194_vm14 = vmmov %vm11189_vm3  ;;  %v7233_v39 = vld [vmem:[%s10842_s1 + $0x98] sm:$0xff]  }
  0x8c   : > { %v697_v9 = vsel %vm11194_vm14, %v674_v45, %v675_v6  ;;  %v709_v4 = vpack.c.bf16 %v698_v40, %v699_v23  ;;  %v7234_v12 = vld [vmem:[%s10842_s1 + $0xa0] sm:$0xff]   ;;  %v694_v54 = vsel %vm11189_vm3, %v677_v49, %v678_v47  ;;  %vm11195_vm12 = vmmov %vm11189_vm3  ;;  %v11232_v22 = vrot.slane %v8008_v34, 1 }
  0x8d   : > { %v695_v45 = vsel %vm11195_vm12, %v676_v1, %v677_v49  ;;  %vm11198_vm14 = vmmov %vm11189_vm3  ;;  %v7236_v49 = vld [vmem:[%s10842_s1 + $0xb0] sm:$0xff]   ;;  %vm11244_vm5 = vnez %v11078_v32 }
  0x90   : > { %6395 = vmatmul.mubr.bf16.vlgmr.msra.gmra.mrb[0].mxu0 %v707_v25  ;;  %v696_v25 = vsel %vm11193_vm7, %v675_v6, %v676_v1  ;;  %v11196_v6 = vrot.slane %v8000_v50, 7  ;;  %vm11197_vm7 = vmmov %vm11189_vm3  ;;  %vm10918_vm3 = vcmp.lt.s32.totalorder %v7489_v21, 7  ;;  %v11199_v1 = vrot.slane %v8008_v34, 7 }
  0x91   : > { %6415 = vmatpush3.bf16.msra.mxu0 %v7230_v31  ;;  %6398 = vmatprep.mubr.bf16.mxu0 %v708_v2  ;;  %v710_v31 = vpack.c.bf16 %v696_v25, %v697_v9  ;;  %v693_v9 = vsel %vm11198_vm14, %v678_v47, %v679_v56  ;;  %v11200_v47 = vrot.slane %v8004_v53, 7  ;;  %vm11201_vm12 = vmmov %vm11197_vm7  ;;  %v11204_v25 = vrot.slane %v8022_v35, 7 }
  0x92   : > { %6416 = vmatprep.subr.bf16.mxu0 %v7231_v43  ;;  %v692_v2 = vsel %vm11197_vm7, %v679_v56, %v11196_v6  ;;  %v11203_v40 = vmov %v11196_v6  ;;  %vm11205_vm14 = vmmov %vm11197_vm7  ;;  %v11234_v50 = vrot.slane %v8034_v58, 1  ;;  %v7239_v58 = vld [vmem:[%s10844_s3 + $0x48] sm:$0xff]  }
  0x93   : > { %v690_v56 = vsel %vm11201_vm12, %v11200_v47, %v11199_v1  ;;  %vm11208_vm12 = vmmov %vm11197_vm7 }
  0x95   : > { %6417 = vmatpush3.bf16.msra.mxu0 %v7231_v43  ;;  %v7235_v43 = vld [vmem:[%s10842_s1 + $0xa8] sm:$0xff]  }
  0x96   : > { %6418 = vmatprep.subr.bf16.mxu0 %v7232_v61 }
  0x98   : > { %6399 = vmatmul.mubr.bf16.gmra.mrb[4].mxu0 %v709_v4  ;;  %v711_v4 = vpack.c.bf16 %v694_v54, %v695_v45  ;;  %v11207_v54 = vmov %v11199_v1  ;;  %v11210_v1 = vrot.slane %v7612_v17, 1  ;;  %v11222_v17 = vrot.slane %v7781_v57, 1 }
  0x99   : > { %6419 = vmatpush3.bf16.msra.mxu0 %v7232_v61  ;;  %6402 = vmatprep.mubr.bf16.mxu0 %v710_v31  ;;  %v712_v61 = vpack.c.bf16 %v692_v2, %v693_v9  ;;  %v688_v31 = vsel %vm11205_vm14, %v11204_v25, %v684_v51  ;;  %v7237_v2 = vld [vmem:[%s10842_s1 + $0xb8] sm:$0xff]  }
  0x9a   : > { %6420 = vmatprep.subr.bf16.mxu0 %v7233_v39 }
  0x9d   : > { %6421 = vmatpush3.bf16.msra.mxu0 %v7233_v39  ;;  %v11202_v39 = vmov %v11200_v47  ;;  %v11211_v47 = vrot.slane %v7564_v63, 1  ;;  %v11217_v63 = vmov %v11210_v1 }
  0x9e   : > { %6422 = vmatprep.subr.bf16.mxu0 %v7234_v12  ;;  %v691_v23 = vsel %vm11197_vm7, %v11203_v40, %v11202_v39  ;;  %v11213_v39 = vrot.slane %v7560_v62, 1 }
  0x9f   : > { %v713_v6 = vpack.c.bf16 %v690_v56, %v691_v23  ;;  %v11212_v56 = vmov %v11211_v47 }
  0xa0   : > { %6403 = vmatmul.mubr.bf16.gmra.mrb[8].mxu0 %v711_v4  ;;  %v11209_v4 = vrot.slane %v8026_v0, 7  ;;  %v7241_v0 = vld [vmem:[%s10844_s3 + $0x58] sm:$0xff]  }
  0xa1   : > { %6423 = vmatpush3.bf16.msra.mxu0 %v7234_v12  ;;  %6406 = vmatprep.mubr.bf16.mxu0 %v712_v61  ;;  %v11206_v12 = vmov %v11204_v25  ;;  %v11215_v25 = vrot.slane %v7617_v18, 1 }
  0xa2   : > { %6424 = vmatprep.subr.bf16.mxu0 %v7235_v43  ;;  %v689_v45 = vsel %vm11208_vm12, %v11207_v54, %v11206_v12  ;;  %v687_v61 = vsel %vm11197_vm7, %v684_v51, %v11209_v4  ;;  %v11214_v51 = vrot.slane %v7660_v38, 1 }
  0xa3   : > { %v714_v9 = vpack.c.bf16 %v688_v31, %v689_v45  ;;  %v715_v40 = vpack.c.bf16 %v687_v61, %v687_v61  ;;  %v11216_v12 = vmov %v11215_v25  ;;  %v11218_v45 = vrot.slane %v7712_v7, 1 }
  0xa4   : > { %v760_v31 = vsel %vm10918_vm3, %v11215_v25, %v11214_v51  ;;  %v761_v54 = vsel %vm10918_vm3, %v11217_v63, %v11216_v12  ;;  %v11221_v4 = vmov %v11214_v51  ;;  %v11229_v7 = vrot.slane %v7974_v26, 1 }
  0xa5   : > { %6425 = vmatpush3.bf16.msra.mxu0 %v7235_v43  ;;  %v762_v43 = vsel %vm10918_vm3, %v11211_v47, %v11210_v1  ;;  %v766_v18 = vpack.c.bf16 %v760_v31, %v761_v54  ;;  %v11223_v47 = vrot.slane %v7730_v24, 1  ;;  %v751_v63 = vsel %vm10918_vm3, %v738_v8, %v739_v16 }
  0xa6   : > { %6426 = vmatprep.subr.bf16.mxu0 %v7236_v49  ;;  %v752_v31 = vsel %vm10918_vm3, %v11229_v7, %v738_v8  ;;  %v11230_v12 = vmov %v11229_v7  ;;  %v746_v8 = vsel %vm10918_vm3, %v11234_v50, %v744_v44  ;;  %v8331_v7 = vld [vmem:[%s10843_s2] ss:$0 sm:$0xff] }
  0xa7   : > { %v753_v57 = vsel %vm10918_vm3, %v736_v52, %v11230_v12 }
  0xa8   : > { %6407 = vmatmul.mubr.bf16.gmra.mrb[12].mxu0 %v713_v6  ;;  %v11219_v6 = vrot.slane %v7668_v42, 1  ;;  %v11225_v42 = vmov %v11218_v45  ;;  %v770_v26 = vpack.c.bf16 %v752_v31, %v753_v57 }
  0xa9   : > { %6410 = vmatprep.mubr.bf16.mxu0 %v714_v9  ;;  %6427 = vmatpush3.bf16.msra.mxu0 %v7236_v49  ;;  %v763_v49 = vsel %vm10918_vm3, %v11213_v39, %v11212_v56  ;;  %v11224_v56 = vmov %v11223_v47  ;;  %v11226_v39 = vrot.slane %v7933_v41, 1  ;;  %v750_v41 = vsel %vm10918_vm3, %v739_v16, %v740_v14 }
  0xaa   : > { %6428 = vmatprep.subr.bf16.mxu0 %v7237_v2  ;;  %v765_v23 = vpack.c.bf16 %v762_v43, %v763_v49  ;;  %v11220_v9 = vmov %v11219_v6  ;;  %v756_v43 = vsel %vm10918_vm3, %v11223_v47, %v11222_v17  ;;  %v757_v38 = vsel %vm10918_vm3, %v11225_v42, %v11224_v56  ;;  %v8319_v47 = vld [vmem:[%s10844_s3] sm:$0xff]  }
  0xab   : > { %v759_v61 = vsel %vm10918_vm3, %v11221_v4, %v11220_v9  ;;  %v754_v49 = vsel %vm10918_vm3, %v11226_v39, %v736_v52  ;;  %v768_v24 = vpack.c.bf16 %v756_v43, %v757_v38  ;;  %v771_v54 = vpack.c.bf16 %v750_v41, %v751_v63 }
  0xac   : > { %v11231_v52 = vrot.slane %v8022_v35, 1  ;;  %v11235_v16 = vmov %v11234_v50  ;;  %v7238_v35 = vld [vmem:[%s10844_s3 + $0x40] sm:$0xff]  }
  0xad   : > { %6429 = vmatpush3.bf16.msra.mxu0 %v7237_v2  ;;  %v758_v2 = vsel %vm10918_vm3, %v11219_v6, %v11218_v45  ;;  %v11233_v6 = vmov %v11232_v22  ;;  %6450 = vmatprep.subr.bf16.mxu1 %v7238_v35 }
  0xae   : > { %v767_v1 = vpack.c.bf16 %v758_v2, %v759_v61  ;;  %v748_v45 = vsel %vm10918_vm3, %v11232_v22, %v11231_v52  ;;  %v749_v13 = vsel %vm10918_vm3, %v740_v14, %v11233_v6  ;;  %v11236_v2 = vmov %v11231_v52  ;;  %6451 = vmatpush3.bf16.msra.mxu1 %v7238_v35 }
  0xaf   : > { %v747_v9 = vsel %vm10918_vm3, %v11236_v2, %v11235_v16  ;;  %v772_v34 = vpack.c.bf16 %v748_v45, %v749_v13  ;;  %v11237_v14 = vrot.slane %v7560_v62, 1  ;;  %6452 = vmatprep.subr.bf16.mxu1 %v7239_v58  ;;  %v7240_v62 = vld [vmem:[%s10844_s3 + $0x50] sm:$0xff]  }
  0xb0   : > { %6411 = vmatmul.mubr.bf16.gmra.mrb[20].mxu0 %v715_v40  ;;  %v11227_v40 = vmov %v11226_v39  ;;  %v773_v4 = vpack.c.bf16 %v746_v8, %v747_v9 }
  0xb1   : > { %6430 = vmatprep.mubr.bf16.mxu0 %v765_v23  ;;  %v11228_v23 = vmov %v11222_v17  ;;  %v764_v53 = vsel %vm10918_vm3, %v744_v44, %v11237_v14  ;;  %v7242_v44 = vld [vmem:[%s10844_s3 + $0x60] sm:$0xff]   ;;  %v7245_v17 = vld [vmem:[%s10844_s3 + $0x78] sm:$0xff]  }
  0xb2   : > { %v755_v51 = vsel %vm10918_vm3, %v11228_v23, %v11227_v40  ;;  %v774_v61 = vpack.c.bf16 %v764_v53, %v764_v53  ;;  %6453 = vmatpush3.bf16.msra.mxu1 %v7239_v58 }
  0xb3   : > { %v769_v25 = vpack.c.bf16 %v754_v49, %v755_v51  ;;  %6454 = vmatprep.subr.bf16.mxu1 %v7240_v62 }
  0xb6   : > { %6455 = vmatpush3.bf16.msra.mxu1 %v7240_v62 }
  0xb7   : > { %6456 = vmatprep.subr.bf16.mxu1 %v7241_v0 }
  0xb8   : > { %6431 = vmatmul.mubr.bf16.vlgmr.msra.gmra.mrb[0].mxu0 %v766_v18  ;;  %v7243_v18 = vld [vmem:[%s10844_s3 + $0x68] sm:$0xff]  }
  0xb9   : > { %6434 = vmatprep.mubr.bf16.mxu0 %v767_v1  ;;  %v7244_v1 = vld [vmem:[%s10844_s3 + $0x70] sm:$0xff]  }
  0xba   : > { %6457 = vmatpush3.bf16.msra.mxu1 %v7241_v0 }
  0xbb   : > { %6458 = vmatprep.subr.bf16.mxu1 %v7242_v44 }
  0xbe   : > { %6459 = vmatpush3.bf16.msra.mxu1 %v7242_v44 }
  0xbf   : > { %6460 = vmatprep.subr.bf16.mxu1 %v7243_v18 }
  0xc0   : > { %6435 = vmatmul.mubr.bf16.gmra.mrb[4].mxu0 %v768_v24 }
  0xc1   : > { %6438 = vmatprep.mubr.bf16.mxu0 %v769_v25 }
  0xc2   : > { %6461 = vmatpush3.bf16.msra.mxu1 %v7243_v18 }
  0xc3   : > { %6462 = vmatprep.subr.bf16.mxu1 %v7244_v1 }
  0xc6   : > { %6463 = vmatpush3.bf16.msra.mxu1 %v7244_v1 }
  0xc7   : > { %6464 = vmatprep.subr.bf16.mxu1 %v7245_v17 }
  0xc8   : > { %6439 = vmatmul.mubr.bf16.gmra.mrb[8].mxu0 %v770_v26 }
  0xc9   : > { %6442 = vmatprep.mubr.bf16.mxu0 %v771_v54 }
  0xca   : > { %6465 = vmatpush3.bf16.msra.mxu1 %v7245_v17 }
  0xcb   : > { %6486 = vmatprep.subr.bf16.mxu1 %v8319_v47 }
  0xd0   : > { %6443 = vmatmul.mubr.bf16.gmra.mrb[12].mxu0 %v772_v34 }
  0xd1   : > { %6446 = vmatprep.mubr.bf16.mxu0 %v773_v4 }
  0xd8   : > { %6447 = vmatmul.mubr.bf16.gmra.mrb[24].mxu0 %v774_v61 }
 0x15b   : > { %v6376_v43 = vpop.f32.mrb[16].mxu0 }
 0x15c   : > { %v954_v56 = vpop.f32.mrb[17].mxu0 }
 0x15d   : > { %v6377_v42 = vpop.f32.mrb[18].mxu0 }
 0x15e   : > { %v957_v38 = vpop.f32.mrb[19].mxu0 }
 0x183   : > { %v6412_v39 = vpop.f32.mrb[20].mxu0 }
 0x184   : > { %v8322_v49 = vadd.f32 %v6412_v39, %v6376_v43  ;;  %v1114_v40 = vpop.f32.mrb[21].mxu0 }
 0x185   : > { %v8324_v23 = vadd.f32 %v1114_v40, %v954_v56  ;;  %v6413_v51 = vpop.f32.mrb[22].mxu0 }
 0x186   : > { %v1117_v24 = vpop.f32.mrb[23].mxu0 }
 0x187   : > { %v8326_v25 = vadd.f32 %v1117_v24, %v957_v38 }
 0x18b   : > { %v6432_v31 = vpop.f32.mrb[0].mxu0 }
 0x18c   : > { %v1333_v12 = vadd.f32 %v6432_v31, %v8331_v7  ;;  %v1227_v57 = vpop.f32.mrb[1].mxu0 }
 0x18d   : > { %v1331_v41 = vadd.f32 %v8331_v7, %v1227_v57  ;;  %v6433_v63 = vpop.f32.mrb[2].mxu0 }
 0x18e   : > { %vm1352_vm14 = vcmp.ge.f32.partialorder %v1333_v12, 0.0  ;;  %v1371_v26 = vmul.f32 0.1, %v1333_v12  ;;  %v1334_v54 = vadd.f32 %v6433_v63, %v8331_v7  ;;  %v1230_v52 = vpop.f32.mrb[3].mxu0 }
 0x18f   : > { %v1369_v22 = vmul.f32 0.1, %v1331_v41  ;;  %v1332_v45 = vadd.f32 %v8331_v7, %v1230_v52  ;;  %vm1350_vm12 = vcmp.ge.f32.partialorder %v1331_v41, 0.0 }
 0x190   : > { %v8337_v6 = vsel %vm1352_vm14, %v1333_v12, %v1371_v26  ;;  %vm1353_vm7 = vcmp.ge.f32.partialorder %v1334_v54, 0.0  ;;  %v1372_v13 = vmul.f32 0.1, %v1334_v54  ;;  %vm11238_vm14 = vnez %v11072_v15 }
 0x191   : > { %v8342_v50 = vsel %vm7584_vm1, %v8337_v6, 0.0  ;;  %v1370_v8 = vmul.f32 0.1, %v1332_v45  ;;  %vm1351_vm3 = vcmp.ge.f32.partialorder %v1332_v45, 0.0  ;;  %v1388_v16 = vsel %vm1350_vm12, %v1331_v41, %v1369_v22 }
 0x192   : > { %v8344_v2 = vsel %vm1353_vm7, %v1334_v54, %v1372_v13  ;;  %v8348_v9 = vsel %vm7525_vm4, %v1388_v16, 0.0  ;;  %v10929_v34 = vrot.slane %v8342_v50, 1  ;;  %vm11239_vm12 = vnez %v11062_v48 }
 0x193   : > { %v1410_v4 = vsel %vm11238_vm14, %v8344_v2, 0.0  ;;  %v5490_v14 = vpack.c.bf16 %v8344_v2, %v8337_v6  ;;  %v6436_v53 = vpop.f32.mrb[4].mxu0  ;;  %v1389_v61 = vsel %vm1351_vm3, %v1332_v45, %v1370_v8  ;;  %v1428_v18 = vrot.slane %v8342_v50, 7 }
 0x194   : > { %v1429_v35 = vrot.slane %v1410_v4, 7  ;;  %v1487_v58 = vrot.slane %v1410_v4, 1  ;;  %v1337_v62 = vadd.f32 %v6436_v53, %v8331_v7  ;;  %v1243_v0 = vpop.f32.mrb[5].mxu0  ;;  %v8359_v44 = vsel %vm11239_vm12, %v1389_v61, 0.0 }
 0x195   : > { %v1335_v1 = vadd.f32 %v8331_v7, %v1243_v0  ;;  %v6437_v17 = vpop.f32.mrb[6].mxu0  ;;  %v10927_v43 = vrot.slane %v8348_v9, 7  ;;  %v1427_v56 = vrot.slane %v8359_v44, 7  ;;  %vm11240_vm3 = vcmp.lt.s32.totalorder %v7489_v21, 7 }
 0x196   : > { %v8369_v42 = vsel %vm11240_vm3, %v10929_v34, %v1487_v58  ;;  %vm1356_vm7 = vcmp.ge.f32.partialorder %v1337_v62, 0.0  ;;  %v1375_v38 = vmul.f32 0.1, %v1337_v62  ;;  %v1338_v39 = vadd.f32 %v6437_v17, %v8331_v7  ;;  %v1246_v40 = vpop.f32.mrb[7].mxu0 }
 0x197   : > { %vm1354_vm1 = vcmp.ge.f32.partialorder %v1335_v1, 0.0  ;;  %v1373_v51 = vmul.f32 0.1, %v1335_v1  ;;  %v1336_v24 = vadd.f32 %v8331_v7, %v1246_v40  ;;  %vm11241_vm14 = vcmp.lt.s32.totalorder %v7489_v21, 1 }
 0x198   : > { %v8375_v31 = vsel %vm11241_vm14, %v1428_v18, %v1429_v35  ;;  %v8377_v12 = vsel %vm1356_vm7, %v1337_v62, %v1375_v38  ;;  %vm1357_vm4 = vcmp.ge.f32.partialorder %v1338_v39, 0.0  ;;  %v1376_v57 = vmul.f32 0.1, %v1338_v39  ;;  %vm11242_vm3 = vmmov %vm11241_vm14 }
 0x199   : > { %v8381_v41 = vsel %vm11242_vm3, %v1427_v56, %v1428_v18  ;;  %vm11243_vm12 = vnez %v11085_v59  ;;  %v1392_v26 = vsel %vm1354_vm1, %v1335_v1, %v1373_v51  ;;  %vm1355_vm0 = vcmp.ge.f32.partialorder %v1336_v24, 0.0  ;;  %vm11249_vm7 = vmmov %vm11242_vm3 }
 0x19a   : > { %v8386_v63 = vsel %vm11243_vm12, %v8377_v12, 0.0  ;;  %v1374_v54 = vmul.f32 0.1, %v1336_v24  ;;  %v8390_v52 = vsel %vm11244_vm5, %v1392_v26, 0.0  ;;  %v8392_v22 = vsel %vm1357_vm4, %v1338_v39, %v1376_v57 }
 0x19b   : > { %v1430_v13 = vrot.slane %v8390_v52, 7  ;;  %v10928_v8 = vrot.slane %v8390_v52, 1  ;;  %vm11245_vm14 = vnez %v11090_v3  ;;  %v6440_v53 = vpop.f32.mrb[8].mxu0  ;;  %v10930_v62 = vrot.slane %v8386_v63, 7  ;;  %v11268_v3 = vld [vmem:[#allocation38_spill] sm:$0xff] }
 0x19c   : > { %v8401_v2 = vsel %vm11245_vm14, %v8392_v22, 0.0  ;;  %v1393_v18 = vsel %vm1355_vm0, %v1336_v24, %v1374_v54  ;;  %v1259_v17 = vpop.f32.mrb[9].mxu0  ;;  %vm11246_vm4 = vcmp.lt.s32.totalorder %v7489_v21, 7  ;;  %vm11247_vm1 = vnez %v11082_v37  ;;  %v11284_v37 = vld [vmem:[#allocation44_spill] sm:$0xff] }
 0x19d   : > { %v8413_v38 = vsel %vm11246_vm4, %v1487_v58, %v10928_v8  ;;  %v8417_v39 = vsel %vm11247_vm1, %v1393_v18, 0.0  ;;  %v5493_v40 = vpack.c.bf16 %v1393_v18, %v1392_v26  ;;  %v5487_v51 = vpack.c.bf16 %v1389_v61, %v1388_v16  ;;  %v6441_v57 = vpop.f32.mrb[10].mxu0  ;;  %v7247_v58 = vld [vmem:[%s10844_s3 + $0x8] sm:$0xff]  }
 0x19e   : > { %v1433_v0 = vrot.slane %v8401_v2, 7  ;;  %v1431_v24 = vrot.slane %v8417_v39, 7  ;;  %v1341_v54 = vadd.f32 %v6440_v53, %v8331_v7  ;;  %v1339_v1 = vadd.f32 %v8331_v7, %v1259_v17  ;;  %v1262_v45 = vpop.f32.mrb[11].mxu0 }
 0x19f   : > { %vm11248_vm0 = vnez %v11065_v60  ;;  %v1342_v26 = vadd.f32 %v6441_v57, %v8331_v7  ;;  %v1340_v16 = vadd.f32 %v8331_v7, %v1262_v45  ;;  %v8434_v61 = vsel %vm11249_vm7, %v10927_v43, %v1427_v56  ;;  %v7250_v43 = vld [vmem:[%s10844_s3 + $0x20] sm:$0xff]  }
 0x1a0   : > { %6466 = vmatprep.mubr.msk.bf16.mxu1 %vm11248_vm0, %v5487_v51  ;;  %v8438_v53 = vsel %vm11242_vm3, %v1429_v35, %v1430_v13  ;;  %vm11250_vm4 = vnez %v11093_v19  ;;  %vm1360_vm12 = vcmp.ge.f32.partialorder %v1341_v54, 0.0  ;;  %v1379_v18 = vmul.f32 0.1, %v1341_v54 }
 0x1a1   : > { %6467 = vmatmul.mubr.msk.bf16.vlgmr.msra.gmra.mrb[0].mxu1 %vm11250_vm4, %v5490_v14  ;;  %vm1358_vm14 = vcmp.ge.f32.partialorder %v1339_v1, 0.0  ;;  %v1377_v17 = vmul.f32 0.1, %v1339_v1  ;;  %vm1361_vm5 = vcmp.ge.f32.partialorder %v1342_v26, 0.0  ;;  %v1380_v45 = vmul.f32 0.1, %v1342_v26  ;;  %vm11252_vm4 = vmmov %vm11242_vm3 }
 0x1a2   : > { %6487 = vmatpush3.bf16.msra.mxu1 %v8319_v47  ;;  %vm1359_vm1 = vcmp.ge.f32.partialorder %v1340_v16, 0.0  ;;  %v1378_v51 = vmul.f32 0.1, %v1340_v16  ;;  %vm11251_vm7 = vnez %v11095_v33  ;;  %v8445_v56 = vsel %vm1360_vm12, %v1341_v54, %v1379_v18  ;;  %v7248_v14 = vld [vmem:[%s10844_s3 + $0x10] sm:$0xff]  }
 0x1a3   : > { %6470 = vmatprep.mubr.msk.bf16.mxu1 %vm11251_vm7, %v5493_v40  ;;  %v1396_v35 = vsel %vm1358_vm14, %v1339_v1, %v1377_v17  ;;  %6488 = vmatprep.subr.bf16.mxu1 %v7247_v58  ;;  %v8452_v57 = vsel %vm11242_vm3, %v1430_v13, %v1431_v24  ;;  %v8458_v47 = vsel %vm11252_vm4, %v10930_v62, %v1433_v0  ;;  %v8463_v40 = vsel %vm7837_vm6, %v8445_v56, 0.0  ;;  %v6444_v13 = vpop.f32.mrb[12].mxu0 }
 0x1a4   : > { %vm11253_vm12 = vnez %v11100_v55  ;;  %v8469_v54 = vsel %vm1361_vm5, %v1342_v26, %v1380_v45  ;;  %v1397_v18 = vsel %vm1359_vm1, %v1340_v16, %v1378_v51  ;;  %v1275_v34 = vpop.f32.mrb[13].mxu0  ;;  %vm11254_vm5 = vnez %v11107_v11  ;;  %vm11258_vm1 = vmmov %vm11242_vm3 }
 0x1a5   : > { %v8467_v1 = vsel %vm11253_vm12, %v1396_v35, 0.0  ;;  %v8478_v62 = vsel %vm7855_vm13, %v8469_v54, 0.0  ;;  %v5502_v26 = vpack.c.bf16 %v8469_v54, %v8445_v56  ;;  %v8484_v16 = vsel %vm11254_vm5, %v1397_v18, 0.0  ;;  %v6445_v51 = vpop.f32.mrb[14].mxu0  ;;  %v7249_v56 = vld [vmem:[%s10844_s3 + $0x18] sm:$0xff]   ;;  %vm11259_vm4 = vmmov %vm11258_vm1 }
 0x1a6   : > { %v1434_v6 = vrot.slane %v8467_v1, 7  ;;  %v5499_v45 = vpack.c.bf16 %v1397_v18, %v1396_v35  ;;  %6489 = vmatpush3.bf16.msra.mxu1 %v7247_v58  ;;  %v1435_v4 = vrot.slane %v8484_v16, 7  ;;  %v1278_v28 = vpop.f32.mrb[15].mxu0  ;;  %v1345_v54 = vadd.f32 %v6444_v13, %v8331_v7  ;;  %vm11260_vm3 = vmmov %vm11258_vm1 }
 0x1a7   : > { %6490 = vmatprep.subr.bf16.mxu1 %v7248_v14  ;;  %v1343_v35 = vadd.f32 %v8331_v7, %v1275_v34  ;;  %v1346_v58 = vadd.f32 %v6445_v51, %v8331_v7  ;;  %v1344_v18 = vadd.f32 %v8331_v7, %v1278_v28  ;;  %v11255_v17 = vpack.c.bf16 %v8392_v22, %v8377_v12 }
 0x1a8   : > { %vm11256_vm14 = vnez %v11110_v29  ;;  %v11257_v13 = vrot.slane %v8386_v63, 7  ;;  %v8515_v28 = vsel %vm11259_vm4, %v1434_v6, %v1435_v4  ;;  %v8519_v12 = vsel %vm11260_vm3, %v1433_v0, %v1434_v6  ;;  %vm11271_vm4 = vmmov %vm11260_vm3 }
 0x1a9   : > { %6471 = vmatmul.mubr.msk.bf16.gmra.mrb[4].mxu1 %vm11256_vm14, %v11255_v17  ;;  %vm1364_vm6 = vcmp.ge.f32.partialorder %v1345_v54, 0.0  ;;  %v1383_v22 = vmul.f32 0.1, %v1345_v54  ;;  %vm1362_vm13 = vcmp.ge.f32.partialorder %v1343_v35, 0.0  ;;  %v1381_v17 = vmul.f32 0.1, %v1343_v35 }
 0x1aa   : > { %v8511_v34 = vsel %vm11258_vm1, %v1431_v24, %v11257_v13  ;;  %6491 = vmatpush3.bf16.msra.mxu1 %v7248_v14  ;;  %vm11261_vm12 = vnez %v11114_v30  ;;  %vm1365_vm5 = vcmp.ge.f32.partialorder %v1346_v58, 0.0  ;;  %v1384_v51 = vmul.f32 0.1, %v1346_v58 }
 0x1ab   : > { %6474 = vmatprep.mubr.msk.bf16.mxu1 %vm11261_vm12, %v5499_v45  ;;  %vm1363_vm1 = vcmp.ge.f32.partialorder %v1344_v18, 0.0  ;;  %v1382_v24 = vmul.f32 0.1, %v1344_v18  ;;  %6492 = vmatprep.subr.bf16.mxu1 %v7249_v56  ;;  %v8523_v13 = vsel %vm1364_vm6, %v1345_v54, %v1383_v22  ;;  %v1400_v8 = vsel %vm1362_vm13, %v1343_v35, %v1381_v17  ;;  %v6448_v36 = vpop.f32.mrb[24].mxu0  ;;  %vm11267_vm13 = vmmov %vm11260_vm3 }
 0x1ac   : > { %v8532_v14 = vsel %vm7923_vm9, %v8523_v13, 0.0  ;;  %v8536_v45 = vsel %vm7871_vm10, %v1400_v8, 0.0  ;;  %v8538_v55 = vsel %vm1365_vm5, %v1346_v58, %v1384_v51  ;;  %v1291_v35 = vpop.f32.mrb[25].mxu0  ;;  %v11266_v11 = vrot.slane %v8463_v40, 7 }
 0x1ad   : > { %v1401_v54 = vsel %vm1363_vm1, %v1344_v18, %v1382_v24  ;;  %v1440_v6 = vrot.slane %v8532_v14, 7  ;;  %v1438_v0 = vrot.slane %v8536_v45, 7  ;;  %v6449_v5 = vpop.f32.mrb[26].mxu0  ;;  %v8547_v27 = vsel %vm7939_vm11, %v8538_v55, 0.0  ;;  %vm11273_vm1 = vmmov %vm11260_vm3 }
 0x1ae   : > { %6493 = vmatpush3.bf16.msra.mxu1 %v7249_v56  ;;  %v5508_v58 = vpack.c.bf16 %v8538_v55, %v8523_v13  ;;  %v8553_v51 = vsel %vm7881_vm2, %v1401_v54, 0.0  ;;  %v5505_v24 = vpack.c.bf16 %v1401_v54, %v1400_v8  ;;  %v1294_v22 = vpop.f32.mrb[27].mxu0  ;;  %v7251_v56 = vld [vmem:[%s10844_s3 + $0x28] sm:$0xff]   ;;  %v1441_v20 = vrot.slane %v8547_v27, 7 }
 0x1af   : > { %6494 = vmatprep.subr.bf16.mxu1 %v7250_v43  ;;  %v1439_v59 = vrot.slane %v8553_v51, 7  ;;  %v11263_v55 = vld [vmem:[#allocation37_spill] sm:$0xff]  ;;  %v1323_v13 = vadd.f32 %v6448_v36, %v8322_v49  ;;  %v1321_v8 = vadd.f32 %v1291_v35, %v8324_v23  ;;  %v1322_v54 = vadd.f32 %v1294_v22, %v8326_v25  ;;  %v7253_v22 = vld [vmem:[%s10844_s3 + $0x38] sm:$0xff]  }
 0x1b0   : > { %vm11264_vm6 = vnez %v11263_v55  ;;  %v11265_v18 = vrot.slane %v8478_v62, 7  ;;  %vm11269_vm5 = vnez %v11268_v3  ;;  %v11270_v36 = vmov %v11266_v11 }
 0x1b1   : > { %6475 = vmatmul.mubr.msk.bf16.gmra.mrb[8].mxu1 %vm11264_vm6, %v5502_v26  ;;  %v8582_v49 = vsel %vm11271_vm4, %v1435_v4, %v11270_v36  ;;  %v8586_v23 = vsel %vm11260_vm3, %v1438_v0, %v1439_v59  ;;  %v1349_v26 = vadd.f32 %v8331_v7, %v1323_v13  ;;  %v1348_v35 = vadd.f32 %v8331_v7, %v1322_v54  ;;  %v7252_v4 = vld [vmem:[%s10844_s3 + $0x30] sm:$0xff]   ;;  %vm11275_vm4 = vmmov %vm11273_vm1 }
 0x1b2   : > { %v8573_v5 = vsel %vm11267_vm13, %v11266_v11, %v11265_v18  ;;  %6478 = vmatprep.mubr.msk.bf16.mxu1 %vm11269_vm5, %v5505_v24  ;;  %6495 = vmatpush3.bf16.msra.mxu1 %v7250_v43  ;;  %v11272_v25 = vmov %v11265_v18  ;;  %v1347_v43 = vadd.f32 %v8331_v7, %v1321_v8  ;;  %vm11274_vm13 = vmmov %vm11273_vm1  ;;  %v8610_v24 = vsel %vm11275_vm4, %v1439_v59, %v1440_v6 }
 0x1b3   : > { %v8592_v11 = vsel %vm11273_vm1, %v11272_v25, %v1438_v0  ;;  %6496 = vmatprep.subr.bf16.mxu1 %v7251_v56  ;;  %v8606_v0 = vsel %vm11274_vm13, %v1440_v6, %v1441_v20  ;;  %v11276_v7 = vrot.slane %v8342_v50, 1  ;;  %v11277_v13 = vrot.slane %v8359_v44, 1 }
 0x1b4   : > { %vm11278_vm3 = vcmp.lt.s32.totalorder %v7489_v21, 7  ;;  %vm1368_vm1 = vcmp.ge.f32.partialorder %v1349_v26, 0.0  ;;  %v1387_v54 = vmul.f32 0.1, %v1349_v26  ;;  %vm1366_vm9 = vcmp.ge.f32.partialorder %v1347_v43, 0.0 }
 0x1b5   : > { %v8618_v8 = vsel %vm11278_vm3, %v11277_v13, %v11276_v7  ;;  %v1385_v36 = vmul.f32 0.1, %v1347_v43  ;;  %vm1367_vm11 = vcmp.ge.f32.partialorder %v1348_v35, 0.0  ;;  %v1386_v25 = vmul.f32 0.1, %v1348_v35  ;;  %vm11281_vm13 = vmmov %vm11278_vm3 }
 0x1b6   : > { %6497 = vmatpush3.bf16.msra.mxu1 %v7251_v56  ;;  %v11279_v59 = vmov %v11277_v13  ;;  %v11280_v50 = vrot.slane %v8348_v9, 1  ;;  %v1406_v7 = vsel %vm1368_vm1, %v1349_v26, %v1387_v54  ;;  %v1497_v44 = vrot.slane %v8553_v51, 1  ;;  %v11286_v56 = vld [vmem:[#allocation43_spill] sm:$0xff] }
 0x1b7   : > { %v1404_v13 = vsel %vm1366_vm9, %v1347_v43, %v1385_v36  ;;  %6498 = vmatprep.subr.bf16.mxu1 %v7252_v4  ;;  %v1425_v32 = vsel %vm8010_vm8, %v1406_v7, 0.0  ;;  %v1405_v43 = vsel %vm1367_vm11, %v1348_v35, %v1386_v25  ;;  %vm11285_vm9 = vnez %v11284_v37  ;;  %vm11292_vm11 = vmmov %vm11278_vm3 }
 0x1b8   : > { %v8628_v6 = vsel %vm11281_vm13, %v11280_v50, %v11279_v59  ;;  %v1423_v26 = vsel %vm7953_vm15, %v1404_v13, 0.0  ;;  %v1444_v54 = vrot.slane %v1425_v32, 7  ;;  %v1502_v36 = vrot.slane %v1425_v32, 1 }
 0x1b9   : > { %v1442_v50 = vrot.slane %v1423_v26, 7  ;;  %v1500_v10 = vrot.slane %v1423_v26, 1  ;;  %6479 = vmatmul.mubr.msk.bf16.gmra.mrb[12].mxu1 %vm11285_vm9, %v5508_v58  ;;  %vm11287_vm4 = vnez %v11286_v56  ;;  %v5511_v18 = vpack.c.bf16 %v1405_v43, %v1404_v13 }
 0x1ba   : > { %v1424_v15 = vsel %vm11287_vm4, %v1405_v43, 0.0  ;;  %6499 = vmatpush3.bf16.msra.mxu1 %v7252_v4  ;;  %v11288_v51 = vrot.slane %v8386_v63, 1  ;;  %v11289_v17 = vrot.slane %v8417_v39, 1  ;;  %v11291_v35 = vrot.slane %v8390_v52, 1  ;;  %v11296_v52 = vld [vmem:[#allocation45_spill] sm:$0xff] }
 0x1bb   : > { %v1443_v25 = vrot.slane %v1424_v15, 7  ;;  %v1501_v26 = vrot.slane %v1424_v15, 1  ;;  %v11293_v4 = vrot.slane %v8348_v9, 7  ;;  %vm11294_vm1 = vcmp.lt.s32.totalorder %v7489_v21, 1  ;;  %6500 = vmatprep.subr.bf16.mxu1 %v7253_v22 }
 0x1bc   : > { %v8652_v59 = vsel %vm11278_vm3, %v11289_v17, %v11288_v51  ;;  %v11290_v32 = vmov %v11289_v17  ;;  %v7254_v17 = vld [vmem:[%s10844_s3 + $0x80] sm:$0xff]   ;;  %vm11295_vm13 = vmmov %vm11294_vm1  ;;  %vm11297_vm3 = vnez %v11296_v52  ;;  %v11298_v51 = vrot.slane %v8467_v1, 1 }
 0x1bd   : > { %v8660_v58 = vsel %vm11292_vm11, %v11291_v35, %v11290_v32  ;;  %v1463_v13 = vsel %vm11294_vm1, %v1444_v54, %v11293_v4  ;;  %v1447_v39 = vsel %vm11295_vm13, %v1441_v20, %v1442_v50  ;;  %6482 = vmatprep.mubr.msk.bf16.mxu1 %vm11297_vm3, %v5511_v18  ;;  %v11299_v32 = vrot.slane %v8401_v2, 1  ;;  %vm11302_vm1 = vmmov %vm11292_vm11 }
 0x1be   : > { %v1464_v43 = vpack.c.bf16 %v8434_v61, %v1463_v13  ;;  %v1524_v15 = vpack.c.bf16 %v8652_v59, %v8660_v58  ;;  %v11301_v56 = vrot.slane %v8386_v63, 1  ;;  %v1446_v61 = vsel %vm11295_vm13, %v1442_v50, %v1443_v25  ;;  %vm11303_vm15 = vmmov %vm11295_vm13  ;;  %6501 = vmatpush3.bf16.msra.mxu1 %v7253_v22 }
 0x1bf   : > { %v1513_v35 = vsel %vm11292_vm11, %v11299_v32, %v11298_v51  ;;  %v11300_v4 = vmov %v11299_v32  ;;  %v1445_v18 = vsel %vm11303_vm15, %v1443_v25, %v1444_v54  ;;  %v11304_v58 = vrot.slane %v8463_v40, 1  ;;  %vm11306_vm11 = vmmov %vm11302_vm1  ;;  %6522 = vmatprep.subr.bf16.mxu1 %v7254_v17 }
 0x1c0   : > { %v1514_v20 = vsel %vm11302_vm1, %v11301_v56, %v11300_v4  ;;  %v11305_v13 = vrot.slane %v8484_v16, 1  ;;  %v5514_v2 = vpack.c.bf16 %v1406_v7, %v1406_v7  ;;  %v1472_v63 = vpack.c.bf16 %v1446_v61, %v1447_v39  ;;  %vm11311_vm15 = vmmov %vm11302_vm1 }
 0x1c1   : > { %v1525_v59 = vpack.c.bf16 %v1513_v35, %v1514_v20  ;;  %v11308_v56 = vrot.slane %v8467_v1, 1  ;;  %v11309_v54 = vrot.slane %v8536_v45, 1  ;;  %v11310_v25 = vrot.slane %v8478_v62, 1  ;;  %vm11314_vm13 = vmmov %vm11302_vm1 }
 0x1c2   : > { %v1511_v51 = vsel %vm11306_vm11, %v11305_v13, %v11304_v58  ;;  %v11307_v32 = vmov %v11305_v13  ;;  %v11313_v22 = vmov %v11304_v58  ;;  %v11315_v1 = vrot.slane %v8532_v14, 1  ;;  %vm11316_vm11 = vmmov %vm11302_vm1 }
 0x1c3   : > { %v1512_v50 = vsel %vm11302_vm1, %v11308_v56, %v11307_v32  ;;  %v1509_v35 = vsel %vm11311_vm15, %v11310_v25, %v11309_v54  ;;  %v11312_v7 = vmov %v11310_v25  ;;  %v11317_v20 = vmov %v11309_v54  ;;  %vm11319_vm15 = vmmov %vm11302_vm1 }
 0x1c4   : > { %v1526_v4 = vpack.c.bf16 %v1511_v51, %v1512_v50  ;;  %v1510_v16 = vsel %vm11314_vm13, %v11313_v22, %v11312_v7  ;;  %v1507_v39 = vsel %vm11316_vm11, %v1497_v44, %v11315_v1  ;;  %v1508_v61 = vsel %vm11302_vm1, %v11317_v20, %v1497_v44  ;;  %vm11322_vm13 = vmmov %vm11302_vm1  ;;  %v11323_v50 = vld [vmem:[#allocation47_spill] sm:$0xff] }
 0x1c5   : > { %v1527_v58 = vpack.c.bf16 %v1509_v35, %v1510_v16  ;;  %v1528_v13 = vpack.c.bf16 %v1507_v39, %v1508_v61  ;;  %v11318_v51 = vrot.slane %v8547_v27, 1  ;;  %v11321_v32 = vmov %v11315_v1  ;;  %vm11325_vm4 = vmmov %vm11302_vm1  ;;  %v7255_v35 = vld [vmem:[%s10844_s3 + $0x88] sm:$0xff]  }
 0x1c6   : > { %vm11324_vm11 = vnez %v11323_v50  ;;  %v1503_v44 = vsel %vm11302_vm1, %v1501_v26, %v1502_v36  ;;  %v1504_v54 = vsel %vm11325_vm4, %v1500_v10, %v1501_v26  ;;  %v11326_v25 = vrot.slane %v8348_v9, 1  ;;  %v7257_v9 = vld [vmem:[%s10844_s3 + $0x98] sm:$0xff]   ;;  %v7268_v26 = vld [vmem:[%s10842_s1 + $0x130] sm:$0xff]  }
 0x1c7   : > { %v1505_v62 = vsel %vm11319_vm15, %v11318_v51, %v1500_v10  ;;  %v11320_v40 = vmov %v11318_v51  ;;  %6483 = vmatmul.mubr.msk.bf16.gmra.mrb[16].mxu1 %vm11324_vm11, %v5514_v2  ;;  %vm11327_vm15 = vmmov %vm11302_vm1  ;;  %v1530_v14 = vpack.c.bf16 %v1503_v44, %v1504_v54  ;;  %v11328_v2 = vpack.c.bf16 %v8375_v31, %v8381_v41  ;;  %v7256_v10 = vld [vmem:[%s10844_s3 + $0x90] sm:$0xff]  }
 0x1c8   : > { %v1506_v56 = vsel %vm11322_vm13, %v11321_v32, %v11320_v40  ;;  %v1521_v27 = vsel %vm11327_vm15, %v1502_v36, %v11326_v25  ;;  %6502 = vmatprep.mubr.bf16.mxu1 %v1464_v43  ;;  %v11329_v7 = vpack.c.bf16 %v8452_v57, %v8438_v53  ;;  %v11330_v31 = vpack.c.bf16 %v8458_v47, %v8511_v34  ;;  %v7258_v53 = vld [vmem:[%s10844_s3 + $0xa0] sm:$0xff]   ;;  %v7259_v57 = vld [vmem:[%s10844_s3 + $0xa8] sm:$0xff]   ;;  %v11339_v25 = vld [vmem:[#allocation7_spill] sm:$0xff] }
 0x1c9   : > { %v1529_v45 = vpack.c.bf16 %v1505_v62, %v1506_v56  ;;  %v11331_v41 = vpack.c.bf16 %v8515_v28, %v8519_v12  ;;  %v11332_v47 = vpack.c.bf16 %v8573_v5, %v8582_v49  ;;  %v11333_v34 = vpack.c.bf16 %v8586_v23, %v8592_v11  ;;  %v7260_v28 = vld [vmem:[%s10844_s3 + $0xb0] sm:$0xff]   ;;  %v7261_v12 = vld [vmem:[%s10844_s3 + $0xb8] sm:$0xff]   ;;  %v7267_v36 = vld [vmem:[%s10842_s1 + $0x128] sm:$0xff]  }
 0x1ca   : > { %v11334_v5 = vpack.c.bf16 %v8606_v0, %v8610_v24  ;;  %v1473_v49 = vpack.c.bf16 %v1445_v18, %v1445_v18  ;;  %v11335_v23 = vpack.c.bf16 %v8618_v8, %v8628_v6  ;;  %v11336_v11 = vpack.c.bf16 %v8413_v38, %v8369_v42  ;;  %v7262_v24 = vld [vmem:[%s10842_s1 + $0x100] sm:$0xff]   ;;  %v7263_v8 = vld [vmem:[%s10842_s1 + $0x108] sm:$0xff]   ;;  %v7264_v42 = vld [vmem:[%s10842_s1 + $0x110] sm:$0xff]  }
 0x1cb   : > { %v1531_v0 = vpack.c.bf16 %v1521_v27, %v1521_v27  ;;  %6558 = vmatprep.subr.bf16.mxu0 %v7262_v24  ;;  %v7265_v38 = vld [vmem:[%s10842_s1 + $0x118] sm:$0xff]   ;;  %v7266_v6 = vld [vmem:[%s10842_s1 + $0x120] sm:$0xff]   ;;  %v11337_v56 = vld [vmem:[#allocation9_spill] sm:$0xff] }
 0x1cc   : > { %6559 = vmatpush3.bf16.msra.mxu0 %v7262_v24  ;;  %v7270_v43 = vld [vmem:[%s10842_s1 + $0xc0] sm:$0xff]  }
 0x1cd   : > { %6560 = vmatprep.subr.bf16.mxu0 %v7263_v8 }
 0x1cf   : > { %6503 = vmatmul.mubr.bf16.vlgmr.msra.gmra.mrb[0].mxu1 %v11328_v2 }
 0x1d0   : > { %6506 = vmatprep.mubr.bf16.mxu1 %v11329_v7  ;;  %6523 = vmatpush3.bf16.msra.mxu1 %v7254_v17  ;;  %v7269_v17 = vld [vmem:[%s10842_s1 + $0x138] sm:$0xff]  }
 0x1d1   : > { %6524 = vmatprep.subr.bf16.mxu1 %v7255_v35  ;;  %6561 = vmatpush3.bf16.msra.mxu0 %v7263_v8  ;;  %v11345_v8 = vld [vmem:[#allocation15_spill] sm:$0xff] }
 0x1d2   : > { %6562 = vmatprep.subr.bf16.mxu0 %v7264_v42 }
 0x1d4   : > { %6525 = vmatpush3.bf16.msra.mxu1 %v7255_v35  ;;  %v11341_v35 = vld [vmem:[#allocation10_spill] sm:$0xff] }
 0x1d5   : > { %6526 = vmatprep.subr.bf16.mxu1 %v7256_v10  ;;  %6563 = vmatpush3.bf16.msra.mxu0 %v7264_v42 }
 0x1d6   : > { %6564 = vmatprep.subr.bf16.mxu0 %v7265_v38 }
 0x1d7   : > { %6507 = vmatmul.mubr.bf16.gmra.mrb[4].mxu1 %v11330_v31 }
 0x1d8   : > { %6510 = vmatprep.mubr.bf16.mxu1 %v11331_v41  ;;  %6527 = vmatpush3.bf16.msra.mxu1 %v7256_v10  ;;  %v11343_v10 = vld [vmem:[#allocation8_spill] sm:$0xff] }
 0x1d9   : > { %6528 = vmatprep.subr.bf16.mxu1 %v7257_v9  ;;  %6565 = vmatpush3.bf16.msra.mxu0 %v7265_v38  ;;  %v11347_v38 = vld [vmem:[#allocation11_spill] sm:$0xff] }
 0x1da   : > { %6566 = vmatprep.subr.bf16.mxu0 %v7266_v6 }
 0x1dc   : > { %6529 = vmatpush3.bf16.msra.mxu1 %v7257_v9 }
 0x1dd   : > { %6530 = vmatprep.subr.bf16.mxu1 %v7258_v53  ;;  %6567 = vmatpush3.bf16.msra.mxu0 %v7266_v6 }
 0x1de   : > { %6568 = vmatprep.subr.bf16.mxu0 %v7267_v36 }
 0x1df   : > { %6511 = vmatmul.mubr.bf16.gmra.mrb[8].mxu1 %v11332_v47 }
 0x1e0   : > { %6514 = vmatprep.mubr.bf16.mxu1 %v11333_v34  ;;  %6531 = vmatpush3.bf16.msra.mxu1 %v7258_v53 }
 0x1e1   : > { %6532 = vmatprep.subr.bf16.mxu1 %v7259_v57  ;;  %6569 = vmatpush3.bf16.msra.mxu0 %v7267_v36 }
 0x1e2   : > { %6570 = vmatprep.subr.bf16.mxu0 %v7268_v26 }
 0x1e4   : > { %6533 = vmatpush3.bf16.msra.mxu1 %v7259_v57 }
 0x1e5   : > { %6534 = vmatprep.subr.bf16.mxu1 %v7260_v28  ;;  %6571 = vmatpush3.bf16.msra.mxu0 %v7268_v26 }
 0x1e6   : > { %6572 = vmatprep.subr.bf16.mxu0 %v7269_v17 }
 0x1e7   : > { %6515 = vmatmul.mubr.bf16.gmra.mrb[12].mxu1 %v11334_v5 }
 0x1e8   : > { %6518 = vmatprep.mubr.bf16.mxu1 %v1472_v63  ;;  %6535 = vmatpush3.bf16.msra.mxu1 %v7260_v28 }
 0x1e9   : > { %6536 = vmatprep.subr.bf16.mxu1 %v7261_v12  ;;  %6573 = vmatpush3.bf16.msra.mxu0 %v7269_v17 }
 0x1ea   : > { %6594 = vmatprep.subr.bf16.mxu0 %v7270_v43 }
 0x1ec   : > { %6537 = vmatpush3.bf16.msra.mxu1 %v7261_v12 }
 0x1ef   : > { %6519 = vmatmul.mubr.bf16.gmra.mrb[20].mxu1 %v1473_v49 }
 0x1f0   : > { %6538 = vmatprep.mubr.bf16.mxu1 %v11335_v23 }
 0x1f7   : > { %6539 = vmatmul.mubr.bf16.vlgmr.msra.gmra.mrb[0].mxu1 %v11336_v11 }
 0x1f8   : > { %6542 = vmatprep.mubr.bf16.mxu1 %v1524_v15 }
 0x1ff   : > { %6543 = vmatmul.mubr.bf16.gmra.mrb[4].mxu1 %v1525_v59 }
 0x200   : > { %6546 = vmatprep.mubr.bf16.mxu1 %v1526_v4 }
 0x207   : > { %6547 = vmatmul.mubr.bf16.gmra.mrb[8].mxu1 %v1527_v58  ;;  %v8828_v58 = vld [vmem:[%s10845_s4] ss:$0 sm:$0xff] }
 0x208   : > { %6550 = vmatprep.mubr.bf16.mxu1 %v1528_v13 }
 0x20f   : > { %6551 = vmatmul.mubr.bf16.gmra.mrb[12].mxu1 %v1529_v45 }
 0x210   : > { %6554 = vmatprep.mubr.bf16.mxu1 %v1530_v14 }
 0x217   : > { %6555 = vmatmul.mubr.bf16.gmra.mrb[24].mxu1 %v1531_v0 }
 0x29a   : > { %v6484_v15 = vpop.f32.mrb[16].mxu1 }
 0x29b   : > { %v1711_v18 = vpop.f32.mrb[17].mxu1 }
 0x29c   : > { %v6485_v59 = vpop.f32.mrb[18].mxu1 }
 0x29d   : > { %v1714_v63 = vpop.f32.mrb[19].mxu1  ;;  %v7271_v59 = vld [vmem:[%s10842_s1 + $0xc8] sm:$0xff]  }
 0x2c2   : > { %v6520_v4 = vpop.f32.mrb[20].mxu1 }
 0x2c3   : > { %v8819_v22 = vadd.f32 %v6520_v4, %v6484_v15  ;;  %v1871_v16 = vpop.f32.mrb[21].mxu1  ;;  %v11349_v15 = vld [vmem:[#allocation16_spill] sm:$0xff] }
 0x2c4   : > { %v8821_v1 = vadd.f32 %v1871_v16, %v1711_v18  ;;  %v6521_v39 = vpop.f32.mrb[22].mxu1  ;;  %v11351_v4 = vld [vmem:[#allocation12_spill] sm:$0xff] }
 0x2c5   : > { %v1874_v20 = vpop.f32.mrb[23].mxu1 }
 0x2c6   : > { %v8823_v61 = vadd.f32 %v1874_v20, %v1714_v63 }
 0x2ca   : > { %v6540_v13 = vpop.f32.mrb[0].mxu1 }
 0x2cb   : > { %v2090_v51 = vadd.f32 %v6540_v13, %v8828_v58  ;;  %v1984_v62 = vpop.f32.mrb[1].mxu1 }
 0x2cc   : > { %v2088_v40 = vadd.f32 %v8828_v58, %v1984_v62  ;;  %v6541_v32 = vpop.f32.mrb[2].mxu1 }
 0x2cd   : > { %v8833_v45 = vadd.f32 %v11337_v56, %v2090_v51  ;;  %v2091_v44 = vadd.f32 %v6541_v32, %v8828_v58  ;;  %v1987_v54 = vpop.f32.mrb[3].mxu1  ;;  %v7272_v32 = vld [vmem:[%s10842_s1 + $0xd0] sm:$0xff]  }
 0x2ce   : > { %v8837_v27 = vadd.f32 %v11339_v25, %v2088_v40  ;;  %v2089_v14 = vadd.f32 %v8828_v58, %v1987_v54 }
 0x2cf   : > { %11338 = vst [vmem:[#allocation37_spill] sm:$0xff] %v8833_v45  ;;  %v8841_v2 = vadd.f32 %v11341_v35, %v2091_v44  ;;  %v2147_v7 = vmul.f32 0.1, %v8833_v45  ;;  %vm2128_vm13 = vcmp.ge.f32.partialorder %v8833_v45, 0.0 }
 0x2d0   : > { %11340 = vst [vmem:[#allocation38_spill] sm:$0xff] %v8837_v27  ;;  %v8845_v9 = vadd.f32 %v11343_v10, %v2089_v14  ;;  %v2145_v31 = vmul.f32 0.1, %v8837_v27  ;;  %vm2126_vm1 = vcmp.ge.f32.partialorder %v8837_v27, 0.0  ;;  %v11354_v10 = vld [vmem:[#allocation22_spill] sm:$0xff] }
 0x2d1   : > { %11342 = vst [vmem:[#allocation44_spill] sm:$0xff] %v8841_v2  ;;  %vm2129_vm4 = vcmp.ge.f32.partialorder %v8841_v2, 0.0  ;;  %v2148_v41 = vmul.f32 0.1, %v8841_v2  ;;  %v8863_v23 = vsel %vm2128_vm13, %v8833_v45, %v2147_v7 }
 0x2d2   : > { %11344 = vst [vmem:[#allocation45_spill] sm:$0xff] %v8845_v9  ;;  %vm2127_vm15 = vcmp.ge.f32.partialorder %v8845_v9, 0.0  ;;  %v2146_v53 = vmul.f32 0.1, %v8845_v9  ;;  %v6544_v57 = vpop.f32.mrb[4].mxu1  ;;  %v8867_v24 = vsel %vm2126_vm1, %v8837_v27, %v2145_v31  ;;  %vm11353_vm1 = vnez %v11093_v19 }
 0x2d3   : > { %v2094_v47 = vadd.f32 %v6544_v57, %v8828_v58  ;;  %v2000_v34 = vpop.f32.mrb[5].mxu1  ;;  %v8856_v28 = vsel %vm2129_vm4, %v8841_v2, %v2148_v41  ;;  %v11356_v41 = vld [vmem:[#allocation17_spill] sm:$0xff]  ;;  %v11409_v2 = vld [vmem:[#allocation42_spill] sm:$0xff] }
 0x2d4   : > { %v2092_v12 = vadd.f32 %v8828_v58, %v2000_v34  ;;  %v6545_v5 = vpop.f32.mrb[6].mxu1  ;;  %v8860_v49 = vsel %vm2127_vm15, %v8845_v9, %v2146_v53  ;;  %v5593_v17 = vpack.c.bf16 %v8856_v28, %v8863_v23  ;;  %v11358_v34 = vld [vmem:[#allocation23_spill] sm:$0xff] }
 0x2d5   : > { %v2095_v11 = vadd.f32 %v6545_v5, %v8828_v58  ;;  %v2003_v0 = vpop.f32.mrb[7].mxu1  ;;  %v8870_v42 = vadd.f32 %v11345_v8, %v2094_v47  ;;  %v5590_v26 = vpack.c.bf16 %v8860_v49, %v8867_v24  ;;  %v11360_v8 = vld [vmem:[#allocation19_spill] sm:$0xff] }
 0x2d6   : > { %v8873_v6 = vadd.f32 %v11347_v38, %v2092_v12  ;;  %v2093_v36 = vadd.f32 %v8828_v58, %v2003_v0 }
 0x2d7   : > { %11346 = vst [vmem:[#allocation9_spill] sm:$0xff] %v8870_v42  ;;  %v8881_v18 = vadd.f32 %v11349_v15, %v2095_v11  ;;  %6574 = vmatprep.mubr.msk.bf16.mxu0 %vm11248_vm0, %v5590_v26  ;;  %v2151_v20 = vmul.f32 0.1, %v8870_v42  ;;  %vm2132_vm10 = vcmp.ge.f32.partialorder %v8870_v42, 0.0  ;;  %v7273_v11 = vld [vmem:[%s10842_s1 + $0xd8] sm:$0xff]  }
 0x2d8   : > { %11348 = vst [vmem:[#allocation7_spill] sm:$0xff] %v8873_v6  ;;  %v2149_v63 = vmul.f32 0.1, %v8873_v6  ;;  %v8888_v16 = vadd.f32 %v11351_v4, %v2093_v36  ;;  %vm2130_vm4 = vcmp.ge.f32.partialorder %v8873_v6, 0.0  ;;  %6575 = vmatmul.mubr.msk.bf16.vlgmr.msra.gmra.mrb[28].mxu0 %vm11353_vm1, %v5593_v17  ;;  %v7274_v4 = vld [vmem:[%s10842_s1 + $0xe0] sm:$0xff]  }
 0x2d9   : > { %11350 = vst [vmem:[#allocation10_spill] sm:$0xff] %v8881_v18  ;;  %vm2133_vm13 = vcmp.ge.f32.partialorder %v8881_v18, 0.0  ;;  %v2152_v39 = vmul.f32 0.1, %v8881_v18  ;;  %6595 = vmatpush3.bf16.msra.mxu0 %v7270_v43  ;;  %v8932_v47 = vsel %vm2132_vm10, %v8870_v42, %v2151_v20 }
 0x2da   : > { %11352 = vst [vmem:[#allocation8_spill] sm:$0xff] %v8888_v16  ;;  %vm2131_vm15 = vcmp.ge.f32.partialorder %v8888_v16, 0.0  ;;  %v2150_v13 = vmul.f32 0.1, %v8888_v16  ;;  %v6548_v51 = vpop.f32.mrb[8].mxu1  ;;  %6596 = vmatprep.subr.bf16.mxu0 %v7271_v59  ;;  %v8909_v54 = vsel %vm2130_vm4, %v8873_v6, %v2149_v63  ;;  %v11407_v6 = vld [vmem:[#allocation40_spill] sm:$0xff] }
 0x2db   : > { %v2098_v62 = vadd.f32 %v6548_v51, %v8828_v58  ;;  %v2016_v40 = vpop.f32.mrb[9].mxu1  ;;  %v8917_v25 = vsel %vm2133_vm13, %v8881_v18, %v2152_v39  ;;  %v11401_v18 = vld [vmem:[#allocation34_spill] sm:$0xff] }
 0x2dc   : > { %v2096_v56 = vadd.f32 %v8828_v58, %v2016_v40  ;;  %v6549_v44 = vpop.f32.mrb[10].mxu1  ;;  %v8912_v43 = vsel %vm2131_vm15, %v8888_v16, %v2150_v13  ;;  %v5599_v5 = vpack.c.bf16 %v8917_v25, %v8932_v47 }
 0x2dd   : > { %v2099_v14 = vadd.f32 %v6549_v44, %v8828_v58  ;;  %v2019_v35 = vpop.f32.mrb[11].mxu1  ;;  %v5596_v7 = vpack.c.bf16 %v8912_v43, %v8909_v54  ;;  %v8923_v31 = vadd.f32 %v11354_v10, %v2098_v62  ;;  %6597 = vmatpush3.bf16.msra.mxu0 %v7271_v59  ;;  %v11362_v44 = vld [vmem:[#allocation29_spill] sm:$0xff] }
 0x2de   : > { %v8926_v53 = vadd.f32 %v11356_v41, %v2096_v56  ;;  %v2097_v57 = vadd.f32 %v8828_v58, %v2019_v35  ;;  %6598 = vmatprep.subr.bf16.mxu0 %v7272_v32  ;;  %v11364_v35 = vld [vmem:[#allocation25_spill] sm:$0xff] }
 0x2df   : > { %11355 = vst [vmem:[#allocation15_spill] sm:$0xff] %v8923_v31  ;;  %v8935_v12 = vadd.f32 %v11358_v34, %v2099_v14  ;;  %6578 = vmatprep.mubr.msk.bf16.mxu0 %vm11251_vm7, %v5596_v7  ;;  %v2155_v26 = vmul.f32 0.1, %v8923_v31  ;;  %vm2136_vm15 = vcmp.ge.f32.partialorder %v8923_v31, 0.0 }
 0x2e0   : > { %11357 = vst [vmem:[#allocation11_spill] sm:$0xff] %v8926_v53  ;;  %v2153_v0 = vmul.f32 0.1, %v8926_v53  ;;  %v8946_v38 = vadd.f32 %v11360_v8, %v2097_v57  ;;  %vm2134_vm10 = vcmp.ge.f32.partialorder %v8926_v53, 0.0  ;;  %6579 = vmatmul.mubr.msk.bf16.gmra.mrb[32].mxu0 %vm11256_vm14, %v5599_v5  ;;  %v11366_v57 = vld [vmem:[#allocation30_spill] sm:$0xff]  ;;  %vm11408_vm14 = vnez %v11407_v6 }
 0x2e1   : > { %11359 = vst [vmem:[#allocation16_spill] sm:$0xff] %v8935_v12  ;;  %vm2137_vm4 = vcmp.ge.f32.partialorder %v8935_v12, 0.0  ;;  %v2156_v36 = vmul.f32 0.1, %v8935_v12  ;;  %6599 = vmatpush3.bf16.msra.mxu0 %v7272_v32  ;;  %v8988_v41 = vsel %vm2136_vm15, %v8923_v31, %v2155_v26 }
 0x2e2   : > { %11361 = vst [vmem:[#allocation12_spill] sm:$0xff] %v8946_v38  ;;  %vm2135_vm13 = vcmp.ge.f32.partialorder %v8946_v38, 0.0  ;;  %v2154_v17 = vmul.f32 0.1, %v8946_v38  ;;  %v6552_v15 = vpop.f32.mrb[12].mxu1  ;;  %6600 = vmatprep.subr.bf16.mxu0 %v7273_v11  ;;  %v8965_v13 = vsel %vm2134_vm10, %v8926_v53, %v2153_v0  ;;  %v7275_v0 = vld [vmem:[%s10842_s1 + $0xe8] sm:$0xff]  }
 0x2e3   : > { %v2102_v59 = vadd.f32 %v6552_v15, %v8828_v58  ;;  %v2032_v63 = vpop.f32.mrb[13].mxu1  ;;  %v8973_v62 = vsel %vm2137_vm4, %v8935_v12, %v2156_v36  ;;  %v11368_v36 = vld [vmem:[#allocation26_spill] sm:$0xff]  ;;  %v11399_v53 = vld [vmem:[#allocation31_spill] sm:$0xff] }
 0x2e4   : > { %v2100_v39 = vadd.f32 %v8828_v58, %v2032_v63  ;;  %v6553_v20 = vpop.f32.mrb[14].mxu1  ;;  %v8968_v51 = vsel %vm2135_vm13, %v8946_v38, %v2154_v17  ;;  %v5605_v5 = vpack.c.bf16 %v8973_v62, %v8988_v41 }
 0x2e5   : > { %v2103_v40 = vadd.f32 %v6553_v20, %v8828_v58  ;;  %v2035_v32 = vpop.f32.mrb[15].mxu1  ;;  %v5602_v56 = vpack.c.bf16 %v8968_v51, %v8965_v13  ;;  %v8979_v14 = vadd.f32 %v11362_v44, %v2102_v59  ;;  %6601 = vmatpush3.bf16.msra.mxu0 %v7273_v11  ;;  %v7276_v20 = vld [vmem:[%s10842_s1 + $0xf0] sm:$0xff]  }
 0x2e6   : > { %v8982_v7 = vadd.f32 %v11364_v35, %v2100_v39  ;;  %v2101_v10 = vadd.f32 %v8828_v58, %v2035_v32  ;;  %6602 = vmatprep.subr.bf16.mxu0 %v7274_v4 }
 0x2e7   : > { %11363 = vst [vmem:[#allocation22_spill] sm:$0xff] %v8979_v14  ;;  %v8991_v34 = vadd.f32 %v11366_v57, %v2103_v40  ;;  %6582 = vmatprep.mubr.msk.bf16.mxu0 %vm11261_vm12, %v5602_v56  ;;  %v2159_v17 = vmul.f32 0.1, %v8979_v14  ;;  %vm2140_vm15 = vcmp.ge.f32.partialorder %v8979_v14, 0.0 }
 0x2e8   : > { %11365 = vst [vmem:[#allocation17_spill] sm:$0xff] %v8982_v7  ;;  %v2157_v8 = vmul.f32 0.1, %v8982_v7  ;;  %v9002_v26 = vadd.f32 %v11368_v36, %v2101_v10  ;;  %vm2138_vm10 = vcmp.ge.f32.partialorder %v8982_v7, 0.0  ;;  %6583 = vmatmul.mubr.msk.bf16.gmra.mrb[36].mxu0 %vm11264_vm6, %v5605_v5 }
 0x2e9   : > { %11367 = vst [vmem:[#allocation23_spill] sm:$0xff] %v8991_v34  ;;  %vm2141_vm4 = vcmp.ge.f32.partialorder %v8991_v34, 0.0  ;;  %v2160_v11 = vmul.f32 0.1, %v8991_v34  ;;  %6603 = vmatpush3.bf16.msra.mxu0 %v7274_v4  ;;  %v9037_v5 = vsel %vm2140_vm15, %v8979_v14, %v2159_v17 }
 0x2ea   : > { %11369 = vst [vmem:[#allocation19_spill] sm:$0xff] %v9002_v26  ;;  %vm2139_vm13 = vcmp.ge.f32.partialorder %v9002_v26, 0.0  ;;  %v2158_v15 = vmul.f32 0.1, %v9002_v26  ;;  %v6556_v59 = vpop.f32.mrb[24].mxu1  ;;  %6604 = vmatprep.subr.bf16.mxu0 %v7275_v0  ;;  %v9021_v56 = vsel %vm2138_vm10, %v8982_v7, %v2157_v8  ;;  %v11370_v8 = vld [vmem:[#allocation39_spill] sm:$0xff]  ;;  %vm11372_vm10 = vnez %v11062_v48 }
 0x2eb   : > { %v2080_v63 = vadd.f32 %v6556_v59, %v8819_v22  ;;  %v2048_v39 = vpop.f32.mrb[25].mxu1  ;;  %v9029_v22 = vsel %vm2141_vm4, %v8991_v34, %v2160_v11  ;;  %v11392_v34 = vld [vmem:[#allocation21_spill] sm:$0xff]  ;;  %v9223_v9 = vsel %vm11408_vm14, %v9037_v5, 0.0 }
 0x2ec   : > { %v2078_v40 = vadd.f32 %v2048_v39, %v8821_v1  ;;  %v6557_v32 = vpop.f32.mrb[26].mxu1  ;;  %v9024_v4 = vsel %vm2139_vm13, %v9002_v26, %v2158_v15  ;;  %v5611_v11 = vpack.c.bf16 %v9029_v22, %v9037_v5  ;;  %v7277_v15 = vld [vmem:[%s10842_s1 + $0xf8] sm:$0xff]   ;;  %vm11375_vm13 = vnez %v11059_v46  ;;  %v11386_v26 = vld [vmem:[#allocation18_spill] sm:$0xff] }
 0x2ed   : > { %v2106_v44 = vadd.f32 %v8828_v58, %v2080_v63  ;;  %v2051_v35 = vpop.f32.mrb[27].mxu1  ;;  %v5608_v1 = vpack.c.bf16 %v9024_v4, %v9021_v56  ;;  %6605 = vmatpush3.bf16.msra.mxu0 %v7275_v0  ;;  %v11373_v0 = vld [vmem:[#allocation33_spill] sm:$0xff]  ;;  %v9065_v39 = vsel %vm11375_vm13, %v8867_v24, 0.0 }
 0x2ee   : > { %v2104_v10 = vadd.f32 %v8828_v58, %v2078_v40  ;;  %v2079_v57 = vadd.f32 %v2051_v35, %v8823_v61  ;;  %6606 = vmatprep.subr.bf16.mxu0 %v7276_v20  ;;  %v9052_v61 = vsel %vm11372_vm10, %v8860_v49, 0.0  ;;  %v11376_v40 = vld [vmem:[#allocation35_spill] sm:$0xff]  ;;  %v7278_v35 = vld [vmem:[%s10842_s1 + $0x140] sm:$0xff]  }
 0x2ef   : > { %v9040_v36 = vadd.f32 %v2106_v44, %v11370_v8  ;;  %6586 = vmatprep.mubr.msk.bf16.mxu0 %vm11269_vm5, %v5608_v1  ;;  %v2203_v44 = vrot.slane %v9052_v61, 5  ;;  %v11378_v1 = vld [vmem:[#allocation46_spill] sm:$0xff]  ;;  %vm10999_vm5 = vcmp.lt.s32.totalorder %v7489_v21, 3  ;;  %v2262_v45 = vrot.slane %v9052_v61, 3 }
 0x2f0   : > { %v9055_v17 = vadd.f32 %v11373_v0, %v2104_v10  ;;  %v2105_v59 = vadd.f32 %v8828_v58, %v2079_v57  ;;  %6587 = vmatmul.mubr.msk.bf16.gmra.mrb[40].mxu0 %vm11285_vm9, %v5611_v11  ;;  %v11379_v8 = vld [vmem:[#allocation14_spill] sm:$0xff] }
 0x2f1   : > { %11371 = vst [vmem:[#allocation29_spill] sm:$0xff] %v9040_v36  ;;  %v2163_v63 = vmul.f32 0.1, %v9040_v36  ;;  %vm2144_vm4 = vcmp.ge.f32.partialorder %v9040_v36, 0.0  ;;  %6607 = vmatpush3.bf16.msra.mxu0 %v7276_v20  ;;  %v2202_v20 = vrot.slane %v9065_v39, 5 }
 0x2f2   : > { %11374 = vst [vmem:[#allocation25_spill] sm:$0xff] %v9055_v17  ;;  %v2161_v49 = vmul.f32 0.1, %v9055_v17  ;;  %v9069_v32 = vadd.f32 %v11376_v40, %v2105_v59  ;;  %vm2142_vm15 = vcmp.ge.f32.partialorder %v9055_v17, 0.0  ;;  %6608 = vmatprep.subr.bf16.mxu0 %v7277_v15 }
 0x2f3   : > { %v2182_v58 = vsel %vm2144_vm4, %v9040_v36, %v2163_v63  ;;  %vm11380_vm4 = vnez %v11379_v8  ;;  %v11381_v63 = vld [vmem:[#allocation20_spill] sm:$0xff]  ;;  %v2239_v36 = vsel %vm10999_vm5, %v2202_v20, %v2203_v44 }
 0x2f4   : > { %11377 = vst [vmem:[#allocation30_spill] sm:$0xff] %v9069_v32  ;;  %v2162_v24 = vmul.f32 0.1, %v9069_v32  ;;  %vm2143_vm9 = vcmp.ge.f32.partialorder %v9069_v32, 0.0  ;;  %v9081_v10 = vsel %vm8010_vm8, %v2182_v58, 0.0  ;;  %v9089_v11 = vsel %vm11380_vm4, %v8856_v28, 0.0 }
 0x2f5   : > { %v9092_v0 = vsel %vm2142_vm15, %v9055_v17, %v2161_v49  ;;  %6609 = vmatpush3.bf16.msra.mxu0 %v7277_v15  ;;  %vm11382_vm8 = vnez %v11381_v63  ;;  %v11383_v28 = vrot.slane %v9081_v10, 5  ;;  %v2205_v17 = vrot.slane %v9089_v11, 5 }
 0x2f6   : > { %v9095_v59 = vsel %vm2143_vm9, %v9069_v32, %v2162_v24  ;;  %v9100_v40 = vsel %vm11382_vm8, %v8912_v43, 0.0  ;;  %6630 = vmatprep.subr.bf16.mxu0 %v7278_v35  ;;  %v11384_v24 = vld [vmem:[#allocation13_spill] sm:$0xff]  ;;  %v5617_v32 = vpack.c.bf16 %v2182_v58, %v2182_v58  ;;  %vm11387_vm15 = vnez %v11386_v26 }
 0x2f7   : > { %v5614_v57 = vpack.c.bf16 %v9095_v59, %v9092_v0  ;;  %v2240_v49 = vsel %vm10999_vm5, %v11383_v28, %v2202_v20  ;;  %vm11385_vm9 = vnez %v11384_v24  ;;  %v9119_v14 = vsel %vm11387_vm15, %v8909_v54, 0.0  ;;  %v11388_v28 = vld [vmem:[#allocation24_spill] sm:$0xff] }
 0x2f8   : > { %v9113_v15 = vsel %vm11385_vm9, %v8863_v23, 0.0  ;;  %v2241_v43 = vpack.c.bf16 %v2239_v36, %v2240_v49  ;;  %v2207_v20 = vrot.slane %v9100_v40, 5  ;;  %v2206_v36 = vrot.slane %v9119_v14, 5  ;;  %v11390_v49 = vld [vmem:[#allocation28_spill] sm:$0xff] }
 0x2f9   : > { %6590 = vmatprep.mubr.msk.bf16.mxu0 %vm11297_vm3, %v5614_v57  ;;  %v2204_v23 = vrot.slane %v9113_v15, 5  ;;  %vm11389_vm6 = vnez %v11388_v28  ;;  %vm11393_vm3 = vnez %v11392_v34 }
 0x2fa   : > { %6591 = vmatmul.mubr.msk.bf16.gmra.mrb[44].mxu0 %vm11324_vm11, %v5617_v32  ;;  %v9135_v57 = vsel %vm11389_vm6, %v8917_v25, 0.0  ;;  %v2235_v32 = vsel %vm10999_vm5, %v2206_v36, %v2207_v20  ;;  %vm11391_vm11 = vnez %v11390_v49  ;;  %v9147_v7 = vsel %vm11393_vm3, %v8932_v47, 0.0  ;;  %v7279_v25 = vld [vmem:[%s10842_s1 + $0x148] sm:$0xff]  }
 0x2fb   : > { %6610 = vmatprep.mubr.bf16.mxu0 %v2241_v43  ;;  %v2237_v58 = vsel %vm10999_vm5, %v2204_v23, %v2205_v17  ;;  %v2238_v54 = vsel %vm10999_vm5, %v2203_v44, %v2204_v23  ;;  %v9142_v43 = vsel %vm11391_vm11, %v8968_v51, 0.0  ;;  %v2236_v44 = vsel %vm10999_vm5, %v2205_v17, %v2206_v36  ;;  %v11394_v23 = vld [vmem:[#allocation27_spill] sm:$0xff]  ;;  %v7280_v36 = vld [vmem:[%s10842_s1 + $0x150] sm:$0xff]  }
 0x2fc   : > { %v2242_v38 = vpack.c.bf16 %v2237_v58, %v2238_v54  ;;  %vm11395_vm12 = vnez %v11394_v23  ;;  %v2243_v51 = vpack.c.bf16 %v2235_v32, %v2236_v44  ;;  %v2209_v31 = vrot.slane %v9135_v57, 5  ;;  %v11398_v44 = vld [vmem:[#allocation36_spill] sm:$0xff] }
 0x2fd   : > { %v9157_v12 = vsel %vm11395_vm12, %v8965_v13, 0.0  ;;  %v2211_v47 = vrot.slane %v9142_v43, 5  ;;  %v2208_v58 = vrot.slane %v9147_v7, 5  ;;  %vm11400_vm12 = vnez %v11399_v53 }
 0x2fe   : > { %v2210_v17 = vrot.slane %v9157_v12, 5  ;;  %v9185_v16 = vsel %vm11400_vm12, %v8988_v41, 0.0 }
 0x2ff   : > { %v2233_v13 = vsel %vm10999_vm5, %v2208_v58, %v2209_v31  ;;  %v2234_v54 = vsel %vm10999_vm5, %v2207_v20, %v2208_v58 }
 0x300   : > { %v2244_v20 = vpack.c.bf16 %v2233_v13, %v2234_v54  ;;  %v2232_v58 = vsel %vm10999_vm5, %v2209_v31, %v2210_v17  ;;  %v2212_v31 = vrot.slane %v9185_v16, 5  ;;  %v7282_v13 = vld [vmem:[%s10842_s1 + $0x160] sm:$0xff]  }
 0x302   : > { %6611 = vmatmul.mubr.bf16.vlgmr.msra.gmra.mrb[28].mxu0 %v2242_v38  ;;  %v11396_v38 = vld [vmem:[#allocation32_spill] sm:$0xff]  ;;  %v2230_v54 = vsel %vm10999_vm5, %v2211_v47, %v2212_v31 }
 0x303   : > { %6614 = vmatprep.mubr.bf16.mxu0 %v2243_v51  ;;  %6631 = vmatpush3.bf16.msra.mxu0 %v7278_v35  ;;  %vm11397_vm11 = vnez %v11396_v38  ;;  %v2231_v35 = vsel %vm10999_vm5, %v2210_v17, %v2211_v47  ;;  %v9180_v51 = vsel %vm7881_vm2, %v9024_v4, 0.0 }
 0x304   : > { %6632 = vmatprep.subr.bf16.mxu0 %v7279_v25  ;;  %v9173_v32 = vsel %vm11397_vm11, %v8973_v62, 0.0  ;;  %v7281_v62 = vld [vmem:[%s10842_s1 + $0x158] sm:$0xff]   ;;  %vm11402_vm11 = vnez %v11401_v18  ;;  %v2215_v41 = vrot.slane %v9180_v51, 5 }
 0x305   : > { %v9195_v4 = vsel %vm11402_vm11, %v9021_v56, 0.0  ;;  %v2213_v42 = vrot.slane %v9173_v32, 5 }
 0x306   : > { %v2214_v17 = vrot.slane %v9195_v4, 5 }
 0x307   : > { %6633 = vmatpush3.bf16.msra.mxu0 %v7279_v25  ;;  %v2245_v25 = vpack.c.bf16 %v2231_v35, %v2232_v58  ;;  %v2229_v56 = vsel %vm10999_vm5, %v2212_v31, %v2213_v42  ;;  %v11403_v35 = vld [vmem:[#allocation41_spill] sm:$0xff]  ;;  %v11405_v58 = vld [vmem:[#allocation43_spill] sm:$0xff] }
 0x308   : > { %6634 = vmatprep.subr.bf16.mxu0 %v7280_v36  ;;  %vm11404_vm2 = vnez %v11403_v35  ;;  %vm11406_vm11 = vnez %v11405_v58  ;;  %v2246_v47 = vpack.c.bf16 %v2229_v56, %v2230_v54  ;;  %v2228_v31 = vsel %vm10999_vm5, %v2213_v42, %v2214_v17  ;;  %v7284_v56 = vld [vmem:[%s10842_s1 + $0x170] sm:$0xff]  }
 0x309   : > { %v2216_v42 = vrot.slane %v9223_v9, 5 }
 0x30a   : > { %6615 = vmatmul.mubr.bf16.gmra.mrb[32].mxu0 %v2244_v20  ;;  %v9211_v20 = vsel %vm11404_vm2, %v9029_v22, 0.0  ;;  %v7283_v22 = vld [vmem:[%s10842_s1 + $0x168] sm:$0xff]   ;;  %vm11410_vm2 = vnez %v11409_v2 }
 0x30b   : > { %6618 = vmatprep.mubr.bf16.mxu0 %v2245_v25  ;;  %6635 = vmatpush3.bf16.msra.mxu0 %v7280_v36  ;;  %v2227_v36 = vsel %vm10999_vm5, %v2214_v17, %v2215_v41  ;;  %v9218_v25 = vsel %vm11406_vm11, %v9095_v59, 0.0  ;;  %v9233_v59 = vsel %vm11410_vm2, %v9092_v0, 0.0  ;;  %v2217_v27 = vrot.slane %v9211_v20, 5 }
 0x30c   : > { %6636 = vmatprep.subr.bf16.mxu0 %v7281_v62  ;;  %v2219_v5 = vrot.slane %v9218_v25, 5  ;;  %v2218_v17 = vrot.slane %v9233_v59, 5  ;;  %v2226_v54 = vsel %vm10999_vm5, %v2215_v41, %v2216_v42  ;;  %vm11000_vm11 = vcmp.lt.s32.totalorder %v7489_v21, 5 }
 0x30d   : > { %v2225_v0 = vsel %vm10999_vm5, %v2216_v42, %v2217_v27  ;;  %v2261_v41 = vrot.slane %v9065_v39, 3  ;;  %v2266_v39 = vrot.slane %v9100_v40, 3  ;;  %v2269_v40 = vrot.slane %v9157_v12, 3 }
 0x30f   : > { %6637 = vmatpush3.bf16.msra.mxu0 %v7281_v62  ;;  %v2247_v62 = vpack.c.bf16 %v2227_v36, %v2228_v31  ;;  %v2223_v36 = vsel %vm10999_vm5, %v2218_v17, %v2219_v5  ;;  %v7285_v31 = vld [vmem:[%s10842_s1 + $0x178] sm:$0xff]   ;;  %v2298_v61 = vsel %vm11000_vm11, %v2261_v41, %v2262_v45 }
 0x310   : > { %6638 = vmatprep.subr.bf16.mxu0 %v7282_v13 }
 0x312   : > { %6619 = vmatmul.mubr.bf16.gmra.mrb[36].mxu0 %v2246_v47  ;;  %v2224_v47 = vsel %vm10999_vm5, %v2217_v27, %v2218_v17  ;;  %v11411_v27 = vrot.slane %v9081_v10, 5 }
 0x313   : > { %6622 = vmatprep.mubr.bf16.mxu0 %v2247_v62  ;;  %6639 = vmatpush3.bf16.msra.mxu0 %v7282_v13  ;;  %v2248_v13 = vpack.c.bf16 %v2225_v0, %v2226_v54  ;;  %v2249_v62 = vpack.c.bf16 %v2223_v36, %v2224_v47  ;;  %v2265_v0 = vrot.slane %v9119_v14, 3  ;;  %v2267_v36 = vrot.slane %v9147_v7, 3 }
 0x314   : > { %6640 = vmatprep.subr.bf16.mxu0 %v7283_v22  ;;  %v2222_v42 = vsel %vm10999_vm5, %v2219_v5, %v11411_v27  ;;  %v2268_v7 = vrot.slane %v9135_v57, 3  ;;  %v2274_v57 = vrot.slane %v9180_v51, 3  ;;  %v2277_v51 = vrot.slane %v9233_v59, 3 }
 0x316   : > { %v2291_v27 = vsel %vm11000_vm11, %v2268_v7, %v2269_v40  ;;  %v2292_v12 = vsel %vm11000_vm11, %v2267_v36, %v2268_v7  ;;  %v7290_v7 = vld [vmem:[%s10844_s3 + $0x120] sm:$0xff]  }
 0x317   : > { %6641 = vmatpush3.bf16.msra.mxu0 %v7283_v22  ;;  %v2263_v22 = vrot.slane %v9113_v15, 3  ;;  %v2264_v15 = vrot.slane %v9089_v11, 3  ;;  %v2270_v11 = vrot.slane %v9142_v43, 3  ;;  %v2273_v43 = vrot.slane %v9195_v4, 3 }
 0x318   : > { %6642 = vmatprep.subr.bf16.mxu0 %v7284_v56 }
 0x319   : > { %v2297_v17 = vsel %vm11000_vm11, %v2262_v45, %v2263_v22  ;;  %v2295_v5 = vsel %vm11000_vm11, %v2264_v15, %v2265_v0  ;;  %v2294_v45 = vsel %vm11000_vm11, %v2265_v0, %v2266_v39  ;;  %v2296_v14 = vsel %vm11000_vm11, %v2263_v22, %v2264_v15 }
 0x31a   : > { %6623 = vmatmul.mubr.bf16.gmra.mrb[40].mxu0 %v2248_v13  ;;  %v2300_v54 = vpack.c.bf16 %v2297_v17, %v2298_v61  ;;  %v2293_v13 = vsel %vm11000_vm11, %v2266_v39, %v2267_v36  ;;  %v2301_v47 = vpack.c.bf16 %v2295_v5, %v2296_v14  ;;  %v2290_v22 = vsel %vm11000_vm11, %v2269_v40, %v2270_v11  ;;  %v7287_v40 = vld [vmem:[%s10844_s3 + $0x108] sm:$0xff]  }
 0x31b   : > { %6626 = vmatprep.mubr.bf16.mxu0 %v2249_v62  ;;  %6643 = vmatpush3.bf16.msra.mxu0 %v7284_v56  ;;  %v2250_v56 = vpack.c.bf16 %v2222_v42, %v2222_v42  ;;  %v2271_v62 = vrot.slane %v9185_v16, 3  ;;  %v2303_v17 = vpack.c.bf16 %v2291_v27, %v2292_v12  ;;  %v2272_v16 = vrot.slane %v9173_v32, 3  ;;  %v7292_v27 = vld [vmem:[%s10844_s3 + $0x130] sm:$0xff]  }
 0x31c   : > { %6644 = vmatprep.subr.bf16.mxu0 %v7285_v31  ;;  %v2286_v39 = vsel %vm11000_vm11, %v2273_v43, %v2274_v57  ;;  %v2278_v32 = vrot.slane %v9218_v25, 3  ;;  %v2279_v5 = vrot.slane %v9081_v10, 3  ;;  %v7286_v25 = vld [vmem:[%s10844_s3 + $0x100] sm:$0xff]  }
 0x31d   : > { %v2289_v42 = vsel %vm11000_vm11, %v2270_v11, %v2271_v62  ;;  %v2287_v0 = vsel %vm11000_vm11, %v2272_v16, %v2273_v43  ;;  %v2288_v4 = vsel %vm11000_vm11, %v2271_v62, %v2272_v16  ;;  %6666 = vmatprep.subr.bf16.mxu1 %v7286_v25  ;;  %v7288_v11 = vld [vmem:[%s10844_s3 + $0x110] sm:$0xff]   ;;  %v7291_v62 = vld [vmem:[%s10844_s3 + $0x128] sm:$0xff]  }
 0x31e   : > { %v2304_v61 = vpack.c.bf16 %v2289_v42, %v2290_v22  ;;  %v2305_v15 = vpack.c.bf16 %v2287_v0, %v2288_v4  ;;  %v2282_v14 = vsel %vm11000_vm11, %v2277_v51, %v2278_v32  ;;  %6667 = vmatpush3.bf16.msra.mxu1 %v7286_v25  ;;  %v7293_v42 = vld [vmem:[%s10844_s3 + $0x138] sm:$0xff]   ;;  %v9342_v22 = vld [vmem:[%s10844_s3 + $0xc0] sm:$0xff]  }
 0x31f   : > { %6645 = vmatpush3.bf16.msra.mxu0 %v7285_v31  ;;  %v2302_v31 = vpack.c.bf16 %v2293_v13, %v2294_v45  ;;  %v2281_v45 = vsel %vm11000_vm11, %v2278_v32, %v2279_v5  ;;  %6668 = vmatprep.subr.bf16.mxu1 %v7287_v40 }
 0x322   : > { %6627 = vmatmul.mubr.bf16.gmra.mrb[48].mxu0 %v2250_v56  ;;  %v2275_v56 = vrot.slane %v9223_v9, 3  ;;  %v2276_v9 = vrot.slane %v9211_v20, 3  ;;  %v2299_v20 = vsel %vm11000_vm11, %v2279_v5, %v2261_v41  ;;  %6669 = vmatpush3.bf16.msra.mxu1 %v7287_v40  ;;  %v7289_v41 = vld [vmem:[%s10844_s3 + $0x118] sm:$0xff]  }
 0x323   : > { %6646 = vmatprep.mubr.bf16.mxu0 %v2300_v54  ;;  %v2309_v10 = vpack.c.bf16 %v2299_v20, %v2299_v20  ;;  %6670 = vmatprep.subr.bf16.mxu1 %v7288_v11 }
 0x324   : > { %v2285_v54 = vsel %vm11000_vm11, %v2274_v57, %v2275_v56  ;;  %v2283_v13 = vsel %vm11000_vm11, %v2276_v9, %v2277_v51  ;;  %v2284_v59 = vsel %vm11000_vm11, %v2275_v56, %v2276_v9 }
 0x325   : > { %v2306_v36 = vpack.c.bf16 %v2285_v54, %v2286_v39 }
 0x326   : > { %6671 = vmatpush3.bf16.msra.mxu1 %v7288_v11 }
 0x327   : > { %6672 = vmatprep.subr.bf16.mxu1 %v7289_v41 }
 0x32a   : > { %6647 = vmatmul.mubr.bf16.vlgmr.msra.gmra.mrb[28].mxu0 %v2301_v47  ;;  %v2307_v47 = vpack.c.bf16 %v2283_v13, %v2284_v59  ;;  %6673 = vmatpush3.bf16.msra.mxu1 %v7289_v41 }
 0x32b   : > { %6650 = vmatprep.mubr.bf16.mxu0 %v2302_v31  ;;  %v2308_v31 = vpack.c.bf16 %v2281_v45, %v2282_v14  ;;  %6674 = vmatprep.subr.bf16.mxu1 %v7290_v7 }
 0x32e   : > { %6675 = vmatpush3.bf16.msra.mxu1 %v7290_v7 }
 0x32f   : > { %6676 = vmatprep.subr.bf16.mxu1 %v7291_v62 }
 0x332   : > { %6651 = vmatmul.mubr.bf16.gmra.mrb[32].mxu0 %v2303_v17  ;;  %6677 = vmatpush3.bf16.msra.mxu1 %v7291_v62 }
 0x333   : > { %6654 = vmatprep.mubr.bf16.mxu0 %v2304_v61  ;;  %6678 = vmatprep.subr.bf16.mxu1 %v7292_v27 }
 0x336   : > { %6679 = vmatpush3.bf16.msra.mxu1 %v7292_v27 }
 0x337   : > { %6680 = vmatprep.subr.bf16.mxu1 %v7293_v42 }
 0x33a   : > { %6655 = vmatmul.mubr.bf16.gmra.mrb[36].mxu0 %v2305_v15  ;;  %6681 = vmatpush3.bf16.msra.mxu1 %v7293_v42  ;;  %v9354_v15 = vld [vmem:[%s10843_s2 + $0x1] ss:$0 sm:$0xff] }
 0x33b   : > { %6658 = vmatprep.mubr.bf16.mxu0 %v2306_v36  ;;  %6702 = vmatprep.subr.bf16.mxu1 %v9342_v22 }
 0x342   : > { %6659 = vmatmul.mubr.bf16.gmra.mrb[40].mxu0 %v2307_v47 }
 0x343   : > { %6662 = vmatprep.mubr.bf16.mxu0 %v2308_v31 }
 0x34a   : > { %6663 = vmatmul.mubr.bf16.gmra.mrb[52].mxu0 %v2309_v10 }
 0x3cd   : > { %v6592_v12 = vpop.f32.mrb[44].mxu0 }
 0x3ce   : > { %v2490_v17 = vpop.f32.mrb[45].mxu0 }
 0x3cf   : > { %v6593_v61 = vpop.f32.mrb[46].mxu0 }
 0x3d0   : > { %v2493_v43 = vpop.f32.mrb[47].mxu0 }
 0x3f5   : > { %v6628_v57 = vpop.f32.mrb[48].mxu0 }
 0x3f6   : > { %v9345_v16 = vadd.f32 %v6628_v57, %v6592_v12  ;;  %v2650_v56 = vpop.f32.mrb[49].mxu0 }
 0x3f7   : > { %v9347_v0 = vadd.f32 %v2650_v56, %v2490_v17  ;;  %v6629_v54 = vpop.f32.mrb[50].mxu0 }
 0x3f8   : > { %v2653_v39 = vpop.f32.mrb[51].mxu0 }
 0x3f9   : > { %v9349_v4 = vadd.f32 %v2653_v39, %v2493_v43 }
 0x3fd   : > { %v6648_v36 = vpop.f32.mrb[28].mxu0 }
 0x3fe   : > { %v2870_v51 = vadd.f32 %v6648_v36, %v9354_v15  ;;  %v2763_v32 = vpop.f32.mrb[29].mxu0 }
 0x3ff   : > { %v2868_v9 = vadd.f32 %v9354_v15, %v2763_v32  ;;  %v6649_v5 = vpop.f32.mrb[30].mxu0 }
 0x400   : > { %vm2889_vm5 = vcmp.ge.f32.partialorder %v2870_v51, 0.0  ;;  %v2908_v13 = vmul.f32 0.1, %v2870_v51  ;;  %v2871_v45 = vadd.f32 %v6649_v5, %v9354_v15  ;;  %v2766_v14 = vpop.f32.mrb[31].mxu0 }
 0x401   : > { %vm2887_vm11 = vcmp.ge.f32.partialorder %v2868_v9, 0.0  ;;  %v2906_v59 = vmul.f32 0.1, %v2868_v9  ;;  %v2869_v47 = vadd.f32 %v9354_v15, %v2766_v14 }
 0x402   : > { %v2927_v31 = vsel %vm2889_vm5, %v2870_v51, %v2908_v13  ;;  %vm2890_vm2 = vcmp.ge.f32.partialorder %v2871_v45, 0.0  ;;  %v2909_v20 = vmul.f32 0.1, %v2871_v45 }
 0x403   : > { %v2946_v10 = vsel %vm11385_vm9, %v2927_v31, 0.0  ;;  %v2925_v25 = vsel %vm2887_vm11, %v2868_v9, %v2906_v59  ;;  %vm2888_vm14 = vcmp.ge.f32.partialorder %v2869_v47, 0.0  ;;  %v2907_v40 = vmul.f32 0.1, %v2869_v47  ;;  %v7295_v59 = vld [vmem:[%s10844_s3 + $0xc8] sm:$0xff]  }
 0x404   : > { %v9364_v11 = vsel %vm11375_vm13, %v2925_v25, 0.0  ;;  %v2928_v41 = vsel %vm2890_vm2, %v2871_v45, %v2909_v20  ;;  %v2965_v7 = vrot.slane %v2946_v10, 7  ;;  %v3023_v62 = vrot.slane %v2946_v10, 1 }
 0x405   : > { %v9368_v27 = vsel %vm11380_vm4, %v2928_v41, 0.0  ;;  %v5697_v42 = vpack.c.bf16 %v2928_v41, %v2927_v31  ;;  %v6652_v12 = vpop.f32.mrb[32].mxu0  ;;  %v2926_v43 = vsel %vm2888_vm14, %v2869_v47, %v2907_v40  ;;  %v11003_v54 = vrot.slane %v9364_v11, 7 }
 0x406   : > { %v11004_v17 = vrot.slane %v9368_v27, 7  ;;  %v3024_v61 = vrot.slane %v9368_v27, 1  ;;  %v2874_v57 = vadd.f32 %v6652_v12, %v9354_v15  ;;  %v2779_v56 = vpop.f32.mrb[33].mxu0  ;;  %v9376_v39 = vsel %vm11372_vm10, %v2926_v43, 0.0 }
 0x407   : > { %v5694_v36 = vpack.c.bf16 %v2926_v43, %v2925_v25  ;;  %v2872_v51 = vadd.f32 %v9354_v15, %v2779_v56  ;;  %v6653_v32 = vpop.f32.mrb[34].mxu0  ;;  %vm11412_vm2 = vcmp.lt.s32.totalorder %v7489_v21, 1  ;;  %vm11413_vm14 = vcmp.lt.s32.totalorder %v7489_v21, 7 }
 0x408   : > { %v9383_v9 = vsel %vm11412_vm2, %v2965_v7, %v11004_v17  ;;  %v9387_v5 = vsel %vm11413_vm14, %v3023_v62, %v3024_v61  ;;  %v2964_v13 = vrot.slane %v9376_v39, 7  ;;  %v11002_v45 = vrot.slane %v9376_v39, 1  ;;  %v2782_v14 = vpop.f32.mrb[35].mxu0  ;;  %vm11414_vm14 = vmmov %vm11412_vm2 }
 0x409   : > { %vm2893_vm5 = vcmp.ge.f32.partialorder %v2874_v57, 0.0  ;;  %v2912_v47 = vmul.f32 0.1, %v2874_v57  ;;  %vm2891_vm11 = vcmp.ge.f32.partialorder %v2872_v51, 0.0  ;;  %v2910_v31 = vmul.f32 0.1, %v2872_v51  ;;  %6682 = vmatprep.mubr.msk.bf16.mxu1 %vm11248_vm0, %v5694_v36 }
 0x40a   : > { %v9398_v20 = vsel %vm11412_vm2, %v2964_v13, %v2965_v7  ;;  %v2875_v10 = vadd.f32 %v6653_v32, %v9354_v15  ;;  %v2873_v25 = vadd.f32 %v9354_v15, %v2782_v14  ;;  %6683 = vmatmul.mubr.msk.bf16.vlgmr.msra.gmra.mrb[28].mxu1 %vm11353_vm1, %v5697_v42  ;;  %v9408_v40 = vsel %vm11414_vm14, %v11003_v54, %v2964_v13 }
 0x40b   : > { %v2931_v41 = vsel %vm2893_vm5, %v2874_v57, %v2912_v47  ;;  %v2929_v12 = vsel %vm2891_vm11, %v2872_v51, %v2910_v31  ;;  %6703 = vmatpush3.bf16.msra.mxu1 %v9342_v22  ;;  %vm11415_vm2 = vcmp.lt.s32.totalorder %v7489_v21, 7  ;;  %v7296_v22 = vld [vmem:[%s10844_s3 + $0xd0] sm:$0xff]  }
 0x40c   : > { %v9417_v43 = vsel %vm11415_vm2, %v11002_v45, %v3023_v62  ;;  %v9421_v42 = vsel %vm11387_vm15, %v2929_v12, 0.0  ;;  %vm2894_vm9 = vcmp.ge.f32.partialorder %v2875_v10, 0.0  ;;  %v2913_v56 = vmul.f32 0.1, %v2875_v10  ;;  %6704 = vmatprep.subr.bf16.mxu1 %v7295_v59  ;;  %vm11416_vm11 = vmmov %vm11415_vm2 }
 0x40d   : > { %v9429_v36 = vsel %vm11393_vm3, %v2931_v41, 0.0  ;;  %v11005_v51 = vrot.slane %v9421_v42, 1  ;;  %v6656_v32 = vpop.f32.mrb[36].mxu0  ;;  %vm2892_vm5 = vcmp.ge.f32.partialorder %v2873_v25, 0.0  ;;  %v2911_v14 = vmul.f32 0.1, %v2873_v25 }
 0x40e   : > { %v2932_v13 = vsel %vm2894_vm9, %v2875_v10, %v2913_v56  ;;  %v2878_v47 = vadd.f32 %v6656_v32, %v9354_v15  ;;  %v2795_v31 = vpop.f32.mrb[37].mxu0  ;;  %vm11419_vm2 = vcmp.lt.s32.totalorder %v7489_v21, 1  ;;  %vm11425_vm3 = vnez %v11407_v6 }
 0x40f   : > { %v9438_v7 = vsel %vm11416_vm11, %v3024_v61, %v11005_v51  ;;  %v9442_v57 = vsel %vm11389_vm6, %v2932_v13, 0.0  ;;  %v5703_v45 = vpack.c.bf16 %v2932_v13, %v2931_v41  ;;  %v2876_v54 = vadd.f32 %v9354_v15, %v2795_v31  ;;  %v6657_v17 = vpop.f32.mrb[38].mxu0  ;;  %6705 = vmatpush3.bf16.msra.mxu1 %v7295_v59  ;;  %v7297_v61 = vld [vmem:[%s10844_s3 + $0xd8] sm:$0xff]  }
 0x410   : > { %v2930_v32 = vsel %vm2892_vm5, %v2873_v25, %v2911_v14  ;;  %vm2897_vm9 = vcmp.ge.f32.partialorder %v2878_v47, 0.0  ;;  %v2798_v62 = vpop.f32.mrb[39].mxu0  ;;  %6706 = vmatprep.subr.bf16.mxu1 %v7296_v22  ;;  %v2916_v13 = vmul.f32 0.1, %v2878_v47  ;;  %v2879_v25 = vadd.f32 %v6657_v17, %v9354_v15 }
 0x411   : > { %v9452_v51 = vsel %vm11382_vm8, %v2930_v32, 0.0  ;;  %v5700_v41 = vpack.c.bf16 %v2930_v32, %v2929_v12  ;;  %vm2895_vm14 = vcmp.ge.f32.partialorder %v2876_v54, 0.0  ;;  %v2914_v56 = vmul.f32 0.1, %v2876_v54 }
 0x412   : > { %v2935_v10 = vsel %vm2897_vm9, %v2878_v47, %v2916_v13  ;;  %v2877_v34 = vadd.f32 %v9354_v15, %v2798_v62  ;;  %v11417_v12 = vrot.slane %v9421_v42, 7  ;;  %v11418_v32 = vrot.slane %v9368_v27, 7  ;;  %v7299_v13 = vld [vmem:[%s10844_s3 + $0xe8] sm:$0xff]  }
 0x413   : > { %6686 = vmatprep.mubr.msk.bf16.mxu1 %vm11251_vm7, %v5700_v41  ;;  %6707 = vmatpush3.bf16.msra.mxu1 %v7296_v22  ;;  %v9471_v17 = vsel %vm11400_vm12, %v2935_v10, 0.0  ;;  %v2933_v31 = vsel %vm2895_vm14, %v2876_v54, %v2914_v56  ;;  %vm2898_vm5 = vcmp.ge.f32.partialorder %v2879_v25, 0.0  ;;  %v2917_v47 = vmul.f32 0.1, %v2879_v25  ;;  %v7298_v22 = vld [vmem:[%s10844_s3 + $0xe0] sm:$0xff]  }
 0x414   : > { %v9467_v59 = vsel %vm11419_vm2, %v11418_v32, %v11417_v12  ;;  %vm11420_vm11 = vnez %v11110_v29  ;;  %6708 = vmatprep.subr.bf16.mxu1 %v7297_v61  ;;  %vm11421_vm9 = vnez %v11394_v23  ;;  %vm2896_vm2 = vcmp.ge.f32.partialorder %v2877_v34, 0.0 }
 0x415   : > { %6687 = vmatmul.mubr.msk.bf16.gmra.mrb[32].mxu1 %vm11420_vm11, %v5703_v45  ;;  %v9482_v41 = vsel %vm11421_vm9, %v2933_v31, 0.0  ;;  %v6660_v54 = vpop.f32.mrb[40].mxu0  ;;  %v2936_v45 = vsel %vm2898_vm5, %v2879_v25, %v2917_v47  ;;  %v2915_v12 = vmul.f32 0.1, %v2877_v34  ;;  %vm11422_vm14 = vnez %v11396_v38 }
 0x416   : > { %v2811_v32 = vpop.f32.mrb[41].mxu0  ;;  %v9488_v14 = vsel %vm11422_vm14, %v2936_v45, 0.0  ;;  %v5709_v27 = vpack.c.bf16 %v2936_v45, %v2935_v10  ;;  %v2882_v62 = vadd.f32 %v6660_v54, %v9354_v15  ;;  %vm11423_vm5 = vnez %v11390_v49 }
 0x417   : > { %v2880_v53 = vadd.f32 %v9354_v15, %v2811_v32  ;;  %v6661_v23 = vpop.f32.mrb[42].mxu0  ;;  %6709 = vmatpush3.bf16.msra.mxu1 %v7297_v61  ;;  %v2934_v26 = vsel %vm2896_vm2, %v2877_v34, %v2915_v12  ;;  %vm11424_vm9 = vnez %v11114_v30  ;;  %vm11444_vm15 = vnez %v11284_v37 }
 0x418   : > { %v2883_v25 = vadd.f32 %v6661_v23, %v9354_v15  ;;  %v2814_v47 = vpop.f32.mrb[43].mxu0  ;;  %6710 = vmatprep.subr.bf16.mxu1 %v7298_v22  ;;  %v9500_v10 = vsel %vm11423_vm5, %v2934_v26, 0.0  ;;  %v5706_v54 = vpack.c.bf16 %v2934_v26, %v2933_v31  ;;  %vm2901_vm12 = vcmp.ge.f32.partialorder %v2882_v62, 0.0 }
 0x419   : > { %v2920_v61 = vmul.f32 0.1, %v2882_v62  ;;  %vm2899_vm2 = vcmp.ge.f32.partialorder %v2880_v53, 0.0  ;;  %v2918_v34 = vmul.f32 0.1, %v2880_v53  ;;  %v2881_v28 = vadd.f32 %v9354_v15, %v2814_v47 }
 0x41a   : > { %vm2902_vm14 = vcmp.ge.f32.partialorder %v2883_v25, 0.0  ;;  %v2921_v12 = vmul.f32 0.1, %v2883_v25  ;;  %6690 = vmatprep.mubr.msk.bf16.mxu1 %vm11424_vm9, %v5706_v54  ;;  %vm11426_vm5 = vnez %v11263_v55  ;;  %v11428_v47 = vrot.slane %v9421_v42, 7 }
 0x41b   : > { %v2939_v23 = vsel %vm2901_vm12, %v2882_v62, %v2920_v61  ;;  %6711 = vmatpush3.bf16.msra.mxu1 %v7298_v22  ;;  %v2937_v31 = vsel %vm2899_vm2, %v2880_v53, %v2918_v34  ;;  %v7300_v62 = vld [vmem:[%s10844_s3 + $0xf0] sm:$0xff]   ;;  %v11427_v61 = vrot.slane %v9452_v51, 7  ;;  %vm11429_vm12 = vcmp.lt.s32.totalorder %v7489_v21, 1 }
 0x41c   : > { %v9509_v26 = vsel %vm11425_vm3, %v2939_v23, 0.0  ;;  %6712 = vmatprep.subr.bf16.mxu1 %v7299_v13  ;;  %v11430_v54 = vrot.slane %v9442_v57, 7  ;;  %v11431_v53 = vrot.slane %v9429_v36, 7  ;;  %vm11432_vm2 = vmmov %vm11429_vm12  ;;  %vm11433_vm3 = vnez %v11401_v18 }
 0x41d   : > { %6691 = vmatmul.mubr.msk.bf16.gmra.mrb[36].mxu1 %vm11426_vm5, %v5709_v27  ;;  %v9522_v22 = vsel %vm11429_vm12, %v11428_v47, %v11427_v61  ;;  %v9536_v56 = vsel %vm11433_vm3, %v2937_v31, 0.0  ;;  %v2940_v32 = vsel %vm2902_vm14, %v2883_v25, %v2921_v12  ;;  %v6664_v6 = vpop.f32.mrb[52].mxu0  ;;  %vm11434_vm12 = vnez %v11403_v35  ;;  %v7301_v35 = vld [vmem:[%s10844_s3 + $0xf8] sm:$0xff]  }
 0x41e   : > { %v9530_v27 = vsel %vm11432_vm2, %v11431_v53, %v11430_v54  ;;  %v2975_v47 = vrot.slane %v9536_v56, 7  ;;  %v9542_v38 = vsel %vm11434_vm12, %v2940_v32, 0.0  ;;  %v5715_v54 = vpack.c.bf16 %v2940_v32, %v2939_v23  ;;  %v2827_v53 = vpop.f32.mrb[53].mxu0 }
 0x41f   : > { %vm2900_vm2 = vcmp.ge.f32.partialorder %v2881_v28, 0.0  ;;  %v2919_v18 = vmul.f32 0.1, %v2881_v28  ;;  %v6665_v49 = vpop.f32.mrb[54].mxu0  ;;  %6713 = vmatpush3.bf16.msra.mxu1 %v7299_v13  ;;  %v2859_v25 = vadd.f32 %v6664_v6, %v9345_v16  ;;  %v2857_v12 = vadd.f32 %v2827_v53, %v9347_v0 }
 0x420   : > { %v2830_v61 = vpop.f32.mrb[55].mxu0  ;;  %6714 = vmatprep.subr.bf16.mxu1 %v7300_v62  ;;  %v11435_v23 = vrot.slane %v9429_v36, 7  ;;  %v11436_v34 = vrot.slane %v9452_v51, 7  ;;  %vm11437_vm14 = vcmp.lt.s32.totalorder %v7489_v21, 1  ;;  %v11438_v13 = vrot.slane %v9500_v10, 7 }
 0x421   : > { %v2938_v6 = vsel %vm2900_vm2, %v2881_v28, %v2919_v18  ;;  %v2858_v16 = vadd.f32 %v2830_v61, %v9349_v4  ;;  %v11439_v53 = vrot.slane %v9482_v41, 7  ;;  %vm11440_vm12 = vmmov %vm11437_vm14  ;;  %vm11441_vm3 = vnez %v11398_v44 }
 0x422   : > { %v9559_v49 = vsel %vm11437_vm14, %v11436_v34, %v11435_v23  ;;  %v9574_v45 = vsel %vm11441_vm3, %v2938_v6, 0.0  ;;  %v5712_v34 = vpack.c.bf16 %v2938_v6, %v2937_v31  ;;  %v2886_v18 = vadd.f32 %v9354_v15, %v2859_v25  ;;  %vm11449_vm8 = vmmov %vm11440_vm12 }
 0x423   : > { %v9570_v32 = vsel %vm11440_vm12, %v11439_v53, %v11438_v13  ;;  %v2884_v28 = vadd.f32 %v9354_v15, %v2857_v12  ;;  %v2976_v61 = vrot.slane %v9574_v45, 7  ;;  %v2885_v23 = vadd.f32 %v9354_v15, %v2858_v16  ;;  %6715 = vmatpush3.bf16.msra.mxu1 %v7300_v62  ;;  %v9584_v13 = vld [vmem:[%s10844_s3 + $0x140] sm:$0xff]   ;;  %vm11450_vm4 = vmmov %vm11449_vm8 }
 0x424   : > { %v11442_v31 = vrot.slane %v9442_v57, 7  ;;  %vm2905_vm2 = vcmp.ge.f32.partialorder %v2886_v18, 0.0  ;;  %v2924_v12 = vmul.f32 0.1, %v2886_v18  ;;  %vm11443_vm3 = vnez %v11268_v3  ;;  %6716 = vmatprep.subr.bf16.mxu1 %v7301_v35 }
 0x425   : > { %vm2903_vm14 = vcmp.ge.f32.partialorder %v2884_v28, 0.0  ;;  %v2922_v6 = vmul.f32 0.1, %v2884_v28  ;;  %6694 = vmatprep.mubr.msk.bf16.mxu1 %vm11443_vm3, %v5712_v34  ;;  %vm2904_vm6 = vcmp.ge.f32.partialorder %v2885_v23, 0.0  ;;  %v2923_v15 = vmul.f32 0.1, %v2885_v23 }
 0x426   : > { %v9592_v25 = vsel %vm11440_vm12, %v11442_v31, %v11439_v53  ;;  %6695 = vmatmul.mubr.msk.bf16.gmra.mrb[40].mxu1 %vm11444_vm15, %v5715_v54  ;;  %v11445_v16 = vrot.slane %v9488_v14, 7  ;;  %v11446_v53 = vrot.slane %v9471_v17, 7  ;;  %v2943_v0 = vsel %vm2905_vm2, %v2886_v18, %v2924_v12 }
 0x427   : > { %v2941_v4 = vsel %vm2903_vm14, %v2884_v28, %v2922_v6  ;;  %v11448_v44 = vrot.slane %v9500_v10, 7  ;;  %v9618_v62 = vsel %vm11450_vm4, %v2975_v47, %v2976_v61  ;;  %v3034_v24 = vrot.slane %v9574_v45, 1  ;;  %6717 = vmatpush3.bf16.msra.mxu1 %v7301_v35 }
 0x428   : > { %v9606_v31 = vsel %vm11440_vm12, %v11446_v53, %v11445_v16  ;;  %v11447_v34 = vmov %v11446_v53  ;;  %vm11451_vm15 = vnez %v11378_v1  ;;  %vm11452_vm2 = vnez %v11409_v2  ;;  %6738 = vmatprep.subr.bf16.mxu1 %v9584_v13  ;;  %vm11460_vm12 = vmmov %vm11450_vm4 }
 0x429   : > { %v9614_v54 = vsel %vm11449_vm8, %v11448_v44, %v11447_v34  ;;  %v2962_v16 = vsel %vm11451_vm15, %v2943_v0, 0.0  ;;  %v2960_v18 = vsel %vm11452_vm2, %v2941_v4, 0.0  ;;  %v2942_v28 = vsel %vm2904_vm6, %v2885_v23, %v2923_v15  ;;  %vm11456_vm6 = vmmov %vm11450_vm4 }
 0x42a   : > { %v2981_v12 = vrot.slane %v2962_v16, 7  ;;  %v3039_v6 = vrot.slane %v2962_v16, 1  ;;  %v2979_v53 = vrot.slane %v2960_v18, 7  ;;  %v5721_v63 = vpack.c.bf16 %v2943_v0, %v2943_v0  ;;  %vm11464_vm2 = vmmov %vm11450_vm4 }
 0x42b   : > { %vm11453_vm8 = vnez %v11405_v58  ;;  %v5718_v34 = vpack.c.bf16 %v2942_v28, %v2941_v4  ;;  %v3006_v45 = vpack.c.bf16 %v9606_v31, %v9614_v54  ;;  %v11454_v8 = vrot.slane %v9488_v14, 7 }
 0x42c   : > { %v2961_v44 = vsel %vm11453_vm8, %v2942_v28, 0.0  ;;  %v3037_v23 = vrot.slane %v2960_v18, 1  ;;  %v11455_v15 = vrot.slane %v9364_v11, 7  ;;  %vm11457_vm14 = vnez %v11296_v52  ;;  %vm11465_vm8 = vmmov %vm11464_vm2 }
 0x42d   : > { %v2988_v2 = vsel %vm11450_vm4, %v11454_v8, %v2975_v47  ;;  %v2980_v35 = vrot.slane %v2961_v44, 7  ;;  %6698 = vmatprep.mubr.msk.bf16.mxu1 %vm11457_vm14, %v5718_v34  ;;  %v11458_v31 = vrot.slane %v9542_v38, 7  ;;  %v11459_v54 = vrot.slane %v9509_v26, 7 }
 0x42e   : > { %v3000_v0 = vsel %vm11456_vm6, %v2981_v12, %v11455_v15  ;;  %v3007_v16 = vpack.c.bf16 %v9618_v62, %v2988_v2  ;;  %vm11463_vm6 = vmmov %vm11450_vm4  ;;  %v11466_v15 = vrot.slane %v9376_v39, 1  ;;  %v11471_v39 = vrot.slane %v9452_v51, 1 }
 0x42f   : > { %v3001_v4 = vpack.c.bf16 %v9408_v40, %v3000_v0  ;;  %v2985_v8 = vsel %vm11460_vm12, %v11459_v54, %v11458_v31  ;;  %v11461_v47 = vmov %v11459_v54  ;;  %v11462_v28 = vmov %v11458_v31 }
 0x430   : > { %v2986_v18 = vsel %vm11450_vm4, %v2976_v61, %v11461_v47  ;;  %v2984_v2 = vsel %vm11463_vm6, %v11462_v28, %v2979_v53  ;;  %v2983_v40 = vsel %vm11464_vm2, %v2979_v53, %v2980_v35  ;;  %v2982_v34 = vsel %vm11465_vm8, %v2980_v35, %v2981_v12 }
 0x431   : > { %v3008_v62 = vpack.c.bf16 %v2985_v8, %v2986_v18  ;;  %v11467_v0 = vrot.slane %v9364_v11, 1  ;;  %vm11468_vm12 = vcmp.lt.s32.totalorder %v7489_v21, 7  ;;  %v3038_v61 = vrot.slane %v2961_v44, 1 }
 0x432   : > { %vm11469_vm4 = vnez %v11323_v50  ;;  %v3009_v54 = vpack.c.bf16 %v2983_v40, %v2984_v2  ;;  %v3060_v53 = vpack.c.bf16 %v9438_v7, %v9387_v5  ;;  %v11470_v12 = vrot.slane %v9429_v36, 1  ;;  %vm11472_vm2 = vmmov %vm11468_vm12 }
 0x433   : > { %v3057_v31 = vsel %vm11468_vm12, %v11467_v0, %v11466_v15  ;;  %6699 = vmatmul.mubr.msk.bf16.gmra.mrb[44].mxu1 %vm11469_vm4, %v5721_v63  ;;  %v11473_v47 = vmov %v11471_v39  ;;  %v11474_v44 = vrot.slane %v9421_v42, 1  ;;  %vm11475_vm8 = vmmov %vm11472_vm2  ;;  %v11477_v18 = vrot.slane %v9442_v57, 1 }
 0x434   : > { %v3059_v8 = vpack.c.bf16 %v9417_v43, %v3057_v31  ;;  %6718 = vmatprep.mubr.bf16.mxu1 %v3001_v4  ;;  %v3052_v35 = vsel %vm11472_vm2, %v11471_v39, %v11470_v12  ;;  %v11476_v43 = vrot.slane %v9482_v41, 1  ;;  %vm11478_vm6 = vmmov %vm11472_vm2  ;;  %v11480_v4 = vmov %v11470_v12 }
 0x435   : > { %v3053_v63 = vsel %vm11475_vm8, %v11474_v44, %v11473_v47  ;;  %v11479_v7 = vmov %v11477_v18  ;;  %vm11481_vm12 = vmmov %vm11472_vm2  ;;  %v11482_v42 = vrot.slane %v9471_v17, 1  ;;  %v11483_v40 = vrot.slane %v9500_v10, 1 }
 0x436   : > { %v3050_v5 = vsel %vm11478_vm6, %v11477_v18, %v11476_v43  ;;  %v3051_v28 = vsel %vm11481_vm12, %v11480_v4, %v11479_v7  ;;  %v3061_v51 = vpack.c.bf16 %v3052_v35, %v3053_v63  ;;  %v11485_v31 = vmov %v11476_v43  ;;  %vm11486_vm8 = vmmov %vm11472_vm2 }
 0x437   : > { %v3062_v2 = vpack.c.bf16 %v3050_v5, %v3051_v28  ;;  %v3048_v15 = vsel %vm11472_vm2, %v11483_v40, %v11482_v42  ;;  %v11484_v0 = vmov %v11483_v40  ;;  %v11487_v12 = vrot.slane %v9536_v56, 1  ;;  %vm11489_vm6 = vmmov %vm11472_vm2 }
 0x438   : > { %v3049_v57 = vsel %vm11486_vm8, %v11485_v31, %v11484_v0  ;;  %v11488_v39 = vrot.slane %v9488_v14, 1  ;;  %v11491_v44 = vmov %v11482_v42  ;;  %vm11492_vm12 = vmmov %vm11472_vm2  ;;  %v11493_v41 = vrot.slane %v9509_v26, 1 }
 0x439   : > { %v3063_v36 = vpack.c.bf16 %v3048_v15, %v3049_v57  ;;  %v11494_v18 = vmov %v11487_v12  ;;  %vm11495_vm8 = vmmov %vm11472_vm2  ;;  %v11496_v7 = vrot.slane %v9542_v38, 1  ;;  %v3040_v56 = vsel %vm11472_vm2, %v3038_v61, %v3039_v6  ;;  %v7303_v15 = vld [vmem:[%s10844_s3 + $0x148] sm:$0xff]  }
 0x43a   : > { %v3046_v35 = vsel %vm11489_vm6, %v11488_v39, %v11487_v12  ;;  %v11490_v47 = vmov %v11488_v39  ;;  %v3044_v63 = vsel %vm11472_vm2, %v3034_v24, %v11493_v41  ;;  %v3045_v5 = vsel %vm11495_vm8, %v11494_v18, %v3034_v24  ;;  %vm11497_vm6 = vmmov %vm11472_vm2 }
 0x43b   : > { %v3047_v10 = vsel %vm11492_vm12, %v11491_v44, %v11490_v47  ;;  %v3042_v14 = vsel %vm11497_vm6, %v11496_v7, %v3037_v23  ;;  %v11498_v17 = vmov %v11496_v7  ;;  %v11499_v4 = vmov %v11493_v41  ;;  %vm11500_vm12 = vmmov %vm11472_vm2 }
 0x43c   : > { %v3064_v43 = vpack.c.bf16 %v3046_v35, %v3047_v10  ;;  %v3043_v28 = vsel %vm11500_vm12, %v11499_v4, %v11498_v17  ;;  %v3065_v42 = vpack.c.bf16 %v3044_v63, %v3045_v5  ;;  %vm11501_vm4 = vmmov %vm11472_vm2  ;;  %v11502_v38 = vrot.slane %v9364_v11, 1  ;;  %v7305_v11 = vld [vmem:[%s10844_s3 + $0x158] sm:$0xff]   ;;  %v9818_v63 = vld [vmem:[%s10845_s4 + $0x1] ss:$0 sm:$0xff] }
 0x43d   : > { %v3066_v40 = vpack.c.bf16 %v3042_v14, %v3043_v28  ;;  %v3041_v24 = vsel %vm11501_vm4, %v3037_v23, %v3038_v61  ;;  %vm11503_vm8 = vmmov %vm11472_vm2  ;;  %v11504_v31 = vpack.c.bf16 %v9383_v9, %v9398_v20  ;;  %v11505_v57 = vpack.c.bf16 %v9522_v22, %v9467_v59  ;;  %v7304_v23 = vld [vmem:[%s10844_s3 + $0x150] sm:$0xff]   ;;  %v7306_v59 = vld [vmem:[%s10844_s3 + $0x160] sm:$0xff]  }
 0x43e   : > { %v3067_v0 = vpack.c.bf16 %v3040_v56, %v3041_v24  ;;  %v3058_v26 = vsel %vm11503_vm8, %v3039_v6, %v11502_v38  ;;  %v11506_v9 = vpack.c.bf16 %v9530_v27, %v9559_v49  ;;  %v11507_v20 = vpack.c.bf16 %v9570_v32, %v9592_v25  ;;  %v7307_v22 = vld [vmem:[%s10844_s3 + $0x168] sm:$0xff]   ;;  %v7308_v27 = vld [vmem:[%s10844_s3 + $0x170] sm:$0xff]   ;;  %v7309_v32 = vld [vmem:[%s10844_s3 + $0x178] sm:$0xff]  }
 0x43f   : > { %6719 = vmatmul.mubr.bf16.vlgmr.msra.gmra.mrb[28].mxu1 %v11504_v31  ;;  %v3010_v49 = vpack.c.bf16 %v2982_v34, %v2982_v34  ;;  %v7310_v25 = vld [vmem:[%s10842_s1 + $0x1c0] sm:$0xff]   ;;  %v7311_v6 = vld [vmem:[%s10842_s1 + $0x1c8] sm:$0xff]   ;;  %v7316_v61 = vld [vmem:[%s10842_s1 + $0x1f0] sm:$0xff]  }
 0x440   : > { %6722 = vmatprep.mubr.bf16.mxu1 %v11505_v57  ;;  %6739 = vmatpush3.bf16.msra.mxu1 %v9584_v13  ;;  %v3068_v13 = vpack.c.bf16 %v3058_v26, %v3058_v26  ;;  %v7315_v34 = vld [vmem:[%s10842_s1 + $0x1e8] sm:$0xff]   ;;  %v11510_v56 = vld [vmem:[#allocation38_spill] sm:$0xff] }
 0x441   : > { %6740 = vmatprep.subr.bf16.mxu1 %v7303_v15  ;;  %6774 = vmatprep.subr.bf16.mxu0 %v7310_v25  ;;  %v11508_v17 = vld [vmem:[#allocation37_spill] sm:$0xff] }
 0x442   : > { %6775 = vmatpush3.bf16.msra.mxu0 %v7310_v25  ;;  %v11513_v38 = vld [vmem:[#allocation45_spill] sm:$0xff] }
 0x443   : > { %6776 = vmatprep.subr.bf16.mxu0 %v7311_v6 }
 0x444   : > { %6741 = vmatpush3.bf16.msra.mxu1 %v7303_v15  ;;  %v11511_v15 = vld [vmem:[#allocation44_spill] sm:$0xff] }
 0x445   : > { %6742 = vmatprep.subr.bf16.mxu1 %v7304_v23 }
 0x446   : > { %6777 = vmatpush3.bf16.msra.mxu0 %v7311_v6 }
 0x447   : > { %6723 = vmatmul.mubr.bf16.gmra.mrb[32].mxu1 %v11506_v9 }
 0x448   : > { %6726 = vmatprep.mubr.bf16.mxu1 %v11507_v20  ;;  %6743 = vmatpush3.bf16.msra.mxu1 %v7304_v23 }
 0x449   : > { %6744 = vmatprep.subr.bf16.mxu1 %v7305_v11 }
 0x44c   : > { %6745 = vmatpush3.bf16.msra.mxu1 %v7305_v11 }
 0x44d   : > { %6746 = vmatprep.subr.bf16.mxu1 %v7306_v59 }
 0x44f   : > { %6727 = vmatmul.mubr.bf16.gmra.mrb[36].mxu1 %v3006_v45  ;;  %v7312_v45 = vld [vmem:[%s10842_s1 + $0x1d0] sm:$0xff]  }
 0x450   : > { %6730 = vmatprep.mubr.bf16.mxu1 %v3007_v16  ;;  %6747 = vmatpush3.bf16.msra.mxu1 %v7306_v59  ;;  %v7313_v16 = vld [vmem:[%s10842_s1 + $0x1d8] sm:$0xff]  }
 0x451   : > { %6748 = vmatprep.subr.bf16.mxu1 %v7307_v22  ;;  %6778 = vmatprep.subr.bf16.mxu0 %v7312_v45 }
 0x452   : > { %6779 = vmatpush3.bf16.msra.mxu0 %v7312_v45 }
 0x453   : > { %6780 = vmatprep.subr.bf16.mxu0 %v7313_v16 }
 0x454   : > { %6749 = vmatpush3.bf16.msra.mxu1 %v7307_v22 }
 0x455   : > { %6750 = vmatprep.subr.bf16.mxu1 %v7308_v27 }
 0x456   : > { %6781 = vmatpush3.bf16.msra.mxu0 %v7313_v16 }
 0x457   : > { %6731 = vmatmul.mubr.bf16.gmra.mrb[40].mxu1 %v3008_v62  ;;  %v7314_v62 = vld [vmem:[%s10842_s1 + $0x1e0] sm:$0xff]  }
 0x458   : > { %6734 = vmatprep.mubr.bf16.mxu1 %v3009_v54  ;;  %6751 = vmatpush3.bf16.msra.mxu1 %v7308_v27  ;;  %v7317_v54 = vld [vmem:[%s10842_s1 + $0x1f8] sm:$0xff]  }
 0x459   : > { %6752 = vmatprep.subr.bf16.mxu1 %v7309_v32  ;;  %6782 = vmatprep.subr.bf16.mxu0 %v7314_v62 }
 0x45a   : > { %6783 = vmatpush3.bf16.msra.mxu0 %v7314_v62  ;;  %v11515_v62 = vld [vmem:[#allocation7_spill] sm:$0xff] }
 0x45b   : > { %6784 = vmatprep.subr.bf16.mxu0 %v7315_v34 }
 0x45c   : > { %6753 = vmatpush3.bf16.msra.mxu1 %v7309_v32 }
 0x45e   : > { %6785 = vmatpush3.bf16.msra.mxu0 %v7315_v34 }
 0x45f   : > { %6735 = vmatmul.mubr.bf16.gmra.mrb[48].mxu1 %v3010_v49  ;;  %6786 = vmatprep.subr.bf16.mxu0 %v7316_v61 }
 0x460   : > { %6754 = vmatprep.mubr.bf16.mxu1 %v3059_v8  ;;  %v9806_v8 = vld [vmem:[%s10842_s1 + $0x180] sm:$0xff]  }
 0x462   : > { %6787 = vmatpush3.bf16.msra.mxu0 %v7316_v61  ;;  %v11517_v61 = vld [vmem:[#allocation9_spill] sm:$0xff] }
 0x463   : > { %6788 = vmatprep.subr.bf16.mxu0 %v7317_v54 }
 0x466   : > { %6789 = vmatpush3.bf16.msra.mxu0 %v7317_v54 }
 0x467   : > { %6755 = vmatmul.mubr.bf16.vlgmr.msra.gmra.mrb[28].mxu1 %v3060_v53  ;;  %6810 = vmatprep.subr.bf16.mxu0 %v9806_v8 }
 0x468   : > { %6758 = vmatprep.mubr.bf16.mxu1 %v3061_v51 }
 0x46f   : > { %6759 = vmatmul.mubr.bf16.gmra.mrb[32].mxu1 %v3062_v2 }
 0x470   : > { %6762 = vmatprep.mubr.bf16.mxu1 %v3063_v36 }
 0x477   : > { %6763 = vmatmul.mubr.bf16.gmra.mrb[36].mxu1 %v3064_v43 }
 0x478   : > { %6766 = vmatprep.mubr.bf16.mxu1 %v3065_v42 }
 0x47f   : > { %6767 = vmatmul.mubr.bf16.gmra.mrb[40].mxu1 %v3066_v40 }
 0x480   : > { %6770 = vmatprep.mubr.bf16.mxu1 %v3067_v0 }
 0x487   : > { %6771 = vmatmul.mubr.bf16.gmra.mrb[52].mxu1 %v3068_v13 }
 0x506   : > { %v6700_v53 = vpop.f32.mrb[44].mxu1 }
 0x507   : > { %v3249_v51 = vpop.f32.mrb[45].mxu1 }
 0x508   : > { %v6701_v2 = vpop.f32.mrb[46].mxu1 }
 0x509   : > { %v3252_v36 = vpop.f32.mrb[47].mxu1  ;;  %v11521_v2 = vld [vmem:[#allocation8_spill] sm:$0xff] }
 0x532   : > { %v6736_v12 = vpop.f32.mrb[48].mxu1 }
 0x533   : > { %v9809_v39 = vadd.f32 %v6736_v12, %v6700_v53  ;;  %v3409_v35 = vpop.f32.mrb[49].mxu1  ;;  %v11519_v53 = vld [vmem:[#allocation10_spill] sm:$0xff] }
 0x534   : > { %v9811_v47 = vadd.f32 %v3409_v35, %v3249_v51  ;;  %v6737_v44 = vpop.f32.mrb[50].mxu1 }
 0x535   : > { %v3412_v10 = vpop.f32.mrb[51].mxu1 }
 0x536   : > { %v9813_v41 = vadd.f32 %v3412_v10, %v3252_v36  ;;  %v7319_v10 = vld [vmem:[%s10842_s1 + $0x188] sm:$0xff]  }
 0x53a   : > { %v6756_v43 = vpop.f32.mrb[28].mxu1 }
 0x53b   : > { %v3629_v18 = vadd.f32 %v6756_v43, %v9818_v63  ;;  %v3522_v5 = vpop.f32.mrb[29].mxu1 }
 0x53c   : > { %v3627_v7 = vadd.f32 %v9818_v63, %v3522_v5  ;;  %v6757_v14 = vpop.f32.mrb[30].mxu1 }
 0x53d   : > { %v9823_v4 = vadd.f32 %v3629_v18, %v11508_v17  ;;  %v3630_v28 = vadd.f32 %v6757_v14, %v9818_v63  ;;  %v3525_v42 = vpop.f32.mrb[31].mxu1 }
 0x53e   : > { %v3628_v40 = vadd.f32 %v9818_v63, %v3525_v42  ;;  %v3646_v24 = vadd.f32 %v3627_v7, %v11510_v56 }
 0x53f   : > { %11509 = vst [vmem:[#allocation26_spill] sm:$0xff] %v9823_v4  ;;  %v9829_v0 = vadd.f32 %v3630_v28, %v11511_v15  ;;  %v3686_v31 = vmul.f32 0.1, %v9823_v4  ;;  %vm3667_vm12 = vcmp.ge.f32.partialorder %v9823_v4, 0.0  ;;  %v7320_v15 = vld [vmem:[%s10842_s1 + $0x190] sm:$0xff]  }
 0x540   : > { %v9832_v26 = vadd.f32 %v3628_v40, %v11513_v38  ;;  %v3684_v9 = vmul.f32 0.1, %v3646_v24  ;;  %vm3665_vm2 = vcmp.ge.f32.partialorder %v3646_v24, 0.0 }
 0x541   : > { %11512 = vst [vmem:[#allocation39_spill] sm:$0xff] %v9829_v0  ;;  %v3687_v57 = vmul.f32 0.1, %v9829_v0  ;;  %vm3668_vm4 = vcmp.ge.f32.partialorder %v9829_v0, 0.0  ;;  %v9851_v45 = vsel %vm3667_vm12, %v9823_v4, %v3686_v31 }
 0x542   : > { %11514 = vst [vmem:[#allocation33_spill] sm:$0xff] %v9832_v26  ;;  %v3685_v23 = vmul.f32 0.1, %v9832_v26  ;;  %v6760_v11 = vpop.f32.mrb[32].mxu1  ;;  %vm3666_vm6 = vcmp.ge.f32.partialorder %v9832_v26, 0.0  ;;  %v9853_v16 = vsel %vm3665_vm2, %v3646_v24, %v3684_v9  ;;  %v11525_v9 = vld [vmem:[#allocation15_spill] sm:$0xff] }
 0x543   : > { %v3538_v20 = vpop.f32.mrb[33].mxu1  ;;  %v3633_v59 = vadd.f32 %v6760_v11, %v9818_v63  ;;  %v9843_v49 = vsel %vm3668_vm4, %v9829_v0, %v3687_v57  ;;  %v11523_v57 = vld [vmem:[#allocation11_spill] sm:$0xff]  ;;  %v11586_v0 = vld [vmem:[#allocation42_spill] sm:$0xff] }
 0x544   : > { %v6761_v22 = vpop.f32.mrb[34].mxu1  ;;  %v3631_v27 = vadd.f32 %v9818_v63, %v3538_v20  ;;  %v9848_v6 = vsel %vm3666_vm6, %v9832_v26, %v3685_v23  ;;  %v5801_v35 = vpack.c.bf16 %v9843_v49, %v9851_v45 }
 0x545   : > { %v3541_v32 = vpop.f32.mrb[35].mxu1  ;;  %v3634_v13 = vadd.f32 %v6761_v22, %v9818_v63  ;;  %v9859_v54 = vadd.f32 %v3633_v59, %v11517_v61  ;;  %v5798_v12 = vpack.c.bf16 %v9848_v6, %v9853_v16  ;;  %v11527_v59 = vld [vmem:[#allocation16_spill] sm:$0xff]  ;;  %v7321_v61 = vld [vmem:[%s10842_s1 + $0x198] sm:$0xff]  }
 0x546   : > { %v3632_v25 = vadd.f32 %v9818_v63, %v3541_v32  ;;  %v9856_v34 = vadd.f32 %v3631_v27, %v11515_v62 }
 0x547   : > { %11518 = vst [vmem:[#allocation46_spill] sm:$0xff] %v9859_v54  ;;  %v9862_v51 = vadd.f32 %v3634_v13, %v11519_v53  ;;  %6790 = vmatprep.mubr.msk.bf16.mxu0 %vm11248_vm0, %v5798_v12  ;;  %v3690_v7 = vmul.f32 0.1, %v9859_v54  ;;  %vm3671_vm12 = vcmp.ge.f32.partialorder %v9859_v54, 0.0  ;;  %v11529_v13 = vld [vmem:[#allocation12_spill] sm:$0xff] }
 0x548   : > { %11516 = vst [vmem:[#allocation35_spill] sm:$0xff] %v9856_v34  ;;  %v9865_v36 = vadd.f32 %v3632_v25, %v11521_v2  ;;  %vm3669_vm8 = vcmp.ge.f32.partialorder %v9856_v34, 0.0  ;;  %v3688_v44 = vmul.f32 0.1, %v9856_v34  ;;  %6791 = vmatmul.mubr.msk.bf16.vlgmr.msra.gmra.mrb[56].mxu0 %vm11353_vm1, %v5801_v35 }
 0x549   : > { %11520 = vst [vmem:[#allocation43_spill] sm:$0xff] %v9862_v51  ;;  %v3691_v43 = vmul.f32 0.1, %v9862_v51  ;;  %vm3672_vm6 = vcmp.ge.f32.partialorder %v9862_v51, 0.0  ;;  %6811 = vmatpush3.bf16.msra.mxu0 %v9806_v8  ;;  %v9919_v27 = vsel %vm3671_vm12, %v9859_v54, %v3690_v7 }
 0x54a   : > { %11522 = vst [vmem:[#allocation37_spill] sm:$0xff] %v9865_v36  ;;  %vm3670_vm4 = vcmp.ge.f32.partialorder %v9865_v36, 0.0  ;;  %v3689_v18 = vmul.f32 0.1, %v9865_v36  ;;  %v6764_v5 = vpop.f32.mrb[36].mxu1  ;;  %v9888_v28 = vsel %vm3669_vm8, %v9856_v34, %v3688_v44  ;;  %6812 = vmatprep.subr.bf16.mxu0 %v7319_v10  ;;  %v11577_v34 = vld [vmem:[#allocation34_spill] sm:$0xff] }
 0x54b   : > { %v3637_v14 = vadd.f32 %v6764_v5, %v9818_v63  ;;  %v3554_v17 = vpop.f32.mrb[37].mxu1  ;;  %v9904_v31 = vsel %vm3672_vm6, %v9862_v51, %v3691_v43 }
 0x54c   : > { %v9891_v42 = vsel %vm3670_vm4, %v9865_v36, %v3689_v18  ;;  %v3635_v40 = vadd.f32 %v9818_v63, %v3554_v17  ;;  %v6765_v56 = vpop.f32.mrb[38].mxu1  ;;  %v5807_v62 = vpack.c.bf16 %v9904_v31, %v9919_v27  ;;  %v11573_v36 = vld [vmem:[#allocation36_spill] sm:$0xff] }
 0x54d   : > { %v5804_v24 = vpack.c.bf16 %v9891_v42, %v9888_v28  ;;  %v3638_v8 = vadd.f32 %v6765_v56, %v9818_v63  ;;  %v3557_v38 = vpop.f32.mrb[39].mxu1  ;;  %v9913_v20 = vadd.f32 %v3637_v14, %v11525_v9  ;;  %6813 = vmatpush3.bf16.msra.mxu0 %v7319_v10  ;;  %v11531_v56 = vld [vmem:[#allocation17_spill] sm:$0xff]  ;;  %v11535_v9 = vld [vmem:[#allocation22_spill] sm:$0xff] }
 0x54e   : > { %v9907_v23 = vadd.f32 %v3635_v40, %v11523_v57  ;;  %v3636_v11 = vadd.f32 %v9818_v63, %v3557_v38  ;;  %6814 = vmatprep.subr.bf16.mxu0 %v7320_v15  ;;  %v7322_v40 = vld [vmem:[%s10842_s1 + $0x1a0] sm:$0xff]   ;;  %v11533_v57 = vld [vmem:[#allocation23_spill] sm:$0xff] }
 0x54f   : > { %6794 = vmatprep.mubr.msk.bf16.mxu0 %vm11251_vm7, %v5804_v24  ;;  %11526 = vst [vmem:[#allocation44_spill] sm:$0xff] %v9913_v20  ;;  %v9916_v22 = vadd.f32 %v3638_v8, %v11527_v59  ;;  %v3694_v44 = vmul.f32 0.1, %v9913_v20  ;;  %vm3675_vm6 = vcmp.ge.f32.partialorder %v9913_v20, 0.0  ;;  %vm11574_vm7 = vnez %v11573_v36 }
 0x550   : > { %11524 = vst [vmem:[#allocation38_spill] sm:$0xff] %v9907_v23  ;;  %v3692_v32 = vmul.f32 0.1, %v9907_v23  ;;  %v9923_v25 = vadd.f32 %v3636_v11, %v11529_v13  ;;  %vm3673_vm2 = vcmp.ge.f32.partialorder %v9907_v23, 0.0  ;;  %6795 = vmatmul.mubr.msk.bf16.gmra.mrb[60].mxu0 %vm11420_vm11, %v5807_v62  ;;  %v11537_v13 = vld [vmem:[#allocation19_spill] sm:$0xff] }
 0x551   : > { %11528 = vst [vmem:[#allocation45_spill] sm:$0xff] %v9916_v22  ;;  %v3695_v53 = vmul.f32 0.1, %v9916_v22  ;;  %vm3676_vm8 = vcmp.ge.f32.partialorder %v9916_v22, 0.0  ;;  %6815 = vmatpush3.bf16.msra.mxu0 %v7320_v15 }
 0x552   : > { %11530 = vst [vmem:[#allocation7_spill] sm:$0xff] %v9923_v25  ;;  %v6768_v2 = vpop.f32.mrb[40].mxu1  ;;  %vm3674_vm4 = vcmp.ge.f32.partialorder %v9923_v25, 0.0  ;;  %v3693_v12 = vmul.f32 0.1, %v9923_v25  ;;  %v9945_v14 = vsel %vm3673_vm2, %v9907_v23, %v3692_v32  ;;  %6816 = vmatprep.subr.bf16.mxu0 %v7321_v61 }
 0x553   : > { %v3570_v35 = vpop.f32.mrb[41].mxu1  ;;  %v3641_v10 = vadd.f32 %v6768_v2, %v9818_v63  ;;  %v9962_v38 = vsel %vm3676_vm8, %v9916_v22, %v3695_v53  ;;  %v9979_v2 = vsel %vm3675_vm6, %v9913_v20, %v3694_v44 }
 0x554   : > { %v3639_v43 = vadd.f32 %v9818_v63, %v3570_v35  ;;  %v6769_v18 = vpop.f32.mrb[42].mxu1  ;;  %v9948_v17 = vsel %vm3674_vm4, %v9923_v25, %v3693_v12  ;;  %v5813_v53 = vpack.c.bf16 %v9962_v38, %v9979_v2  ;;  %v7323_v12 = vld [vmem:[%s10842_s1 + $0x1a8] sm:$0xff]  }
 0x555   : > { %v3642_v5 = vadd.f32 %v6769_v18, %v9818_v63  ;;  %v3573_v7 = vpop.f32.mrb[43].mxu1  ;;  %v5810_v8 = vpack.c.bf16 %v9948_v17, %v9945_v14  ;;  %v9968_v59 = vadd.f32 %v3641_v10, %v11535_v9  ;;  %6817 = vmatpush3.bf16.msra.mxu0 %v7321_v61 }
 0x556   : > { %v9954_v24 = vadd.f32 %v3639_v43, %v11531_v56  ;;  %v3640_v15 = vadd.f32 %v9818_v63, %v3573_v7  ;;  %6818 = vmatprep.subr.bf16.mxu0 %v7322_v40 }
 0x557   : > { %v9965_v11 = vadd.f32 %v3642_v5, %v11533_v57  ;;  %11536 = vst [vmem:[#allocation8_spill] sm:$0xff] %v9968_v59  ;;  %6798 = vmatprep.mubr.msk.bf16.mxu0 %vm11424_vm9, %v5810_v8  ;;  %v3698_v18 = vmul.f32 0.1, %v9968_v59  ;;  %vm3679_vm4 = vcmp.ge.f32.partialorder %v9968_v59, 0.0 }
 0x558   : > { %11532 = vst [vmem:[#allocation9_spill] sm:$0xff] %v9954_v24  ;;  %v3696_v32 = vmul.f32 0.1, %v9954_v24  ;;  %v9972_v62 = vadd.f32 %v3640_v15, %v11537_v13  ;;  %vm3677_vm12 = vcmp.ge.f32.partialorder %v9954_v24, 0.0  ;;  %6799 = vmatmul.mubr.msk.bf16.gmra.mrb[64].mxu0 %vm11426_vm5, %v5813_v53  ;;  %v11539_v13 = vld [vmem:[#allocation29_spill] sm:$0xff] }
 0x559   : > { %11534 = vst [vmem:[#allocation10_spill] sm:$0xff] %v9965_v11  ;;  %v3699_v35 = vmul.f32 0.1, %v9965_v11  ;;  %vm3680_vm8 = vcmp.ge.f32.partialorder %v9965_v11, 0.0  ;;  %6819 = vmatpush3.bf16.msra.mxu0 %v7322_v40 }
 0x55a   : > { %11538 = vst [vmem:[#allocation11_spill] sm:$0xff] %v9972_v62  ;;  %vm3678_vm2 = vcmp.ge.f32.partialorder %v9972_v62, 0.0  ;;  %v3697_v10 = vmul.f32 0.1, %v9972_v62  ;;  %v6772_v43 = vpop.f32.mrb[52].mxu1  ;;  %v9997_v56 = vsel %vm3677_vm12, %v9954_v24, %v3696_v32  ;;  %6820 = vmatprep.subr.bf16.mxu0 %v7323_v12  ;;  %vm11544_vm12 = vnez %v11284_v37  ;;  %v11563_v24 = vld [vmem:[#allocation21_spill] sm:$0xff] }
 0x55b   : > { %v3618_v61 = vadd.f32 %v6772_v43, %v9809_v39  ;;  %v3586_v44 = vpop.f32.mrb[53].mxu1  ;;  %v10014_v40 = vsel %vm3680_vm8, %v9965_v11, %v3699_v35  ;;  %v11540_v43 = vld [vmem:[#allocation25_spill] sm:$0xff]  ;;  %vm11564_vm9 = vnez %v11563_v24 }
 0x55c   : > { %v3616_v5 = vadd.f32 %v3586_v44, %v9811_v47  ;;  %v6773_v7 = vpop.f32.mrb[54].mxu1  ;;  %v10000_v15 = vsel %vm3678_vm2, %v9972_v62, %v3697_v10  ;;  %v7324_v47 = vld [vmem:[%s10842_s1 + $0x1b0] sm:$0xff]   ;;  %v10022_v10 = vsel %vm11372_vm10, %v9848_v6, 0.0  ;;  %v10029_v44 = vsel %vm3679_vm4, %v9968_v59, %v3698_v18  ;;  %v7325_v6 = vld [vmem:[%s10842_s1 + $0x1b8] sm:$0xff]  }
 0x55d   : > { %v3645_v8 = vadd.f32 %v9818_v63, %v3618_v61  ;;  %v3589_v57 = vpop.f32.mrb[55].mxu1  ;;  %v5816_v39 = vpack.c.bf16 %v10000_v15, %v9997_v56  ;;  %6821 = vmatpush3.bf16.msra.mxu0 %v7323_v12  ;;  %v10039_v7 = vsel %vm11375_vm13, %v9853_v16, 0.0  ;;  %v11542_v18 = vld [vmem:[#allocation30_spill] sm:$0xff]  ;;  %v10121_v59 = vsel %vm11564_vm9, %v9919_v27, 0.0 }
 0x55e   : > { %v3643_v9 = vadd.f32 %v9818_v63, %v3616_v5  ;;  %v3617_v32 = vadd.f32 %v3589_v57, %v9813_v41  ;;  %v5819_v5 = vpack.c.bf16 %v10014_v40, %v10029_v44  ;;  %6822 = vmatprep.subr.bf16.mxu0 %v7324_v47  ;;  %v3742_v57 = vrot.slane %v10022_v10, 3 }
 0x55f   : > { %v3664_v53 = vadd.f32 %v3645_v8, %v11539_v13  ;;  %6802 = vmatprep.mubr.msk.bf16.mxu0 %vm11443_vm3, %v5816_v39  ;;  %v7326_v13 = vld [vmem:[%s10842_s1 + $0x200] sm:$0xff]   ;;  %v11048_v20 = vrot.slane %v10039_v7, 5  ;;  %v10164_v51 = vsel %vm11574_vm7, %v10000_v15, 0.0 }
 0x560   : > { %v10025_v61 = vadd.f32 %v3643_v9, %v11540_v43  ;;  %v3644_v41 = vadd.f32 %v9818_v63, %v3617_v32  ;;  %6803 = vmatmul.mubr.msk.bf16.gmra.mrb[68].mxu0 %vm11544_vm12, %v5819_v5  ;;  %v3741_v9 = vrot.slane %v10039_v7, 3 }
 0x561   : > { %vm3683_vm6 = vcmp.ge.f32.partialorder %v3664_v53, 0.0  ;;  %v3702_v35 = vmul.f32 0.1, %v3664_v53  ;;  %6823 = vmatpush3.bf16.msra.mxu0 %v7324_v47  ;;  %v11545_v47 = vld [vmem:[#allocation14_spill] sm:$0xff] }
 0x562   : > { %11541 = vst [vmem:[#allocation15_spill] sm:$0xff] %v10025_v61  ;;  %v3700_v63 = vmul.f32 0.1, %v10025_v61  ;;  %v10043_v8 = vadd.f32 %v3644_v41, %v11542_v18  ;;  %vm3681_vm2 = vcmp.ge.f32.partialorder %v10025_v61, 0.0  ;;  %6824 = vmatprep.subr.bf16.mxu0 %v7325_v6  ;;  %vm11546_vm4 = vnez %v11545_v47  ;;  %v11549_v18 = vld [vmem:[#allocation20_spill] sm:$0xff] }
 0x563   : > { %v3721_v12 = vsel %vm3683_vm6, %v3664_v53, %v3702_v35  ;;  %v10069_v41 = vsel %vm11546_vm4, %v9843_v49, 0.0  ;;  %vm11547_vm6 = vcmp.lt.s32.totalorder %v7489_v21, 5  ;;  %v11551_v49 = vld [vmem:[#allocation13_spill] sm:$0xff] }
 0x564   : > { %11543 = vst [vmem:[#allocation16_spill] sm:$0xff] %v10043_v8  ;;  %v3701_v39 = vmul.f32 0.1, %v10043_v8  ;;  %vm3682_vm8 = vcmp.ge.f32.partialorder %v10043_v8, 0.0  ;;  %v10053_v16 = vsel %vm11451_vm15, %v3721_v12, 0.0  ;;  %v10061_v53 = vsel %vm3681_vm2, %v10025_v61, %v3700_v63  ;;  %vm11548_vm15 = vmmov %vm11547_vm6 }
 0x565   : > { %v11032_v32 = vrot.slane %v10053_v16, 3  ;;  %v3777_v5 = vsel %vm11547_vm6, %v3741_v9, %v3742_v57  ;;  %vm11550_vm2 = vnez %v11549_v18  ;;  %6825 = vmatpush3.bf16.msra.mxu0 %v7325_v6  ;;  %v5825_v62 = vpack.c.bf16 %v3721_v12, %v3721_v12 }
 0x566   : > { %v10064_v43 = vsel %vm3682_vm8, %v10043_v8, %v3701_v39  ;;  %v10082_v39 = vsel %vm11550_vm2, %v9891_v42, 0.0  ;;  %vm11552_vm8 = vnez %v11551_v49  ;;  %6846 = vmatprep.subr.bf16.mxu0 %v7326_v13  ;;  %v3744_v11 = vrot.slane %v10069_v41, 3 }
 0x567   : > { %v5822_v35 = vpack.c.bf16 %v10064_v43, %v10061_v53  ;;  %v3778_v63 = vsel %vm11548_vm15, %v11032_v32, %v3741_v9  ;;  %v10087_v61 = vsel %vm11552_vm8, %v9851_v45, 0.0  ;;  %v11553_v9 = vld [vmem:[#allocation18_spill] sm:$0xff]  ;;  %vm11555_vm6 = vnez %v11323_v50 }
 0x568   : > { %v3779_v8 = vpack.c.bf16 %v3777_v5, %v3778_v63  ;;  %vm11554_vm15 = vnez %v11553_v9  ;;  %v3746_v42 = vrot.slane %v10082_v39, 3  ;;  %v3743_v45 = vrot.slane %v10087_v61, 3  ;;  %v11558_v5 = vld [vmem:[#allocation24_spill] sm:$0xff] }
 0x569   : > { %6806 = vmatprep.mubr.msk.bf16.mxu0 %vm11457_vm14, %v5822_v35  ;;  %v10095_v32 = vsel %vm11554_vm15, %v9888_v28, 0.0  ;;  %vm11556_vm14 = vcmp.lt.s32.totalorder %v7489_v21, 5  ;;  %vm11559_vm3 = vnez %v11558_v5  ;;  %v11561_v63 = vld [vmem:[#allocation28_spill] sm:$0xff]  ;;  %v3800_v50 = vrot.slane %v10022_v10, 5 }
 0x56a   : > { %6807 = vmatmul.mubr.msk.bf16.gmra.mrb[72].mxu0 %vm11555_vm6, %v5825_v62  ;;  %v3745_v6 = vrot.slane %v10095_v32, 3  ;;  %v3775_v12 = vsel %vm11556_vm14, %v3743_v45, %v3744_v11  ;;  %vm11557_vm12 = vmmov %vm11556_vm14  ;;  %v10109_v28 = vsel %vm11559_vm3, %v9904_v31, 0.0  ;;  %vm11562_vm5 = vnez %v11561_v63  ;;  %v7327_v31 = vld [vmem:[%s10842_s1 + $0x208] sm:$0xff]  }
 0x56b   : > { %6826 = vmatprep.mubr.bf16.mxu0 %v3779_v8  ;;  %v3776_v35 = vsel %vm11557_vm12, %v3742_v57, %v3743_v45  ;;  %vm11560_vm6 = vmmov %vm11557_vm12  ;;  %v10116_v8 = vsel %vm11562_vm5, %v9948_v17, 0.0  ;;  %v11566_v45 = vld [vmem:[#allocation27_spill] sm:$0xff]  ;;  %v3748_v23 = vrot.slane %v10109_v28, 3 }
 0x56c   : > { %v3773_v62 = vsel %vm11560_vm6, %v3745_v6, %v3746_v42  ;;  %v3780_v25 = vpack.c.bf16 %v3775_v12, %v3776_v35  ;;  %vm11565_vm14 = vmmov %vm11560_vm6  ;;  %vm11567_vm12 = vnez %v11566_v45  ;;  %v3750_v27 = vrot.slane %v10116_v8, 3 }
 0x56d   : > { %v3774_v57 = vsel %vm11565_vm14, %v3744_v11, %v3745_v6  ;;  %v10131_v22 = vsel %vm11567_vm12, %v9945_v14, 0.0  ;;  %v11047_v12 = vrot.slane %v10053_v16, 5  ;;  %v3747_v11 = vrot.slane %v10121_v59, 3  ;;  %v7328_v14 = vld [vmem:[%s10842_s1 + $0x210] sm:$0xff]   ;;  %vm11569_vm5 = vmmov %vm11565_vm14 }
 0x56e   : > { %v3781_v17 = vpack.c.bf16 %v3773_v62, %v3774_v57  ;;  %v3749_v6 = vrot.slane %v10131_v22, 3  ;;  %vm11568_vm6 = vcmp.lt.s32.totalorder %v7489_v21, 3  ;;  %v11570_v62 = vld [vmem:[#allocation32_spill] sm:$0xff]  ;;  %vm11572_vm11 = vmmov %vm11569_vm5 }
 0x56f   : > { %v3772_v35 = vsel %vm11569_vm5, %v3746_v42, %v3747_v11  ;;  %vm11571_vm12 = vnez %v11570_v62 }
 0x570   : > { %v10157_v57 = vsel %vm11571_vm12, %v9962_v38, 0.0  ;;  %v7329_v38 = vld [vmem:[%s10842_s1 + $0x218] sm:$0xff]   ;;  %vm11583_vm12 = vnez %v11405_v58 }
 0x571   : > { %v3752_v54 = vrot.slane %v10157_v57, 3 }
 0x572   : > { %6827 = vmatmul.mubr.bf16.vlgmr.msra.gmra.mrb[56].mxu0 %v3780_v25  ;;  %v10148_v25 = vsel %vm11568_vm6, %v11047_v12, %v11048_v20  ;;  %v11575_v12 = vld [vmem:[#allocation31_spill] sm:$0xff] }
 0x573   : > { %6830 = vmatprep.mubr.bf16.mxu0 %v3781_v17  ;;  %6847 = vmatpush3.bf16.msra.mxu0 %v7326_v13  ;;  %v3771_v13 = vsel %vm11565_vm14, %v3747_v11, %v3748_v23  ;;  %v3769_v17 = vsel %vm11572_vm11, %v3749_v6, %v3750_v27  ;;  %vm11576_vm6 = vnez %v11575_v12  ;;  %v3770_v11 = vsel %vm11569_vm5, %v3748_v23, %v3749_v6  ;;  %vm11579_vm14 = vmmov %vm11569_vm5 }
 0x574   : > { %6848 = vmatprep.subr.bf16.mxu0 %v7327_v31  ;;  %v10169_v20 = vsel %vm11576_vm6, %v9979_v2, 0.0  ;;  %v3782_v42 = vpack.c.bf16 %v3771_v13, %v3772_v35  ;;  %vm11578_vm11 = vnez %v11577_v34  ;;  %v3754_v2 = vrot.slane %v10164_v51, 3  ;;  %v7330_v13 = vld [vmem:[%s10842_s1 + $0x220] sm:$0xff]  }
 0x575   : > { %v10179_v15 = vsel %vm11578_vm11, %v9997_v56, 0.0  ;;  %v3751_v23 = vrot.slane %v10169_v20, 3  ;;  %vm11582_vm11 = vmmov %vm11569_vm5 }
 0x576   : > { %v3753_v6 = vrot.slane %v10179_v15, 3 }
 0x577   : > { %6849 = vmatpush3.bf16.msra.mxu0 %v7327_v31  ;;  %v3783_v31 = vpack.c.bf16 %v3769_v17, %v3770_v11  ;;  %v3767_v56 = vsel %vm11579_vm14, %v3751_v23, %v3752_v54  ;;  %v3768_v35 = vsel %vm11569_vm5, %v3750_v27, %v3751_v23  ;;  %v11580_v17 = vld [vmem:[#allocation41_spill] sm:$0xff]  ;;  %v10202_v11 = vsel %vm11583_vm12, %v10064_v43, 0.0  ;;  %vm11588_vm12 = vmmov %vm11569_vm5 }
 0x578   : > { %6850 = vmatprep.subr.bf16.mxu0 %v7328_v14  ;;  %vm11581_vm7 = vnez %v11580_v17  ;;  %v3784_v27 = vpack.c.bf16 %v3767_v56, %v3768_v35  ;;  %v3766_v23 = vsel %vm11569_vm5, %v3752_v54, %v3753_v6  ;;  %v7332_v56 = vld [vmem:[%s10842_s1 + $0x230] sm:$0xff]  }
 0x57a   : > { %6831 = vmatmul.mubr.bf16.gmra.mrb[60].mxu0 %v3782_v42  ;;  %v10195_v42 = vsel %vm11581_vm7, %v10014_v40, 0.0  ;;  %v7331_v40 = vld [vmem:[%s10842_s1 + $0x228] sm:$0xff]   ;;  %vm11590_vm7 = vmmov %vm11569_vm5 }
 0x57b   : > { %6834 = vmatprep.mubr.bf16.mxu0 %v3783_v31  ;;  %6851 = vmatpush3.bf16.msra.mxu0 %v7328_v14  ;;  %v3765_v14 = vsel %vm11582_vm11, %v3753_v6, %v3754_v2  ;;  %v11584_v31 = vld [vmem:[#allocation40_spill] sm:$0xff]  ;;  %vm11587_vm11 = vnez %v11586_v0  ;;  %v3756_v4 = vrot.slane %v10195_v42, 3 }
 0x57c   : > { %6852 = vmatprep.subr.bf16.mxu0 %v7329_v38  ;;  %vm11585_vm14 = vnez %v11584_v31  ;;  %v10217_v43 = vsel %vm11587_vm11, %v10061_v53, 0.0  ;;  %vm11589_vm11 = vmmov %vm11569_vm5 }
 0x57d   : > { %v10207_v26 = vsel %vm11585_vm14, %v10029_v44, 0.0  ;;  %v3758_v44 = vrot.slane %v10202_v11, 3  ;;  %v3757_v6 = vrot.slane %v10217_v43, 3 }
 0x57e   : > { %v3755_v54 = vrot.slane %v10207_v26, 3 }
 0x57f   : > { %6853 = vmatpush3.bf16.msra.mxu0 %v7329_v38  ;;  %v3785_v38 = vpack.c.bf16 %v3765_v14, %v3766_v23  ;;  %v3761_v14 = vsel %vm11589_vm11, %v3757_v6, %v3758_v44  ;;  %v7333_v23 = vld [vmem:[%s10842_s1 + $0x238] sm:$0xff]  }
 0x580   : > { %6854 = vmatprep.subr.bf16.mxu0 %v7330_v13  ;;  %v3763_v53 = vsel %vm11569_vm5, %v3755_v54, %v3756_v4  ;;  %v3764_v35 = vsel %vm11588_vm12, %v3754_v2, %v3755_v54  ;;  %v3801_v2 = vrot.slane %v10087_v61, 5  ;;  %vm11592_vm12 = vmmov %vm11569_vm5  ;;  %v3804_v61 = vrot.slane %v10082_v39, 5 }
 0x581   : > { %v3807_v39 = vrot.slane %v10131_v22, 5 }
 0x582   : > { %6835 = vmatmul.mubr.bf16.gmra.mrb[64].mxu0 %v3784_v27  ;;  %v3762_v27 = vsel %vm11590_vm7, %v3756_v4, %v3757_v6  ;;  %vm11593_vm7 = vcmp.lt.s32.totalorder %v7489_v21, 3  ;;  %v11594_v6 = vrot.slane %v10039_v7, 5 }
 0x583   : > { %6838 = vmatprep.mubr.bf16.mxu0 %v3785_v38  ;;  %6855 = vmatpush3.bf16.msra.mxu0 %v7330_v13  ;;  %v3786_v13 = vpack.c.bf16 %v3763_v53, %v3764_v35  ;;  %v3787_v38 = vpack.c.bf16 %v3761_v14, %v3762_v27  ;;  %v3834_v4 = vsel %vm11593_vm7, %v3800_v50, %v3801_v2  ;;  %vm11595_vm11 = vmmov %vm11593_vm7  ;;  %v3802_v14 = vrot.slane %v10069_v41, 5 }
 0x584   : > { %6856 = vmatprep.subr.bf16.mxu0 %v7331_v40  ;;  %v3835_v53 = vsel %vm11595_vm11, %v11594_v6, %v3800_v50  ;;  %vm11596_vm5 = vmmov %vm11593_vm7  ;;  %v3808_v41 = vrot.slane %v10116_v8, 5  ;;  %v3811_v8 = vrot.slane %v10179_v15, 5 }
 0x585   : > { %v3837_v35 = vpack.c.bf16 %v3834_v4, %v3835_v53  ;;  %vm11598_vm7 = vmmov %vm11596_vm5  ;;  %v3813_v53 = vrot.slane %v10207_v26, 5  ;;  %v3814_v26 = vrot.slane %v10195_v42, 5  ;;  %v3846_v42 = vpack.c.bf16 %v10148_v25, %v10148_v25  ;;  %v7337_v25 = vld [vmem:[%s10844_s3 + $0x1d8] sm:$0xff]  }
 0x586   : > { %vm11599_vm11 = vmmov %vm11596_vm5 }
 0x587   : > { %6857 = vmatpush3.bf16.msra.mxu0 %v7331_v40  ;;  %v11591_v40 = vrot.slane %v10053_v16, 3 }
 0x588   : > { %6858 = vmatprep.subr.bf16.mxu0 %v7332_v56 }
 0x589   : > { %v3760_v54 = vsel %vm11592_vm12, %v3758_v44, %v11591_v40  ;;  %v3805_v44 = vrot.slane %v10121_v59, 5  ;;  %vm11597_vm12 = vmmov %vm11596_vm5  ;;  %v3806_v59 = vrot.slane %v10109_v28, 5  ;;  %v3812_v28 = vrot.slane %v10164_v51, 5 }
 0x58a   : > { %6839 = vmatmul.mubr.bf16.gmra.mrb[68].mxu0 %v3786_v13  ;;  %v3788_v10 = vpack.c.bf16 %v3760_v54, %v3760_v54  ;;  %v3815_v51 = vrot.slane %v10217_v43, 5 }
 0x58b   : > { %6842 = vmatprep.mubr.bf16.mxu0 %v3787_v38  ;;  %6859 = vmatpush3.bf16.msra.mxu0 %v7332_v56  ;;  %v3803_v56 = vrot.slane %v10095_v32, 5  ;;  %v3830_v7 = vsel %vm11597_vm12, %v3804_v61, %v3805_v44  ;;  %v3833_v32 = vsel %vm11599_vm11, %v3801_v2, %v3802_v14  ;;  %v3809_v38 = vrot.slane %v10169_v20, 5  ;;  %vm11600_vm12 = vmmov %vm11596_vm5 }
 0x58c   : > { %6860 = vmatprep.subr.bf16.mxu0 %v7333_v23  ;;  %v3828_v40 = vsel %vm11596_vm5, %v3806_v59, %v3807_v39  ;;  %vm11602_vm11 = vmmov %vm11596_vm5  ;;  %v3810_v20 = vrot.slane %v10157_v57, 5  ;;  %v3816_v57 = vrot.slane %v10202_v11, 5  ;;  %v7335_v11 = vld [vmem:[%s10844_s3 + $0x1c8] sm:$0xff]  }
 0x58d   : > { %v3832_v13 = vsel %vm11596_vm5, %v3802_v14, %v3803_v56  ;;  %v3831_v50 = vsel %vm11598_vm7, %v3803_v56, %v3804_v61  ;;  %v3826_v54 = vsel %vm11600_vm12, %v3808_v41, %v3809_v38  ;;  %vm11601_vm7 = vmmov %vm11596_vm5  ;;  %v3829_v22 = vsel %vm11602_vm11, %v3805_v44, %v3806_v59  ;;  %v7340_v59 = vld [vmem:[%s10844_s3 + $0x1f0] sm:$0xff]  }
 0x58e   : > { %v3838_v27 = vpack.c.bf16 %v3832_v13, %v3833_v32  ;;  %v3827_v2 = vsel %vm11601_vm7, %v3807_v39, %v3808_v41  ;;  %v3840_v4 = vpack.c.bf16 %v3828_v40, %v3829_v22  ;;  %vm11603_vm12 = vmmov %vm11596_vm5  ;;  %v3820_v44 = vsel %vm11596_vm5, %v3814_v26, %v3815_v51  ;;  %v7338_v39 = vld [vmem:[%s10844_s3 + $0x1e0] sm:$0xff]   ;;  %v7339_v41 = vld [vmem:[%s10844_s3 + $0x1e8] sm:$0xff]  }
 0x58f   : > { %6861 = vmatpush3.bf16.msra.mxu0 %v7333_v23  ;;  %v3839_v23 = vpack.c.bf16 %v3830_v7, %v3831_v50  ;;  %v3841_v6 = vpack.c.bf16 %v3826_v54, %v3827_v2  ;;  %v3822_v56 = vsel %vm11603_vm12, %v3812_v28, %v3813_v53  ;;  %vm11604_vm7 = vmmov %vm11596_vm5  ;;  %v11606_v13 = vrot.slane %v10053_v16, 5  ;;  %v7334_v16 = vld [vmem:[%s10844_s3 + $0x1c0] sm:$0xff]  }
 0x590   : > { %vm11605_vm11 = vmmov %vm11596_vm5  ;;  %6882 = vmatprep.subr.bf16.mxu1 %v7334_v16  ;;  %v10327_v40 = vld [vmem:[%s10844_s3 + $0x180] sm:$0xff]  }
 0x591   : > { %v3825_v15 = vsel %vm11605_vm11, %v3809_v38, %v3810_v20  ;;  %vm11607_vm12 = vmmov %vm11596_vm5  ;;  %6883 = vmatpush3.bf16.msra.mxu1 %v7334_v16  ;;  %v7341_v38 = vld [vmem:[%s10844_s3 + $0x1f8] sm:$0xff]  }
 0x592   : > { %6843 = vmatmul.mubr.bf16.gmra.mrb[76].mxu0 %v3788_v10  ;;  %v3824_v10 = vsel %vm11596_vm5, %v3810_v20, %v3811_v8  ;;  %v3818_v7 = vsel %vm11607_vm12, %v3816_v57, %v11606_v13  ;;  %vm11609_vm11 = vmmov %vm11596_vm5  ;;  %6884 = vmatprep.subr.bf16.mxu1 %v7335_v11 }
 0x593   : > { %6862 = vmatprep.mubr.bf16.mxu0 %v3837_v35  ;;  %v3823_v35 = vsel %vm11604_vm7, %v3811_v8, %v3812_v28  ;;  %v3842_v61 = vpack.c.bf16 %v3824_v10, %v3825_v15  ;;  %vm11608_vm7 = vmmov %vm11596_vm5  ;;  %v3821_v43 = vsel %vm11609_vm11, %v3813_v53, %v3814_v26 }
 0x594   : > { %v3843_v14 = vpack.c.bf16 %v3822_v56, %v3823_v35  ;;  %v3819_v50 = vsel %vm11608_vm7, %v3815_v51, %v3816_v57  ;;  %v3844_v32 = vpack.c.bf16 %v3820_v44, %v3821_v43  ;;  %v10339_v35 = vld [vmem:[%s10843_s2 + $0x2] ss:$0 sm:$0xff] }
 0x595   : > { %6885 = vmatpush3.bf16.msra.mxu1 %v7335_v11 }
 0x59a   : > { %6863 = vmatmul.mubr.bf16.vlgmr.msra.gmra.mrb[56].mxu0 %v3838_v27  ;;  %v3845_v27 = vpack.c.bf16 %v3818_v7, %v3819_v50 }
 0x59b   : > { %6866 = vmatprep.mubr.bf16.mxu0 %v3839_v23  ;;  %v7336_v23 = vld [vmem:[%s10844_s3 + $0x1d0] sm:$0xff]  }
 0x59c   : > { %6886 = vmatprep.subr.bf16.mxu1 %v7336_v23 }
 0x59d   : > { %6887 = vmatpush3.bf16.msra.mxu1 %v7336_v23 }
 0x59e   : > { %6888 = vmatprep.subr.bf16.mxu1 %v7337_v25 }
 0x5a1   : > { %6889 = vmatpush3.bf16.msra.mxu1 %v7337_v25 }
 0x5a2   : > { %6867 = vmatmul.mubr.bf16.gmra.mrb[60].mxu0 %v3840_v4  ;;  %6890 = vmatprep.subr.bf16.mxu1 %v7338_v39 }
 0x5a3   : > { %6870 = vmatprep.mubr.bf16.mxu0 %v3841_v6 }
 0x5a5   : > { %6891 = vmatpush3.bf16.msra.mxu1 %v7338_v39 }
 0x5a6   : > { %6892 = vmatprep.subr.bf16.mxu1 %v7339_v41 }
 0x5a9   : > { %6893 = vmatpush3.bf16.msra.mxu1 %v7339_v41 }
 0x5aa   : > { %6871 = vmatmul.mubr.bf16.gmra.mrb[64].mxu0 %v3842_v61  ;;  %6894 = vmatprep.subr.bf16.mxu1 %v7340_v59 }
 0x5ab   : > { %6874 = vmatprep.mubr.bf16.mxu0 %v3843_v14 }
 0x5ad   : > { %6895 = vmatpush3.bf16.msra.mxu1 %v7340_v59 }
 0x5ae   : > { %6896 = vmatprep.subr.bf16.mxu1 %v7341_v38 }
 0x5b1   : > { %6897 = vmatpush3.bf16.msra.mxu1 %v7341_v38 }
 0x5b2   : > { %6875 = vmatmul.mubr.bf16.gmra.mrb[68].mxu0 %v3844_v32  ;;  %6918 = vmatprep.subr.bf16.mxu1 %v10327_v40 }
 0x5b3   : > { %6878 = vmatprep.mubr.bf16.mxu0 %v3845_v27 }
 0x5ba   : > { %6879 = vmatmul.mubr.bf16.gmra.mrb[80].mxu0 %v3846_v42 }
 0x63d   : > { %v6808_v54 = vpop.f32.mrb[72].mxu0 }
 0x63e   : > { %v4027_v2 = vpop.f32.mrb[73].mxu0 }
 0x63f   : > { %v6809_v22 = vpop.f32.mrb[74].mxu0 }
 0x640   : > { %v4030_v4 = vpop.f32.mrb[75].mxu0 }
 0x665   : > { %v6844_v6 = vpop.f32.mrb[76].mxu0 }
 0x666   : > { %v10330_v8 = vadd.f32 %v6844_v6, %v6808_v54  ;;  %v4187_v28 = vpop.f32.mrb[77].mxu0 }
 0x667   : > { %v10332_v20 = vadd.f32 %v4187_v28, %v4027_v2  ;;  %v6845_v53 = vpop.f32.mrb[78].mxu0 }
 0x668   : > { %v4190_v10 = vpop.f32.mrb[79].mxu0 }
 0x669   : > { %v10334_v56 = vadd.f32 %v4190_v10, %v4030_v4 }
 0x66d   : > { %v6864_v15 = vpop.f32.mrb[56].mxu0 }
 0x66e   : > { %v4407_v61 = vadd.f32 %v6864_v15, %v10339_v35  ;;  %v4300_v14 = vpop.f32.mrb[57].mxu0 }
 0x66f   : > { %v4405_v51 = vadd.f32 %v10339_v35, %v4300_v14  ;;  %v6865_v57 = vpop.f32.mrb[58].mxu0 }
 0x670   : > { %vm4426_vm5 = vcmp.ge.f32.partialorder %v4407_v61, 0.0  ;;  %v4445_v26 = vmul.f32 0.1, %v4407_v61  ;;  %v4408_v44 = vadd.f32 %v6865_v57, %v10339_v35  ;;  %v4303_v13 = vpop.f32.mrb[59].mxu0 }
 0x671   : > { %vm4424_vm12 = vcmp.ge.f32.partialorder %v4405_v51, 0.0  ;;  %v4443_v7 = vmul.f32 0.1, %v4405_v51  ;;  %v4406_v50 = vadd.f32 %v10339_v35, %v4303_v13 }
 0x672   : > { %v4464_v43 = vsel %vm4426_vm5, %v4407_v61, %v4445_v26  ;;  %vm4427_vm7 = vcmp.ge.f32.partialorder %v4408_v44, 0.0  ;;  %v4446_v32 = vmul.f32 0.1, %v4408_v44 }
 0x673   : > { %v4483_v27 = vsel %vm11552_vm8, %v4464_v43, 0.0  ;;  %v4462_v42 = vsel %vm4424_vm12, %v4405_v51, %v4443_v7  ;;  %vm4425_vm11 = vcmp.ge.f32.partialorder %v4406_v50, 0.0  ;;  %v4444_v16 = vmul.f32 0.1, %v4406_v50  ;;  %v7343_v51 = vld [vmem:[%s10844_s3 + $0x188] sm:$0xff]  }
 0x674   : > { %v10349_v11 = vsel %vm11375_vm13, %v4462_v42, 0.0  ;;  %v4465_v23 = vsel %vm4427_vm7, %v4408_v44, %v4446_v32  ;;  %v4502_v25 = vrot.slane %v4483_v27, 7  ;;  %v4560_v39 = vrot.slane %v4483_v27, 1 }
 0x675   : > { %v10353_v41 = vsel %vm11546_vm4, %v4465_v23, 0.0  ;;  %v5905_v59 = vpack.c.bf16 %v4465_v23, %v4464_v43  ;;  %v6868_v38 = vpop.f32.mrb[60].mxu0  ;;  %v4463_v2 = vsel %vm4425_vm11, %v4406_v50, %v4444_v16  ;;  %v4500_v46 = vrot.slane %v10349_v11, 7 }
 0x676   : > { %v4503_v54 = vrot.slane %v10353_v41, 7  ;;  %v4561_v49 = vrot.slane %v10353_v41, 1  ;;  %v4411_v22 = vadd.f32 %v6868_v38, %v10339_v35  ;;  %v4316_v4 = vpop.f32.mrb[61].mxu0  ;;  %v10361_v6 = vsel %vm11372_vm10, %v4463_v2, 0.0 }
 0x677   : > { %v5902_v28 = vpack.c.bf16 %v4463_v2, %v4462_v42  ;;  %v4409_v47 = vadd.f32 %v10339_v35, %v4316_v4  ;;  %v6869_v53 = vpop.f32.mrb[62].mxu0  ;;  %vm11610_vm13 = vcmp.lt.s32.totalorder %v7489_v21, 1  ;;  %vm11611_vm4 = vcmp.lt.s32.totalorder %v7489_v21, 7 }
 0x678   : > { %v10368_v10 = vsel %vm11610_vm13, %v4502_v25, %v4503_v54  ;;  %v10372_v15 = vsel %vm11611_vm4, %v4560_v39, %v4561_v49  ;;  %v4501_v61 = vrot.slane %v10361_v6, 7  ;;  %v4559_v48 = vrot.slane %v10361_v6, 1  ;;  %v4319_v14 = vpop.f32.mrb[63].mxu0  ;;  %vm11612_vm5 = vmmov %vm11610_vm13 }
 0x679   : > { %vm4430_vm10 = vcmp.ge.f32.partialorder %v4411_v22, 0.0  ;;  %v4449_v57 = vmul.f32 0.1, %v4411_v22  ;;  %vm4428_vm8 = vcmp.ge.f32.partialorder %v4409_v47, 0.0  ;;  %v4447_v26 = vmul.f32 0.1, %v4409_v47  ;;  %6898 = vmatprep.mubr.msk.bf16.mxu1 %vm11248_vm0, %v5902_v28  ;;  %vm11613_vm12 = vmmov %vm11612_vm5 }
 0x67a   : > { %v10383_v44 = vsel %vm11612_vm5, %v4501_v61, %v4502_v25  ;;  %v4412_v13 = vadd.f32 %v6869_v53, %v10339_v35  ;;  %v4410_v7 = vadd.f32 %v10339_v35, %v4319_v14  ;;  %6899 = vmatmul.mubr.msk.bf16.vlgmr.msra.gmra.mrb[56].mxu1 %vm11353_vm1, %v5905_v59  ;;  %v10393_v50 = vsel %vm11613_vm12, %v4500_v46, %v4501_v61  ;;  %vm11614_vm0 = vmmov %vm11611_vm4 }
 0x67b   : > { %v4468_v43 = vsel %vm4430_vm10, %v4411_v22, %v4449_v57  ;;  %v4466_v60 = vsel %vm4428_vm8, %v4409_v47, %v4447_v26  ;;  %6919 = vmatpush3.bf16.msra.mxu1 %v10327_v40  ;;  %v10402_v27 = vsel %vm11614_vm0, %v4559_v48, %v4560_v39  ;;  %v7344_v40 = vld [vmem:[%s10844_s3 + $0x190] sm:$0xff]   ;;  %v4558_v16 = vrot.slane %v10349_v11, 1  ;;  %vm11615_vm7 = vmmov %vm11614_vm0  ;;  %v7354_v11 = vld [vmem:[%s10844_s3 + $0x220] sm:$0xff]  }
 0x67c   : > { %v10406_v19 = vsel %vm11554_vm15, %v4466_v60, 0.0  ;;  %vm4431_vm1 = vcmp.ge.f32.partialorder %v4412_v13, 0.0  ;;  %v4450_v42 = vmul.f32 0.1, %v4412_v13  ;;  %6920 = vmatprep.subr.bf16.mxu1 %v7343_v51  ;;  %v10414_v23 = vsel %vm11564_vm9, %v4468_v43, 0.0 }
 0x67d   : > { %v4504_v25 = vrot.slane %v10406_v19, 7  ;;  %v11055_v39 = vrot.slane %v10406_v19, 1  ;;  %v6872_v9 = vpop.f32.mrb[64].mxu0  ;;  %vm4429_vm15 = vcmp.ge.f32.partialorder %v4410_v7, 0.0  ;;  %v4448_v38 = vmul.f32 0.1, %v4410_v7 }
 0x67e   : > { %v4469_v59 = vsel %vm4431_vm1, %v4412_v13, %v4450_v42  ;;  %v4415_v2 = vadd.f32 %v6872_v9, %v10339_v35  ;;  %v4332_v22 = vpop.f32.mrb[65].mxu0  ;;  %v4506_v61 = vrot.slane %v10414_v23, 7  ;;  %v4564_v14 = vrot.slane %v10414_v23, 1 }
 0x67f   : > { %v10423_v4 = vsel %vm11615_vm7, %v4561_v49, %v11055_v39  ;;  %v10427_v24 = vsel %vm11559_vm3, %v4469_v59, 0.0  ;;  %v5911_v28 = vpack.c.bf16 %v4469_v59, %v4468_v43  ;;  %v4413_v47 = vadd.f32 %v10339_v35, %v4332_v22  ;;  %v6873_v53 = vpop.f32.mrb[66].mxu0  ;;  %6921 = vmatpush3.bf16.msra.mxu1 %v7343_v51  ;;  %v7345_v49 = vld [vmem:[%s10844_s3 + $0x198] sm:$0xff]  }
 0x680   : > { %v4467_v57 = vsel %vm4429_vm15, %v4410_v7, %v4448_v38  ;;  %vm4434_vm9 = vcmp.ge.f32.partialorder %v4415_v2, 0.0  ;;  %v4335_v26 = vpop.f32.mrb[67].mxu0  ;;  %6922 = vmatprep.subr.bf16.mxu1 %v7344_v40  ;;  %v4453_v43 = vmul.f32 0.1, %v4415_v2  ;;  %v4507_v51 = vrot.slane %v10427_v24, 7 }
 0x681   : > { %v10437_v5 = vsel %vm11550_vm2, %v4467_v57, 0.0  ;;  %v5908_v13 = vpack.c.bf16 %v4467_v57, %v4466_v60  ;;  %vm4432_vm3 = vcmp.ge.f32.partialorder %v4413_v47, 0.0  ;;  %v4451_v9 = vmul.f32 0.1, %v4413_v47  ;;  %vm11617_vm2 = vmmov %vm11612_vm5 }
 0x682   : > { %v4416_v7 = vadd.f32 %v6873_v53, %v10339_v35  ;;  %v4505_v59 = vrot.slane %v10437_v5, 7  ;;  %v4472_v38 = vsel %vm4434_vm9, %v4415_v2, %v4453_v43  ;;  %v4414_v22 = vadd.f32 %v10339_v35, %v4335_v26  ;;  %vm11624_vm9 = vmmov %vm11617_vm2 }
 0x683   : > { %vm11616_vm11 = vnez %v11095_v33  ;;  %6923 = vmatpush3.bf16.msra.mxu1 %v7344_v40  ;;  %v10452_v18 = vsel %vm11617_vm2, %v4503_v54, %v4504_v25  ;;  %v10456_v60 = vsel %vm11576_vm6, %v4472_v38, 0.0  ;;  %v4470_v53 = vsel %vm4432_vm3, %v4413_v47, %v4451_v9  ;;  %v7346_v33 = vld [vmem:[%s10844_s3 + $0x1a0] sm:$0xff]  }
 0x684   : > { %6902 = vmatprep.mubr.msk.bf16.mxu1 %vm11616_vm11, %v5908_v13  ;;  %vm4435_vm13 = vcmp.ge.f32.partialorder %v4416_v7, 0.0  ;;  %v4454_v2 = vmul.f32 0.1, %v4416_v7  ;;  %vm11618_vm4 = vnez %v11110_v29  ;;  %6924 = vmatprep.subr.bf16.mxu1 %v7345_v49  ;;  %v4510_v54 = vrot.slane %v10456_v60, 7 }
 0x685   : > { %6903 = vmatmul.mubr.msk.bf16.gmra.mrb[60].mxu1 %vm11618_vm4, %v5911_v28  ;;  %vm11619_vm10 = vnez %v11566_v45  ;;  %vm4433_vm6 = vcmp.ge.f32.partialorder %v4414_v22, 0.0  ;;  %v6876_v40 = vpop.f32.mrb[68].mxu0  ;;  %v4452_v57 = vmul.f32 0.1, %v4414_v22  ;;  %vm11620_vm8 = vnez %v11570_v62  ;;  %v7347_v62 = vld [vmem:[%s10844_s3 + $0x1a8] sm:$0xff]   ;;  %vm11629_vm4 = vmmov %vm11624_vm9 }
 0x686   : > { %v10467_v12 = vsel %vm11619_vm10, %v4470_v53, 0.0  ;;  %v4473_v28 = vsel %vm4435_vm13, %v4416_v7, %v4454_v2  ;;  %v4348_v26 = vpop.f32.mrb[69].mxu0  ;;  %v4419_v9 = vadd.f32 %v6876_v40, %v10339_v35  ;;  %vm11621_vm5 = vnez %v11561_v63  ;;  %vm11628_vm13 = vmmov %vm11624_vm9 }
 0x687   : > { %v4508_v29 = vrot.slane %v10467_v12, 7  ;;  %v10473_v13 = vsel %vm11620_vm8, %v4473_v28, 0.0  ;;  %v5917_v43 = vpack.c.bf16 %v4473_v28, %v4472_v38  ;;  %v4417_v45 = vadd.f32 %v10339_v35, %v4348_v26  ;;  %v6877_v32 = vpop.f32.mrb[70].mxu0  ;;  %6925 = vmatpush3.bf16.msra.mxu1 %v7345_v49 }
 0x688   : > { %v4511_v47 = vrot.slane %v10473_v13, 7  ;;  %v4471_v39 = vsel %vm4433_vm6, %v4414_v22, %v4452_v57  ;;  %v4420_v7 = vadd.f32 %v6877_v32, %v10339_v35  ;;  %v4351_v2 = vpop.f32.mrb[71].mxu0  ;;  %6926 = vmatprep.subr.bf16.mxu1 %v7346_v33  ;;  %vm4438_vm12 = vcmp.ge.f32.partialorder %v4419_v9, 0.0  ;;  %vm11631_vm6 = vmmov %vm11629_vm4 }
 0x689   : > { %v10485_v38 = vsel %vm11621_vm5, %v4471_v39, 0.0  ;;  %v5914_v40 = vpack.c.bf16 %v4471_v39, %v4470_v53  ;;  %v4457_v49 = vmul.f32 0.1, %v4419_v9  ;;  %vm4436_vm0 = vcmp.ge.f32.partialorder %v4417_v45, 0.0  ;;  %v7348_v53 = vld [vmem:[%s10844_s3 + $0x1b0] sm:$0xff]  }
 0x68a   : > { %v4509_v26 = vrot.slane %v10485_v38, 7  ;;  %v4455_v22 = vmul.f32 0.1, %v4417_v45  ;;  %vm4439_vm1 = vcmp.ge.f32.partialorder %v4420_v7, 0.0  ;;  %v4458_v57 = vmul.f32 0.1, %v4420_v7 }
 0x68b   : > { %v4476_v32 = vsel %vm4438_vm12, %v4419_v9, %v4457_v49  ;;  %v4418_v42 = vadd.f32 %v10339_v35, %v4351_v2  ;;  %vm11622_vm15 = vnez %v11114_v30  ;;  %6927 = vmatpush3.bf16.msra.mxu1 %v7346_v33  ;;  %vm11623_vm7 = vnez %v11263_v55 }
 0x68c   : > { %6906 = vmatprep.mubr.msk.bf16.mxu1 %vm11622_vm15, %v5914_v40  ;;  %v10494_v63 = vsel %vm11585_vm14, %v4476_v32, 0.0  ;;  %v4474_v39 = vsel %vm4436_vm0, %v4417_v45, %v4455_v22  ;;  %6928 = vmatprep.subr.bf16.mxu1 %v7347_v62  ;;  %v10507_v30 = vsel %vm11624_vm9, %v4504_v25, %v4505_v59  ;;  %vm11625_vm14 = vmmov %vm11617_vm2  ;;  %vm11626_vm3 = vnez %v11577_v34 }
 0x68d   : > { %6907 = vmatmul.mubr.msk.bf16.gmra.mrb[64].mxu1 %vm11623_vm7, %v5917_v43  ;;  %v10515_v55 = vsel %vm11625_vm14, %v4506_v61, %v4507_v51  ;;  %v4514_v33 = vrot.slane %v10494_v63, 7  ;;  %v10521_v43 = vsel %vm11626_vm3, %v4474_v39, 0.0  ;;  %v4477_v9 = vsel %vm4439_vm1, %v4420_v7, %v4458_v57  ;;  %v6880_v45 = vpop.f32.mrb[80].mxu0  ;;  %vm11634_vm15 = vmmov %vm11629_vm4 }
 0x68e   : > { %v4512_v2 = vrot.slane %v10521_v43, 7  ;;  %vm11627_vm11 = vnez %v11580_v17  ;;  %v5923_v49 = vpack.c.bf16 %v4477_v9, %v4476_v32  ;;  %v4364_v22 = vpop.f32.mrb[81].mxu0  ;;  %v4570_v28 = vrot.slane %v10521_v43, 1  ;;  %v7349_v17 = vld [vmem:[%s10844_s3 + $0x1b8] sm:$0xff]   ;;  %vm11635_vm7 = vmmov %vm11629_vm4 }
 0x68f   : > { %v10527_v40 = vsel %vm11627_vm11, %v4477_v9, 0.0  ;;  %vm4437_vm2 = vcmp.ge.f32.partialorder %v4418_v42, 0.0  ;;  %v4456_v34 = vmul.f32 0.1, %v4418_v42  ;;  %v6881_v41 = vpop.f32.mrb[82].mxu0  ;;  %6929 = vmatpush3.bf16.msra.mxu1 %v7347_v62  ;;  %v4396_v7 = vadd.f32 %v6880_v45, %v10330_v8  ;;  %vm11636_vm9 = vmmov %vm11629_vm4 }
 0x690   : > { %v4515_v31 = vrot.slane %v10527_v40, 7  ;;  %v4394_v57 = vadd.f32 %v4364_v22, %v10332_v20  ;;  %v4367_v25 = vpop.f32.mrb[83].mxu0  ;;  %6930 = vmatprep.subr.bf16.mxu1 %v7348_v53  ;;  %v4540_v32 = vpack.c.bf16 %v10507_v30, %v10452_v18  ;;  %v10544_v41 = vsel %vm11628_vm13, %v4505_v59, %v4506_v61 }
 0x691   : > { %v4475_v8 = vsel %vm4437_vm2, %v4418_v42, %v4456_v34  ;;  %v4395_v20 = vadd.f32 %v4367_v25, %v10334_v56  ;;  %v4541_v62 = vpack.c.bf16 %v10515_v55, %v10544_v41  ;;  %v10555_v9 = vsel %vm11629_vm4, %v4508_v29, %v4509_v26  ;;  %v10569_v34 = vld [vmem:[%s10844_s3 + $0x200] sm:$0xff]   ;;  %vm11640_vm2 = vmmov %vm11629_vm4 }
 0x692   : > { %vm11630_vm10 = vnez %v11573_v36  ;;  %v5920_v61 = vpack.c.bf16 %v4475_v8, %v4474_v39  ;;  %v4423_v42 = vadd.f32 %v10339_v35, %v4396_v7  ;;  %v4421_v56 = vadd.f32 %v10339_v35, %v4394_v57  ;;  %vm11641_vm13 = vmmov %vm11640_vm2 }
 0x693   : > { %v10559_v45 = vsel %vm11630_vm10, %v4475_v8, 0.0  ;;  %v4573_v59 = vrot.slane %v10527_v40, 1  ;;  %v4422_v22 = vadd.f32 %v10339_v35, %v4395_v20  ;;  %6931 = vmatpush3.bf16.msra.mxu1 %v7348_v53  ;;  %v10577_v36 = vsel %vm11631_vm6, %v4507_v51, %v4508_v29  ;;  %vm11643_vm10 = vmmov %vm11640_vm2 }
 0x694   : > { %v4513_v25 = vrot.slane %v10559_v45, 7  ;;  %vm4442_vm8 = vcmp.ge.f32.partialorder %v4423_v42, 0.0  ;;  %v4461_v39 = vmul.f32 0.1, %v4423_v42  ;;  %vm4440_vm5 = vcmp.ge.f32.partialorder %v4421_v56, 0.0  ;;  %6932 = vmatprep.subr.bf16.mxu1 %v7349_v17  ;;  %vm11644_vm6 = vmmov %vm11640_vm2 }
 0x695   : > { %v4459_v7 = vmul.f32 0.1, %v4421_v56  ;;  %vm11632_vm12 = vnez %v11268_v3  ;;  %vm4441_vm0 = vcmp.ge.f32.partialorder %v4422_v22, 0.0  ;;  %v4460_v35 = vmul.f32 0.1, %v4422_v22 }
 0x696   : > { %6910 = vmatprep.mubr.msk.bf16.mxu1 %vm11632_vm12, %v5920_v61  ;;  %vm11633_vm1 = vnez %v11284_v37  ;;  %v4542_v53 = vpack.c.bf16 %v10555_v9, %v10577_v36  ;;  %v10591_v51 = vsel %vm11634_vm15, %v4510_v54, %v4511_v47  ;;  %v4480_v29 = vsel %vm4442_vm8, %v4423_v42, %v4461_v39  ;;  %vm11645_vm8 = vmmov %vm11640_vm2 }
 0x697   : > { %6911 = vmatmul.mubr.msk.bf16.gmra.mrb[68].mxu1 %vm11633_vm1, %v5923_v49  ;;  %v4478_v3 = vsel %vm4440_vm5, %v4421_v56, %v4459_v7  ;;  %v10599_v37 = vsel %vm11635_vm7, %v4509_v26, %v4510_v54  ;;  %v10603_v49 = vsel %vm11636_vm9, %v4512_v2, %v4513_v25  ;;  %v4571_v57 = vrot.slane %v10559_v45, 1  ;;  %vm11646_vm5 = vmmov %vm11640_vm2 }
 0x698   : > { %vm11637_vm14 = vnez %v11378_v1  ;;  %vm11638_vm3 = vnez %v11586_v0  ;;  %v4479_v61 = vsel %vm4441_vm0, %v4422_v22, %v4460_v35  ;;  %6933 = vmatpush3.bf16.msra.mxu1 %v7349_v17  ;;  %v5929_v7 = vpack.c.bf16 %v4480_v29, %v4480_v29  ;;  %vm11647_vm12 = vmmov %vm11640_vm2 }
 0x699   : > { %v4499_v8 = vsel %vm11637_vm14, %v4480_v29, 0.0  ;;  %v4497_v20 = vsel %vm11638_vm3, %v4478_v3, 0.0  ;;  %6954 = vmatprep.subr.bf16.mxu1 %v10569_v34  ;;  %vm11639_vm11 = vnez %v11405_v58  ;;  %v5926_v26 = vpack.c.bf16 %v4479_v61, %v4478_v3 }
 0x69a   : > { %v4518_v42 = vrot.slane %v4499_v8, 7  ;;  %v4576_v56 = vrot.slane %v4499_v8, 1  ;;  %v4516_v39 = vrot.slane %v4497_v20, 7  ;;  %v4498_v54 = vsel %vm11639_vm11, %v4479_v61, 0.0 }
 0x69b   : > { %v4543_v45 = vpack.c.bf16 %v10591_v51, %v10599_v37  ;;  %v4525_v1 = vsel %vm11640_vm2, %v4511_v47, %v4512_v2  ;;  %v4574_v0 = vrot.slane %v4497_v20, 1  ;;  %v4517_v17 = vrot.slane %v4498_v54, 7 }
 0x69c   : > { %v4537_v22 = vsel %vm11641_vm13, %v4518_v42, %v4500_v46  ;;  %v4544_v35 = vpack.c.bf16 %v10603_v49, %v4525_v1  ;;  %vm11642_vm4 = vnez %v11296_v52  ;;  %v4522_v47 = vsel %vm11643_vm10, %v4514_v33, %v4515_v31 }
 0x69d   : > { %6914 = vmatprep.mubr.msk.bf16.mxu1 %vm11642_vm4, %v5926_v26  ;;  %v4538_v58 = vpack.c.bf16 %v10393_v50, %v4537_v22  ;;  %v4523_v2 = vsel %vm11644_vm6, %v4513_v25, %v4514_v33  ;;  %v4521_v52 = vsel %vm11645_vm8, %v4515_v31, %v4516_v39  ;;  %v4520_v50 = vsel %vm11646_vm5, %v4516_v39, %v4517_v17  ;;  %v11649_v25 = vld [vmem:[#allocation47_spill] sm:$0xff] }
 0x69e   : > { %v4545_v46 = vpack.c.bf16 %v4522_v47, %v4523_v2  ;;  %v4519_v51 = vsel %vm11647_vm12, %v4517_v17, %v4518_v42  ;;  %vm11648_vm0 = vcmp.lt.s32.totalorder %v7489_v21, 7  ;;  %v4575_v33 = vrot.slane %v4498_v54, 1  ;;  %v7353_v21 = vld [vmem:[%s10844_s3 + $0x218] sm:$0xff]  }
 0x69f   : > { %v4594_v29 = vsel %vm11648_vm0, %v4558_v16, %v4559_v48  ;;  %vm11650_vm1 = vnez %v11649_v25  ;;  %v4546_v3 = vpack.c.bf16 %v4520_v50, %v4521_v52  ;;  %v4597_v37 = vpack.c.bf16 %v10423_v4, %v10372_v15  ;;  %vm11652_vm15 = vmmov %vm11648_vm0 }
 0x6a0   : > { %6915 = vmatmul.mubr.msk.bf16.gmra.mrb[72].mxu1 %vm11650_vm1, %v5929_v7  ;;  %v4596_v31 = vpack.c.bf16 %v10402_v27, %v4594_v29  ;;  %v11651_v6 = vrot.slane %v10437_v5, 1  ;;  %v11654_v8 = vrot.slane %v10406_v19, 1  ;;  %vm11655_vm7 = vmmov %vm11648_vm0  ;;  %v11656_v27 = vrot.slane %v10467_v12, 1 }
 0x6a1   : > { %6934 = vmatprep.mubr.bf16.mxu1 %v4538_v58  ;;  %v11657_v61 = vrot.slane %v10427_v24, 1  ;;  %vm11658_vm9 = vmmov %vm11648_vm0  ;;  %v11661_v19 = vrot.slane %v10456_v60, 1  ;;  %v11662_v7 = vrot.slane %v10485_v38, 1  ;;  %v11672_v12 = vrot.slane %v10494_v63, 1 }
 0x6a2   : > { %v4589_v49 = vsel %vm11652_vm15, %v11651_v6, %v4564_v14  ;;  %v11653_v48 = vmov %v11651_v6  ;;  %vm11660_vm14 = vmmov %vm11648_vm0  ;;  %v11665_v1 = vmov %v11656_v27  ;;  %v4595_v63 = vsel %vm11648_vm0, %v4576_v56, %v4558_v16  ;;  %v7357_v16 = vld [vmem:[%s10844_s3 + $0x238] sm:$0xff]  }
 0x6a3   : > { %v4590_v20 = vsel %vm11655_vm7, %v11654_v8, %v11653_v48  ;;  %v4587_v15 = vsel %vm11658_vm9, %v11657_v61, %v11656_v27  ;;  %v11659_v4 = vmov %v11657_v61  ;;  %vm11663_vm3 = vmmov %vm11648_vm0  ;;  %v11664_v26 = vmov %v11662_v7  ;;  %v10771_v27 = vld [vmem:[%s10845_s4 + $0x2] ss:$0 sm:$0xff] }
 0x6a4   : > { %v4588_v42 = vsel %vm11660_vm14, %v4564_v14, %v11659_v4  ;;  %v4598_v5 = vpack.c.bf16 %v4589_v49, %v4590_v20  ;;  %v4585_v54 = vsel %vm11663_vm3, %v11662_v7, %v11661_v19  ;;  %vm11666_vm11 = vmmov %vm11648_vm0  ;;  %v11667_v14 = vrot.slane %v10473_v13, 1  ;;  %v11681_v7 = vld [vmem:[#allocation26_spill] sm:$0xff] }
 0x6a5   : > { %v4599_v39 = vpack.c.bf16 %v4587_v15, %v4588_v42  ;;  %v4586_v24 = vsel %vm11666_vm11, %v11665_v1, %v11664_v26  ;;  %vm11668_vm2 = vmmov %vm11648_vm0  ;;  %v11670_v58 = vmov %v11661_v19  ;;  %v11676_v60 = vmov %v11672_v12 }
 0x6a6   : > { %v4600_v23 = vpack.c.bf16 %v4585_v54, %v4586_v24  ;;  %v4583_v17 = vsel %vm11668_vm2, %v11667_v14, %v4570_v28  ;;  %v11669_v22 = vmov %v11667_v14  ;;  %vm11671_vm13 = vmmov %vm11648_vm0  ;;  %v11680_v40 = vpack.c.bf16 %v10368_v10, %v10383_v44  ;;  %v7355_v10 = vld [vmem:[%s10844_s3 + $0x228] sm:$0xff]   ;;  %v7356_v44 = vld [vmem:[%s10844_s3 + $0x230] sm:$0xff]  }
 0x6a7   : > { %v4584_v38 = vsel %vm11671_vm13, %v11670_v58, %v11669_v22  ;;  %vm11673_vm4 = vmmov %vm11648_vm0  ;;  %v4547_v18 = vpack.c.bf16 %v4519_v51, %v4519_v51  ;;  %v4605_v30 = vpack.c.bf16 %v4595_v63, %v4595_v63  ;;  %v11682_v24 = vld [vmem:[#allocation39_spill] sm:$0xff]  ;;  %v11683_v14 = vld [vmem:[#allocation33_spill] sm:$0xff] }
 0x6a8   : > { %v4581_v47 = vsel %vm11673_vm4, %v4571_v57, %v11672_v12  ;;  %v4601_v2 = vpack.c.bf16 %v4583_v17, %v4584_v38  ;;  %vm11674_vm10 = vmmov %vm11648_vm0  ;;  %6935 = vmatmul.mubr.bf16.vlgmr.msra.gmra.mrb[76].mxu1 %v11680_v40 }
 0x6a9   : > { %v4582_v52 = vsel %vm11674_vm10, %v4570_v28, %v4571_v57  ;;  %vm11675_vm6 = vmmov %vm11648_vm0  ;;  %v7351_v57 = vld [vmem:[%s10844_s3 + $0x208] sm:$0xff]   ;;  %6938 = vmatprep.mubr.bf16.mxu1 %v4540_v32  ;;  %6955 = vmatpush3.bf16.msra.mxu1 %v10569_v34 }
 0x6aa   : > { %v4579_v13 = vsel %vm11675_vm6, %v4573_v59, %v4574_v0  ;;  %vm11677_vm8 = vmmov %vm11648_vm0  ;;  %v4602_v29 = vpack.c.bf16 %v4581_v47, %v4582_v52  ;;  %6956 = vmatprep.subr.bf16.mxu1 %v7351_v57 }
 0x6ab   : > { %v4580_v50 = vsel %vm11677_vm8, %v11676_v60, %v4573_v59  ;;  %vm11678_vm5 = vmmov %vm11648_vm0  ;;  %v7352_v59 = vld [vmem:[%s10844_s3 + $0x210] sm:$0xff]  }
 0x6ac   : > { %v4603_v25 = vpack.c.bf16 %v4579_v13, %v4580_v50  ;;  %v4577_v43 = vsel %vm11678_vm5, %v4575_v33, %v4576_v56  ;;  %vm11679_vm12 = vmmov %vm11648_vm0  ;;  %v11685_v50 = vld [vmem:[#allocation35_spill] sm:$0xff] }
 0x6ad   : > { %v4578_v28 = vsel %vm11679_vm12, %v4574_v0, %v4575_v33  ;;  %6957 = vmatpush3.bf16.msra.mxu1 %v7351_v57  ;;  %v11687_v57 = vld [vmem:[#allocation37_spill] sm:$0xff] }
 0x6ae   : > { %v4604_v6 = vpack.c.bf16 %v4577_v43, %v4578_v28  ;;  %6958 = vmatprep.subr.bf16.mxu1 %v7352_v59  ;;  %v11686_v43 = vld [vmem:[#allocation43_spill] sm:$0xff] }
 0x6b0   : > { %6939 = vmatmul.mubr.bf16.gmra.mrb[60].mxu1 %v4541_v62 }
 0x6b1   : > { %6942 = vmatprep.mubr.bf16.mxu1 %v4542_v53  ;;  %6959 = vmatpush3.bf16.msra.mxu1 %v7352_v59 }
 0x6b2   : > { %6960 = vmatprep.subr.bf16.mxu1 %v7353_v21 }
 0x6b5   : > { %6961 = vmatpush3.bf16.msra.mxu1 %v7353_v21 }
 0x6b6   : > { %6962 = vmatprep.subr.bf16.mxu1 %v7354_v11 }
 0x6b8   : > { %6943 = vmatmul.mubr.bf16.gmra.mrb[64].mxu1 %v4543_v45 }
 0x6b9   : > { %6946 = vmatprep.mubr.bf16.mxu1 %v4544_v35  ;;  %6963 = vmatpush3.bf16.msra.mxu1 %v7354_v11 }
 0x6ba   : > { %6964 = vmatprep.subr.bf16.mxu1 %v7355_v10 }
 0x6bd   : > { %6965 = vmatpush3.bf16.msra.mxu1 %v7355_v10  ;;  %v11688_v10 = vld [vmem:[#allocation44_spill] sm:$0xff] }
 0x6be   : > { %6966 = vmatprep.subr.bf16.mxu1 %v7356_v44 }
 0x6c0   : > { %6947 = vmatmul.mubr.bf16.gmra.mrb[68].mxu1 %v4545_v46 }
 0x6c1   : > { %6950 = vmatprep.mubr.bf16.mxu1 %v4546_v3  ;;  %6967 = vmatpush3.bf16.msra.mxu1 %v7356_v44 }
 0x6c2   : > { %6968 = vmatprep.subr.bf16.mxu1 %v7357_v16 }
 0x6c5   : > { %6969 = vmatpush3.bf16.msra.mxu1 %v7357_v16 }
 0x6c8   : > { %6951 = vmatmul.mubr.bf16.gmra.mrb[80].mxu1 %v4547_v18 }
 0x6c9   : > { %6970 = vmatprep.mubr.bf16.mxu1 %v4596_v31 }
 0x6d0   : > { %6971 = vmatmul.mubr.bf16.vlgmr.msra.gmra.mrb[84].mxu1 %v4597_v37 }
 0x6d1   : > { %6974 = vmatprep.mubr.bf16.mxu1 %v4598_v5 }
 0x6d8   : > { %6975 = vmatmul.mubr.bf16.gmra.mrb[60].mxu1 %v4599_v39 }
 0x6d9   : > { %6978 = vmatprep.mubr.bf16.mxu1 %v4600_v23 }
 0x6e0   : > { %6979 = vmatmul.mubr.bf16.gmra.mrb[64].mxu1 %v4601_v2  ;;  %v11684_v2 = vld [vmem:[#allocation46_spill] sm:$0xff] }
 0x6e1   : > { %6982 = vmatprep.mubr.bf16.mxu1 %v4602_v29 }
 0x6e8   : > { %6983 = vmatmul.mubr.bf16.gmra.mrb[68].mxu1 %v4603_v25 }
 0x6e9   : > { %6986 = vmatprep.mubr.bf16.mxu1 %v4604_v6 }
 0x6f0   : > { %6987 = vmatmul.mubr.bf16.gmra.mrb[88].mxu1 %v4605_v30  ;;  %v11689_v30 = vld [vmem:[#allocation38_spill] sm:$0xff] }
 0x74d   : > { %v6900_v55 = vpop.f32.mrb[56].mxu1 }
 0x74e   : > { %v4722_v32 = vpop.f32.mrb[57].mxu1 }
 0x74f   : > { %v6901_v41 = vpop.f32.mrb[58].mxu1 }
 0x750   : > { %v4724_v62 = vpop.f32.mrb[59].mxu1 }
 0x773   : > { %v6916_v9 = vpop.f32.mrb[72].mxu1 }
 0x774   : > { %v4785_v34 = vpop.f32.mrb[73].mxu1  ;;  %v11691_v9 = vld [vmem:[#allocation7_spill] sm:$0xff] }
 0x775   : > { %v6917_v36 = vpop.f32.mrb[74].mxu1 }
 0x776   : > { %v4788_v53 = vpop.f32.mrb[75].mxu1 }
 0x77b   : > { %v6936_v56 = vpop.f32.mrb[76].mxu1 }
 0x77c   : > { %v4888_v45 = vadd.f32 %v6936_v56, %v6900_v55  ;;  %v4880_v0 = vpop.f32.mrb[77].mxu1 }
 0x77d   : > { %v6937_v35 = vpop.f32.mrb[78].mxu1 }
 0x77e   : > { %v4891_v46 = vadd.f32 %v6937_v35, %v6901_v41  ;;  %v4882_v51 = vpop.f32.mrb[79].mxu1  ;;  %v11690_v41 = vld [vmem:[#allocation45_spill] sm:$0xff]  ;;  %v11692_v35 = vld [vmem:[#allocation8_spill] sm:$0xff] }
 0x77f   : > { %v4883_v33 = vadd.f32 %v4882_v51, %v4724_v62 }
 0x79b   : > { %v6952_v3 = vpop.f32.mrb[80].mxu1 }
 0x79c   : > { %v4943_v31 = vpop.f32.mrb[81].mxu1  ;;  %v11693_v3 = vld [vmem:[#allocation9_spill] sm:$0xff] }
 0x79d   : > { %v10764_v37 = vadd.f32 %v4943_v31, %v4785_v34  ;;  %v6953_v49 = vpop.f32.mrb[82].mxu1 }
 0x79e   : > { %v4946_v48 = vpop.f32.mrb[83].mxu1 }
 0x79f   : > { %v10766_v8 = vadd.f32 %v4946_v48, %v4788_v53  ;;  %v11694_v48 = vld [vmem:[#allocation10_spill] sm:$0xff] }
 0x7a3   : > { %v6972_v20 = vpop.f32.mrb[84].mxu1 }
 0x7a4   : > { %v5132_v61 = vadd.f32 %v6972_v20, %v4888_v45  ;;  %v5055_v15 = vpop.f32.mrb[85].mxu1 }
 0x7a5   : > { %v6973_v4 = vpop.f32.mrb[86].mxu1 }
 0x7a6   : > { %v5157_v42 = vadd.f32 %v10771_v27, %v5132_v61  ;;  %v5133_v5 = vadd.f32 %v6973_v4, %v4891_v46  ;;  %v5057_v39 = vpop.f32.mrb[87].mxu1  ;;  %v11695_v61 = vld [vmem:[#allocation11_spill] sm:$0xff] }
 0x7a7   : > { %v5131_v19 = vadd.f32 %v5057_v39, %v4883_v33 }
 0x7a8   : > { %v5174_v54 = vadd.f32 %v5157_v42, %v11681_v7  ;;  %v5158_v26 = vadd.f32 %v10771_v27, %v5133_v5 }
 0x7a9   : > { %v5156_v1 = vadd.f32 %v10771_v27, %v5131_v19 }
 0x7aa   : > { %5191 = vst [vmem:[%s7470_s7 + $0x4] sm:$0xff] %v5174_v54  ;;  %v5175_v23 = vadd.f32 %v5158_v26, %v11682_v24  ;;  %v11696_v26 = vld [vmem:[#allocation15_spill] sm:$0xff] }
 0x7ab   : > { %v5173_v17 = vadd.f32 %v5156_v1, %v11683_v14  ;;  %v6976_v22 = vpop.f32.mrb[60].mxu1 }
 0x7ac   : > { %5192 = vst [vmem:[%s7470_s7 + $0xc] sm:$0xff] %v5175_v23  ;;  %v5161_v58 = vadd.f32 %v6976_v22, %v10771_v27  ;;  %v5070_v38 = vpop.f32.mrb[61].mxu1  ;;  %v11697_v23 = vld [vmem:[#allocation16_spill] sm:$0xff] }
 0x7ad   : > { %5190 = vst [vmem:[%s7470_s7 - $0x4] sm:$0xf0] %v5173_v17  ;;  %v5159_v12 = vadd.f32 %v10771_v27, %v5070_v38  ;;  %v6977_v47 = vpop.f32.mrb[62].mxu1 }
 0x7ae   : > { %v5178_v52 = vadd.f32 %v5161_v58, %v11684_v2  ;;  %v5162_v13 = vadd.f32 %v6977_v47, %v10771_v27  ;;  %v5073_v60 = vpop.f32.mrb[63].mxu1 }
 0x7af   : > { %v5176_v29 = vadd.f32 %v5159_v12, %v11685_v50  ;;  %v5160_v25 = vadd.f32 %v10771_v27, %v5073_v60 }
 0x7b0   : > { %5195 = vst [vmem:[%s7470_s7 + $0x24] sm:$0xff] %v5178_v52  ;;  %v5179_v28 = vadd.f32 %v5162_v13, %v11686_v43 }
 0x7b1   : > { %5193 = vst [vmem:[%s7470_s7 + $0x14] sm:$0xff] %v5176_v29  ;;  %v5177_v6 = vadd.f32 %v5160_v25, %v11687_v57 }
 0x7b2   : > { %5196 = vst [vmem:[%s7470_s7 + $0x2c] sm:$0xff] %v5179_v28 }
 0x7b3   : > { %5194 = vst [vmem:[%s7470_s7 + $0x1c] sm:$0xff] %v5177_v6  ;;  %v6980_v63 = vpop.f32.mrb[64].mxu1 }
 0x7b4   : > { %v5165_v40 = vadd.f32 %v6980_v63, %v10771_v27  ;;  %v5086_v59 = vpop.f32.mrb[65].mxu1 }
 0x7b5   : > { %v5163_v21 = vadd.f32 %v10771_v27, %v5086_v59  ;;  %v6981_v11 = vpop.f32.mrb[66].mxu1 }
 0x7b6   : > { %v5182_v44 = vadd.f32 %v5165_v40, %v11688_v10  ;;  %v5166_v16 = vadd.f32 %v6981_v11, %v10771_v27  ;;  %v5089_v18 = vpop.f32.mrb[67].mxu1 }
 0x7b7   : > { %v5180_v55 = vadd.f32 %v5163_v21, %v11689_v30  ;;  %v5164_v32 = vadd.f32 %v10771_v27, %v5089_v18 }
 0x7b8   : > { %5199 = vst [vmem:[%s7470_s7 + $0x44] sm:$0xff] %v5182_v44  ;;  %v5183_v62 = vadd.f32 %v5166_v16, %v11690_v41 }
 0x7b9   : > { %5197 = vst [vmem:[%s7470_s7 + $0x34] sm:$0xff] %v5180_v55  ;;  %v5181_v34 = vadd.f32 %v5164_v32, %v11691_v9 }
 0x7ba   : > { %5200 = vst [vmem:[%s7470_s7 + $0x4c] sm:$0xff] %v5183_v62 }
 0x7bb   : > { %5198 = vst [vmem:[%s7470_s7 + $0x3c] sm:$0xff] %v5181_v34  ;;  %v6984_v36 = vpop.f32.mrb[68].mxu1 }
 0x7bc   : > { %v5169_v53 = vadd.f32 %v6984_v36, %v10771_v27  ;;  %v5102_v56 = vpop.f32.mrb[69].mxu1 }
 0x7bd   : > { %v5167_v45 = vadd.f32 %v10771_v27, %v5102_v56  ;;  %v6985_v0 = vpop.f32.mrb[70].mxu1 }
 0x7be   : > { %v5186_v46 = vadd.f32 %v5169_v53, %v11692_v35  ;;  %v5170_v51 = vadd.f32 %v6985_v0, %v10771_v27  ;;  %v5105_v33 = vpop.f32.mrb[71].mxu1 }
 0x7bf   : > { %v5184_v31 = vadd.f32 %v5167_v45, %v11693_v3  ;;  %v5168_v49 = vadd.f32 %v10771_v27, %v5105_v33 }
 0x7c0   : > { %5203 = vst [vmem:[%s7470_s7 + $0x64] sm:$0xff] %v5186_v46  ;;  %v5187_v20 = vadd.f32 %v5170_v51, %v11694_v48 }
 0x7c1   : > { %5201 = vst [vmem:[%s7470_s7 + $0x54] sm:$0xff] %v5184_v31  ;;  %v5185_v15 = vadd.f32 %v5168_v49, %v11695_v61 }
 0x7c2   : > { %5204 = vst [vmem:[%s7470_s7 + $0x6c] sm:$0xff] %v5187_v20 }
 0x7c3   : > { %5202 = vst [vmem:[%s7470_s7 + $0x5c] sm:$0xff] %v5185_v15  ;;  %v6988_v4 = vpop.f32.mrb[88].mxu1 }
 0x7c4   : > { %v5118_v42 = vpop.f32.mrb[89].mxu1 }
 0x7c5   : > { %v5146_v5 = vadd.f32 %v5118_v42, %v10764_v37  ;;  %v6989_v39 = vpop.f32.mrb[90].mxu1 }
 0x7c6   : > { %v5121_v19 = vpop.f32.mrb[91].mxu1 }
 0x7c7   : > { %v5171_v7 = vadd.f32 %v10771_v27, %v5146_v5  ;;  %v5147_v54 = vadd.f32 %v5121_v19, %v10766_v8 }
 0x7c9   : > { %v5188_v1 = vadd.f32 %v5171_v7, %v11696_v26  ;;  %v5172_v24 = vadd.f32 %v10771_v27, %v5147_v54 }
 0x7cb   : > { %5205 = vst [vmem:[%s7470_s7 + $0x74] sm:$0xff] %v5188_v1  ;;  %v5189_v14 = vadd.f32 %v5172_v24, %v11697_v23 }
 0x7cd   : > { %5206 = vst [vmem:[%s7470_s7 + $0x7c] sm:$0xf] %v5189_v14 }
 0x7ce PF: > { %s15_s22 = sadd.s32 1, %s7398_s22   ;;  %s11698_s18 = smov %s7390_s20 }
 0x7cf   : > { %p12_p13 = scmp.ge.s32.totalorder %s15_s22, 6   ;;  %s11699_s19 = smov %s7394_s21 }
 0x7d0   : > { %s11700_s20 = smov %s11703_s23  ;;  %s11701_s21 = smov %s11707_s24 }
 0x7d1   :  { %14 = sbr.rel (!%p12_p13) target bundleno = 3 (0x3), region = 200 }
 0x7d8   :  { %5237 = vsyncmov [#allocation3] }
 0x7db   :  { %s5238_s7 = vpop.sfrf %5237 }
 0x7dc   :  { %p5967_p0 = scmp.ne.s32.totalorder %s5238_s7, 0 }
 0x7de   :  { %5242 = shalt.err (%p5967_p0)  }
 0x7df   :  { %5244 = vsyncmov [#allocation3 + $0x1] }
 0x7e2   :  { %s5245_s17 = vpop.sfrf %5244 }
 0x7e3   :  { %p5968_p1 = scmp.ne.s32.totalorder %s5245_s17, 0 }
 0x7e5   :  { %5249 = shalt.err (%p5968_p1)  }

// kernel: _resblock1_pallas.1
= control target key start
LH: loop header
LB: loop body
LE: loop exit
PB: predicated region body
PF: predicated region fallthrough
CT: control target
= control target key end

     0   :  { %s7430_s18 = smov 0   ;;  %s7432_s19 = smov 0   ;;  %s10841_s0 = inlined_call_operand.vmem [shape: bf16[2,280,128], index: 0, kind: input, shape index: {}]   ;;  %s10842_s1 = inlined_call_operand.vmem [shape: bf16[3,3,128,128], index: 1, kind: input, shape index: {}]   ;;  %s10843_s2 = inlined_call_operand.vmem [shape: f32[3,1,128], index: 2, kind: input, shape index: {}]   ;;  %s10844_s3 = inlined_call_operand.vmem [shape: bf16[3,3,128,128], index: 3, kind: input, shape index: {}]   ;;  %s10845_s4 = inlined_call_operand.vmem [shape: f32[3,1,128], index: 4, kind: input, shape index: {}]   ;;  %s10846_s5 = inlined_call_operand.vmem [shape: f32[2,256,128], index: 5, kind: output, shape index: {}]  }
   0x1   :  { %s7434_s20 = smov 0   ;;  %s7436_s21 = smov 0  }
   0x2   :  { %s7438_s22 = smov 0  }
   0x3 LB: > { %s24_s23 = sadd.s32 1, %s7390_s20  ;;  %s27_s24 = sadd.s32 1, %s7394_s21  ;;  %s7398_s22 = sphi %s7438_s22, %s15_s22   ;;  %s7394_s21 = sphi %s7436_s21, %s11701_s21   ;;  %s7390_s20 = sphi %s7434_s20, %s11700_s20   ;;  %s7386_s19 = sphi %s7432_s19, %s11699_s19   ;;  %s7382_s18 = sphi %s7430_s18, %s11698_s18  }
   0x4   : > { %p25_p0 = scmp.ge.s32.totalorder %s24_s23, 2  ;;  %p5335_p1 = scmp.ge.s32.totalorder %s7398_s22, 1 }
   0x5   : > { %p167_p2 = scmp.lt.s32.totalorder %s7398_s22, 5 }
   0x6   : > { %s11703_s23 = smov (%p25_p0, %s24_s23), 0  ;;  %s11705_s24 = smov (!%p25_p0, %s27_s24), %s7394_s21 }
   0x7   : > { %p168_p3 = pnand %p5335_p1, %p167_p2  ;;  %p29_p4 = scmp.ge.s32.totalorder %s11705_s24, 2 }
   0x9   : > { %s11707_s24 = smov (%p29_p4, %s11705_s24), 0  ;;  %171 = sbr.rel (%p168_p3) target bundleno = 1998 (0x7ce), region = 36 }
  0x10   : > { %s5336_s25 = sshll.u32 %s7382_s18, 4  ;;  %p193_p5 = scmp.lt.s32.totalorder %s7386_s19, 1 }
  0x11   : > { %p195_p6 = scmp.lt.s32.totalorder %s5336_s25, 31  ;;  %p5339_p7 = scmp.ne.s32.totalorder %s7382_s18, 0 }
  0x12   : > { %s194_s26 = scalar_select %p193_p5, %s7386_s19, 1 }
  0x13   : > { %s11709_s25 = smov (!%p195_p6, %s5336_s25), 31  ;;  %206 = sbr.rel (%p5339_p7) target bundleno = 30 (0x1e), region = 40 }
  0x14   : > { %s5337_s27 = sshll.u32 %s194_s26, 5  ;;  %s5969_s8 = smul.u32 (!%p5339_p7), 140, %s7386_s19 }
  0x15   : > { %s198_s28 = sadd.s32 %s5337_s27, %s11709_s25 }
  0x16   : > { %s5338_s29 = sshll.u32 %s198_s28, 3  ;;  %s209_s11 = scalar_lea.vmem (!%p5339_p7), %s10841_s0, %s5969_s8 }
  0x17   : > { %s7470_s7 = scalar_lea.vmem %s10846_s5, %s5338_s29  ;;  %v247_v0 = vld [vmem:[%s209_s11] sm:$0xff] (!%p5339_p7)  ;;  %v249_v1 = vld [vmem:[%s209_s11 + $0x8] sm:$0xff] (!%p5339_p7)  ;;  %v251_v2 = vld [vmem:[%s209_s11 + $0x10] sm:$0xff] (!%p5339_p7) }
  0x18   : > { %248 = vst [vmem:[#allocation2] sm:$0xff] (!%p5339_p7), %v247_v0  ;;  %250 = vst [vmem:[#allocation2 + $0x8] sm:$0xff] (!%p5339_p7), %v249_v1  ;;  %v253_v3 = vld [vmem:[%s209_s11 + $0x18] sm:$0xff] (!%p5339_p7)  ;;  %v255_v4 = vld [vmem:[%s209_s11 + $0x20] sm:$0xff] (!%p5339_p7) }
  0x19   : > { %252 = vst [vmem:[#allocation2 + $0x10] sm:$0xff] (!%p5339_p7), %v251_v2  ;;  %v257_v5 = vld [vmem:[%s209_s11 + $0x28] sm:$0xff] (!%p5339_p7)  ;;  %254 = vst [vmem:[#allocation2 + $0x18] sm:$0xff] (!%p5339_p7), %v253_v3  ;;  %v259_v6 = vld [vmem:[%s209_s11 + $0x30] sm:$0xff] (!%p5339_p7) }
  0x1a   : > { %256 = vst [vmem:[#allocation2 + $0x20] sm:$0xff] %v255_v4  ;;  %258 = vst [vmem:[#allocation2 + $0x28] sm:$0xff] %v257_v5  ;;  %v261_v7 = vld [vmem:[%s209_s11 + $0x38] sm:$0xff]  ;;  %v263_v8 = vld [vmem:[%s209_s11 + $0x40] sm:$0xff] }
  0x1b   : > { %260 = vst [vmem:[#allocation2 + $0x30] sm:$0xff] %v259_v6  ;;  %262 = vst [vmem:[#allocation2 + $0x38] sm:$0xff] %v261_v7  ;;  %v5341_v9 = vld [vmem:[%s209_s11 + $0x48] sm:$0xf] }
  0x1c   : > { %264 = vst [vmem:[#allocation2 + $0x40] sm:$0xff] %v263_v8  ;;  %275 = vst [vmem:[#allocation2 + $0x48] sm:$0xf] %v5341_v9 }
  0x1d   : > { %279 = vsyncadd [#allocation3], 1216 }
  0x1e PF: > { %s280_s12 = sadd.s32 1, %s7382_s18 }
  0x1f   : > { %p5342_p8 = scmp.ge.s32.totalorder %s280_s12, 2 }
  0x20   : > { %p285_p9 = scmp.lt.s32.totalorder (!%p5342_p8), %s280_s12, 0  ;;  %s286_s13 = ssub.s32 (!%p5342_p8), 0, %s280_s12 }
  0x21   : > { %284 = sbr.rel (%p5342_p8) target bundleno = 53 (0x35), region = 81  ;;  %s5343_s14 = smin.u32 (!%p5342_p8), %s286_s13, %s280_s12 }
  0x22   : > { %s5970_s15 = sshll.u32 (!%p5342_p8), %s7382_s18, 7  ;;  %s288_s16 = sand.u32 (!%p5342_p8), 1, %s5343_s14  }
  0x23   : > { %s5971_s17 = sadd.s32 (!%p5342_p8), 128, %s5970_s15  ;;  %s289_s25 = ssub.s32 (!%p5342_p8), 0, %s288_s16 }
  0x24   : > { %s298_s26 = sshra.s32 (!%p5342_p8), %s5971_s17, 3  ;;  %s300_s27 = smul.u32 (!%p5342_p8), 35, %s7386_s19 }
  0x26   : > { %s301_s29 = sadd.s32 (!%p5342_p8), %s300_s27, %s298_s26 }
  0x27   : > { %s5347_s30 = sshll.u32 (!%p5342_p8), %s301_s29, 2 }
  0x28   : > { %s11711_s25 = smov (!%p285_p9, %s289_s25), %s288_s16  ;;  %s303_s9 = scalar_lea.vmem %s10841_s0, %s5347_s30 }
  0x29   : > { %p5345_p10 = scmp.lt.s32.totalorder %s11711_s25, 0  ;;  %s295_s28 = sadd.s32 2, %s11711_s25  ;;  %v345_v10 = vld [vmem:[%s303_s9] sm:$0xff]  ;;  %v347_v11 = vld [vmem:[%s303_s9 + $0x8] sm:$0xff]  ;;  %v349_v12 = vld [vmem:[%s303_s9 + $0x10] sm:$0xff] }
  0x2a   : > { %v351_v13 = vld [vmem:[%s303_s9 + $0x18] sm:$0xff]  ;;  %v353_v14 = vld [vmem:[%s303_s9 + $0x20] sm:$0xff]  ;;  %v355_v15 = vld [vmem:[%s303_s9 + $0x28] sm:$0xff] }
  0x2b   : > { %s11713_s28 = smov (!%p5345_p10, %s295_s28), %s11711_s25  ;;  %v357_v16 = vld [vmem:[%s303_s9 + $0x30] sm:$0xff]  ;;  %v359_v17 = vld [vmem:[%s303_s9 + $0x38] sm:$0xff]  ;;  %v361_v18 = vld [vmem:[%s303_s9 + $0x40] sm:$0xff] }
  0x2c   : > { %s5972_s10 = smul.u32 76, %s11713_s28  ;;  %v5349_v19 = vld [vmem:[%s303_s9 + $0x48] sm:$0xf]  ;;  %s307_s19 = scalar_lea.sflag [#allocation3], %s11713_s28 }
  0x2e   : > { %s306_s11 = scalar_lea.vmem [#allocation2], %s5972_s10 }
  0x2f   : > { %346 = vst [vmem:[%s306_s11] sm:$0xff] %v345_v10  ;;  %348 = vst [vmem:[%s306_s11 + $0x8] sm:$0xff] %v347_v11 }
  0x30   : > { %350 = vst [vmem:[%s306_s11 + $0x10] sm:$0xff] %v349_v12  ;;  %352 = vst [vmem:[%s306_s11 + $0x18] sm:$0xff] %v351_v13 }
  0x31   : > { %354 = vst [vmem:[%s306_s11 + $0x20] sm:$0xff] %v353_v14  ;;  %356 = vst [vmem:[%s306_s11 + $0x28] sm:$0xff] %v355_v15 }
  0x32   : > { %358 = vst [vmem:[%s306_s11 + $0x30] sm:$0xff] %v357_v16  ;;  %360 = vst [vmem:[%s306_s11 + $0x38] sm:$0xff] %v359_v17 }
  0x33   : > { %362 = vst [vmem:[%s306_s11 + $0x40] sm:$0xff] %v361_v18  ;;  %5350 = vst [vmem:[%s306_s11 + $0x48] sm:$0xf] %v5349_v19 }
  0x34   : > { %377 = vsyncadd %s307_s19, 1216 }
  0x35 PF: > { %p378_p11 = scmp.lt.s32.totalorder %s7382_s18, 0  ;;  %s379_s12 = ssub.s32 0, %s7382_s18 }
  0x36   : > { %s5351_s13 = smin.u32 %s7382_s18, %s379_s12  ;;  %s5354_s14 = sshll.u32 %s7382_s18, 7 }
  0x37   : > { %s381_s15 = sand.u32 1, %s5351_s13  }
  0x38   : > { %s382_s16 = ssub.s32 0, %s381_s15 }
  0x39   : > { %s11715_s16 = smov (!%p378_p11, %s382_s16), %s381_s15 }
  0x3a   : > { %p5353_p12 = scmp.lt.s32.totalorder %s11715_s16, 0  ;;  %s388_s17 = sadd.s32 2, %s11715_s16 }
  0x3c   : > { %s11717_s17 = smov (!%p5353_p12, %s388_s17), %s11715_s16 }
  0x3d   : > { %s5973_s25 = smul.u32 76, %s11717_s17  ;;  %s394_s27 = scalar_lea.sflag [#allocation3], %s11717_s17 }
  0x3f   : > { %s7487_s26 = scalar_lea.vmem [#allocation2], %s5973_s25 }
  0x40   : > { %7378 = dma.done.wait %s394_s27, 1216 }
  0x41   : > { %7379 = vsyncadd %s394_s27, 4294966080  ;;  %v437_v20 = vlaneseq  ;;  %v7491_v22 = vstv %s5354_s14  ;;  %v7214_v26 = vld [vmem:[%s10842_s1 + $0x40] sm:$0xff]   ;;  %v7215_v28 = vld [vmem:[%s10842_s1 + $0x48] sm:$0xff]   ;;  %v11058_v46 = vmov 0  ;;  %v11061_v48 = vmov 0 }
  0x42   : > { %6342 = vmatprep.subr.bf16.mxu0 %v7214_v26  ;;  %v7216_v33 = vld [vmem:[%s10842_s1 + $0x50] sm:$0xff]   ;;  %v7217_v38 = vld [vmem:[%s10842_s1 + $0x58] sm:$0xff]   ;;  %v7218_v55 = vld [vmem:[%s10842_s1 + $0x60] sm:$0xff]   ;;  %v11064_v60 = vmov 0  ;;  %v11068_v10 = vmov 0  ;;  %v11071_v15 = vmov 0 }
  0x43   : > { %v7489_v21 = vshrl.u32 %v437_v20, 7  ;;  %6343 = vmatpush3.bf16.msra.mxu0 %v7214_v26  ;;  %v5975_v39 = vld [vmem:[%s7487_s26] sm:$0xff]   ;;  %v6010_v40 = vld [vmem:[%s7487_s26 + $0x8] sm:$0xff]   ;;  %v6011_v2 = vld [vmem:[%s7487_s26 + $0x10] sm:$0xff]  }
  0x44   : > { %6344 = vmatprep.subr.bf16.mxu0 %v7215_v28  ;;  %v7520_v44 = vunpack.c.l.bf16 %v5975_v39  ;;  %v7522_v45 = vunpack.c.h.bf16 %v5975_v39  ;;  %v7529_v47 = vunpack.c.l.bf16 %v6010_v40  ;;  %v7535_v49 = vunpack.c.h.bf16 %v6010_v40  ;;  %v7219_v4 = vld [vmem:[%s10842_s1 + $0x68] sm:$0xff]   ;;  %v7220_v12 = vld [vmem:[%s10842_s1 + $0x70] sm:$0xff]  }
  0x45   : > { %v439_v23 = vadd.s32 8, %v7489_v21  ;;  %v458_v24 = vadd.s32 %v7491_v22, %v7489_v21  ;;  %v440_v27 = vadd.s32 16, %v7489_v21  ;;  %v441_v30 = vadd.s32 24, %v7489_v21  ;;  %v6012_v7 = vld [vmem:[%s7487_s26 + $0x18] sm:$0xff]   ;;  %v6017_v13 = vld [vmem:[%s7487_s26 + $0x40] sm:$0xff]  }
  0x46   : > { %v442_v32 = vadd.s32 32, %v7489_v21  ;;  %v443_v35 = vadd.s32 40, %v7489_v21  ;;  %v444_v36 = vadd.s32 48, %v7489_v21  ;;  %11056 = vst [vmem:[#allocation7_spill] sm:$0xff] %v7520_v44  ;;  %11057 = vst [vmem:[#allocation8_spill] sm:$0xff] %v7522_v45  ;;  %v445_v51 = vadd.s32 56, %v7489_v21 }
  0x47   : > { %v459_v25 = vadd.s32 %v7491_v22, %v439_v23  ;;  %v5356_v29 = vadd.s32 4294967284, %v458_v24  ;;  %v460_v34 = vadd.s32 %v7491_v22, %v440_v27  ;;  %v461_v37 = vadd.s32 %v7491_v22, %v441_v30  ;;  %6345 = vmatpush3.bf16.msra.mxu0 %v7215_v28  ;;  %11060 = vst [vmem:[#allocation9_spill] sm:$0xff] %v7529_v47  ;;  %v6013_v24 = vld [vmem:[%s7487_s26 + $0x20] sm:$0xff]  }
  0x48   : > { %6346 = vmatprep.subr.bf16.mxu0 %v7216_v33  ;;  %v462_v42 = vadd.s32 %v7491_v22, %v442_v32  ;;  %v463_v43 = vadd.s32 %v7491_v22, %v443_v35  ;;  %11063 = vst [vmem:[#allocation10_spill] sm:$0xff] %v7535_v49  ;;  %v464_v52 = vadd.s32 %v7491_v22, %v444_v36  ;;  %vm553_vm6 = vcmp.ge.f32.partialorder %v7520_v44, 0.0  ;;  %v7221_v36 = vld [vmem:[%s10842_s1 + $0x78] sm:$0xff]  }
  0x49   : > { %v5357_v31 = vadd.s32 4294967284, %v459_v25  ;;  %vm496_vm0 = vcmp.ge.s32.totalorder %v5356_v29, 0  ;;  %vm515_vm1 = vcmp.lt.s32.totalorder %v5356_v29, 256  ;;  %v5358_v41 = vadd.s32 4294967284, %v460_v34 }
  0x4a   : > { %vm7525_vm4 = vmand %vm496_vm0, %vm515_vm1  ;;  %v5359_v50 = vadd.s32 4294967284, %v461_v37  ;;  %vm554_vm7 = vcmp.ge.f32.partialorder %v7522_v45, 0.0  ;;  %v572_v53 = vmul.f32 0.1, %v7520_v44  ;;  %v573_v54 = vmul.f32 0.1, %v7522_v45 }
  0x4b   : > { %vm497_vm2 = vcmp.ge.s32.totalorder %v5357_v31, 0  ;;  %vm516_vm3 = vcmp.lt.s32.totalorder %v5357_v31, 256  ;;  %v11059_v46 = vsel %vm7525_vm4, 4294967295, %v11058_v46  ;;  %6347 = vmatpush3.bf16.msra.mxu0 %v7216_v33  ;;  %vm498_vm8 = vcmp.ge.s32.totalorder %v5358_v41, 0 }
  0x4c   : > { %vm7531_vm5 = vmand %vm497_vm2, %vm516_vm3  ;;  %6348 = vmatprep.subr.bf16.mxu0 %v7217_v38  ;;  %vm517_vm9 = vcmp.lt.s32.totalorder %v5358_v41, 256  ;;  %v5360_v56 = vadd.s32 4294967284, %v462_v42  ;;  %v5361_v57 = vadd.s32 4294967284, %v463_v43  ;;  %v591_v58 = vsel %vm553_vm6, %v7520_v44, %v572_v53  ;;  %v6014_v53 = vld [vmem:[%s7487_s26 + $0x28] sm:$0xff]  }
  0x4d   : > { %v11062_v48 = vsel %vm7531_vm5, 4294967295, %v11061_v48  ;;  %v592_v59 = vsel %vm554_vm7, %v7522_v45, %v573_v54  ;;  %vm7552_vm10 = vmpackc.low %vm7531_vm5, %vm7525_vm4  ;;  %vm555_vm11 = vcmp.ge.f32.partialorder %v7529_v47, 0.0  ;;  %v574_v61 = vmul.f32 0.1, %v7529_v47  ;;  %v7222_v54 = vld [vmem:[%s10842_s1] sm:$0xff]  }
  0x4e   : > { %v11065_v60 = vsel %vm7552_vm10, 4294967295, %v11064_v60  ;;  %v7560_v62 = vsel %vm7525_vm4, %v591_v58, 0.0  ;;  %v7564_v63 = vsel %vm7531_vm5, %v592_v59, 0.0  ;;  %v5400_v0 = vpack.c.bf16 %v592_v59, %v591_v58  ;;  %vm7584_vm1 = vmand %vm498_vm8, %vm517_vm9 }
  0x4f   : > { %v575_v1 = vmul.f32 0.1, %v7535_v49  ;;  %6349 = vmatpush3.bf16.msra.mxu0 %v7217_v38  ;;  %vm499_vm12 = vcmp.ge.s32.totalorder %v5359_v50, 0  ;;  %vm518_vm13 = vcmp.lt.s32.totalorder %v5359_v50, 256  ;;  %vm556_vm14 = vcmp.ge.f32.partialorder %v7535_v49, 0.0 }
  0x50   : > { %v465_v3 = vadd.s32 %v7491_v22, %v445_v51  ;;  %6350 = vmatprep.subr.bf16.mxu0 %v7218_v55  ;;  %6358 = vmatprep.mubr.msk.bf16.mxu0 %vm7552_vm10, %v5400_v0  ;;  %v7575_v5 = vunpack.c.l.bf16 %v6011_v2  ;;  %v7577_v6 = vunpack.c.h.bf16 %v6011_v2  ;;  %vm500_vm15 = vcmp.ge.s32.totalorder %v5360_v56, 0  ;;  %vm7600_vm3 = vmand %vm499_vm12, %vm518_vm13 }
  0x51   : > { %vm501_vm0 = vcmp.ge.s32.totalorder %v5361_v57, 0  ;;  %v11069_v10 = vsel %vm7584_vm1, 4294967295, %v11068_v10  ;;  %v7591_v11 = vsel %vm555_vm11, %v7529_v47, %v574_v61  ;;  %vm519_vm2 = vcmp.lt.s32.totalorder %v5360_v56, 256 }
  0x52   : > { %11066 = vst [vmem:[#allocation11_spill] sm:$0xff] %v7575_v5  ;;  %11067 = vst [vmem:[#allocation12_spill] sm:$0xff] %v7577_v6  ;;  %v11072_v15 = vsel %vm7600_vm3, 4294967295, %v11071_v15  ;;  %v7607_v16 = vsel %vm556_vm14, %v7535_v49, %v575_v1  ;;  %v7612_v17 = vsel %vm7584_vm1, %v7591_v11, 0.0  ;;  %v576_v19 = vmul.f32 0.1, %v7575_v5 }
  0x53   : > { %11070 = vst [vmem:[#allocation13_spill] sm:$0xff] %v11069_v10  ;;  %11073 = vst [vmem:[#allocation14_spill] sm:$0xff] %v11072_v15  ;;  %6351 = vmatpush3.bf16.msra.mxu0 %v7218_v55  ;;  %v7617_v18 = vsel %vm7600_vm3, %v7607_v16, 0.0  ;;  %v577_v20 = vmul.f32 0.1, %v7577_v6  ;;  %v7621_v23 = vunpack.c.l.bf16 %v6012_v7  ;;  %vm557_vm6 = vcmp.ge.f32.partialorder %v7575_v5, 0.0 }
  0x54   : > { %6352 = vmatprep.subr.bf16.mxu0 %v7219_v4  ;;  %vm558_vm7 = vcmp.ge.f32.partialorder %v7577_v6, 0.0  ;;  %vm520_vm8 = vcmp.lt.s32.totalorder %v5361_v57, 256  ;;  %v7627_v26 = vunpack.c.h.bf16 %v6012_v7  ;;  %v5362_v27 = vadd.s32 4294967284, %v464_v52  ;;  %vm7635_vm9 = vmand %vm500_vm15, %vm519_vm2 }
  0x55   : > { %11074 = vst [vmem:[#allocation15_spill] sm:$0xff] %v7621_v23  ;;  %v5363_v30 = vadd.s32 4294967284, %v465_v3  ;;  %v7631_v31 = vunpack.c.l.bf16 %v6013_v24  ;;  %v11077_v32 = vmov 0  ;;  %v7640_v33 = vsel %vm557_vm6, %v7575_v5, %v576_v19  ;;  %vm7653_vm12 = vmand %vm501_vm0, %vm520_vm8 }
  0x56   : > { %11075 = vst [vmem:[#allocation16_spill] sm:$0xff] %v7627_v26  ;;  %v11078_v32 = vsel %vm7635_vm9, 4294967295, %v11077_v32  ;;  %v7643_v34 = vsel %vm558_vm7, %v7577_v6, %v577_v20  ;;  %vm559_vm11 = vcmp.ge.f32.partialorder %v7621_v23, 0.0  ;;  %v7646_v35 = vunpack.c.h.bf16 %v6013_v24 }
  0x57   : > { %11076 = vst [vmem:[#allocation17_spill] sm:$0xff] %v7631_v31  ;;  %6353 = vmatpush3.bf16.msra.mxu0 %v7219_v4  ;;  %11079 = vst [vmem:[#allocation18_spill] sm:$0xff] %v11078_v32  ;;  %v11081_v37 = vmov 0  ;;  %v7660_v38 = vsel %vm7635_vm9, %v7640_v33, 0.0  ;;  %v578_v39 = vmul.f32 0.1, %v7621_v23  ;;  %v5403_v55 = vpack.c.bf16 %v7607_v16, %v7591_v11 }
  0x58   : > { %11080 = vst [vmem:[#allocation19_spill] sm:$0xff] %v7646_v35  ;;  %6354 = vmatprep.subr.bf16.mxu0 %v7220_v12  ;;  %v11082_v37 = vsel %vm7653_vm12, 4294967295, %v11081_v37  ;;  %v446_v40 = vadd.s32 64, %v7489_v21  ;;  %v447_v41 = vadd.s32 72, %v7489_v21  ;;  %v7668_v42 = vsel %vm7653_vm12, %v7643_v34, 0.0  ;;  %v6015_v16 = vld [vmem:[%s7487_s26 + $0x30] sm:$0xff]  }
  0x59   : > { %11083 = vst [vmem:[#allocation20_spill] sm:$0xff] %v11082_v37  ;;  %vm502_vm13 = vcmp.ge.s32.totalorder %v5362_v27, 0  ;;  %vm560_vm14 = vcmp.ge.f32.partialorder %v7627_v26, 0.0  ;;  %vm521_vm15 = vcmp.lt.s32.totalorder %v5362_v27, 256  ;;  %v579_v50 = vmul.f32 0.1, %v7627_v26 }
  0x5a   : > { %v466_v51 = vadd.s32 %v7491_v22, %v446_v40  ;;  %v467_v52 = vadd.s32 %v7491_v22, %v447_v41  ;;  %vm503_vm0 = vcmp.ge.s32.totalorder %v5363_v30, 0  ;;  %vm522_vm2 = vcmp.lt.s32.totalorder %v5363_v30, 256  ;;  %vm7690_vm8 = vmand %vm502_vm13, %vm521_vm15  ;;  %v7223_v30 = vld [vmem:[%s10842_s1 + $0x8] sm:$0xff]   ;;  %v7224_v41 = vld [vmem:[%s10842_s1 + $0x10] sm:$0xff]  }
  0x5b   : > { %6355 = vmatpush3.bf16.msra.mxu0 %v7220_v12  ;;  %v7686_v56 = vsel %vm559_vm11, %v7621_v23, %v578_v39  ;;  %v11084_v59 = vmov 0  ;;  %v7694_v61 = vunpack.c.l.bf16 %v6014_v53  ;;  %v7696_v0 = vunpack.c.h.bf16 %v6014_v53  ;;  %vm7700_vm7 = vmand %vm503_vm0, %vm522_vm2  ;;  %v6016_v53 = vld [vmem:[%s7487_s26 + $0x38] sm:$0xff]  }
  0x5c   : > { %6356 = vmatprep.subr.bf16.mxu0 %v7221_v36  ;;  %v5364_v57 = vadd.s32 4294967284, %v466_v51  ;;  %v5365_v58 = vadd.s32 4294967284, %v467_v52  ;;  %v11085_v59 = vsel %vm7690_vm8, 4294967295, %v11084_v59  ;;  %v448_v1 = vadd.s32 80, %v7489_v21  ;;  %vm7721_vm11 = vmpackc.low %vm7600_vm3, %vm7584_vm1 }
  0x5d   : > { %11086 = vst [vmem:[#allocation21_spill] sm:$0xff] %v11085_v59  ;;  %11087 = vst [vmem:[#allocation22_spill] sm:$0xff] %v7694_v61  ;;  %v449_v2 = vadd.s32 88, %v7489_v21  ;;  %v11089_v3 = vmov 0  ;;  %v7707_v4 = vsel %vm560_vm14, %v7627_v26, %v579_v50  ;;  %v7712_v7 = vsel %vm7690_vm8, %v7686_v56, 0.0 }
  0x5e   : > { %11088 = vst [vmem:[#allocation23_spill] sm:$0xff] %v7696_v0  ;;  %v11090_v3 = vsel %vm7700_vm7, 4294967295, %v11089_v3  ;;  %v580_v11 = vmul.f32 0.1, %v7631_v31  ;;  %v581_v12 = vmul.f32 0.1, %v7646_v35  ;;  %v5406_v20 = vpack.c.bf16 %v7643_v34, %v7640_v33  ;;  %vm7740_vm14 = vmpackc.low %vm7653_vm12, %vm7635_vm9 }
  0x5f   : > { %11091 = vst [vmem:[#allocation24_spill] sm:$0xff] %v11090_v3  ;;  %6357 = vmatpush3.bf16.msra.mxu0 %v7221_v36  ;;  %v11092_v19 = vmov 0  ;;  %v7730_v24 = vsel %vm7700_vm7, %v7707_v4, 0.0  ;;  %v468_v27 = vadd.s32 %v7491_v22, %v448_v1  ;;  %v11094_v33 = vmov 0 }
  0x60   : > { %v11093_v19 = vsel %vm7721_vm11, 4294967295, %v11092_v19  ;;  %6378 = vmatprep.subr.bf16.mxu0 %v7222_v54  ;;  %v11095_v33 = vsel %vm7740_vm14, 4294967295, %v11094_v33  ;;  %vm523_vm0 = vcmp.lt.s32.totalorder %v5364_v57, 256  ;;  %v469_v34 = vadd.s32 %v7491_v22, %v449_v2 }
  0x61   : > { %v5366_v36 = vadd.s32 4294967284, %v468_v27  ;;  %v7747_v39 = vunpack.c.l.bf16 %v6015_v16  ;;  %v5409_v40 = vpack.c.bf16 %v7707_v4, %v7686_v56  ;;  %v7756_v50 = vunpack.c.h.bf16 %v6015_v16 }
  0x62   : > { %6359 = vmatmul.mubr.msk.bf16.vlgmr.msra.gmra.mrb[0].mxu0 %vm7721_vm11, %v5403_v55  ;;  %v450_v51 = vadd.s32 96, %v7489_v21  ;;  %v451_v52 = vadd.s32 104, %v7489_v21  ;;  %vm11098_vm13 = vcmp.ge.s32.totalorder %v5364_v57, 0  ;;  %v11099_v55 = vmov 0 }
  0x63   : > { %11096 = vst [vmem:[#allocation25_spill] sm:$0xff] %v7747_v39  ;;  %11097 = vst [vmem:[#allocation26_spill] sm:$0xff] %v7756_v50  ;;  %6379 = vmatpush3.bf16.msra.mxu0 %v7222_v54  ;;  %6362 = vmatprep.mubr.msk.bf16.mxu0 %vm7740_vm14, %v5406_v20  ;;  %vm11102_vm15 = vcmp.ge.f32.partialorder %v7631_v31, 0.0  ;;  %vm11103_vm2 = vcmp.ge.f32.partialorder %v7646_v35, 0.0  ;;  %v582_v54 = vmul.f32 0.1, %v7694_v61  ;;  %v7828_v43 = vunpack.c.h.bf16 %v6016_v53 }
  0x64   : > { %vm7765_vm6 = vmand %vm11098_vm13, %vm523_vm0  ;;  %v599_v56 = vsel %vm11102_vm15, %v7631_v31, %v580_v11  ;;  %v7775_v1 = vsel %vm11103_vm2, %v7646_v35, %v581_v12  ;;  %v583_v2 = vmul.f32 0.1, %v7696_v0  ;;  %6380 = vmatprep.subr.bf16.mxu0 %v7223_v30  ;;  %v5367_v4 = vadd.s32 4294967284, %v469_v34  ;;  %v7225_v34 = vld [vmem:[%s10842_s1 + $0x18] sm:$0xff]  }
  0x65   : > { %v11100_v55 = vsel %vm7765_vm6, 4294967295, %v11099_v55  ;;  %v7781_v57 = vsel %vm7765_vm6, %v599_v56, 0.0  ;;  %v470_v16 = vadd.s32 %v7491_v22, %v450_v51  ;;  %v471_v20 = vadd.s32 %v7491_v22, %v451_v52  ;;  %11116 = vst [vmem:[#allocation30_spill] sm:$0xff] %v7828_v43 }
  0x66   : > { %11101 = vst [vmem:[#allocation27_spill] sm:$0xff] %v11100_v55  ;;  %vm11104_vm13 = vcmp.lt.s32.totalorder %v5365_v58, 256  ;;  %vm11105_vm15 = vcmp.ge.s32.totalorder %v5365_v58, 0  ;;  %v11106_v11 = vmov 0  ;;  %v584_v12 = vmul.f32 0.1, %v7747_v39 }
  0x67   : > { %vm7787_vm0 = vmand %vm11105_vm15, %vm11104_vm13  ;;  %v5412_v27 = vpack.c.bf16 %v7775_v1, %v599_v56  ;;  %v5368_v51 = vadd.s32 4294967284, %v470_v16  ;;  %v5369_v52 = vadd.s32 4294967284, %v471_v20  ;;  %v585_v58 = vmul.f32 0.1, %v7756_v50  ;;  %6381 = vmatpush3.bf16.msra.mxu0 %v7223_v30 }
  0x68   : > { %v11107_v11 = vsel %vm7787_vm0, 4294967295, %v11106_v11  ;;  %vm7802_vm13 = vmpackc.low %vm7700_vm7, %vm7690_vm8  ;;  %v11109_v29 = vmov 0  ;;  %vm11111_vm15 = vcmp.ge.f32.partialorder %v7694_v61, 0.0  ;;  %v7812_v16 = vunpack.c.l.bf16 %v6016_v53  ;;  %6382 = vmatprep.subr.bf16.mxu0 %v7224_v41 }
  0x69   : > { %11108 = vst [vmem:[#allocation28_spill] sm:$0xff] %v11107_v11  ;;  %v11110_v29 = vsel %vm7802_vm13, 4294967295, %v11109_v29  ;;  %v7809_v56 = vsel %vm11111_vm15, %v7694_v61, %v582_v54  ;;  %v452_v20 = vadd.s32 112, %v7489_v21  ;;  %vm7819_vm2 = vmpackc.low %vm7787_vm0, %vm7765_vm6  ;;  %v11113_v30 = vmov 0 }
  0x6a   : > { %11112 = vst [vmem:[#allocation29_spill] sm:$0xff] %v7812_v16  ;;  %v11114_v30 = vsel %vm7819_vm2, 4294967295, %v11113_v30  ;;  %vm11115_vm15 = vcmp.ge.f32.partialorder %v7696_v0, 0.0  ;;  %v453_v14 = vadd.s32 120, %v7489_v21  ;;  %6363 = vmatmul.mubr.msk.bf16.gmra.mrb[4].mxu0 %vm7802_vm13, %v5409_v40  ;;  %vm11117_vm14 = vcmp.lt.s32.totalorder %v5366_v36, 256  ;;  %v7226_v40 = vld [vmem:[%s10842_s1 + $0x20] sm:$0xff]  }
  0x6b   : > { %v7826_v54 = vsel %vm11115_vm15, %v7696_v0, %v583_v2  ;;  %v472_v25 = vadd.s32 %v7491_v22, %v452_v20  ;;  %vm11118_vm10 = vcmp.ge.s32.totalorder %v5366_v36, 0  ;;  %v11119_v28 = vmov 0  ;;  %6383 = vmatpush3.bf16.msra.mxu0 %v7224_v41  ;;  %6366 = vmatprep.mubr.msk.bf16.mxu0 %vm7819_vm2, %v5412_v27  ;;  %v417_v41 = vld [vmem:[%s7487_s26 + $0x48] sm:$0xf] }
  0x6c   : > { %vm7837_vm6 = vmand %vm11118_vm10, %vm11117_vm14  ;;  %vm509_vm15 = vcmp.ge.s32.totalorder %v5369_v52, 0  ;;  %vm528_vm7 = vcmp.lt.s32.totalorder %v5369_v52, 256  ;;  %vm11122_vm11 = vcmp.ge.f32.partialorder %v7747_v39, 0.0  ;;  %vm11123_vm12 = vcmp.ge.f32.partialorder %v7756_v50, 0.0  ;;  %6384 = vmatprep.subr.bf16.mxu0 %v7225_v34 }
  0x6d   : > { %v11120_v28 = vsel %vm7837_vm6, 4294967295, %v11119_v28  ;;  %v7844_v53 = vsel %vm11122_vm11, %v7747_v39, %v584_v12  ;;  %v7849_v2 = vsel %vm11123_vm12, %v7756_v50, %v585_v58  ;;  %vm11124_vm10 = vcmp.lt.s32.totalorder %v5367_v4, 256  ;;  %vm7881_vm2 = vmand %vm509_vm15, %vm528_vm7 }
  0x6e   : > { %11121 = vst [vmem:[#allocation31_spill] sm:$0xff] %v11120_v28  ;;  %vm11125_vm14 = vcmp.ge.s32.totalorder %v5367_v4, 0  ;;  %v11126_v36 = vmov 0  ;;  %v473_v12 = vadd.s32 %v7491_v22, %v453_v14  ;;  %v5370_v20 = vadd.s32 4294967284, %v472_v25 }
  0x6f   : > { %vm7855_vm13 = vmand %vm11125_vm14, %vm11124_vm10  ;;  %v586_v58 = vmul.f32 0.1, %v7812_v16  ;;  %v7864_v8 = vunpack.c.l.bf16 %v6017_v13  ;;  %v5415_v4 = vpack.c.bf16 %v7826_v54, %v7809_v56  ;;  %vm11130_vm12 = vcmp.lt.s32.totalorder %v5368_v51, 256  ;;  %6385 = vmatpush3.bf16.msra.mxu0 %v7225_v34  ;;  %v7227_v34 = vld [vmem:[%s10842_s1 + $0x28] sm:$0xff]  }
  0x70   : > { %v11127_v36 = vsel %vm7855_vm13, 4294967295, %v11126_v36  ;;  %vm11131_vm11 = vcmp.ge.s32.totalorder %v5368_v51, 0  ;;  %v11132_v27 = vmov 0  ;;  %v7876_v9 = vunpack.c.h.bf16 %v6017_v13  ;;  %vm7895_vm7 = vmpackc.low %vm7855_vm13, %vm7837_vm6  ;;  %6386 = vmatprep.subr.bf16.mxu0 %v7226_v40 }
  0x71   : > { %11128 = vst [vmem:[#allocation32_spill] sm:$0xff] %v11127_v36  ;;  %11129 = vst [vmem:[#allocation33_spill] sm:$0xff] %v7864_v8  ;;  %v454_v14 = vadd.s32 128, %v7489_v21  ;;  %v11136_v25 = vmov 0  ;;  %v5418_v50 = vpack.c.bf16 %v7849_v2, %v7844_v53  ;;  %v5371_v51 = vadd.s32 4294967284, %v473_v12 }
  0x72   : > { %vm7871_vm10 = vmand %vm11131_vm11, %vm11130_vm12  ;;  %11135 = vst [vmem:[#allocation35_spill] sm:$0xff] %v7876_v9  ;;  %v11137_v25 = vsel %vm7881_vm2, 4294967295, %v11136_v25  ;;  %v587_v39 = vmul.f32 0.1, %v7828_v43  ;;  %v455_v13 = vadd.s32 136, %v7489_v21  ;;  %v11139_v52 = vmov 0  ;;  %6367 = vmatmul.mubr.msk.bf16.gmra.mrb[8].mxu0 %vm7895_vm7, %v5415_v4 }
  0x73   : > { %v11133_v27 = vsel %vm7871_vm10, 4294967295, %v11132_v27  ;;  %11138 = vst [vmem:[#allocation36_spill] sm:$0xff] %v11137_v25  ;;  %v474_v35 = vadd.s32 %v7491_v22, %v454_v14  ;;  %v11140_v52 = vsel %vm7895_vm7, 4294967295, %v11139_v52  ;;  %v588_v12 = vmul.f32 0.1, %v7864_v8  ;;  %vm7906_vm14 = vmpackc.low %vm7881_vm2, %vm7871_vm10  ;;  %6387 = vmatpush3.bf16.msra.mxu0 %v7226_v40 }
  0x74   : > { %11134 = vst [vmem:[#allocation34_spill] sm:$0xff] %v11133_v27  ;;  %11141 = vst [vmem:[#allocation37_spill] sm:$0xff] %v11140_v52  ;;  %v11142_v14 = vmov 0  ;;  %v475_v0 = vadd.s32 %v7491_v22, %v455_v13  ;;  %v589_v61 = vmul.f32 0.1, %v7876_v9  ;;  %v7915_v6 = vunpack.c.l.bf16 %v417_v41  ;;  %6370 = vmatprep.mubr.msk.bf16.mxu0 %vm7906_vm14, %v5418_v50  ;;  %6388 = vmatprep.subr.bf16.mxu0 %v7227_v34 }
  0x75   : > { %v11143_v14 = vsel %vm7906_vm14, 4294967295, %v11142_v14  ;;  %v5372_v31 = vadd.s32 4294967284, %v474_v35  ;;  %v456_v26 = vadd.s32 144, %v7489_v21  ;;  %vm11146_vm12 = vcmp.lt.s32.totalorder %v5370_v20, 256 }
  0x76   : > { %11144 = vst [vmem:[#allocation38_spill] sm:$0xff] %v11143_v14  ;;  %11145 = vst [vmem:[#allocation39_spill] sm:$0xff] %v7915_v6  ;;  %vm11147_vm15 = vcmp.ge.s32.totalorder %v5370_v20, 0  ;;  %v11148_v5 = vmov 0  ;;  %vm11151_vm8 = vcmp.ge.f32.partialorder %v7812_v16, 0.0  ;;  %v5373_v13 = vadd.s32 4294967284, %v475_v0 }
  0x77   : > { %vm7923_vm9 = vmand %vm11147_vm15, %vm11146_vm12  ;;  %v605_v35 = vsel %vm11151_vm8, %v7812_v16, %v586_v58  ;;  %vm512_vm5 = vcmp.ge.s32.totalorder %v5372_v31, 0  ;;  %vm531_vm3 = vcmp.lt.s32.totalorder %v5372_v31, 256  ;;  %v7933_v41 = vsel %vm7787_vm0, %v7775_v1, 0.0  ;;  %v7228_v31 = vld [vmem:[%s10842_s1 + $0x30] sm:$0xff]   ;;  %6389 = vmatpush3.bf16.msra.mxu0 %v7227_v34 }
  0x78   : > { %v11149_v5 = vsel %vm7923_vm9, 4294967295, %v11148_v5  ;;  %vm11152_vm12 = vcmp.lt.s32.totalorder %v5371_v51, 256  ;;  %vm11153_vm15 = vcmp.ge.s32.totalorder %v5371_v51, 0  ;;  %v11154_v20 = vmov 0  ;;  %6390 = vmatprep.subr.bf16.mxu0 %v7228_v31 }
  0x79   : > { %11150 = vst [vmem:[#allocation40_spill] sm:$0xff] %v11149_v5  ;;  %vm7939_vm11 = vmand %vm11153_vm15, %vm11152_vm12  ;;  %vm11157_vm8 = vcmp.ge.f32.partialorder %v7828_v43, 0.0  ;;  %vm11158_vm7 = vcmp.ge.f32.partialorder %v7864_v8, 0.0  ;;  %v476_v50 = vadd.s32 %v7491_v22, %v456_v26  ;;  %vm513_vm14 = vcmp.ge.s32.totalorder %v5373_v13, 0 }
  0x7a   : > { %v11155_v20 = vsel %vm7939_vm11, 4294967295, %v11154_v20  ;;  %v606_v0 = vsel %vm11157_vm8, %v7828_v43, %v587_v39  ;;  %v607_v1 = vsel %vm11158_vm7, %v7864_v8, %v588_v12  ;;  %vm532_vm12 = vcmp.lt.s32.totalorder %v5373_v13, 256  ;;  %vm7953_vm15 = vmand %vm512_vm5, %vm531_vm3 }
  0x7b   : > { %11156 = vst [vmem:[#allocation41_spill] sm:$0xff] %v11155_v20  ;;  %v11159_v40 = vmov 0  ;;  %vm11162_vm8 = vcmp.ge.f32.partialorder %v7876_v9, 0.0  ;;  %v590_v58 = vmul.f32 0.1, %v7915_v6  ;;  %vm7961_vm0 = vmand %vm513_vm14, %vm532_vm12  ;;  %v11163_v4 = vmov 0  ;;  %6391 = vmatpush3.bf16.msra.mxu0 %v7228_v31 }
  0x7c   : > { %v11160_v40 = vsel %vm7953_vm15, 4294967295, %v11159_v40  ;;  %v608_v39 = vsel %vm11162_vm8, %v7876_v9, %v589_v61  ;;  %v11164_v4 = vsel %vm7961_vm0, 4294967295, %v11163_v4  ;;  %v5374_v51 = vadd.s32 4294967284, %v476_v50  ;;  %vm7980_vm5 = vmpackc.low %vm7939_vm11, %vm7923_vm9  ;;  %v7230_v31 = vld [vmem:[%s10842_s1 + $0x80] sm:$0xff]  }
  0x7d   : > { %11161 = vst [vmem:[#allocation42_spill] sm:$0xff] %v11160_v40  ;;  %11165 = vst [vmem:[#allocation43_spill] sm:$0xff] %v11164_v4  ;;  %vm571_vm7 = vcmp.ge.f32.partialorder %v7915_v6, 0.0  ;;  %v7969_v22 = vsel %vm7837_vm6, %v7809_v56, 0.0  ;;  %v7974_v26 = vsel %vm7855_vm13, %v7826_v54, 0.0  ;;  %v11166_v61 = vmov 0 }
  0x7e   : > { %v11167_v61 = vsel %vm7980_vm5, 4294967295, %v11166_v61  ;;  %v5421_v12 = vpack.c.bf16 %v606_v0, %v605_v35  ;;  %v7987_v13 = vsel %vm7871_vm10, %v7844_v53, 0.0  ;;  %vm7993_vm3 = vmpackc.low %vm7961_vm0, %vm7953_vm15  ;;  %v11169_v56 = vmov 0 }
  0x7f   : > { %11168 = vst [vmem:[#allocation44_spill] sm:$0xff] %v11167_v61  ;;  %v11170_v56 = vsel %vm7993_vm3, 4294967295, %v11169_v56  ;;  %v5424_v54 = vpack.c.bf16 %v608_v39, %v607_v1  ;;  %vm514_vm14 = vcmp.ge.s32.totalorder %v5374_v51, 0  ;;  %vm533_vm12 = vcmp.lt.s32.totalorder %v5374_v51, 256 }
  0x80   : > { %11171 = vst [vmem:[#allocation45_spill] sm:$0xff] %v11170_v56  ;;  %v8000_v50 = vsel %vm7881_vm2, %v7849_v2, 0.0  ;;  %v8004_v53 = vsel %vm7923_vm9, %v605_v35, 0.0  ;;  %v8008_v34 = vsel %vm7939_vm11, %v606_v0, 0.0  ;;  %vm8010_vm8 = vmand %vm514_vm14, %vm533_vm12  ;;  %v11172_v9 = vmov 0  ;;  %v7229_v2 = vld [vmem:[%s10842_s1 + $0x38] sm:$0xff]   ;;  %6371 = vmatmul.mubr.msk.bf16.gmra.mrb[12].mxu0 %vm7980_vm5, %v5421_v12 }
  0x81   : > { %v11173_v9 = vsel %vm8010_vm8, 4294967295, %v11172_v9  ;;  %v609_v51 = vsel %vm571_vm7, %v7915_v6, %v590_v58  ;;  %v8022_v35 = vsel %vm7953_vm15, %v607_v1, 0.0  ;;  %v671_v43 = vrot.slane %v7660_v38, 7  ;;  %6374 = vmatprep.mubr.msk.bf16.mxu0 %vm7993_vm3, %v5424_v54  ;;  %6392 = vmatprep.subr.bf16.mxu0 %v7229_v2  ;;  %vm8062_vm12 = vmpackc.low %vm8010_vm8, %vm8010_vm8 }
  0x82   : > { %11174 = vst [vmem:[#allocation46_spill] sm:$0xff] %v11173_v9  ;;  %v8026_v0 = vsel %vm8010_vm8, %v609_v51, 0.0  ;;  %v8034_v58 = vsel %vm7961_vm0, %v608_v39, 0.0  ;;  %v11175_v1 = vrot.slane %v7564_v63, 7  ;;  %v11176_v6 = vrot.slane %v7560_v62, 7  ;;  %6393 = vmatpush3.bf16.msra.mxu0 %v7229_v2 }
  0x83   : > { %vm11177_vm7 = vcmp.lt.s32.totalorder %v7489_v21, 1  ;;  %v672_v12 = vrot.slane %v7668_v42, 7  ;;  %v11179_v23 = vrot.slane %v8026_v0, 7  ;;  %v673_v54 = vrot.slane %v7712_v7, 7  ;;  %6414 = vmatprep.subr.bf16.mxu0 %v7230_v31 }
  0x84   : > { %v704_v16 = vsel %vm11177_vm7, %v11176_v6, %v11175_v1  ;;  %v11178_v8 = vmov %v11176_v6  ;;  %vm11180_vm14 = vmmov %vm11177_vm7  ;;  %v674_v45 = vrot.slane %v7730_v24, 7  ;;  %v675_v6 = vrot.slane %v7781_v57, 7 }
  0x85   : > { %v705_v39 = vsel %vm11180_vm14, %v11179_v23, %v11178_v8  ;;  %v676_v1 = vrot.slane %v7933_v41, 7  ;;  %v677_v49 = vrot.slane %v7969_v22, 7  ;;  %v5427_v44 = vpack.c.bf16 %v609_v51, %v609_v51  ;;  %vm11188_vm14 = vmmov %vm11177_vm7 }
  0x86   : > { %v11181_v8 = vmov 0  ;;  %v706_v23 = vpack.c.bf16 %v704_v16, %v705_v39  ;;  %v678_v47 = vrot.slane %v7974_v26, 7  ;;  %v679_v56 = vrot.slane %v7987_v13, 7  ;;  %vm11189_vm3 = vmmov %vm11177_vm7 }
  0x87   : > { %v11182_v8 = vsel %vm8062_vm12, 4294967295, %v11181_v8  ;;  %v11184_v2 = vrot.slane %v7617_v18, 7  ;;  %v11185_v16 = vrot.slane %v7612_v17, 7  ;;  %v11187_v4 = vrot.slane %v7564_v63, 7 }
  0x88   : > { %11183 = vst [vmem:[#allocation47_spill] sm:$0xff] %v11182_v8  ;;  %6375 = vmatmul.mubr.msk.bf16.gmra.mrb[16].mxu0 %vm8062_vm12, %v5427_v44  ;;  %v700_v40 = vsel %vm11189_vm3, %v671_v43, %v672_v12  ;;  %vm11191_vm12 = vmmov %vm11189_vm3  ;;  %v684_v51 = vrot.slane %v8034_v58, 7  ;;  %v736_v52 = vrot.slane %v7969_v22, 1  ;;  %v738_v8 = vrot.slane %v7987_v13, 1 }
  0x89   : > { %6394 = vmatprep.mubr.bf16.mxu0 %v706_v23  ;;  %v702_v39 = vsel %vm11177_vm7, %v11185_v16, %v11184_v2  ;;  %v11186_v9 = vmov %v11185_v16  ;;  %v11190_v44 = vmov %v11184_v2  ;;  %v739_v16 = vrot.slane %v8000_v50, 1  ;;  %vm11193_vm7 = vmmov %vm11189_vm3 }
  0x8a   : > { %v703_v61 = vsel %vm11188_vm14, %v11187_v4, %v11186_v9  ;;  %v701_v23 = vsel %vm11191_vm12, %v11190_v44, %v671_v43  ;;  %v7231_v43 = vld [vmem:[%s10842_s1 + $0x88] sm:$0xff]   ;;  %v740_v14 = vrot.slane %v8004_v53, 1  ;;  %v744_v44 = vrot.slane %v8026_v0, 1  ;;  %vm11192_vm12 = vmmov %vm11189_vm3 }
  0x8b   : > { %v707_v25 = vpack.c.bf16 %v702_v39, %v703_v61  ;;  %v708_v2 = vpack.c.bf16 %v700_v40, %v701_v23  ;;  %v7232_v61 = vld [vmem:[%s10842_s1 + $0x90] sm:$0xff]   ;;  %v698_v40 = vsel %vm11189_vm3, %v673_v54, %v674_v45  ;;  %v699_v23 = vsel %vm11192_vm12, %v672_v12, %v673_v54  ;;  %vm11194_vm14 = vmmov %vm11189_vm3  ;;  %v7233_v39 = vld [vmem:[%s10842_s1 + $0x98] sm:$0xff]  }
  0x8c   : > { %v697_v9 = vsel %vm11194_vm14, %v674_v45, %v675_v6  ;;  %v709_v4 = vpack.c.bf16 %v698_v40, %v699_v23  ;;  %v7234_v12 = vld [vmem:[%s10842_s1 + $0xa0] sm:$0xff]   ;;  %v694_v54 = vsel %vm11189_vm3, %v677_v49, %v678_v47  ;;  %vm11195_vm12 = vmmov %vm11189_vm3  ;;  %v11232_v22 = vrot.slane %v8008_v34, 1 }
  0x8d   : > { %v695_v45 = vsel %vm11195_vm12, %v676_v1, %v677_v49  ;;  %vm11198_vm14 = vmmov %vm11189_vm3  ;;  %v7236_v49 = vld [vmem:[%s10842_s1 + $0xb0] sm:$0xff]   ;;  %vm11244_vm5 = vnez %v11078_v32 }
  0x90   : > { %6395 = vmatmul.mubr.bf16.vlgmr.msra.gmra.mrb[0].mxu0 %v707_v25  ;;  %v696_v25 = vsel %vm11193_vm7, %v675_v6, %v676_v1  ;;  %v11196_v6 = vrot.slane %v8000_v50, 7  ;;  %vm11197_vm7 = vmmov %vm11189_vm3  ;;  %vm10918_vm3 = vcmp.lt.s32.totalorder %v7489_v21, 7  ;;  %v11199_v1 = vrot.slane %v8008_v34, 7 }
  0x91   : > { %6415 = vmatpush3.bf16.msra.mxu0 %v7230_v31  ;;  %6398 = vmatprep.mubr.bf16.mxu0 %v708_v2  ;;  %v710_v31 = vpack.c.bf16 %v696_v25, %v697_v9  ;;  %v693_v9 = vsel %vm11198_vm14, %v678_v47, %v679_v56  ;;  %v11200_v47 = vrot.slane %v8004_v53, 7  ;;  %vm11201_vm12 = vmmov %vm11197_vm7  ;;  %v11204_v25 = vrot.slane %v8022_v35, 7 }
  0x92   : > { %6416 = vmatprep.subr.bf16.mxu0 %v7231_v43  ;;  %v692_v2 = vsel %vm11197_vm7, %v679_v56, %v11196_v6  ;;  %v11203_v40 = vmov %v11196_v6  ;;  %vm11205_vm14 = vmmov %vm11197_vm7  ;;  %v11234_v50 = vrot.slane %v8034_v58, 1  ;;  %v7239_v58 = vld [vmem:[%s10844_s3 + $0x48] sm:$0xff]  }
  0x93   : > { %v690_v56 = vsel %vm11201_vm12, %v11200_v47, %v11199_v1  ;;  %vm11208_vm12 = vmmov %vm11197_vm7 }
  0x95   : > { %6417 = vmatpush3.bf16.msra.mxu0 %v7231_v43  ;;  %v7235_v43 = vld [vmem:[%s10842_s1 + $0xa8] sm:$0xff]  }
  0x96   : > { %6418 = vmatprep.subr.bf16.mxu0 %v7232_v61 }
  0x98   : > { %6399 = vmatmul.mubr.bf16.gmra.mrb[4].mxu0 %v709_v4  ;;  %v711_v4 = vpack.c.bf16 %v694_v54, %v695_v45  ;;  %v11207_v54 = vmov %v11199_v1  ;;  %v11210_v1 = vrot.slane %v7612_v17, 1  ;;  %v11222_v17 = vrot.slane %v7781_v57, 1 }
  0x99   : > { %6419 = vmatpush3.bf16.msra.mxu0 %v7232_v61  ;;  %6402 = vmatprep.mubr.bf16.mxu0 %v710_v31  ;;  %v712_v61 = vpack.c.bf16 %v692_v2, %v693_v9  ;;  %v688_v31 = vsel %vm11205_vm14, %v11204_v25, %v684_v51  ;;  %v7237_v2 = vld [vmem:[%s10842_s1 + $0xb8] sm:$0xff]  }
  0x9a   : > { %6420 = vmatprep.subr.bf16.mxu0 %v7233_v39 }
  0x9d   : > { %6421 = vmatpush3.bf16.msra.mxu0 %v7233_v39  ;;  %v11202_v39 = vmov %v11200_v47  ;;  %v11211_v47 = vrot.slane %v7564_v63, 1  ;;  %v11217_v63 = vmov %v11210_v1 }
  0x9e   : > { %6422 = vmatprep.subr.bf16.mxu0 %v7234_v12  ;;  %v691_v23 = vsel %vm11197_vm7, %v11203_v40, %v11202_v39  ;;  %v11213_v39 = vrot.slane %v7560_v62, 1 }
  0x9f   : > { %v713_v6 = vpack.c.bf16 %v690_v56, %v691_v23  ;;  %v11212_v56 = vmov %v11211_v47 }
  0xa0   : > { %6403 = vmatmul.mubr.bf16.gmra.mrb[8].mxu0 %v711_v4  ;;  %v11209_v4 = vrot.slane %v8026_v0, 7  ;;  %v7241_v0 = vld [vmem:[%s10844_s3 + $0x58] sm:$0xff]  }
  0xa1   : > { %6423 = vmatpush3.bf16.msra.mxu0 %v7234_v12  ;;  %6406 = vmatprep.mubr.bf16.mxu0 %v712_v61  ;;  %v11206_v12 = vmov %v11204_v25  ;;  %v11215_v25 = vrot.slane %v7617_v18, 1 }
  0xa2   : > { %6424 = vmatprep.subr.bf16.mxu0 %v7235_v43  ;;  %v689_v45 = vsel %vm11208_vm12, %v11207_v54, %v11206_v12  ;;  %v687_v61 = vsel %vm11197_vm7, %v684_v51, %v11209_v4  ;;  %v11214_v51 = vrot.slane %v7660_v38, 1 }
  0xa3   : > { %v714_v9 = vpack.c.bf16 %v688_v31, %v689_v45  ;;  %v715_v40 = vpack.c.bf16 %v687_v61, %v687_v61  ;;  %v11216_v12 = vmov %v11215_v25  ;;  %v11218_v45 = vrot.slane %v7712_v7, 1 }
  0xa4   : > { %v760_v31 = vsel %vm10918_vm3, %v11215_v25, %v11214_v51  ;;  %v761_v54 = vsel %vm10918_vm3, %v11217_v63, %v11216_v12  ;;  %v11221_v4 = vmov %v11214_v51  ;;  %v11229_v7 = vrot.slane %v7974_v26, 1 }
  0xa5   : > { %6425 = vmatpush3.bf16.msra.mxu0 %v7235_v43  ;;  %v762_v43 = vsel %vm10918_vm3, %v11211_v47, %v11210_v1  ;;  %v766_v18 = vpack.c.bf16 %v760_v31, %v761_v54  ;;  %v11223_v47 = vrot.slane %v7730_v24, 1  ;;  %v751_v63 = vsel %vm10918_vm3, %v738_v8, %v739_v16 }
  0xa6   : > { %6426 = vmatprep.subr.bf16.mxu0 %v7236_v49  ;;  %v752_v31 = vsel %vm10918_vm3, %v11229_v7, %v738_v8  ;;  %v11230_v12 = vmov %v11229_v7  ;;  %v746_v8 = vsel %vm10918_vm3, %v11234_v50, %v744_v44  ;;  %v8331_v7 = vld [vmem:[%s10843_s2] ss:$0 sm:$0xff] }
  0xa7   : > { %v753_v57 = vsel %vm10918_vm3, %v736_v52, %v11230_v12 }
  0xa8   : > { %6407 = vmatmul.mubr.bf16.gmra.mrb[12].mxu0 %v713_v6  ;;  %v11219_v6 = vrot.slane %v7668_v42, 1  ;;  %v11225_v42 = vmov %v11218_v45  ;;  %v770_v26 = vpack.c.bf16 %v752_v31, %v753_v57 }
  0xa9   : > { %6410 = vmatprep.mubr.bf16.mxu0 %v714_v9  ;;  %6427 = vmatpush3.bf16.msra.mxu0 %v7236_v49  ;;  %v763_v49 = vsel %vm10918_vm3, %v11213_v39, %v11212_v56  ;;  %v11224_v56 = vmov %v11223_v47  ;;  %v11226_v39 = vrot.slane %v7933_v41, 1  ;;  %v750_v41 = vsel %vm10918_vm3, %v739_v16, %v740_v14 }
  0xaa   : > { %6428 = vmatprep.subr.bf16.mxu0 %v7237_v2  ;;  %v765_v23 = vpack.c.bf16 %v762_v43, %v763_v49  ;;  %v11220_v9 = vmov %v11219_v6  ;;  %v756_v43 = vsel %vm10918_vm3, %v11223_v47, %v11222_v17  ;;  %v757_v38 = vsel %vm10918_vm3, %v11225_v42, %v11224_v56  ;;  %v8319_v47 = vld [vmem:[%s10844_s3] sm:$0xff]  }
  0xab   : > { %v759_v61 = vsel %vm10918_vm3, %v11221_v4, %v11220_v9  ;;  %v754_v49 = vsel %vm10918_vm3, %v11226_v39, %v736_v52  ;;  %v768_v24 = vpack.c.bf16 %v756_v43, %v757_v38  ;;  %v771_v54 = vpack.c.bf16 %v750_v41, %v751_v63 }
  0xac   : > { %v11231_v52 = vrot.slane %v8022_v35, 1  ;;  %v11235_v16 = vmov %v11234_v50  ;;  %v7238_v35 = vld [vmem:[%s10844_s3 + $0x40] sm:$0xff]  }
  0xad   : > { %6429 = vmatpush3.bf16.msra.mxu0 %v7237_v2  ;;  %v758_v2 = vsel %vm10918_vm3, %v11219_v6, %v11218_v45  ;;  %v11233_v6 = vmov %v11232_v22  ;;  %6450 = vmatprep.subr.bf16.mxu1 %v7238_v35 }
  0xae   : > { %v767_v1 = vpack.c.bf16 %v758_v2, %v759_v61  ;;  %v748_v45 = vsel %vm10918_vm3, %v11232_v22, %v11231_v52  ;;  %v749_v13 = vsel %vm10918_vm3, %v740_v14, %v11233_v6  ;;  %v11236_v2 = vmov %v11231_v52  ;;  %6451 = vmatpush3.bf16.msra.mxu1 %v7238_v35 }
  0xaf   : > { %v747_v9 = vsel %vm10918_vm3, %v11236_v2, %v11235_v16  ;;  %v772_v34 = vpack.c.bf16 %v748_v45, %v749_v13  ;;  %v11237_v14 = vrot.slane %v7560_v62, 1  ;;  %6452 = vmatprep.subr.bf16.mxu1 %v7239_v58  ;;  %v7240_v62 = vld [vmem:[%s10844_s3 + $0x50] sm:$0xff]  }
  0xb0   : > { %6411 = vmatmul.mubr.bf16.gmra.mrb[20].mxu0 %v715_v40  ;;  %v11227_v40 = vmov %v11226_v39  ;;  %v773_v4 = vpack.c.bf16 %v746_v8, %v747_v9 }
  0xb1   : > { %6430 = vmatprep.mubr.bf16.mxu0 %v765_v23  ;;  %v11228_v23 = vmov %v11222_v17  ;;  %v764_v53 = vsel %vm10918_vm3, %v744_v44, %v11237_v14  ;;  %v7242_v44 = vld [vmem:[%s10844_s3 + $0x60] sm:$0xff]   ;;  %v7245_v17 = vld [vmem:[%s10844_s3 + $0x78] sm:$0xff]  }
  0xb2   : > { %v755_v51 = vsel %vm10918_vm3, %v11228_v23, %v11227_v40  ;;  %v774_v61 = vpack.c.bf16 %v764_v53, %v764_v53  ;;  %6453 = vmatpush3.bf16.msra.mxu1 %v7239_v58 }
  0xb3   : > { %v769_v25 = vpack.c.bf16 %v754_v49, %v755_v51  ;;  %6454 = vmatprep.subr.bf16.mxu1 %v7240_v62 }
  0xb6   : > { %6455 = vmatpush3.bf16.msra.mxu1 %v7240_v62 }
  0xb7   : > { %6456 = vmatprep.subr.bf16.mxu1 %v7241_v0 }
  0xb8   : > { %6431 = vmatmul.mubr.bf16.vlgmr.msra.gmra.mrb[0].mxu0 %v766_v18  ;;  %v7243_v18 = vld [vmem:[%s10844_s3 + $0x68] sm:$0xff]  }
  0xb9   : > { %6434 = vmatprep.mubr.bf16.mxu0 %v767_v1  ;;  %v7244_v1 = vld [vmem:[%s10844_s3 + $0x70] sm:$0xff]  }
  0xba   : > { %6457 = vmatpush3.bf16.msra.mxu1 %v7241_v0 }
  0xbb   : > { %6458 = vmatprep.subr.bf16.mxu1 %v7242_v44 }
  0xbe   : > { %6459 = vmatpush3.bf16.msra.mxu1 %v7242_v44 }
  0xbf   : > { %6460 = vmatprep.subr.bf16.mxu1 %v7243_v18 }
  0xc0   : > { %6435 = vmatmul.mubr.bf16.gmra.mrb[4].mxu0 %v768_v24 }
  0xc1   : > { %6438 = vmatprep.mubr.bf16.mxu0 %v769_v25 }
  0xc2   : > { %6461 = vmatpush3.bf16.msra.mxu1 %v7243_v18 }
  0xc3   : > { %6462 = vmatprep.subr.bf16.mxu1 %v7244_v1 }
  0xc6   : > { %6463 = vmatpush3.bf16.msra.mxu1 %v7244_v1 }
  0xc7   : > { %6464 = vmatprep.subr.bf16.mxu1 %v7245_v17 }
  0xc8   : > { %6439 = vmatmul.mubr.bf16.gmra.mrb[8].mxu0 %v770_v26 }
  0xc9   : > { %6442 = vmatprep.mubr.bf16.mxu0 %v771_v54 }
  0xca   : > { %6465 = vmatpush3.bf16.msra.mxu1 %v7245_v17 }
  0xcb   : > { %6486 = vmatprep.subr.bf16.mxu1 %v8319_v47 }
  0xd0   : > { %6443 = vmatmul.mubr.bf16.gmra.mrb[12].mxu0 %v772_v34 }
  0xd1   : > { %6446 = vmatprep.mubr.bf16.mxu0 %v773_v4 }
  0xd8   : > { %6447 = vmatmul.mubr.bf16.gmra.mrb[24].mxu0 %v774_v61 }
 0x15b   : > { %v6376_v43 = vpop.f32.mrb[16].mxu0 }
 0x15c   : > { %v954_v56 = vpop.f32.mrb[17].mxu0 }
 0x15d   : > { %v6377_v42 = vpop.f32.mrb[18].mxu0 }
 0x15e   : > { %v957_v38 = vpop.f32.mrb[19].mxu0 }
 0x183   : > { %v6412_v39 = vpop.f32.mrb[20].mxu0 }
 0x184   : > { %v8322_v49 = vadd.f32 %v6412_v39, %v6376_v43  ;;  %v1114_v40 = vpop.f32.mrb[21].mxu0 }
 0x185   : > { %v8324_v23 = vadd.f32 %v1114_v40, %v954_v56  ;;  %v6413_v51 = vpop.f32.mrb[22].mxu0 }
 0x186   : > { %v1117_v24 = vpop.f32.mrb[23].mxu0 }
 0x187   : > { %v8326_v25 = vadd.f32 %v1117_v24, %v957_v38 }
 0x18b   : > { %v6432_v31 = vpop.f32.mrb[0].mxu0 }
 0x18c   : > { %v1333_v12 = vadd.f32 %v6432_v31, %v8331_v7  ;;  %v1227_v57 = vpop.f32.mrb[1].mxu0 }
 0x18d   : > { %v1331_v41 = vadd.f32 %v8331_v7, %v1227_v57  ;;  %v6433_v63 = vpop.f32.mrb[2].mxu0 }
 0x18e   : > { %vm1352_vm14 = vcmp.ge.f32.partialorder %v1333_v12, 0.0  ;;  %v1371_v26 = vmul.f32 0.1, %v1333_v12  ;;  %v1334_v54 = vadd.f32 %v6433_v63, %v8331_v7  ;;  %v1230_v52 = vpop.f32.mrb[3].mxu0 }
 0x18f   : > { %v1369_v22 = vmul.f32 0.1, %v1331_v41  ;;  %v1332_v45 = vadd.f32 %v8331_v7, %v1230_v52  ;;  %vm1350_vm12 = vcmp.ge.f32.partialorder %v1331_v41, 0.0 }
 0x190   : > { %v8337_v6 = vsel %vm1352_vm14, %v1333_v12, %v1371_v26  ;;  %vm1353_vm7 = vcmp.ge.f32.partialorder %v1334_v54, 0.0  ;;  %v1372_v13 = vmul.f32 0.1, %v1334_v54  ;;  %vm11238_vm14 = vnez %v11072_v15 }
 0x191   : > { %v8342_v50 = vsel %vm7584_vm1, %v8337_v6, 0.0  ;;  %v1370_v8 = vmul.f32 0.1, %v1332_v45  ;;  %vm1351_vm3 = vcmp.ge.f32.partialorder %v1332_v45, 0.0  ;;  %v1388_v16 = vsel %vm1350_vm12, %v1331_v41, %v1369_v22 }
 0x192   : > { %v8344_v2 = vsel %vm1353_vm7, %v1334_v54, %v1372_v13  ;;  %v8348_v9 = vsel %vm7525_vm4, %v1388_v16, 0.0  ;;  %v10929_v34 = vrot.slane %v8342_v50, 1  ;;  %vm11239_vm12 = vnez %v11062_v48 }
 0x193   : > { %v1410_v4 = vsel %vm11238_vm14, %v8344_v2, 0.0  ;;  %v5490_v14 = vpack.c.bf16 %v8344_v2, %v8337_v6  ;;  %v6436_v53 = vpop.f32.mrb[4].mxu0  ;;  %v1389_v61 = vsel %vm1351_vm3, %v1332_v45, %v1370_v8  ;;  %v1428_v18 = vrot.slane %v8342_v50, 7 }
 0x194   : > { %v1429_v35 = vrot.slane %v1410_v4, 7  ;;  %v1487_v58 = vrot.slane %v1410_v4, 1  ;;  %v1337_v62 = vadd.f32 %v6436_v53, %v8331_v7  ;;  %v1243_v0 = vpop.f32.mrb[5].mxu0  ;;  %v8359_v44 = vsel %vm11239_vm12, %v1389_v61, 0.0 }
 0x195   : > { %v1335_v1 = vadd.f32 %v8331_v7, %v1243_v0  ;;  %v6437_v17 = vpop.f32.mrb[6].mxu0  ;;  %v10927_v43 = vrot.slane %v8348_v9, 7  ;;  %v1427_v56 = vrot.slane %v8359_v44, 7  ;;  %vm11240_vm3 = vcmp.lt.s32.totalorder %v7489_v21, 7 }
 0x196   : > { %v8369_v42 = vsel %vm11240_vm3, %v10929_v34, %v1487_v58  ;;  %vm1356_vm7 = vcmp.ge.f32.partialorder %v1337_v62, 0.0  ;;  %v1375_v38 = vmul.f32 0.1, %v1337_v62  ;;  %v1338_v39 = vadd.f32 %v6437_v17, %v8331_v7  ;;  %v1246_v40 = vpop.f32.mrb[7].mxu0 }
 0x197   : > { %vm1354_vm1 = vcmp.ge.f32.partialorder %v1335_v1, 0.0  ;;  %v1373_v51 = vmul.f32 0.1, %v1335_v1  ;;  %v1336_v24 = vadd.f32 %v8331_v7, %v1246_v40  ;;  %vm11241_vm14 = vcmp.lt.s32.totalorder %v7489_v21, 1 }
 0x198   : > { %v8375_v31 = vsel %vm11241_vm14, %v1428_v18, %v1429_v35  ;;  %v8377_v12 = vsel %vm1356_vm7, %v1337_v62, %v1375_v38  ;;  %vm1357_vm4 = vcmp.ge.f32.partialorder %v1338_v39, 0.0  ;;  %v1376_v57 = vmul.f32 0.1, %v1338_v39  ;;  %vm11242_vm3 = vmmov %vm11241_vm14 }
 0x199   : > { %v8381_v41 = vsel %vm11242_vm3, %v1427_v56, %v1428_v18  ;;  %vm11243_vm12 = vnez %v11085_v59  ;;  %v1392_v26 = vsel %vm1354_vm1, %v1335_v1, %v1373_v51  ;;  %vm1355_vm0 = vcmp.ge.f32.partialorder %v1336_v24, 0.0  ;;  %vm11249_vm7 = vmmov %vm11242_vm3 }
 0x19a   : > { %v8386_v63 = vsel %vm11243_vm12, %v8377_v12, 0.0  ;;  %v1374_v54 = vmul.f32 0.1, %v1336_v24  ;;  %v8390_v52 = vsel %vm11244_vm5, %v1392_v26, 0.0  ;;  %v8392_v22 = vsel %vm1357_vm4, %v1338_v39, %v1376_v57 }
 0x19b   : > { %v1430_v13 = vrot.slane %v8390_v52, 7  ;;  %v10928_v8 = vrot.slane %v8390_v52, 1  ;;  %vm11245_vm14 = vnez %v11090_v3  ;;  %v6440_v53 = vpop.f32.mrb[8].mxu0  ;;  %v10930_v62 = vrot.slane %v8386_v63, 7  ;;  %v11268_v3 = vld [vmem:[#allocation38_spill] sm:$0xff] }
 0x19c   : > { %v8401_v2 = vsel %vm11245_vm14, %v8392_v22, 0.0  ;;  %v1393_v18 = vsel %vm1355_vm0, %v1336_v24, %v1374_v54  ;;  %v1259_v17 = vpop.f32.mrb[9].mxu0  ;;  %vm11246_vm4 = vcmp.lt.s32.totalorder %v7489_v21, 7  ;;  %vm11247_vm1 = vnez %v11082_v37  ;;  %v11284_v37 = vld [vmem:[#allocation44_spill] sm:$0xff] }
 0x19d   : > { %v8413_v38 = vsel %vm11246_vm4, %v1487_v58, %v10928_v8  ;;  %v8417_v39 = vsel %vm11247_vm1, %v1393_v18, 0.0  ;;  %v5493_v40 = vpack.c.bf16 %v1393_v18, %v1392_v26  ;;  %v5487_v51 = vpack.c.bf16 %v1389_v61, %v1388_v16  ;;  %v6441_v57 = vpop.f32.mrb[10].mxu0  ;;  %v7247_v58 = vld [vmem:[%s10844_s3 + $0x8] sm:$0xff]  }
 0x19e   : > { %v1433_v0 = vrot.slane %v8401_v2, 7  ;;  %v1431_v24 = vrot.slane %v8417_v39, 7  ;;  %v1341_v54 = vadd.f32 %v6440_v53, %v8331_v7  ;;  %v1339_v1 = vadd.f32 %v8331_v7, %v1259_v17  ;;  %v1262_v45 = vpop.f32.mrb[11].mxu0 }
 0x19f   : > { %vm11248_vm0 = vnez %v11065_v60  ;;  %v1342_v26 = vadd.f32 %v6441_v57, %v8331_v7  ;;  %v1340_v16 = vadd.f32 %v8331_v7, %v1262_v45  ;;  %v8434_v61 = vsel %vm11249_vm7, %v10927_v43, %v1427_v56  ;;  %v7250_v43 = vld [vmem:[%s10844_s3 + $0x20] sm:$0xff]  }
 0x1a0   : > { %6466 = vmatprep.mubr.msk.bf16.mxu1 %vm11248_vm0, %v5487_v51  ;;  %v8438_v53 = vsel %vm11242_vm3, %v1429_v35, %v1430_v13  ;;  %vm11250_vm4 = vnez %v11093_v19  ;;  %vm1360_vm12 = vcmp.ge.f32.partialorder %v1341_v54, 0.0  ;;  %v1379_v18 = vmul.f32 0.1, %v1341_v54 }
 0x1a1   : > { %6467 = vmatmul.mubr.msk.bf16.vlgmr.msra.gmra.mrb[0].mxu1 %vm11250_vm4, %v5490_v14  ;;  %vm1358_vm14 = vcmp.ge.f32.partialorder %v1339_v1, 0.0  ;;  %v1377_v17 = vmul.f32 0.1, %v1339_v1  ;;  %vm1361_vm5 = vcmp.ge.f32.partialorder %v1342_v26, 0.0  ;;  %v1380_v45 = vmul.f32 0.1, %v1342_v26  ;;  %vm11252_vm4 = vmmov %vm11242_vm3 }
 0x1a2   : > { %6487 = vmatpush3.bf16.msra.mxu1 %v8319_v47  ;;  %vm1359_vm1 = vcmp.ge.f32.partialorder %v1340_v16, 0.0  ;;  %v1378_v51 = vmul.f32 0.1, %v1340_v16  ;;  %vm11251_vm7 = vnez %v11095_v33  ;;  %v8445_v56 = vsel %vm1360_vm12, %v1341_v54, %v1379_v18  ;;  %v7248_v14 = vld [vmem:[%s10844_s3 + $0x10] sm:$0xff]  }
 0x1a3   : > { %6470 = vmatprep.mubr.msk.bf16.mxu1 %vm11251_vm7, %v5493_v40  ;;  %v1396_v35 = vsel %vm1358_vm14, %v1339_v1, %v1377_v17  ;;  %6488 = vmatprep.subr.bf16.mxu1 %v7247_v58  ;;  %v8452_v57 = vsel %vm11242_vm3, %v1430_v13, %v1431_v24  ;;  %v8458_v47 = vsel %vm11252_vm4, %v10930_v62, %v1433_v0  ;;  %v8463_v40 = vsel %vm7837_vm6, %v8445_v56, 0.0  ;;  %v6444_v13 = vpop.f32.mrb[12].mxu0 }
 0x1a4   : > { %vm11253_vm12 = vnez %v11100_v55  ;;  %v8469_v54 = vsel %vm1361_vm5, %v1342_v26, %v1380_v45  ;;  %v1397_v18 = vsel %vm1359_vm1, %v1340_v16, %v1378_v51  ;;  %v1275_v34 = vpop.f32.mrb[13].mxu0  ;;  %vm11254_vm5 = vnez %v11107_v11  ;;  %vm11258_vm1 = vmmov %vm11242_vm3 }
 0x1a5   : > { %v8467_v1 = vsel %vm11253_vm12, %v1396_v35, 0.0  ;;  %v8478_v62 = vsel %vm7855_vm13, %v8469_v54, 0.0  ;;  %v5502_v26 = vpack.c.bf16 %v8469_v54, %v8445_v56  ;;  %v8484_v16 = vsel %vm11254_vm5, %v1397_v18, 0.0  ;;  %v6445_v51 = vpop.f32.mrb[14].mxu0  ;;  %v7249_v56 = vld [vmem:[%s10844_s3 + $0x18] sm:$0xff]   ;;  %vm11259_vm4 = vmmov %vm11258_vm1 }
 0x1a6   : > { %v1434_v6 = vrot.slane %v8467_v1, 7  ;;  %v5499_v45 = vpack.c.bf16 %v1397_v18, %v1396_v35  ;;  %6489 = vmatpush3.bf16.msra.mxu1 %v7247_v58  ;;  %v1435_v4 = vrot.slane %v8484_v16, 7  ;;  %v1278_v28 = vpop.f32.mrb[15].mxu0  ;;  %v1345_v54 = vadd.f32 %v6444_v13, %v8331_v7  ;;  %vm11260_vm3 = vmmov %vm11258_vm1 }
 0x1a7   : > { %6490 = vmatprep.subr.bf16.mxu1 %v7248_v14  ;;  %v1343_v35 = vadd.f32 %v8331_v7, %v1275_v34  ;;  %v1346_v58 = vadd.f32 %v6445_v51, %v8331_v7  ;;  %v1344_v18 = vadd.f32 %v8331_v7, %v1278_v28  ;;  %v11255_v17 = vpack.c.bf16 %v8392_v22, %v8377_v12 }
 0x1a8   : > { %vm11256_vm14 = vnez %v11110_v29  ;;  %v11257_v13 = vrot.slane %v8386_v63, 7  ;;  %v8515_v28 = vsel %vm11259_vm4, %v1434_v6, %v1435_v4  ;;  %v8519_v12 = vsel %vm11260_vm3, %v1433_v0, %v1434_v6  ;;  %vm11271_vm4 = vmmov %vm11260_vm3 }
 0x1a9   : > { %6471 = vmatmul.mubr.msk.bf16.gmra.mrb[4].mxu1 %vm11256_vm14, %v11255_v17  ;;  %vm1364_vm6 = vcmp.ge.f32.partialorder %v1345_v54, 0.0  ;;  %v1383_v22 = vmul.f32 0.1, %v1345_v54  ;;  %vm1362_vm13 = vcmp.ge.f32.partialorder %v1343_v35, 0.0  ;;  %v1381_v17 = vmul.f32 0.1, %v1343_v35 }
 0x1aa   : > { %v8511_v34 = vsel %vm11258_vm1, %v1431_v24, %v11257_v13  ;;  %6491 = vmatpush3.bf16.msra.mxu1 %v7248_v14  ;;  %vm11261_vm12 = vnez %v11114_v30  ;;  %vm1365_vm5 = vcmp.ge.f32.partialorder %v1346_v58, 0.0  ;;  %v1384_v51 = vmul.f32 0.1, %v1346_v58 }
 0x1ab   : > { %6474 = vmatprep.mubr.msk.bf16.mxu1 %vm11261_vm12, %v5499_v45  ;;  %vm1363_vm1 = vcmp.ge.f32.partialorder %v1344_v18, 0.0  ;;  %v1382_v24 = vmul.f32 0.1, %v1344_v18  ;;  %6492 = vmatprep.subr.bf16.mxu1 %v7249_v56  ;;  %v8523_v13 = vsel %vm1364_vm6, %v1345_v54, %v1383_v22  ;;  %v1400_v8 = vsel %vm1362_vm13, %v1343_v35, %v1381_v17  ;;  %v6448_v36 = vpop.f32.mrb[24].mxu0  ;;  %vm11267_vm13 = vmmov %vm11260_vm3 }
 0x1ac   : > { %v8532_v14 = vsel %vm7923_vm9, %v8523_v13, 0.0  ;;  %v8536_v45 = vsel %vm7871_vm10, %v1400_v8, 0.0  ;;  %v8538_v55 = vsel %vm1365_vm5, %v1346_v58, %v1384_v51  ;;  %v1291_v35 = vpop.f32.mrb[25].mxu0  ;;  %v11266_v11 = vrot.slane %v8463_v40, 7 }
 0x1ad   : > { %v1401_v54 = vsel %vm1363_vm1, %v1344_v18, %v1382_v24  ;;  %v1440_v6 = vrot.slane %v8532_v14, 7  ;;  %v1438_v0 = vrot.slane %v8536_v45, 7  ;;  %v6449_v5 = vpop.f32.mrb[26].mxu0  ;;  %v8547_v27 = vsel %vm7939_vm11, %v8538_v55, 0.0  ;;  %vm11273_vm1 = vmmov %vm11260_vm3 }
 0x1ae   : > { %6493 = vmatpush3.bf16.msra.mxu1 %v7249_v56  ;;  %v5508_v58 = vpack.c.bf16 %v8538_v55, %v8523_v13  ;;  %v8553_v51 = vsel %vm7881_vm2, %v1401_v54, 0.0  ;;  %v5505_v24 = vpack.c.bf16 %v1401_v54, %v1400_v8  ;;  %v1294_v22 = vpop.f32.mrb[27].mxu0  ;;  %v7251_v56 = vld [vmem:[%s10844_s3 + $0x28] sm:$0xff]   ;;  %v1441_v20 = vrot.slane %v8547_v27, 7 }
 0x1af   : > { %6494 = vmatprep.subr.bf16.mxu1 %v7250_v43  ;;  %v1439_v59 = vrot.slane %v8553_v51, 7  ;;  %v11263_v55 = vld [vmem:[#allocation37_spill] sm:$0xff]  ;;  %v1323_v13 = vadd.f32 %v6448_v36, %v8322_v49  ;;  %v1321_v8 = vadd.f32 %v1291_v35, %v8324_v23  ;;  %v1322_v54 = vadd.f32 %v1294_v22, %v8326_v25  ;;  %v7253_v22 = vld [vmem:[%s10844_s3 + $0x38] sm:$0xff]  }
 0x1b0   : > { %vm11264_vm6 = vnez %v11263_v55  ;;  %v11265_v18 = vrot.slane %v8478_v62, 7  ;;  %vm11269_vm5 = vnez %v11268_v3  ;;  %v11270_v36 = vmov %v11266_v11 }
 0x1b1   : > { %6475 = vmatmul.mubr.msk.bf16.gmra.mrb[8].mxu1 %vm11264_vm6, %v5502_v26  ;;  %v8582_v49 = vsel %vm11271_vm4, %v1435_v4, %v11270_v36  ;;  %v8586_v23 = vsel %vm11260_vm3, %v1438_v0, %v1439_v59  ;;  %v1349_v26 = vadd.f32 %v8331_v7, %v1323_v13  ;;  %v1348_v35 = vadd.f32 %v8331_v7, %v1322_v54  ;;  %v7252_v4 = vld [vmem:[%s10844_s3 + $0x30] sm:$0xff]   ;;  %vm11275_vm4 = vmmov %vm11273_vm1 }
 0x1b2   : > { %v8573_v5 = vsel %vm11267_vm13, %v11266_v11, %v11265_v18  ;;  %6478 = vmatprep.mubr.msk.bf16.mxu1 %vm11269_vm5, %v5505_v24  ;;  %6495 = vmatpush3.bf16.msra.mxu1 %v7250_v43  ;;  %v11272_v25 = vmov %v11265_v18  ;;  %v1347_v43 = vadd.f32 %v8331_v7, %v1321_v8  ;;  %vm11274_vm13 = vmmov %vm11273_vm1  ;;  %v8610_v24 = vsel %vm11275_vm4, %v1439_v59, %v1440_v6 }
 0x1b3   : > { %v8592_v11 = vsel %vm11273_vm1, %v11272_v25, %v1438_v0  ;;  %6496 = vmatprep.subr.bf16.mxu1 %v7251_v56  ;;  %v8606_v0 = vsel %vm11274_vm13, %v1440_v6, %v1441_v20  ;;  %v11276_v7 = vrot.slane %v8342_v50, 1  ;;  %v11277_v13 = vrot.slane %v8359_v44, 1 }
 0x1b4   : > { %vm11278_vm3 = vcmp.lt.s32.totalorder %v7489_v21, 7  ;;  %vm1368_vm1 = vcmp.ge.f32.partialorder %v1349_v26, 0.0  ;;  %v1387_v54 = vmul.f32 0.1, %v1349_v26  ;;  %vm1366_vm9 = vcmp.ge.f32.partialorder %v1347_v43, 0.0 }
 0x1b5   : > { %v8618_v8 = vsel %vm11278_vm3, %v11277_v13, %v11276_v7  ;;  %v1385_v36 = vmul.f32 0.1, %v1347_v43  ;;  %vm1367_vm11 = vcmp.ge.f32.partialorder %v1348_v35, 0.0  ;;  %v1386_v25 = vmul.f32 0.1, %v1348_v35  ;;  %vm11281_vm13 = vmmov %vm11278_vm3 }
 0x1b6   : > { %6497 = vmatpush3.bf16.msra.mxu1 %v7251_v56  ;;  %v11279_v59 = vmov %v11277_v13  ;;  %v11280_v50 = vrot.slane %v8348_v9, 1  ;;  %v1406_v7 = vsel %vm1368_vm1, %v1349_v26, %v1387_v54  ;;  %v1497_v44 = vrot.slane %v8553_v51, 1  ;;  %v11286_v56 = vld [vmem:[#allocation43_spill] sm:$0xff] }
 0x1b7   : > { %v1404_v13 = vsel %vm1366_vm9, %v1347_v43, %v1385_v36  ;;  %6498 = vmatprep.subr.bf16.mxu1 %v7252_v4  ;;  %v1425_v32 = vsel %vm8010_vm8, %v1406_v7, 0.0  ;;  %v1405_v43 = vsel %vm1367_vm11, %v1348_v35, %v1386_v25  ;;  %vm11285_vm9 = vnez %v11284_v37  ;;  %vm11292_vm11 = vmmov %vm11278_vm3 }
 0x1b8   : > { %v8628_v6 = vsel %vm11281_vm13, %v11280_v50, %v11279_v59  ;;  %v1423_v26 = vsel %vm7953_vm15, %v1404_v13, 0.0  ;;  %v1444_v54 = vrot.slane %v1425_v32, 7  ;;  %v1502_v36 = vrot.slane %v1425_v32, 1 }
 0x1b9   : > { %v1442_v50 = vrot.slane %v1423_v26, 7  ;;  %v1500_v10 = vrot.slane %v1423_v26, 1  ;;  %6479 = vmatmul.mubr.msk.bf16.gmra.mrb[12].mxu1 %vm11285_vm9, %v5508_v58  ;;  %vm11287_vm4 = vnez %v11286_v56  ;;  %v5511_v18 = vpack.c.bf16 %v1405_v43, %v1404_v13 }
 0x1ba   : > { %v1424_v15 = vsel %vm11287_vm4, %v1405_v43, 0.0  ;;  %6499 = vmatpush3.bf16.msra.mxu1 %v7252_v4  ;;  %v11288_v51 = vrot.slane %v8386_v63, 1  ;;  %v11289_v17 = vrot.slane %v8417_v39, 1  ;;  %v11291_v35 = vrot.slane %v8390_v52, 1  ;;  %v11296_v52 = vld [vmem:[#allocation45_spill] sm:$0xff] }
 0x1bb   : > { %v1443_v25 = vrot.slane %v1424_v15, 7  ;;  %v1501_v26 = vrot.slane %v1424_v15, 1  ;;  %v11293_v4 = vrot.slane %v8348_v9, 7  ;;  %vm11294_vm1 = vcmp.lt.s32.totalorder %v7489_v21, 1  ;;  %6500 = vmatprep.subr.bf16.mxu1 %v7253_v22 }
 0x1bc   : > { %v8652_v59 = vsel %vm11278_vm3, %v11289_v17, %v11288_v51  ;;  %v11290_v32 = vmov %v11289_v17  ;;  %v7254_v17 = vld [vmem:[%s10844_s3 + $0x80] sm:$0xff]   ;;  %vm11295_vm13 = vmmov %vm11294_vm1  ;;  %vm11297_vm3 = vnez %v11296_v52  ;;  %v11298_v51 = vrot.slane %v8467_v1, 1 }
 0x1bd   : > { %v8660_v58 = vsel %vm11292_vm11, %v11291_v35, %v11290_v32  ;;  %v1463_v13 = vsel %vm11294_vm1, %v1444_v54, %v11293_v4  ;;  %v1447_v39 = vsel %vm11295_vm13, %v1441_v20, %v1442_v50  ;;  %6482 = vmatprep.mubr.msk.bf16.mxu1 %vm11297_vm3, %v5511_v18  ;;  %v11299_v32 = vrot.slane %v8401_v2, 1  ;;  %vm11302_vm1 = vmmov %vm11292_vm11 }
 0x1be   : > { %v1464_v43 = vpack.c.bf16 %v8434_v61, %v1463_v13  ;;  %v1524_v15 = vpack.c.bf16 %v8652_v59, %v8660_v58  ;;  %v11301_v56 = vrot.slane %v8386_v63, 1  ;;  %v1446_v61 = vsel %vm11295_vm13, %v1442_v50, %v1443_v25  ;;  %vm11303_vm15 = vmmov %vm11295_vm13  ;;  %6501 = vmatpush3.bf16.msra.mxu1 %v7253_v22 }
 0x1bf   : > { %v1513_v35 = vsel %vm11292_vm11, %v11299_v32, %v11298_v51  ;;  %v11300_v4 = vmov %v11299_v32  ;;  %v1445_v18 = vsel %vm11303_vm15, %v1443_v25, %v1444_v54  ;;  %v11304_v58 = vrot.slane %v8463_v40, 1  ;;  %vm11306_vm11 = vmmov %vm11302_vm1  ;;  %6522 = vmatprep.subr.bf16.mxu1 %v7254_v17 }
 0x1c0   : > { %v1514_v20 = vsel %vm11302_vm1, %v11301_v56, %v11300_v4  ;;  %v11305_v13 = vrot.slane %v8484_v16, 1  ;;  %v5514_v2 = vpack.c.bf16 %v1406_v7, %v1406_v7  ;;  %v1472_v63 = vpack.c.bf16 %v1446_v61, %v1447_v39  ;;  %vm11311_vm15 = vmmov %vm11302_vm1 }
 0x1c1   : > { %v1525_v59 = vpack.c.bf16 %v1513_v35, %v1514_v20  ;;  %v11308_v56 = vrot.slane %v8467_v1, 1  ;;  %v11309_v54 = vrot.slane %v8536_v45, 1  ;;  %v11310_v25 = vrot.slane %v8478_v62, 1  ;;  %vm11314_vm13 = vmmov %vm11302_vm1 }
 0x1c2   : > { %v1511_v51 = vsel %vm11306_vm11, %v11305_v13, %v11304_v58  ;;  %v11307_v32 = vmov %v11305_v13  ;;  %v11313_v22 = vmov %v11304_v58  ;;  %v11315_v1 = vrot.slane %v8532_v14, 1  ;;  %vm11316_vm11 = vmmov %vm11302_vm1 }
 0x1c3   : > { %v1512_v50 = vsel %vm11302_vm1, %v11308_v56, %v11307_v32  ;;  %v1509_v35 = vsel %vm11311_vm15, %v11310_v25, %v11309_v54  ;;  %v11312_v7 = vmov %v11310_v25  ;;  %v11317_v20 = vmov %v11309_v54  ;;  %vm11319_vm15 = vmmov %vm11302_vm1 }
 0x1c4   : > { %v1526_v4 = vpack.c.bf16 %v1511_v51, %v1512_v50  ;;  %v1510_v16 = vsel %vm11314_vm13, %v11313_v22, %v11312_v7  ;;  %v1507_v39 = vsel %vm11316_vm11, %v1497_v44, %v11315_v1  ;;  %v1508_v61 = vsel %vm11302_vm1, %v11317_v20, %v1497_v44  ;;  %vm11322_vm13 = vmmov %vm11302_vm1  ;;  %v11323_v50 = vld [vmem:[#allocation47_spill] sm:$0xff] }
 0x1c5   : > { %v1527_v58 = vpack.c.bf16 %v1509_v35, %v1510_v16  ;;  %v1528_v13 = vpack.c.bf16 %v1507_v39, %v1508_v61  ;;  %v11318_v51 = vrot.slane %v8547_v27, 1  ;;  %v11321_v32 = vmov %v11315_v1  ;;  %vm11325_vm4 = vmmov %vm11302_vm1  ;;  %v7255_v35 = vld [vmem:[%s10844_s3 + $0x88] sm:$0xff]  }
 0x1c6   : > { %vm11324_vm11 = vnez %v11323_v50  ;;  %v1503_v44 = vsel %vm11302_vm1, %v1501_v26, %v1502_v36  ;;  %v1504_v54 = vsel %vm11325_vm4, %v1500_v10, %v1501_v26  ;;  %v11326_v25 = vrot.slane %v8348_v9, 1  ;;  %v7257_v9 = vld [vmem:[%s10844_s3 + $0x98] sm:$0xff]   ;;  %v7268_v26 = vld [vmem:[%s10842_s1 + $0x130] sm:$0xff]  }
 0x1c7   : > { %v1505_v62 = vsel %vm11319_vm15, %v11318_v51, %v1500_v10  ;;  %v11320_v40 = vmov %v11318_v51  ;;  %6483 = vmatmul.mubr.msk.bf16.gmra.mrb[16].mxu1 %vm11324_vm11, %v5514_v2  ;;  %vm11327_vm15 = vmmov %vm11302_vm1  ;;  %v1530_v14 = vpack.c.bf16 %v1503_v44, %v1504_v54  ;;  %v11328_v2 = vpack.c.bf16 %v8375_v31, %v8381_v41  ;;  %v7256_v10 = vld [vmem:[%s10844_s3 + $0x90] sm:$0xff]  }
 0x1c8   : > { %v1506_v56 = vsel %vm11322_vm13, %v11321_v32, %v11320_v40  ;;  %v1521_v27 = vsel %vm11327_vm15, %v1502_v36, %v11326_v25  ;;  %6502 = vmatprep.mubr.bf16.mxu1 %v1464_v43  ;;  %v11329_v7 = vpack.c.bf16 %v8452_v57, %v8438_v53  ;;  %v11330_v31 = vpack.c.bf16 %v8458_v47, %v8511_v34  ;;  %v7258_v53 = vld [vmem:[%s10844_s3 + $0xa0] sm:$0xff]   ;;  %v7259_v57 = vld [vmem:[%s10844_s3 + $0xa8] sm:$0xff]   ;;  %v11339_v25 = vld [vmem:[#allocation7_spill] sm:$0xff] }
 0x1c9   : > { %v1529_v45 = vpack.c.bf16 %v1505_v62, %v1506_v56  ;;  %v11331_v41 = vpack.c.bf16 %v8515_v28, %v8519_v12  ;;  %v11332_v47 = vpack.c.bf16 %v8573_v5, %v8582_v49  ;;  %v11333_v34 = vpack.c.bf16 %v8586_v23, %v8592_v11  ;;  %v7260_v28 = vld [vmem:[%s10844_s3 + $0xb0] sm:$0xff]   ;;  %v7261_v12 = vld [vmem:[%s10844_s3 + $0xb8] sm:$0xff]   ;;  %v7267_v36 = vld [vmem:[%s10842_s1 + $0x128] sm:$0xff]  }
 0x1ca   : > { %v11334_v5 = vpack.c.bf16 %v8606_v0, %v8610_v24  ;;  %v1473_v49 = vpack.c.bf16 %v1445_v18, %v1445_v18  ;;  %v11335_v23 = vpack.c.bf16 %v8618_v8, %v8628_v6  ;;  %v11336_v11 = vpack.c.bf16 %v8413_v38, %v8369_v42  ;;  %v7262_v24 = vld [vmem:[%s10842_s1 + $0x100] sm:$0xff]   ;;  %v7263_v8 = vld [vmem:[%s10842_s1 + $0x108] sm:$0xff]   ;;  %v7264_v42 = vld [vmem:[%s10842_s1 + $0x110] sm:$0xff]  }
 0x1cb   : > { %v1531_v0 = vpack.c.bf16 %v1521_v27, %v1521_v27  ;;  %6558 = vmatprep.subr.bf16.mxu0 %v7262_v24  ;;  %v7265_v38 = vld [vmem:[%s10842_s1 + $0x118] sm:$0xff]   ;;  %v7266_v6 = vld [vmem:[%s10842_s1 + $0x120] sm:$0xff]   ;;  %v11337_v56 = vld [vmem:[#allocation9_spill] sm:$0xff] }
 0x1cc   : > { %6559 = vmatpush3.bf16.msra.mxu0 %v7262_v24  ;;  %v7270_v43 = vld [vmem:[%s10842_s1 + $0xc0] sm:$0xff]  }
 0x1cd   : > { %6560 = vmatprep.subr.bf16.mxu0 %v7263_v8 }
 0x1cf   : > { %6503 = vmatmul.mubr.bf16.vlgmr.msra.gmra.mrb[0].mxu1 %v11328_v2 }
 0x1d0   : > { %6506 = vmatprep.mubr.bf16.mxu1 %v11329_v7  ;;  %6523 = vmatpush3.bf16.msra.mxu1 %v7254_v17  ;;  %v7269_v17 = vld [vmem:[%s10842_s1 + $0x138] sm:$0xff]  }
 0x1d1   : > { %6524 = vmatprep.subr.bf16.mxu1 %v7255_v35  ;;  %6561 = vmatpush3.bf16.msra.mxu0 %v7263_v8  ;;  %v11345_v8 = vld [vmem:[#allocation15_spill] sm:$0xff] }
 0x1d2   : > { %6562 = vmatprep.subr.bf16.mxu0 %v7264_v42 }
 0x1d4   : > { %6525 = vmatpush3.bf16.msra.mxu1 %v7255_v35  ;;  %v11341_v35 = vld [vmem:[#allocation10_spill] sm:$0xff] }
 0x1d5   : > { %6526 = vmatprep.subr.bf16.mxu1 %v7256_v10  ;;  %6563 = vmatpush3.bf16.msra.mxu0 %v7264_v42 }
 0x1d6   : > { %6564 = vmatprep.subr.bf16.mxu0 %v7265_v38 }
 0x1d7   : > { %6507 = vmatmul.mubr.bf16.gmra.mrb[4].mxu1 %v11330_v31 }
 0x1d8   : > { %6510 = vmatprep.mubr.bf16.mxu1 %v11331_v41  ;;  %6527 = vmatpush3.bf16.msra.mxu1 %v7256_v10  ;;  %v11343_v10 = vld [vmem:[#allocation8_spill] sm:$0xff] }
 0x1d9   : > { %6528 = vmatprep.subr.bf16.mxu1 %v7257_v9  ;;  %6565 = vmatpush3.bf16.msra.mxu0 %v7265_v38  ;;  %v11347_v38 = vld [vmem:[#allocation11_spill] sm:$0xff] }
 0x1da   : > { %6566 = vmatprep.subr.bf16.mxu0 %v7266_v6 }
 0x1dc   : > { %6529 = vmatpush3.bf16.msra.mxu1 %v7257_v9 }
 0x1dd   : > { %6530 = vmatprep.subr.bf16.mxu1 %v7258_v53  ;;  %6567 = vmatpush3.bf16.msra.mxu0 %v7266_v6 }
 0x1de   : > { %6568 = vmatprep.subr.bf16.mxu0 %v7267_v36 }
 0x1df   : > { %6511 = vmatmul.mubr.bf16.gmra.mrb[8].mxu1 %v11332_v47 }
 0x1e0   : > { %6514 = vmatprep.mubr.bf16.mxu1 %v11333_v34  ;;  %6531 = vmatpush3.bf16.msra.mxu1 %v7258_v53 }
 0x1e1   : > { %6532 = vmatprep.subr.bf16.mxu1 %v7259_v57  ;;  %6569 = vmatpush3.bf16.msra.mxu0 %v7267_v36 }
 0x1e2   : > { %6570 = vmatprep.subr.bf16.mxu0 %v7268_v26 }
 0x1e4   : > { %6533 = vmatpush3.bf16.msra.mxu1 %v7259_v57 }
 0x1e5   : > { %6534 = vmatprep.subr.bf16.mxu1 %v7260_v28  ;;  %6571 = vmatpush3.bf16.msra.mxu0 %v7268_v26 }
 0x1e6   : > { %6572 = vmatprep.subr.bf16.mxu0 %v7269_v17 }
 0x1e7   : > { %6515 = vmatmul.mubr.bf16.gmra.mrb[12].mxu1 %v11334_v5 }
 0x1e8   : > { %6518 = vmatprep.mubr.bf16.mxu1 %v1472_v63  ;;  %6535 = vmatpush3.bf16.msra.mxu1 %v7260_v28 }
 0x1e9   : > { %6536 = vmatprep.subr.bf16.mxu1 %v7261_v12  ;;  %6573 = vmatpush3.bf16.msra.mxu0 %v7269_v17 }
 0x1ea   : > { %6594 = vmatprep.subr.bf16.mxu0 %v7270_v43 }
 0x1ec   : > { %6537 = vmatpush3.bf16.msra.mxu1 %v7261_v12 }
 0x1ef   : > { %6519 = vmatmul.mubr.bf16.gmra.mrb[20].mxu1 %v1473_v49 }
 0x1f0   : > { %6538 = vmatprep.mubr.bf16.mxu1 %v11335_v23 }
 0x1f7   : > { %6539 = vmatmul.mubr.bf16.vlgmr.msra.gmra.mrb[0].mxu1 %v11336_v11 }
 0x1f8   : > { %6542 = vmatprep.mubr.bf16.mxu1 %v1524_v15 }
 0x1ff   : > { %6543 = vmatmul.mubr.bf16.gmra.mrb[4].mxu1 %v1525_v59 }
 0x200   : > { %6546 = vmatprep.mubr.bf16.mxu1 %v1526_v4 }
 0x207   : > { %6547 = vmatmul.mubr.bf16.gmra.mrb[8].mxu1 %v1527_v58  ;;  %v8828_v58 = vld [vmem:[%s10845_s4] ss:$0 sm:$0xff] }
 0x208   : > { %6550 = vmatprep.mubr.bf16.mxu1 %v1528_v13 }
 0x20f   : > { %6551 = vmatmul.mubr.bf16.gmra.mrb[12].mxu1 %v1529_v45 }
 0x210   : > { %6554 = vmatprep.mubr.bf16.mxu1 %v1530_v14 }
 0x217   : > { %6555 = vmatmul.mubr.bf16.gmra.mrb[24].mxu1 %v1531_v0 }
 0x29a   : > { %v6484_v15 = vpop.f32.mrb[16].mxu1 }
 0x29b   : > { %v1711_v18 = vpop.f32.mrb[17].mxu1 }
 0x29c   : > { %v6485_v59 = vpop.f32.mrb[18].mxu1 }
 0x29d   : > { %v1714_v63 = vpop.f32.mrb[19].mxu1  ;;  %v7271_v59 = vld [vmem:[%s10842_s1 + $0xc8] sm:$0xff]  }
 0x2c2   : > { %v6520_v4 = vpop.f32.mrb[20].mxu1 }
 0x2c3   : > { %v8819_v22 = vadd.f32 %v6520_v4, %v6484_v15  ;;  %v1871_v16 = vpop.f32.mrb[21].mxu1  ;;  %v11349_v15 = vld [vmem:[#allocation16_spill] sm:$0xff] }
 0x2c4   : > { %v8821_v1 = vadd.f32 %v1871_v16, %v1711_v18  ;;  %v6521_v39 = vpop.f32.mrb[22].mxu1  ;;  %v11351_v4 = vld [vmem:[#allocation12_spill] sm:$0xff] }
 0x2c5   : > { %v1874_v20 = vpop.f32.mrb[23].mxu1 }
 0x2c6   : > { %v8823_v61 = vadd.f32 %v1874_v20, %v1714_v63 }
 0x2ca   : > { %v6540_v13 = vpop.f32.mrb[0].mxu1 }
 0x2cb   : > { %v2090_v51 = vadd.f32 %v6540_v13, %v8828_v58  ;;  %v1984_v62 = vpop.f32.mrb[1].mxu1 }
 0x2cc   : > { %v2088_v40 = vadd.f32 %v8828_v58, %v1984_v62  ;;  %v6541_v32 = vpop.f32.mrb[2].mxu1 }
 0x2cd   : > { %v8833_v45 = vadd.f32 %v11337_v56, %v2090_v51  ;;  %v2091_v44 = vadd.f32 %v6541_v32, %v8828_v58  ;;  %v1987_v54 = vpop.f32.mrb[3].mxu1  ;;  %v7272_v32 = vld [vmem:[%s10842_s1 + $0xd0] sm:$0xff]  }
 0x2ce   : > { %v8837_v27 = vadd.f32 %v11339_v25, %v2088_v40  ;;  %v2089_v14 = vadd.f32 %v8828_v58, %v1987_v54 }
 0x2cf   : > { %11338 = vst [vmem:[#allocation37_spill] sm:$0xff] %v8833_v45  ;;  %v8841_v2 = vadd.f32 %v11341_v35, %v2091_v44  ;;  %v2147_v7 = vmul.f32 0.1, %v8833_v45  ;;  %vm2128_vm13 = vcmp.ge.f32.partialorder %v8833_v45, 0.0 }
 0x2d0   : > { %11340 = vst [vmem:[#allocation38_spill] sm:$0xff] %v8837_v27  ;;  %v8845_v9 = vadd.f32 %v11343_v10, %v2089_v14  ;;  %v2145_v31 = vmul.f32 0.1, %v8837_v27  ;;  %vm2126_vm1 = vcmp.ge.f32.partialorder %v8837_v27, 0.0  ;;  %v11354_v10 = vld [vmem:[#allocation22_spill] sm:$0xff] }
 0x2d1   : > { %11342 = vst [vmem:[#allocation44_spill] sm:$0xff] %v8841_v2  ;;  %vm2129_vm4 = vcmp.ge.f32.partialorder %v8841_v2, 0.0  ;;  %v2148_v41 = vmul.f32 0.1, %v8841_v2  ;;  %v8863_v23 = vsel %vm2128_vm13, %v8833_v45, %v2147_v7 }
 0x2d2   : > { %11344 = vst [vmem:[#allocation45_spill] sm:$0xff] %v8845_v9  ;;  %vm2127_vm15 = vcmp.ge.f32.partialorder %v8845_v9, 0.0  ;;  %v2146_v53 = vmul.f32 0.1, %v8845_v9  ;;  %v6544_v57 = vpop.f32.mrb[4].mxu1  ;;  %v8867_v24 = vsel %vm2126_vm1, %v8837_v27, %v2145_v31  ;;  %vm11353_vm1 = vnez %v11093_v19 }
 0x2d3   : > { %v2094_v47 = vadd.f32 %v6544_v57, %v8828_v58  ;;  %v2000_v34 = vpop.f32.mrb[5].mxu1  ;;  %v8856_v28 = vsel %vm2129_vm4, %v8841_v2, %v2148_v41  ;;  %v11356_v41 = vld [vmem:[#allocation17_spill] sm:$0xff]  ;;  %v11409_v2 = vld [vmem:[#allocation42_spill] sm:$0xff] }
 0x2d4   : > { %v2092_v12 = vadd.f32 %v8828_v58, %v2000_v34  ;;  %v6545_v5 = vpop.f32.mrb[6].mxu1  ;;  %v8860_v49 = vsel %vm2127_vm15, %v8845_v9, %v2146_v53  ;;  %v5593_v17 = vpack.c.bf16 %v8856_v28, %v8863_v23  ;;  %v11358_v34 = vld [vmem:[#allocation23_spill] sm:$0xff] }
 0x2d5   : > { %v2095_v11 = vadd.f32 %v6545_v5, %v8828_v58  ;;  %v2003_v0 = vpop.f32.mrb[7].mxu1  ;;  %v8870_v42 = vadd.f32 %v11345_v8, %v2094_v47  ;;  %v5590_v26 = vpack.c.bf16 %v8860_v49, %v8867_v24  ;;  %v11360_v8 = vld [vmem:[#allocation19_spill] sm:$0xff] }
 0x2d6   : > { %v8873_v6 = vadd.f32 %v11347_v38, %v2092_v12  ;;  %v2093_v36 = vadd.f32 %v8828_v58, %v2003_v0 }
 0x2d7   : > { %11346 = vst [vmem:[#allocation9_spill] sm:$0xff] %v8870_v42  ;;  %v8881_v18 = vadd.f32 %v11349_v15, %v2095_v11  ;;  %6574 = vmatprep.mubr.msk.bf16.mxu0 %vm11248_vm0, %v5590_v26  ;;  %v2151_v20 = vmul.f32 0.1, %v8870_v42  ;;  %vm2132_vm10 = vcmp.ge.f32.partialorder %v8870_v42, 0.0  ;;  %v7273_v11 = vld [vmem:[%s10842_s1 + $0xd8] sm:$0xff]  }
 0x2d8   : > { %11348 = vst [vmem:[#allocation7_spill] sm:$0xff] %v8873_v6  ;;  %v2149_v63 = vmul.f32 0.1, %v8873_v6  ;;  %v8888_v16 = vadd.f32 %v11351_v4, %v2093_v36  ;;  %vm2130_vm4 = vcmp.ge.f32.partialorder %v8873_v6, 0.0  ;;  %6575 = vmatmul.mubr.msk.bf16.vlgmr.msra.gmra.mrb[28].mxu0 %vm11353_vm1, %v5593_v17  ;;  %v7274_v4 = vld [vmem:[%s10842_s1 + $0xe0] sm:$0xff]  }
 0x2d9   : > { %11350 = vst [vmem:[#allocation10_spill] sm:$0xff] %v8881_v18  ;;  %vm2133_vm13 = vcmp.ge.f32.partialorder %v8881_v18, 0.0  ;;  %v2152_v39 = vmul.f32 0.1, %v8881_v18  ;;  %6595 = vmatpush3.bf16.msra.mxu0 %v7270_v43  ;;  %v8932_v47 = vsel %vm2132_vm10, %v8870_v42, %v2151_v20 }
 0x2da   : > { %11352 = vst [vmem:[#allocation8_spill] sm:$0xff] %v8888_v16  ;;  %vm2131_vm15 = vcmp.ge.f32.partialorder %v8888_v16, 0.0  ;;  %v2150_v13 = vmul.f32 0.1, %v8888_v16  ;;  %v6548_v51 = vpop.f32.mrb[8].mxu1  ;;  %6596 = vmatprep.subr.bf16.mxu0 %v7271_v59  ;;  %v8909_v54 = vsel %vm2130_vm4, %v8873_v6, %v2149_v63  ;;  %v11407_v6 = vld [vmem:[#allocation40_spill] sm:$0xff] }
 0x2db   : > { %v2098_v62 = vadd.f32 %v6548_v51, %v8828_v58  ;;  %v2016_v40 = vpop.f32.mrb[9].mxu1  ;;  %v8917_v25 = vsel %vm2133_vm13, %v8881_v18, %v2152_v39  ;;  %v11401_v18 = vld [vmem:[#allocation34_spill] sm:$0xff] }
 0x2dc   : > { %v2096_v56 = vadd.f32 %v8828_v58, %v2016_v40  ;;  %v6549_v44 = vpop.f32.mrb[10].mxu1  ;;  %v8912_v43 = vsel %vm2131_vm15, %v8888_v16, %v2150_v13  ;;  %v5599_v5 = vpack.c.bf16 %v8917_v25, %v8932_v47 }
 0x2dd   : > { %v2099_v14 = vadd.f32 %v6549_v44, %v8828_v58  ;;  %v2019_v35 = vpop.f32.mrb[11].mxu1  ;;  %v5596_v7 = vpack.c.bf16 %v8912_v43, %v8909_v54  ;;  %v8923_v31 = vadd.f32 %v11354_v10, %v2098_v62  ;;  %6597 = vmatpush3.bf16.msra.mxu0 %v7271_v59  ;;  %v11362_v44 = vld [vmem:[#allocation29_spill] sm:$0xff] }
 0x2de   : > { %v8926_v53 = vadd.f32 %v11356_v41, %v2096_v56  ;;  %v2097_v57 = vadd.f32 %v8828_v58, %v2019_v35  ;;  %6598 = vmatprep.subr.bf16.mxu0 %v7272_v32  ;;  %v11364_v35 = vld [vmem:[#allocation25_spill] sm:$0xff] }
 0x2df   : > { %11355 = vst [vmem:[#allocation15_spill] sm:$0xff] %v8923_v31  ;;  %v8935_v12 = vadd.f32 %v11358_v34, %v2099_v14  ;;  %6578 = vmatprep.mubr.msk.bf16.mxu0 %vm11251_vm7, %v5596_v7  ;;  %v2155_v26 = vmul.f32 0.1, %v8923_v31  ;;  %vm2136_vm15 = vcmp.ge.f32.partialorder %v8923_v31, 0.0 }
 0x2e0   : > { %11357 = vst [vmem:[#allocation11_spill] sm:$0xff] %v8926_v53  ;;  %v2153_v0 = vmul.f32 0.1, %v8926_v53  ;;  %v8946_v38 = vadd.f32 %v11360_v8, %v2097_v57  ;;  %vm2134_vm10 = vcmp.ge.f32.partialorder %v8926_v53, 0.0  ;;  %6579 = vmatmul.mubr.msk.bf16.gmra.mrb[32].mxu0 %vm11256_vm14, %v5599_v5  ;;  %v11366_v57 = vld [vmem:[#allocation30_spill] sm:$0xff]  ;;  %vm11408_vm14 = vnez %v11407_v6 }
 0x2e1   : > { %11359 = vst [vmem:[#allocation16_spill] sm:$0xff] %v8935_v12  ;;  %vm2137_vm4 = vcmp.ge.f32.partialorder %v8935_v12, 0.0  ;;  %v2156_v36 = vmul.f32 0.1, %v8935_v12  ;;  %6599 = vmatpush3.bf16.msra.mxu0 %v7272_v32  ;;  %v8988_v41 = vsel %vm2136_vm15, %v8923_v31, %v2155_v26 }
 0x2e2   : > { %11361 = vst [vmem:[#allocation12_spill] sm:$0xff] %v8946_v38  ;;  %vm2135_vm13 = vcmp.ge.f32.partialorder %v8946_v38, 0.0  ;;  %v2154_v17 = vmul.f32 0.1, %v8946_v38  ;;  %v6552_v15 = vpop.f32.mrb[12].mxu1  ;;  %6600 = vmatprep.subr.bf16.mxu0 %v7273_v11  ;;  %v8965_v13 = vsel %vm2134_vm10, %v8926_v53, %v2153_v0  ;;  %v7275_v0 = vld [vmem:[%s10842_s1 + $0xe8] sm:$0xff]  }
 0x2e3   : > { %v2102_v59 = vadd.f32 %v6552_v15, %v8828_v58  ;;  %v2032_v63 = vpop.f32.mrb[13].mxu1  ;;  %v8973_v62 = vsel %vm2137_vm4, %v8935_v12, %v2156_v36  ;;  %v11368_v36 = vld [vmem:[#allocation26_spill] sm:$0xff]  ;;  %v11399_v53 = vld [vmem:[#allocation31_spill] sm:$0xff] }
 0x2e4   : > { %v2100_v39 = vadd.f32 %v8828_v58, %v2032_v63  ;;  %v6553_v20 = vpop.f32.mrb[14].mxu1  ;;  %v8968_v51 = vsel %vm2135_vm13, %v8946_v38, %v2154_v17  ;;  %v5605_v5 = vpack.c.bf16 %v8973_v62, %v8988_v41 }
 0x2e5   : > { %v2103_v40 = vadd.f32 %v6553_v20, %v8828_v58  ;;  %v2035_v32 = vpop.f32.mrb[15].mxu1  ;;  %v5602_v56 = vpack.c.bf16 %v8968_v51, %v8965_v13  ;;  %v8979_v14 = vadd.f32 %v11362_v44, %v2102_v59  ;;  %6601 = vmatpush3.bf16.msra.mxu0 %v7273_v11  ;;  %v7276_v20 = vld [vmem:[%s10842_s1 + $0xf0] sm:$0xff]  }
 0x2e6   : > { %v8982_v7 = vadd.f32 %v11364_v35, %v2100_v39  ;;  %v2101_v10 = vadd.f32 %v8828_v58, %v2035_v32  ;;  %6602 = vmatprep.subr.bf16.mxu0 %v7274_v4 }
 0x2e7   : > { %11363 = vst [vmem:[#allocation22_spill] sm:$0xff] %v8979_v14  ;;  %v8991_v34 = vadd.f32 %v11366_v57, %v2103_v40  ;;  %6582 = vmatprep.mubr.msk.bf16.mxu0 %vm11261_vm12, %v5602_v56  ;;  %v2159_v17 = vmul.f32 0.1, %v8979_v14  ;;  %vm2140_vm15 = vcmp.ge.f32.partialorder %v8979_v14, 0.0 }
 0x2e8   : > { %11365 = vst [vmem:[#allocation17_spill] sm:$0xff] %v8982_v7  ;;  %v2157_v8 = vmul.f32 0.1, %v8982_v7  ;;  %v9002_v26 = vadd.f32 %v11368_v36, %v2101_v10  ;;  %vm2138_vm10 = vcmp.ge.f32.partialorder %v8982_v7, 0.0  ;;  %6583 = vmatmul.mubr.msk.bf16.gmra.mrb[36].mxu0 %vm11264_vm6, %v5605_v5 }
 0x2e9   : > { %11367 = vst [vmem:[#allocation23_spill] sm:$0xff] %v8991_v34  ;;  %vm2141_vm4 = vcmp.ge.f32.partialorder %v8991_v34, 0.0  ;;  %v2160_v11 = vmul.f32 0.1, %v8991_v34  ;;  %6603 = vmatpush3.bf16.msra.mxu0 %v7274_v4  ;;  %v9037_v5 = vsel %vm2140_vm15, %v8979_v14, %v2159_v17 }
 0x2ea   : > { %11369 = vst [vmem:[#allocation19_spill] sm:$0xff] %v9002_v26  ;;  %vm2139_vm13 = vcmp.ge.f32.partialorder %v9002_v26, 0.0  ;;  %v2158_v15 = vmul.f32 0.1, %v9002_v26  ;;  %v6556_v59 = vpop.f32.mrb[24].mxu1  ;;  %6604 = vmatprep.subr.bf16.mxu0 %v7275_v0  ;;  %v9021_v56 = vsel %vm2138_vm10, %v8982_v7, %v2157_v8  ;;  %v11370_v8 = vld [vmem:[#allocation39_spill] sm:$0xff]  ;;  %vm11372_vm10 = vnez %v11062_v48 }
 0x2eb   : > { %v2080_v63 = vadd.f32 %v6556_v59, %v8819_v22  ;;  %v2048_v39 = vpop.f32.mrb[25].mxu1  ;;  %v9029_v22 = vsel %vm2141_vm4, %v8991_v34, %v2160_v11  ;;  %v11392_v34 = vld [vmem:[#allocation21_spill] sm:$0xff]  ;;  %v9223_v9 = vsel %vm11408_vm14, %v9037_v5, 0.0 }
 0x2ec   : > { %v2078_v40 = vadd.f32 %v2048_v39, %v8821_v1  ;;  %v6557_v32 = vpop.f32.mrb[26].mxu1  ;;  %v9024_v4 = vsel %vm2139_vm13, %v9002_v26, %v2158_v15  ;;  %v5611_v11 = vpack.c.bf16 %v9029_v22, %v9037_v5  ;;  %v7277_v15 = vld [vmem:[%s10842_s1 + $0xf8] sm:$0xff]   ;;  %vm11375_vm13 = vnez %v11059_v46  ;;  %v11386_v26 = vld [vmem:[#allocation18_spill] sm:$0xff] }
 0x2ed   : > { %v2106_v44 = vadd.f32 %v8828_v58, %v2080_v63  ;;  %v2051_v35 = vpop.f32.mrb[27].mxu1  ;;  %v5608_v1 = vpack.c.bf16 %v9024_v4, %v9021_v56  ;;  %6605 = vmatpush3.bf16.msra.mxu0 %v7275_v0  ;;  %v11373_v0 = vld [vmem:[#allocation33_spill] sm:$0xff]  ;;  %v9065_v39 = vsel %vm11375_vm13, %v8867_v24, 0.0 }
 0x2ee   : > { %v2104_v10 = vadd.f32 %v8828_v58, %v2078_v40  ;;  %v2079_v57 = vadd.f32 %v2051_v35, %v8823_v61  ;;  %6606 = vmatprep.subr.bf16.mxu0 %v7276_v20  ;;  %v9052_v61 = vsel %vm11372_vm10, %v8860_v49, 0.0  ;;  %v11376_v40 = vld [vmem:[#allocation35_spill] sm:$0xff]  ;;  %v7278_v35 = vld [vmem:[%s10842_s1 + $0x140] sm:$0xff]  }
 0x2ef   : > { %v9040_v36 = vadd.f32 %v2106_v44, %v11370_v8  ;;  %6586 = vmatprep.mubr.msk.bf16.mxu0 %vm11269_vm5, %v5608_v1  ;;  %v2203_v44 = vrot.slane %v9052_v61, 5  ;;  %v11378_v1 = vld [vmem:[#allocation46_spill] sm:$0xff]  ;;  %vm10999_vm5 = vcmp.lt.s32.totalorder %v7489_v21, 3  ;;  %v2262_v45 = vrot.slane %v9052_v61, 3 }
 0x2f0   : > { %v9055_v17 = vadd.f32 %v11373_v0, %v2104_v10  ;;  %v2105_v59 = vadd.f32 %v8828_v58, %v2079_v57  ;;  %6587 = vmatmul.mubr.msk.bf16.gmra.mrb[40].mxu0 %vm11285_vm9, %v5611_v11  ;;  %v11379_v8 = vld [vmem:[#allocation14_spill] sm:$0xff] }
 0x2f1   : > { %11371 = vst [vmem:[#allocation29_spill] sm:$0xff] %v9040_v36  ;;  %v2163_v63 = vmul.f32 0.1, %v9040_v36  ;;  %vm2144_vm4 = vcmp.ge.f32.partialorder %v9040_v36, 0.0  ;;  %6607 = vmatpush3.bf16.msra.mxu0 %v7276_v20  ;;  %v2202_v20 = vrot.slane %v9065_v39, 5 }
 0x2f2   : > { %11374 = vst [vmem:[#allocation25_spill] sm:$0xff] %v9055_v17  ;;  %v2161_v49 = vmul.f32 0.1, %v9055_v17  ;;  %v9069_v32 = vadd.f32 %v11376_v40, %v2105_v59  ;;  %vm2142_vm15 = vcmp.ge.f32.partialorder %v9055_v17, 0.0  ;;  %6608 = vmatprep.subr.bf16.mxu0 %v7277_v15 }
 0x2f3   : > { %v2182_v58 = vsel %vm2144_vm4, %v9040_v36, %v2163_v63  ;;  %vm11380_vm4 = vnez %v11379_v8  ;;  %v11381_v63 = vld [vmem:[#allocation20_spill] sm:$0xff]  ;;  %v2239_v36 = vsel %vm10999_vm5, %v2202_v20, %v2203_v44 }
 0x2f4   : > { %11377 = vst [vmem:[#allocation30_spill] sm:$0xff] %v9069_v32  ;;  %v2162_v24 = vmul.f32 0.1, %v9069_v32  ;;  %vm2143_vm9 = vcmp.ge.f32.partialorder %v9069_v32, 0.0  ;;  %v9081_v10 = vsel %vm8010_vm8, %v2182_v58, 0.0  ;;  %v9089_v11 = vsel %vm11380_vm4, %v8856_v28, 0.0 }
 0x2f5   : > { %v9092_v0 = vsel %vm2142_vm15, %v9055_v17, %v2161_v49  ;;  %6609 = vmatpush3.bf16.msra.mxu0 %v7277_v15  ;;  %vm11382_vm8 = vnez %v11381_v63  ;;  %v11383_v28 = vrot.slane %v9081_v10, 5  ;;  %v2205_v17 = vrot.slane %v9089_v11, 5 }
 0x2f6   : > { %v9095_v59 = vsel %vm2143_vm9, %v9069_v32, %v2162_v24  ;;  %v9100_v40 = vsel %vm11382_vm8, %v8912_v43, 0.0  ;;  %6630 = vmatprep.subr.bf16.mxu0 %v7278_v35  ;;  %v11384_v24 = vld [vmem:[#allocation13_spill] sm:$0xff]  ;;  %v5617_v32 = vpack.c.bf16 %v2182_v58, %v2182_v58  ;;  %vm11387_vm15 = vnez %v11386_v26 }
 0x2f7   : > { %v5614_v57 = vpack.c.bf16 %v9095_v59, %v9092_v0  ;;  %v2240_v49 = vsel %vm10999_vm5, %v11383_v28, %v2202_v20  ;;  %vm11385_vm9 = vnez %v11384_v24  ;;  %v9119_v14 = vsel %vm11387_vm15, %v8909_v54, 0.0  ;;  %v11388_v28 = vld [vmem:[#allocation24_spill] sm:$0xff] }
 0x2f8   : > { %v9113_v15 = vsel %vm11385_vm9, %v8863_v23, 0.0  ;;  %v2241_v43 = vpack.c.bf16 %v2239_v36, %v2240_v49  ;;  %v2207_v20 = vrot.slane %v9100_v40, 5  ;;  %v2206_v36 = vrot.slane %v9119_v14, 5  ;;  %v11390_v49 = vld [vmem:[#allocation28_spill] sm:$0xff] }
 0x2f9   : > { %6590 = vmatprep.mubr.msk.bf16.mxu0 %vm11297_vm3, %v5614_v57  ;;  %v2204_v23 = vrot.slane %v9113_v15, 5  ;;  %vm11389_vm6 = vnez %v11388_v28  ;;  %vm11393_vm3 = vnez %v11392_v34 }
 0x2fa   : > { %6591 = vmatmul.mubr.msk.bf16.gmra.mrb[44].mxu0 %vm11324_vm11, %v5617_v32  ;;  %v9135_v57 = vsel %vm11389_vm6, %v8917_v25, 0.0  ;;  %v2235_v32 = vsel %vm10999_vm5, %v2206_v36, %v2207_v20  ;;  %vm11391_vm11 = vnez %v11390_v49  ;;  %v9147_v7 = vsel %vm11393_vm3, %v8932_v47, 0.0  ;;  %v7279_v25 = vld [vmem:[%s10842_s1 + $0x148] sm:$0xff]  }
 0x2fb   : > { %6610 = vmatprep.mubr.bf16.mxu0 %v2241_v43  ;;  %v2237_v58 = vsel %vm10999_vm5, %v2204_v23, %v2205_v17  ;;  %v2238_v54 = vsel %vm10999_vm5, %v2203_v44, %v2204_v23  ;;  %v9142_v43 = vsel %vm11391_vm11, %v8968_v51, 0.0  ;;  %v2236_v44 = vsel %vm10999_vm5, %v2205_v17, %v2206_v36  ;;  %v11394_v23 = vld [vmem:[#allocation27_spill] sm:$0xff]  ;;  %v7280_v36 = vld [vmem:[%s10842_s1 + $0x150] sm:$0xff]  }
 0x2fc   : > { %v2242_v38 = vpack.c.bf16 %v2237_v58, %v2238_v54  ;;  %vm11395_vm12 = vnez %v11394_v23  ;;  %v2243_v51 = vpack.c.bf16 %v2235_v32, %v2236_v44  ;;  %v2209_v31 = vrot.slane %v9135_v57, 5  ;;  %v11398_v44 = vld [vmem:[#allocation36_spill] sm:$0xff] }
 0x2fd   : > { %v9157_v12 = vsel %vm11395_vm12, %v8965_v13, 0.0  ;;  %v2211_v47 = vrot.slane %v9142_v43, 5  ;;  %v2208_v58 = vrot.slane %v9147_v7, 5  ;;  %vm11400_vm12 = vnez %v11399_v53 }
 0x2fe   : > { %v2210_v17 = vrot.slane %v9157_v12, 5  ;;  %v9185_v16 = vsel %vm11400_vm12, %v8988_v41, 0.0 }
 0x2ff   : > { %v2233_v13 = vsel %vm10999_vm5, %v2208_v58, %v2209_v31  ;;  %v2234_v54 = vsel %vm10999_vm5, %v2207_v20, %v2208_v58 }
 0x300   : > { %v2244_v20 = vpack.c.bf16 %v2233_v13, %v2234_v54  ;;  %v2232_v58 = vsel %vm10999_vm5, %v2209_v31, %v2210_v17  ;;  %v2212_v31 = vrot.slane %v9185_v16, 5  ;;  %v7282_v13 = vld [vmem:[%s10842_s1 + $0x160] sm:$0xff]  }
 0x302   : > { %6611 = vmatmul.mubr.bf16.vlgmr.msra.gmra.mrb[28].mxu0 %v2242_v38  ;;  %v11396_v38 = vld [vmem:[#allocation32_spill] sm:$0xff]  ;;  %v2230_v54 = vsel %vm10999_vm5, %v2211_v47, %v2212_v31 }
 0x303   : > { %6614 = vmatprep.mubr.bf16.mxu0 %v2243_v51  ;;  %6631 = vmatpush3.bf16.msra.mxu0 %v7278_v35  ;;  %vm11397_vm11 = vnez %v11396_v38  ;;  %v2231_v35 = vsel %vm10999_vm5, %v2210_v17, %v2211_v47  ;;  %v9180_v51 = vsel %vm7881_vm2, %v9024_v4, 0.0 }
 0x304   : > { %6632 = vmatprep.subr.bf16.mxu0 %v7279_v25  ;;  %v9173_v32 = vsel %vm11397_vm11, %v8973_v62, 0.0  ;;  %v7281_v62 = vld [vmem:[%s10842_s1 + $0x158] sm:$0xff]   ;;  %vm11402_vm11 = vnez %v11401_v18  ;;  %v2215_v41 = vrot.slane %v9180_v51, 5 }
 0x305   : > { %v9195_v4 = vsel %vm11402_vm11, %v9021_v56, 0.0  ;;  %v2213_v42 = vrot.slane %v9173_v32, 5 }
 0x306   : > { %v2214_v17 = vrot.slane %v9195_v4, 5 }
 0x307   : > { %6633 = vmatpush3.bf16.msra.mxu0 %v7279_v25  ;;  %v2245_v25 = vpack.c.bf16 %v2231_v35, %v2232_v58  ;;  %v2229_v56 = vsel %vm10999_vm5, %v2212_v31, %v2213_v42  ;;  %v11403_v35 = vld [vmem:[#allocation41_spill] sm:$0xff]  ;;  %v11405_v58 = vld [vmem:[#allocation43_spill] sm:$0xff] }
 0x308   : > { %6634 = vmatprep.subr.bf16.mxu0 %v7280_v36  ;;  %vm11404_vm2 = vnez %v11403_v35  ;;  %vm11406_vm11 = vnez %v11405_v58  ;;  %v2246_v47 = vpack.c.bf16 %v2229_v56, %v2230_v54  ;;  %v2228_v31 = vsel %vm10999_vm5, %v2213_v42, %v2214_v17  ;;  %v7284_v56 = vld [vmem:[%s10842_s1 + $0x170] sm:$0xff]  }
 0x309   : > { %v2216_v42 = vrot.slane %v9223_v9, 5 }
 0x30a   : > { %6615 = vmatmul.mubr.bf16.gmra.mrb[32].mxu0 %v2244_v20  ;;  %v9211_v20 = vsel %vm11404_vm2, %v9029_v22, 0.0  ;;  %v7283_v22 = vld [vmem:[%s10842_s1 + $0x168] sm:$0xff]   ;;  %vm11410_vm2 = vnez %v11409_v2 }
 0x30b   : > { %6618 = vmatprep.mubr.bf16.mxu0 %v2245_v25  ;;  %6635 = vmatpush3.bf16.msra.mxu0 %v7280_v36  ;;  %v2227_v36 = vsel %vm10999_vm5, %v2214_v17, %v2215_v41  ;;  %v9218_v25 = vsel %vm11406_vm11, %v9095_v59, 0.0  ;;  %v9233_v59 = vsel %vm11410_vm2, %v9092_v0, 0.0  ;;  %v2217_v27 = vrot.slane %v9211_v20, 5 }
 0x30c   : > { %6636 = vmatprep.subr.bf16.mxu0 %v7281_v62  ;;  %v2219_v5 = vrot.slane %v9218_v25, 5  ;;  %v2218_v17 = vrot.slane %v9233_v59, 5  ;;  %v2226_v54 = vsel %vm10999_vm5, %v2215_v41, %v2216_v42  ;;  %vm11000_vm11 = vcmp.lt.s32.totalorder %v7489_v21, 5 }
 0x30d   : > { %v2225_v0 = vsel %vm10999_vm5, %v2216_v42, %v2217_v27  ;;  %v2261_v41 = vrot.slane %v9065_v39, 3  ;;  %v2266_v39 = vrot.slane %v9100_v40, 3  ;;  %v2269_v40 = vrot.slane %v9157_v12, 3 }
 0x30f   : > { %6637 = vmatpush3.bf16.msra.mxu0 %v7281_v62  ;;  %v2247_v62 = vpack.c.bf16 %v2227_v36, %v2228_v31  ;;  %v2223_v36 = vsel %vm10999_vm5, %v2218_v17, %v2219_v5  ;;  %v7285_v31 = vld [vmem:[%s10842_s1 + $0x178] sm:$0xff]   ;;  %v2298_v61 = vsel %vm11000_vm11, %v2261_v41, %v2262_v45 }
 0x310   : > { %6638 = vmatprep.subr.bf16.mxu0 %v7282_v13 }
 0x312   : > { %6619 = vmatmul.mubr.bf16.gmra.mrb[36].mxu0 %v2246_v47  ;;  %v2224_v47 = vsel %vm10999_vm5, %v2217_v27, %v2218_v17  ;;  %v11411_v27 = vrot.slane %v9081_v10, 5 }
 0x313   : > { %6622 = vmatprep.mubr.bf16.mxu0 %v2247_v62  ;;  %6639 = vmatpush3.bf16.msra.mxu0 %v7282_v13  ;;  %v2248_v13 = vpack.c.bf16 %v2225_v0, %v2226_v54  ;;  %v2249_v62 = vpack.c.bf16 %v2223_v36, %v2224_v47  ;;  %v2265_v0 = vrot.slane %v9119_v14, 3  ;;  %v2267_v36 = vrot.slane %v9147_v7, 3 }
 0x314   : > { %6640 = vmatprep.subr.bf16.mxu0 %v7283_v22  ;;  %v2222_v42 = vsel %vm10999_vm5, %v2219_v5, %v11411_v27  ;;  %v2268_v7 = vrot.slane %v9135_v57, 3  ;;  %v2274_v57 = vrot.slane %v9180_v51, 3  ;;  %v2277_v51 = vrot.slane %v9233_v59, 3 }
 0x316   : > { %v2291_v27 = vsel %vm11000_vm11, %v2268_v7, %v2269_v40  ;;  %v2292_v12 = vsel %vm11000_vm11, %v2267_v36, %v2268_v7  ;;  %v7290_v7 = vld [vmem:[%s10844_s3 + $0x120] sm:$0xff]  }
 0x317   : > { %6641 = vmatpush3.bf16.msra.mxu0 %v7283_v22  ;;  %v2263_v22 = vrot.slane %v9113_v15, 3  ;;  %v2264_v15 = vrot.slane %v9089_v11, 3  ;;  %v2270_v11 = vrot.slane %v9142_v43, 3  ;;  %v2273_v43 = vrot.slane %v9195_v4, 3 }
 0x318   : > { %6642 = vmatprep.subr.bf16.mxu0 %v7284_v56 }
 0x319   : > { %v2297_v17 = vsel %vm11000_vm11, %v2262_v45, %v2263_v22  ;;  %v2295_v5 = vsel %vm11000_vm11, %v2264_v15, %v2265_v0  ;;  %v2294_v45 = vsel %vm11000_vm11, %v2265_v0, %v2266_v39  ;;  %v2296_v14 = vsel %vm11000_vm11, %v2263_v22, %v2264_v15 }
 0x31a   : > { %6623 = vmatmul.mubr.bf16.gmra.mrb[40].mxu0 %v2248_v13  ;;  %v2300_v54 = vpack.c.bf16 %v2297_v17, %v2298_v61  ;;  %v2293_v13 = vsel %vm11000_vm11, %v2266_v39, %v2267_v36  ;;  %v2301_v47 = vpack.c.bf16 %v2295_v5, %v2296_v14  ;;  %v2290_v22 = vsel %vm11000_vm11, %v2269_v40, %v2270_v11  ;;  %v7287_v40 = vld [vmem:[%s10844_s3 + $0x108] sm:$0xff]  }
 0x31b   : > { %6626 = vmatprep.mubr.bf16.mxu0 %v2249_v62  ;;  %6643 = vmatpush3.bf16.msra.mxu0 %v7284_v56  ;;  %v2250_v56 = vpack.c.bf16 %v2222_v42, %v2222_v42  ;;  %v2271_v62 = vrot.slane %v9185_v16, 3  ;;  %v2303_v17 = vpack.c.bf16 %v2291_v27, %v2292_v12  ;;  %v2272_v16 = vrot.slane %v9173_v32, 3  ;;  %v7292_v27 = vld [vmem:[%s10844_s3 + $0x130] sm:$0xff]  }
 0x31c   : > { %6644 = vmatprep.subr.bf16.mxu0 %v7285_v31  ;;  %v2286_v39 = vsel %vm11000_vm11, %v2273_v43, %v2274_v57  ;;  %v2278_v32 = vrot.slane %v9218_v25, 3  ;;  %v2279_v5 = vrot.slane %v9081_v10, 3  ;;  %v7286_v25 = vld [vmem:[%s10844_s3 + $0x100] sm:$0xff]  }
 0x31d   : > { %v2289_v42 = vsel %vm11000_vm11, %v2270_v11, %v2271_v62  ;;  %v2287_v0 = vsel %vm11000_vm11, %v2272_v16, %v2273_v43  ;;  %v2288_v4 = vsel %vm11000_vm11, %v2271_v62, %v2272_v16  ;;  %6666 = vmatprep.subr.bf16.mxu1 %v7286_v25  ;;  %v7288_v11 = vld [vmem:[%s10844_s3 + $0x110] sm:$0xff]   ;;  %v7291_v62 = vld [vmem:[%s10844_s3 + $0x128] sm:$0xff]  }
 0x31e   : > { %v2304_v61 = vpack.c.bf16 %v2289_v42, %v2290_v22  ;;  %v2305_v15 = vpack.c.bf16 %v2287_v0, %v2288_v4  ;;  %v2282_v14 = vsel %vm11000_vm11, %v2277_v51, %v2278_v32  ;;  %6667 = vmatpush3.bf16.msra.mxu1 %v7286_v25  ;;  %v7293_v42 = vld [vmem:[%s10844_s3 + $0x138] sm:$0xff]   ;;  %v9342_v22 = vld [vmem:[%s10844_s3 + $0xc0] sm:$0xff]  }
 0x31f   : > { %6645 = vmatpush3.bf16.msra.mxu0 %v7285_v31  ;;  %v2302_v31 = vpack.c.bf16 %v2293_v13, %v2294_v45  ;;  %v2281_v45 = vsel %vm11000_vm11, %v2278_v32, %v2279_v5  ;;  %6668 = vmatprep.subr.bf16.mxu1 %v7287_v40 }
 0x322   : > { %6627 = vmatmul.mubr.bf16.gmra.mrb[48].mxu0 %v2250_v56  ;;  %v2275_v56 = vrot.slane %v9223_v9, 3  ;;  %v2276_v9 = vrot.slane %v9211_v20, 3  ;;  %v2299_v20 = vsel %vm11000_vm11, %v2279_v5, %v2261_v41  ;;  %6669 = vmatpush3.bf16.msra.mxu1 %v7287_v40  ;;  %v7289_v41 = vld [vmem:[%s10844_s3 + $0x118] sm:$0xff]  }
 0x323   : > { %6646 = vmatprep.mubr.bf16.mxu0 %v2300_v54  ;;  %v2309_v10 = vpack.c.bf16 %v2299_v20, %v2299_v20  ;;  %6670 = vmatprep.subr.bf16.mxu1 %v7288_v11 }
 0x324   : > { %v2285_v54 = vsel %vm11000_vm11, %v2274_v57, %v2275_v56  ;;  %v2283_v13 = vsel %vm11000_vm11, %v2276_v9, %v2277_v51  ;;  %v2284_v59 = vsel %vm11000_vm11, %v2275_v56, %v2276_v9 }
 0x325   : > { %v2306_v36 = vpack.c.bf16 %v2285_v54, %v2286_v39 }
 0x326   : > { %6671 = vmatpush3.bf16.msra.mxu1 %v7288_v11 }
 0x327   : > { %6672 = vmatprep.subr.bf16.mxu1 %v7289_v41 }
 0x32a   : > { %6647 = vmatmul.mubr.bf16.vlgmr.msra.gmra.mrb[28].mxu0 %v2301_v47  ;;  %v2307_v47 = vpack.c.bf16 %v2283_v13, %v2284_v59  ;;  %6673 = vmatpush3.bf16.msra.mxu1 %v7289_v41 }
 0x32b   : > { %6650 = vmatprep.mubr.bf16.mxu0 %v2302_v31  ;;  %v2308_v31 = vpack.c.bf16 %v2281_v45, %v2282_v14  ;;  %6674 = vmatprep.subr.bf16.mxu1 %v7290_v7 }
 0x32e   : > { %6675 = vmatpush3.bf16.msra.mxu1 %v7290_v7 }
 0x32f   : > { %6676 = vmatprep.subr.bf16.mxu1 %v7291_v62 }
 0x332   : > { %6651 = vmatmul.mubr.bf16.gmra.mrb[32].mxu0 %v2303_v17  ;;  %6677 = vmatpush3.bf16.msra.mxu1 %v7291_v62 }
 0x333   : > { %6654 = vmatprep.mubr.bf16.mxu0 %v2304_v61  ;;  %6678 = vmatprep.subr.bf16.mxu1 %v7292_v27 }
 0x336   : > { %6679 = vmatpush3.bf16.msra.mxu1 %v7292_v27 }
 0x337   : > { %6680 = vmatprep.subr.bf16.mxu1 %v7293_v42 }
 0x33a   : > { %6655 = vmatmul.mubr.bf16.gmra.mrb[36].mxu0 %v2305_v15  ;;  %6681 = vmatpush3.bf16.msra.mxu1 %v7293_v42  ;;  %v9354_v15 = vld [vmem:[%s10843_s2 + $0x1] ss:$0 sm:$0xff] }
 0x33b   : > { %6658 = vmatprep.mubr.bf16.mxu0 %v2306_v36  ;;  %6702 = vmatprep.subr.bf16.mxu1 %v9342_v22 }
 0x342   : > { %6659 = vmatmul.mubr.bf16.gmra.mrb[40].mxu0 %v2307_v47 }
 0x343   : > { %6662 = vmatprep.mubr.bf16.mxu0 %v2308_v31 }
 0x34a   : > { %6663 = vmatmul.mubr.bf16.gmra.mrb[52].mxu0 %v2309_v10 }
 0x3cd   : > { %v6592_v12 = vpop.f32.mrb[44].mxu0 }
 0x3ce   : > { %v2490_v17 = vpop.f32.mrb[45].mxu0 }
 0x3cf   : > { %v6593_v61 = vpop.f32.mrb[46].mxu0 }
 0x3d0   : > { %v2493_v43 = vpop.f32.mrb[47].mxu0 }
 0x3f5   : > { %v6628_v57 = vpop.f32.mrb[48].mxu0 }
 0x3f6   : > { %v9345_v16 = vadd.f32 %v6628_v57, %v6592_v12  ;;  %v2650_v56 = vpop.f32.mrb[49].mxu0 }
 0x3f7   : > { %v9347_v0 = vadd.f32 %v2650_v56, %v2490_v17  ;;  %v6629_v54 = vpop.f32.mrb[50].mxu0 }
 0x3f8   : > { %v2653_v39 = vpop.f32.mrb[51].mxu0 }
 0x3f9   : > { %v9349_v4 = vadd.f32 %v2653_v39, %v2493_v43 }
 0x3fd   : > { %v6648_v36 = vpop.f32.mrb[28].mxu0 }
 0x3fe   : > { %v2870_v51 = vadd.f32 %v6648_v36, %v9354_v15  ;;  %v2763_v32 = vpop.f32.mrb[29].mxu0 }
 0x3ff   : > { %v2868_v9 = vadd.f32 %v9354_v15, %v2763_v32  ;;  %v6649_v5 = vpop.f32.mrb[30].mxu0 }
 0x400   : > { %vm2889_vm5 = vcmp.ge.f32.partialorder %v2870_v51, 0.0  ;;  %v2908_v13 = vmul.f32 0.1, %v2870_v51  ;;  %v2871_v45 = vadd.f32 %v6649_v5, %v9354_v15  ;;  %v2766_v14 = vpop.f32.mrb[31].mxu0 }
 0x401   : > { %vm2887_vm11 = vcmp.ge.f32.partialorder %v2868_v9, 0.0  ;;  %v2906_v59 = vmul.f32 0.1, %v2868_v9  ;;  %v2869_v47 = vadd.f32 %v9354_v15, %v2766_v14 }
 0x402   : > { %v2927_v31 = vsel %vm2889_vm5, %v2870_v51, %v2908_v13  ;;  %vm2890_vm2 = vcmp.ge.f32.partialorder %v2871_v45, 0.0  ;;  %v2909_v20 = vmul.f32 0.1, %v2871_v45 }
 0x403   : > { %v2946_v10 = vsel %vm11385_vm9, %v2927_v31, 0.0  ;;  %v2925_v25 = vsel %vm2887_vm11, %v2868_v9, %v2906_v59  ;;  %vm2888_vm14 = vcmp.ge.f32.partialorder %v2869_v47, 0.0  ;;  %v2907_v40 = vmul.f32 0.1, %v2869_v47  ;;  %v7295_v59 = vld [vmem:[%s10844_s3 + $0xc8] sm:$0xff]  }
 0x404   : > { %v9364_v11 = vsel %vm11375_vm13, %v2925_v25, 0.0  ;;  %v2928_v41 = vsel %vm2890_vm2, %v2871_v45, %v2909_v20  ;;  %v2965_v7 = vrot.slane %v2946_v10, 7  ;;  %v3023_v62 = vrot.slane %v2946_v10, 1 }
 0x405   : > { %v9368_v27 = vsel %vm11380_vm4, %v2928_v41, 0.0  ;;  %v5697_v42 = vpack.c.bf16 %v2928_v41, %v2927_v31  ;;  %v6652_v12 = vpop.f32.mrb[32].mxu0  ;;  %v2926_v43 = vsel %vm2888_vm14, %v2869_v47, %v2907_v40  ;;  %v11003_v54 = vrot.slane %v9364_v11, 7 }
 0x406   : > { %v11004_v17 = vrot.slane %v9368_v27, 7  ;;  %v3024_v61 = vrot.slane %v9368_v27, 1  ;;  %v2874_v57 = vadd.f32 %v6652_v12, %v9354_v15  ;;  %v2779_v56 = vpop.f32.mrb[33].mxu0  ;;  %v9376_v39 = vsel %vm11372_vm10, %v2926_v43, 0.0 }
 0x407   : > { %v5694_v36 = vpack.c.bf16 %v2926_v43, %v2925_v25  ;;  %v2872_v51 = vadd.f32 %v9354_v15, %v2779_v56  ;;  %v6653_v32 = vpop.f32.mrb[34].mxu0  ;;  %vm11412_vm2 = vcmp.lt.s32.totalorder %v7489_v21, 1  ;;  %vm11413_vm14 = vcmp.lt.s32.totalorder %v7489_v21, 7 }
 0x408   : > { %v9383_v9 = vsel %vm11412_vm2, %v2965_v7, %v11004_v17  ;;  %v9387_v5 = vsel %vm11413_vm14, %v3023_v62, %v3024_v61  ;;  %v2964_v13 = vrot.slane %v9376_v39, 7  ;;  %v11002_v45 = vrot.slane %v9376_v39, 1  ;;  %v2782_v14 = vpop.f32.mrb[35].mxu0  ;;  %vm11414_vm14 = vmmov %vm11412_vm2 }
 0x409   : > { %vm2893_vm5 = vcmp.ge.f32.partialorder %v2874_v57, 0.0  ;;  %v2912_v47 = vmul.f32 0.1, %v2874_v57  ;;  %vm2891_vm11 = vcmp.ge.f32.partialorder %v2872_v51, 0.0  ;;  %v2910_v31 = vmul.f32 0.1, %v2872_v51  ;;  %6682 = vmatprep.mubr.msk.bf16.mxu1 %vm11248_vm0, %v5694_v36 }
 0x40a   : > { %v9398_v20 = vsel %vm11412_vm2, %v2964_v13, %v2965_v7  ;;  %v2875_v10 = vadd.f32 %v6653_v32, %v9354_v15  ;;  %v2873_v25 = vadd.f32 %v9354_v15, %v2782_v14  ;;  %6683 = vmatmul.mubr.msk.bf16.vlgmr.msra.gmra.mrb[28].mxu1 %vm11353_vm1, %v5697_v42  ;;  %v9408_v40 = vsel %vm11414_vm14, %v11003_v54, %v2964_v13 }
 0x40b   : > { %v2931_v41 = vsel %vm2893_vm5, %v2874_v57, %v2912_v47  ;;  %v2929_v12 = vsel %vm2891_vm11, %v2872_v51, %v2910_v31  ;;  %6703 = vmatpush3.bf16.msra.mxu1 %v9342_v22  ;;  %vm11415_vm2 = vcmp.lt.s32.totalorder %v7489_v21, 7  ;;  %v7296_v22 = vld [vmem:[%s10844_s3 + $0xd0] sm:$0xff]  }
 0x40c   : > { %v9417_v43 = vsel %vm11415_vm2, %v11002_v45, %v3023_v62  ;;  %v9421_v42 = vsel %vm11387_vm15, %v2929_v12, 0.0  ;;  %vm2894_vm9 = vcmp.ge.f32.partialorder %v2875_v10, 0.0  ;;  %v2913_v56 = vmul.f32 0.1, %v2875_v10  ;;  %6704 = vmatprep.subr.bf16.mxu1 %v7295_v59  ;;  %vm11416_vm11 = vmmov %vm11415_vm2 }
 0x40d   : > { %v9429_v36 = vsel %vm11393_vm3, %v2931_v41, 0.0  ;;  %v11005_v51 = vrot.slane %v9421_v42, 1  ;;  %v6656_v32 = vpop.f32.mrb[36].mxu0  ;;  %vm2892_vm5 = vcmp.ge.f32.partialorder %v2873_v25, 0.0  ;;  %v2911_v14 = vmul.f32 0.1, %v2873_v25 }
 0x40e   : > { %v2932_v13 = vsel %vm2894_vm9, %v2875_v10, %v2913_v56  ;;  %v2878_v47 = vadd.f32 %v6656_v32, %v9354_v15  ;;  %v2795_v31 = vpop.f32.mrb[37].mxu0  ;;  %vm11419_vm2 = vcmp.lt.s32.totalorder %v7489_v21, 1  ;;  %vm11425_vm3 = vnez %v11407_v6 }
 0x40f   : > { %v9438_v7 = vsel %vm11416_vm11, %v3024_v61, %v11005_v51  ;;  %v9442_v57 = vsel %vm11389_vm6, %v2932_v13, 0.0  ;;  %v5703_v45 = vpack.c.bf16 %v2932_v13, %v2931_v41  ;;  %v2876_v54 = vadd.f32 %v9354_v15, %v2795_v31  ;;  %v6657_v17 = vpop.f32.mrb[38].mxu0  ;;  %6705 = vmatpush3.bf16.msra.mxu1 %v7295_v59  ;;  %v7297_v61 = vld [vmem:[%s10844_s3 + $0xd8] sm:$0xff]  }
 0x410   : > { %v2930_v32 = vsel %vm2892_vm5, %v2873_v25, %v2911_v14  ;;  %vm2897_vm9 = vcmp.ge.f32.partialorder %v2878_v47, 0.0  ;;  %v2798_v62 = vpop.f32.mrb[39].mxu0  ;;  %6706 = vmatprep.subr.bf16.mxu1 %v7296_v22  ;;  %v2916_v13 = vmul.f32 0.1, %v2878_v47  ;;  %v2879_v25 = vadd.f32 %v6657_v17, %v9354_v15 }
 0x411   : > { %v9452_v51 = vsel %vm11382_vm8, %v2930_v32, 0.0  ;;  %v5700_v41 = vpack.c.bf16 %v2930_v32, %v2929_v12  ;;  %vm2895_vm14 = vcmp.ge.f32.partialorder %v2876_v54, 0.0  ;;  %v2914_v56 = vmul.f32 0.1, %v2876_v54 }
 0x412   : > { %v2935_v10 = vsel %vm2897_vm9, %v2878_v47, %v2916_v13  ;;  %v2877_v34 = vadd.f32 %v9354_v15, %v2798_v62  ;;  %v11417_v12 = vrot.slane %v9421_v42, 7  ;;  %v11418_v32 = vrot.slane %v9368_v27, 7  ;;  %v7299_v13 = vld [vmem:[%s10844_s3 + $0xe8] sm:$0xff]  }
 0x413   : > { %6686 = vmatprep.mubr.msk.bf16.mxu1 %vm11251_vm7, %v5700_v41  ;;  %6707 = vmatpush3.bf16.msra.mxu1 %v7296_v22  ;;  %v9471_v17 = vsel %vm11400_vm12, %v2935_v10, 0.0  ;;  %v2933_v31 = vsel %vm2895_vm14, %v2876_v54, %v2914_v56  ;;  %vm2898_vm5 = vcmp.ge.f32.partialorder %v2879_v25, 0.0  ;;  %v2917_v47 = vmul.f32 0.1, %v2879_v25  ;;  %v7298_v22 = vld [vmem:[%s10844_s3 + $0xe0] sm:$0xff]  }
 0x414   : > { %v9467_v59 = vsel %vm11419_vm2, %v11418_v32, %v11417_v12  ;;  %vm11420_vm11 = vnez %v11110_v29  ;;  %6708 = vmatprep.subr.bf16.mxu1 %v7297_v61  ;;  %vm11421_vm9 = vnez %v11394_v23  ;;  %vm2896_vm2 = vcmp.ge.f32.partialorder %v2877_v34, 0.0 }
 0x415   : > { %6687 = vmatmul.mubr.msk.bf16.gmra.mrb[32].mxu1 %vm11420_vm11, %v5703_v45  ;;  %v9482_v41 = vsel %vm11421_vm9, %v2933_v31, 0.0  ;;  %v6660_v54 = vpop.f32.mrb[40].mxu0  ;;  %v2936_v45 = vsel %vm2898_vm5, %v2879_v25, %v2917_v47  ;;  %v2915_v12 = vmul.f32 0.1, %v2877_v34  ;;  %vm11422_vm14 = vnez %v11396_v38 }
 0x416   : > { %v2811_v32 = vpop.f32.mrb[41].mxu0  ;;  %v9488_v14 = vsel %vm11422_vm14, %v2936_v45, 0.0  ;;  %v5709_v27 = vpack.c.bf16 %v2936_v45, %v2935_v10  ;;  %v2882_v62 = vadd.f32 %v6660_v54, %v9354_v15  ;;  %vm11423_vm5 = vnez %v11390_v49 }
 0x417   : > { %v2880_v53 = vadd.f32 %v9354_v15, %v2811_v32  ;;  %v6661_v23 = vpop.f32.mrb[42].mxu0  ;;  %6709 = vmatpush3.bf16.msra.mxu1 %v7297_v61  ;;  %v2934_v26 = vsel %vm2896_vm2, %v2877_v34, %v2915_v12  ;;  %vm11424_vm9 = vnez %v11114_v30  ;;  %vm11444_vm15 = vnez %v11284_v37 }
 0x418   : > { %v2883_v25 = vadd.f32 %v6661_v23, %v9354_v15  ;;  %v2814_v47 = vpop.f32.mrb[43].mxu0  ;;  %6710 = vmatprep.subr.bf16.mxu1 %v7298_v22  ;;  %v9500_v10 = vsel %vm11423_vm5, %v2934_v26, 0.0  ;;  %v5706_v54 = vpack.c.bf16 %v2934_v26, %v2933_v31  ;;  %vm2901_vm12 = vcmp.ge.f32.partialorder %v2882_v62, 0.0 }
 0x419   : > { %v2920_v61 = vmul.f32 0.1, %v2882_v62  ;;  %vm2899_vm2 = vcmp.ge.f32.partialorder %v2880_v53, 0.0  ;;  %v2918_v34 = vmul.f32 0.1, %v2880_v53  ;;  %v2881_v28 = vadd.f32 %v9354_v15, %v2814_v47 }
 0x41a   : > { %vm2902_vm14 = vcmp.ge.f32.partialorder %v2883_v25, 0.0  ;;  %v2921_v12 = vmul.f32 0.1, %v2883_v25  ;;  %6690 = vmatprep.mubr.msk.bf16.mxu1 %vm11424_vm9, %v5706_v54  ;;  %vm11426_vm5 = vnez %v11263_v55  ;;  %v11428_v47 = vrot.slane %v9421_v42, 7 }
 0x41b   : > { %v2939_v23 = vsel %vm2901_vm12, %v2882_v62, %v2920_v61  ;;  %6711 = vmatpush3.bf16.msra.mxu1 %v7298_v22  ;;  %v2937_v31 = vsel %vm2899_vm2, %v2880_v53, %v2918_v34  ;;  %v7300_v62 = vld [vmem:[%s10844_s3 + $0xf0] sm:$0xff]   ;;  %v11427_v61 = vrot.slane %v9452_v51, 7  ;;  %vm11429_vm12 = vcmp.lt.s32.totalorder %v7489_v21, 1 }
 0x41c   : > { %v9509_v26 = vsel %vm11425_vm3, %v2939_v23, 0.0  ;;  %6712 = vmatprep.subr.bf16.mxu1 %v7299_v13  ;;  %v11430_v54 = vrot.slane %v9442_v57, 7  ;;  %v11431_v53 = vrot.slane %v9429_v36, 7  ;;  %vm11432_vm2 = vmmov %vm11429_vm12  ;;  %vm11433_vm3 = vnez %v11401_v18 }
 0x41d   : > { %6691 = vmatmul.mubr.msk.bf16.gmra.mrb[36].mxu1 %vm11426_vm5, %v5709_v27  ;;  %v9522_v22 = vsel %vm11429_vm12, %v11428_v47, %v11427_v61  ;;  %v9536_v56 = vsel %vm11433_vm3, %v2937_v31, 0.0  ;;  %v2940_v32 = vsel %vm2902_vm14, %v2883_v25, %v2921_v12  ;;  %v6664_v6 = vpop.f32.mrb[52].mxu0  ;;  %vm11434_vm12 = vnez %v11403_v35  ;;  %v7301_v35 = vld [vmem:[%s10844_s3 + $0xf8] sm:$0xff]  }
 0x41e   : > { %v9530_v27 = vsel %vm11432_vm2, %v11431_v53, %v11430_v54  ;;  %v2975_v47 = vrot.slane %v9536_v56, 7  ;;  %v9542_v38 = vsel %vm11434_vm12, %v2940_v32, 0.0  ;;  %v5715_v54 = vpack.c.bf16 %v2940_v32, %v2939_v23  ;;  %v2827_v53 = vpop.f32.mrb[53].mxu0 }
 0x41f   : > { %vm2900_vm2 = vcmp.ge.f32.partialorder %v2881_v28, 0.0  ;;  %v2919_v18 = vmul.f32 0.1, %v2881_v28  ;;  %v6665_v49 = vpop.f32.mrb[54].mxu0  ;;  %6713 = vmatpush3.bf16.msra.mxu1 %v7299_v13  ;;  %v2859_v25 = vadd.f32 %v6664_v6, %v9345_v16  ;;  %v2857_v12 = vadd.f32 %v2827_v53, %v9347_v0 }
 0x420   : > { %v2830_v61 = vpop.f32.mrb[55].mxu0  ;;  %6714 = vmatprep.subr.bf16.mxu1 %v7300_v62  ;;  %v11435_v23 = vrot.slane %v9429_v36, 7  ;;  %v11436_v34 = vrot.slane %v9452_v51, 7  ;;  %vm11437_vm14 = vcmp.lt.s32.totalorder %v7489_v21, 1  ;;  %v11438_v13 = vrot.slane %v9500_v10, 7 }
 0x421   : > { %v2938_v6 = vsel %vm2900_vm2, %v2881_v28, %v2919_v18  ;;  %v2858_v16 = vadd.f32 %v2830_v61, %v9349_v4  ;;  %v11439_v53 = vrot.slane %v9482_v41, 7  ;;  %vm11440_vm12 = vmmov %vm11437_vm14  ;;  %vm11441_vm3 = vnez %v11398_v44 }
 0x422   : > { %v9559_v49 = vsel %vm11437_vm14, %v11436_v34, %v11435_v23  ;;  %v9574_v45 = vsel %vm11441_vm3, %v2938_v6, 0.0  ;;  %v5712_v34 = vpack.c.bf16 %v2938_v6, %v2937_v31  ;;  %v2886_v18 = vadd.f32 %v9354_v15, %v2859_v25  ;;  %vm11449_vm8 = vmmov %vm11440_vm12 }
 0x423   : > { %v9570_v32 = vsel %vm11440_vm12, %v11439_v53, %v11438_v13  ;;  %v2884_v28 = vadd.f32 %v9354_v15, %v2857_v12  ;;  %v2976_v61 = vrot.slane %v9574_v45, 7  ;;  %v2885_v23 = vadd.f32 %v9354_v15, %v2858_v16  ;;  %6715 = vmatpush3.bf16.msra.mxu1 %v7300_v62  ;;  %v9584_v13 = vld [vmem:[%s10844_s3 + $0x140] sm:$0xff]   ;;  %vm11450_vm4 = vmmov %vm11449_vm8 }
 0x424   : > { %v11442_v31 = vrot.slane %v9442_v57, 7  ;;  %vm2905_vm2 = vcmp.ge.f32.partialorder %v2886_v18, 0.0  ;;  %v2924_v12 = vmul.f32 0.1, %v2886_v18  ;;  %vm11443_vm3 = vnez %v11268_v3  ;;  %6716 = vmatprep.subr.bf16.mxu1 %v7301_v35 }
 0x425   : > { %vm2903_vm14 = vcmp.ge.f32.partialorder %v2884_v28, 0.0  ;;  %v2922_v6 = vmul.f32 0.1, %v2884_v28  ;;  %6694 = vmatprep.mubr.msk.bf16.mxu1 %vm11443_vm3, %v5712_v34  ;;  %vm2904_vm6 = vcmp.ge.f32.partialorder %v2885_v23, 0.0  ;;  %v2923_v15 = vmul.f32 0.1, %v2885_v23 }
 0x426   : > { %v9592_v25 = vsel %vm11440_vm12, %v11442_v31, %v11439_v53  ;;  %6695 = vmatmul.mubr.msk.bf16.gmra.mrb[40].mxu1 %vm11444_vm15, %v5715_v54  ;;  %v11445_v16 = vrot.slane %v9488_v14, 7  ;;  %v11446_v53 = vrot.slane %v9471_v17, 7  ;;  %v2943_v0 = vsel %vm2905_vm2, %v2886_v18, %v2924_v12 }
 0x427   : > { %v2941_v4 = vsel %vm2903_vm14, %v2884_v28, %v2922_v6  ;;  %v11448_v44 = vrot.slane %v9500_v10, 7  ;;  %v9618_v62 = vsel %vm11450_vm4, %v2975_v47, %v2976_v61  ;;  %v3034_v24 = vrot.slane %v9574_v45, 1  ;;  %6717 = vmatpush3.bf16.msra.mxu1 %v7301_v35 }
 0x428   : > { %v9606_v31 = vsel %vm11440_vm12, %v11446_v53, %v11445_v16  ;;  %v11447_v34 = vmov %v11446_v53  ;;  %vm11451_vm15 = vnez %v11378_v1  ;;  %vm11452_vm2 = vnez %v11409_v2  ;;  %6738 = vmatprep.subr.bf16.mxu1 %v9584_v13  ;;  %vm11460_vm12 = vmmov %vm11450_vm4 }
 0x429   : > { %v9614_v54 = vsel %vm11449_vm8, %v11448_v44, %v11447_v34  ;;  %v2962_v16 = vsel %vm11451_vm15, %v2943_v0, 0.0  ;;  %v2960_v18 = vsel %vm11452_vm2, %v2941_v4, 0.0  ;;  %v2942_v28 = vsel %vm2904_vm6, %v2885_v23, %v2923_v15  ;;  %vm11456_vm6 = vmmov %vm11450_vm4 }
 0x42a   : > { %v2981_v12 = vrot.slane %v2962_v16, 7  ;;  %v3039_v6 = vrot.slane %v2962_v16, 1  ;;  %v2979_v53 = vrot.slane %v2960_v18, 7  ;;  %v5721_v63 = vpack.c.bf16 %v2943_v0, %v2943_v0  ;;  %vm11464_vm2 = vmmov %vm11450_vm4 }
 0x42b   : > { %vm11453_vm8 = vnez %v11405_v58  ;;  %v5718_v34 = vpack.c.bf16 %v2942_v28, %v2941_v4  ;;  %v3006_v45 = vpack.c.bf16 %v9606_v31, %v9614_v54  ;;  %v11454_v8 = vrot.slane %v9488_v14, 7 }
 0x42c   : > { %v2961_v44 = vsel %vm11453_vm8, %v2942_v28, 0.0  ;;  %v3037_v23 = vrot.slane %v2960_v18, 1  ;;  %v11455_v15 = vrot.slane %v9364_v11, 7  ;;  %vm11457_vm14 = vnez %v11296_v52  ;;  %vm11465_vm8 = vmmov %vm11464_vm2 }
 0x42d   : > { %v2988_v2 = vsel %vm11450_vm4, %v11454_v8, %v2975_v47  ;;  %v2980_v35 = vrot.slane %v2961_v44, 7  ;;  %6698 = vmatprep.mubr.msk.bf16.mxu1 %vm11457_vm14, %v5718_v34  ;;  %v11458_v31 = vrot.slane %v9542_v38, 7  ;;  %v11459_v54 = vrot.slane %v9509_v26, 7 }
 0x42e   : > { %v3000_v0 = vsel %vm11456_vm6, %v2981_v12, %v11455_v15  ;;  %v3007_v16 = vpack.c.bf16 %v9618_v62, %v2988_v2  ;;  %vm11463_vm6 = vmmov %vm11450_vm4  ;;  %v11466_v15 = vrot.slane %v9376_v39, 1  ;;  %v11471_v39 = vrot.slane %v9452_v51, 1 }
 0x42f   : > { %v3001_v4 = vpack.c.bf16 %v9408_v40, %v3000_v0  ;;  %v2985_v8 = vsel %vm11460_vm12, %v11459_v54, %v11458_v31  ;;  %v11461_v47 = vmov %v11459_v54  ;;  %v11462_v28 = vmov %v11458_v31 }
 0x430   : > { %v2986_v18 = vsel %vm11450_vm4, %v2976_v61, %v11461_v47  ;;  %v2984_v2 = vsel %vm11463_vm6, %v11462_v28, %v2979_v53  ;;  %v2983_v40 = vsel %vm11464_vm2, %v2979_v53, %v2980_v35  ;;  %v2982_v34 = vsel %vm11465_vm8, %v2980_v35, %v2981_v12 }
 0x431   : > { %v3008_v62 = vpack.c.bf16 %v2985_v8, %v2986_v18  ;;  %v11467_v0 = vrot.slane %v9364_v11, 1  ;;  %vm11468_vm12 = vcmp.lt.s32.totalorder %v7489_v21, 7  ;;  %v3038_v61 = vrot.slane %v2961_v44, 1 }
 0x432   : > { %vm11469_vm4 = vnez %v11323_v50  ;;  %v3009_v54 = vpack.c.bf16 %v2983_v40, %v2984_v2  ;;  %v3060_v53 = vpack.c.bf16 %v9438_v7, %v9387_v5  ;;  %v11470_v12 = vrot.slane %v9429_v36, 1  ;;  %vm11472_vm2 = vmmov %vm11468_vm12 }
 0x433   : > { %v3057_v31 = vsel %vm11468_vm12, %v11467_v0, %v11466_v15  ;;  %6699 = vmatmul.mubr.msk.bf16.gmra.mrb[44].mxu1 %vm11469_vm4, %v5721_v63  ;;  %v11473_v47 = vmov %v11471_v39  ;;  %v11474_v44 = vrot.slane %v9421_v42, 1  ;;  %vm11475_vm8 = vmmov %vm11472_vm2  ;;  %v11477_v18 = vrot.slane %v9442_v57, 1 }
 0x434   : > { %v3059_v8 = vpack.c.bf16 %v9417_v43, %v3057_v31  ;;  %6718 = vmatprep.mubr.bf16.mxu1 %v3001_v4  ;;  %v3052_v35 = vsel %vm11472_vm2, %v11471_v39, %v11470_v12  ;;  %v11476_v43 = vrot.slane %v9482_v41, 1  ;;  %vm11478_vm6 = vmmov %vm11472_vm2  ;;  %v11480_v4 = vmov %v11470_v12 }
 0x435   : > { %v3053_v63 = vsel %vm11475_vm8, %v11474_v44, %v11473_v47  ;;  %v11479_v7 = vmov %v11477_v18  ;;  %vm11481_vm12 = vmmov %vm11472_vm2  ;;  %v11482_v42 = vrot.slane %v9471_v17, 1  ;;  %v11483_v40 = vrot.slane %v9500_v10, 1 }
 0x436   : > { %v3050_v5 = vsel %vm11478_vm6, %v11477_v18, %v11476_v43  ;;  %v3051_v28 = vsel %vm11481_vm12, %v11480_v4, %v11479_v7  ;;  %v3061_v51 = vpack.c.bf16 %v3052_v35, %v3053_v63  ;;  %v11485_v31 = vmov %v11476_v43  ;;  %vm11486_vm8 = vmmov %vm11472_vm2 }
 0x437   : > { %v3062_v2 = vpack.c.bf16 %v3050_v5, %v3051_v28  ;;  %v3048_v15 = vsel %vm11472_vm2, %v11483_v40, %v11482_v42  ;;  %v11484_v0 = vmov %v11483_v40  ;;  %v11487_v12 = vrot.slane %v9536_v56, 1  ;;  %vm11489_vm6 = vmmov %vm11472_vm2 }
 0x438   : > { %v3049_v57 = vsel %vm11486_vm8, %v11485_v31, %v11484_v0  ;;  %v11488_v39 = vrot.slane %v9488_v14, 1  ;;  %v11491_v44 = vmov %v11482_v42  ;;  %vm11492_vm12 = vmmov %vm11472_vm2  ;;  %v11493_v41 = vrot.slane %v9509_v26, 1 }
 0x439   : > { %v3063_v36 = vpack.c.bf16 %v3048_v15, %v3049_v57  ;;  %v11494_v18 = vmov %v11487_v12  ;;  %vm11495_vm8 = vmmov %vm11472_vm2  ;;  %v11496_v7 = vrot.slane %v9542_v38, 1  ;;  %v3040_v56 = vsel %vm11472_vm2, %v3038_v61, %v3039_v6  ;;  %v7303_v15 = vld [vmem:[%s10844_s3 + $0x148] sm:$0xff]  }
 0x43a   : > { %v3046_v35 = vsel %vm11489_vm6, %v11488_v39, %v11487_v12  ;;  %v11490_v47 = vmov %v11488_v39  ;;  %v3044_v63 = vsel %vm11472_vm2, %v3034_v24, %v11493_v41  ;;  %v3045_v5 = vsel %vm11495_vm8, %v11494_v18, %v3034_v24  ;;  %vm11497_vm6 = vmmov %vm11472_vm2 }
 0x43b   : > { %v3047_v10 = vsel %vm11492_vm12, %v11491_v44, %v11490_v47  ;;  %v3042_v14 = vsel %vm11497_vm6, %v11496_v7, %v3037_v23  ;;  %v11498_v17 = vmov %v11496_v7  ;;  %v11499_v4 = vmov %v11493_v41  ;;  %vm11500_vm12 = vmmov %vm11472_vm2 }
 0x43c   : > { %v3064_v43 = vpack.c.bf16 %v3046_v35, %v3047_v10  ;;  %v3043_v28 = vsel %vm11500_vm12, %v11499_v4, %v11498_v17  ;;  %v3065_v42 = vpack.c.bf16 %v3044_v63, %v3045_v5  ;;  %vm11501_vm4 = vmmov %vm11472_vm2  ;;  %v11502_v38 = vrot.slane %v9364_v11, 1  ;;  %v7305_v11 = vld [vmem:[%s10844_s3 + $0x158] sm:$0xff]   ;;  %v9818_v63 = vld [vmem:[%s10845_s4 + $0x1] ss:$0 sm:$0xff] }
 0x43d   : > { %v3066_v40 = vpack.c.bf16 %v3042_v14, %v3043_v28  ;;  %v3041_v24 = vsel %vm11501_vm4, %v3037_v23, %v3038_v61  ;;  %vm11503_vm8 = vmmov %vm11472_vm2  ;;  %v11504_v31 = vpack.c.bf16 %v9383_v9, %v9398_v20  ;;  %v11505_v57 = vpack.c.bf16 %v9522_v22, %v9467_v59  ;;  %v7304_v23 = vld [vmem:[%s10844_s3 + $0x150] sm:$0xff]   ;;  %v7306_v59 = vld [vmem:[%s10844_s3 + $0x160] sm:$0xff]  }
 0x43e   : > { %v3067_v0 = vpack.c.bf16 %v3040_v56, %v3041_v24  ;;  %v3058_v26 = vsel %vm11503_vm8, %v3039_v6, %v11502_v38  ;;  %v11506_v9 = vpack.c.bf16 %v9530_v27, %v9559_v49  ;;  %v11507_v20 = vpack.c.bf16 %v9570_v32, %v9592_v25  ;;  %v7307_v22 = vld [vmem:[%s10844_s3 + $0x168] sm:$0xff]   ;;  %v7308_v27 = vld [vmem:[%s10844_s3 + $0x170] sm:$0xff]   ;;  %v7309_v32 = vld [vmem:[%s10844_s3 + $0x178] sm:$0xff]  }
 0x43f   : > { %6719 = vmatmul.mubr.bf16.vlgmr.msra.gmra.mrb[28].mxu1 %v11504_v31  ;;  %v3010_v49 = vpack.c.bf16 %v2982_v34, %v2982_v34  ;;  %v7310_v25 = vld [vmem:[%s10842_s1 + $0x1c0] sm:$0xff]   ;;  %v7311_v6 = vld [vmem:[%s10842_s1 + $0x1c8] sm:$0xff]   ;;  %v7316_v61 = vld [vmem:[%s10842_s1 + $0x1f0] sm:$0xff]  }
 0x440   : > { %6722 = vmatprep.mubr.bf16.mxu1 %v11505_v57  ;;  %6739 = vmatpush3.bf16.msra.mxu1 %v9584_v13  ;;  %v3068_v13 = vpack.c.bf16 %v3058_v26, %v3058_v26  ;;  %v7315_v34 = vld [vmem:[%s10842_s1 + $0x1e8] sm:$0xff]   ;;  %v11510_v56 = vld [vmem:[#allocation38_spill] sm:$0xff] }
 0x441   : > { %6740 = vmatprep.subr.bf16.mxu1 %v7303_v15  ;;  %6774 = vmatprep.subr.bf16.mxu0 %v7310_v25  ;;  %v11508_v17 = vld [vmem:[#allocation37_spill] sm:$0xff] }
 0x442   : > { %6775 = vmatpush3.bf16.msra.mxu0 %v7310_v25  ;;  %v11513_v38 = vld [vmem:[#allocation45_spill] sm:$0xff] }
 0x443   : > { %6776 = vmatprep.subr.bf16.mxu0 %v7311_v6 }
 0x444   : > { %6741 = vmatpush3.bf16.msra.mxu1 %v7303_v15  ;;  %v11511_v15 = vld [vmem:[#allocation44_spill] sm:$0xff] }
 0x445   : > { %6742 = vmatprep.subr.bf16.mxu1 %v7304_v23 }
 0x446   : > { %6777 = vmatpush3.bf16.msra.mxu0 %v7311_v6 }
 0x447   : > { %6723 = vmatmul.mubr.bf16.gmra.mrb[32].mxu1 %v11506_v9 }
 0x448   : > { %6726 = vmatprep.mubr.bf16.mxu1 %v11507_v20  ;;  %6743 = vmatpush3.bf16.msra.mxu1 %v7304_v23 }
 0x449   : > { %6744 = vmatprep.subr.bf16.mxu1 %v7305_v11 }
 0x44c   : > { %6745 = vmatpush3.bf16.msra.mxu1 %v7305_v11 }
 0x44d   : > { %6746 = vmatprep.subr.bf16.mxu1 %v7306_v59 }
 0x44f   : > { %6727 = vmatmul.mubr.bf16.gmra.mrb[36].mxu1 %v3006_v45  ;;  %v7312_v45 = vld [vmem:[%s10842_s1 + $0x1d0] sm:$0xff]  }
 0x450   : > { %6730 = vmatprep.mubr.bf16.mxu1 %v3007_v16  ;;  %6747 = vmatpush3.bf16.msra.mxu1 %v7306_v59  ;;  %v7313_v16 = vld [vmem:[%s10842_s1 + $0x1d8] sm:$0xff]  }
 0x451   : > { %6748 = vmatprep.subr.bf16.mxu1 %v7307_v22  ;;  %6778 = vmatprep.subr.bf16.mxu0 %v7312_v45 }
 0x452   : > { %6779 = vmatpush3.bf16.msra.mxu0 %v7312_v45 }
 0x453   : > { %6780 = vmatprep.subr.bf16.mxu0 %v7313_v16 }
 0x454   : > { %6749 = vmatpush3.bf16.msra.mxu1 %v7307_v22 }
 0x455   : > { %6750 = vmatprep.subr.bf16.mxu1 %v7308_v27 }
 0x456   : > { %6781 = vmatpush3.bf16.msra.mxu0 %v7313_v16 }
 0x457   : > { %6731 = vmatmul.mubr.bf16.gmra.mrb[40].mxu1 %v3008_v62  ;;  %v7314_v62 = vld [vmem:[%s10842_s1 + $0x1e0] sm:$0xff]  }
 0x458   : > { %6734 = vmatprep.mubr.bf16.mxu1 %v3009_v54  ;;  %6751 = vmatpush3.bf16.msra.mxu1 %v7308_v27  ;;  %v7317_v54 = vld [vmem:[%s10842_s1 + $0x1f8] sm:$0xff]  }
 0x459   : > { %6752 = vmatprep.subr.bf16.mxu1 %v7309_v32  ;;  %6782 = vmatprep.subr.bf16.mxu0 %v7314_v62 }
 0x45a   : > { %6783 = vmatpush3.bf16.msra.mxu0 %v7314_v62  ;;  %v11515_v62 = vld [vmem:[#allocation7_spill] sm:$0xff] }
 0x45b   : > { %6784 = vmatprep.subr.bf16.mxu0 %v7315_v34 }
 0x45c   : > { %6753 = vmatpush3.bf16.msra.mxu1 %v7309_v32 }
 0x45e   : > { %6785 = vmatpush3.bf16.msra.mxu0 %v7315_v34 }
 0x45f   : > { %6735 = vmatmul.mubr.bf16.gmra.mrb[48].mxu1 %v3010_v49  ;;  %6786 = vmatprep.subr.bf16.mxu0 %v7316_v61 }
 0x460   : > { %6754 = vmatprep.mubr.bf16.mxu1 %v3059_v8  ;;  %v9806_v8 = vld [vmem:[%s10842_s1 + $0x180] sm:$0xff]  }
 0x462   : > { %6787 = vmatpush3.bf16.msra.mxu0 %v7316_v61  ;;  %v11517_v61 = vld [vmem:[#allocation9_spill] sm:$0xff] }
 0x463   : > { %6788 = vmatprep.subr.bf16.mxu0 %v7317_v54 }
 0x466   : > { %6789 = vmatpush3.bf16.msra.mxu0 %v7317_v54 }
 0x467   : > { %6755 = vmatmul.mubr.bf16.vlgmr.msra.gmra.mrb[28].mxu1 %v3060_v53  ;;  %6810 = vmatprep.subr.bf16.mxu0 %v9806_v8 }
 0x468   : > { %6758 = vmatprep.mubr.bf16.mxu1 %v3061_v51 }
 0x46f   : > { %6759 = vmatmul.mubr.bf16.gmra.mrb[32].mxu1 %v3062_v2 }
 0x470   : > { %6762 = vmatprep.mubr.bf16.mxu1 %v3063_v36 }
 0x477   : > { %6763 = vmatmul.mubr.bf16.gmra.mrb[36].mxu1 %v3064_v43 }
 0x478   : > { %6766 = vmatprep.mubr.bf16.mxu1 %v3065_v42 }
 0x47f   : > { %6767 = vmatmul.mubr.bf16.gmra.mrb[40].mxu1 %v3066_v40 }
 0x480   : > { %6770 = vmatprep.mubr.bf16.mxu1 %v3067_v0 }
 0x487   : > { %6771 = vmatmul.mubr.bf16.gmra.mrb[52].mxu1 %v3068_v13 }
 0x506   : > { %v6700_v53 = vpop.f32.mrb[44].mxu1 }
 0x507   : > { %v3249_v51 = vpop.f32.mrb[45].mxu1 }
 0x508   : > { %v6701_v2 = vpop.f32.mrb[46].mxu1 }
 0x509   : > { %v3252_v36 = vpop.f32.mrb[47].mxu1  ;;  %v11521_v2 = vld [vmem:[#allocation8_spill] sm:$0xff] }
 0x532   : > { %v6736_v12 = vpop.f32.mrb[48].mxu1 }
 0x533   : > { %v9809_v39 = vadd.f32 %v6736_v12, %v6700_v53  ;;  %v3409_v35 = vpop.f32.mrb[49].mxu1  ;;  %v11519_v53 = vld [vmem:[#allocation10_spill] sm:$0xff] }
 0x534   : > { %v9811_v47 = vadd.f32 %v3409_v35, %v3249_v51  ;;  %v6737_v44 = vpop.f32.mrb[50].mxu1 }
 0x535   : > { %v3412_v10 = vpop.f32.mrb[51].mxu1 }
 0x536   : > { %v9813_v41 = vadd.f32 %v3412_v10, %v3252_v36  ;;  %v7319_v10 = vld [vmem:[%s10842_s1 + $0x188] sm:$0xff]  }
 0x53a   : > { %v6756_v43 = vpop.f32.mrb[28].mxu1 }
 0x53b   : > { %v3629_v18 = vadd.f32 %v6756_v43, %v9818_v63  ;;  %v3522_v5 = vpop.f32.mrb[29].mxu1 }
 0x53c   : > { %v3627_v7 = vadd.f32 %v9818_v63, %v3522_v5  ;;  %v6757_v14 = vpop.f32.mrb[30].mxu1 }
 0x53d   : > { %v9823_v4 = vadd.f32 %v3629_v18, %v11508_v17  ;;  %v3630_v28 = vadd.f32 %v6757_v14, %v9818_v63  ;;  %v3525_v42 = vpop.f32.mrb[31].mxu1 }
 0x53e   : > { %v3628_v40 = vadd.f32 %v9818_v63, %v3525_v42  ;;  %v3646_v24 = vadd.f32 %v3627_v7, %v11510_v56 }
 0x53f   : > { %11509 = vst [vmem:[#allocation26_spill] sm:$0xff] %v9823_v4  ;;  %v9829_v0 = vadd.f32 %v3630_v28, %v11511_v15  ;;  %v3686_v31 = vmul.f32 0.1, %v9823_v4  ;;  %vm3667_vm12 = vcmp.ge.f32.partialorder %v9823_v4, 0.0  ;;  %v7320_v15 = vld [vmem:[%s10842_s1 + $0x190] sm:$0xff]  }
 0x540   : > { %v9832_v26 = vadd.f32 %v3628_v40, %v11513_v38  ;;  %v3684_v9 = vmul.f32 0.1, %v3646_v24  ;;  %vm3665_vm2 = vcmp.ge.f32.partialorder %v3646_v24, 0.0 }
 0x541   : > { %11512 = vst [vmem:[#allocation39_spill] sm:$0xff] %v9829_v0  ;;  %v3687_v57 = vmul.f32 0.1, %v9829_v0  ;;  %vm3668_vm4 = vcmp.ge.f32.partialorder %v9829_v0, 0.0  ;;  %v9851_v45 = vsel %vm3667_vm12, %v9823_v4, %v3686_v31 }
 0x542   : > { %11514 = vst [vmem:[#allocation33_spill] sm:$0xff] %v9832_v26  ;;  %v3685_v23 = vmul.f32 0.1, %v9832_v26  ;;  %v6760_v11 = vpop.f32.mrb[32].mxu1  ;;  %vm3666_vm6 = vcmp.ge.f32.partialorder %v9832_v26, 0.0  ;;  %v9853_v16 = vsel %vm3665_vm2, %v3646_v24, %v3684_v9  ;;  %v11525_v9 = vld [vmem:[#allocation15_spill] sm:$0xff] }
 0x543   : > { %v3538_v20 = vpop.f32.mrb[33].mxu1  ;;  %v3633_v59 = vadd.f32 %v6760_v11, %v9818_v63  ;;  %v9843_v49 = vsel %vm3668_vm4, %v9829_v0, %v3687_v57  ;;  %v11523_v57 = vld [vmem:[#allocation11_spill] sm:$0xff]  ;;  %v11586_v0 = vld [vmem:[#allocation42_spill] sm:$0xff] }
 0x544   : > { %v6761_v22 = vpop.f32.mrb[34].mxu1  ;;  %v3631_v27 = vadd.f32 %v9818_v63, %v3538_v20  ;;  %v9848_v6 = vsel %vm3666_vm6, %v9832_v26, %v3685_v23  ;;  %v5801_v35 = vpack.c.bf16 %v9843_v49, %v9851_v45 }
 0x545   : > { %v3541_v32 = vpop.f32.mrb[35].mxu1  ;;  %v3634_v13 = vadd.f32 %v6761_v22, %v9818_v63  ;;  %v9859_v54 = vadd.f32 %v3633_v59, %v11517_v61  ;;  %v5798_v12 = vpack.c.bf16 %v9848_v6, %v9853_v16  ;;  %v11527_v59 = vld [vmem:[#allocation16_spill] sm:$0xff]  ;;  %v7321_v61 = vld [vmem:[%s10842_s1 + $0x198] sm:$0xff]  }
 0x546   : > { %v3632_v25 = vadd.f32 %v9818_v63, %v3541_v32  ;;  %v9856_v34 = vadd.f32 %v3631_v27, %v11515_v62 }
 0x547   : > { %11518 = vst [vmem:[#allocation46_spill] sm:$0xff] %v9859_v54  ;;  %v9862_v51 = vadd.f32 %v3634_v13, %v11519_v53  ;;  %6790 = vmatprep.mubr.msk.bf16.mxu0 %vm11248_vm0, %v5798_v12  ;;  %v3690_v7 = vmul.f32 0.1, %v9859_v54  ;;  %vm3671_vm12 = vcmp.ge.f32.partialorder %v9859_v54, 0.0  ;;  %v11529_v13 = vld [vmem:[#allocation12_spill] sm:$0xff] }
 0x548   : > { %11516 = vst [vmem:[#allocation35_spill] sm:$0xff] %v9856_v34  ;;  %v9865_v36 = vadd.f32 %v3632_v25, %v11521_v2  ;;  %vm3669_vm8 = vcmp.ge.f32.partialorder %v9856_v34, 0.0  ;;  %v3688_v44 = vmul.f32 0.1, %v9856_v34  ;;  %6791 = vmatmul.mubr.msk.bf16.vlgmr.msra.gmra.mrb[56].mxu0 %vm11353_vm1, %v5801_v35 }
 0x549   : > { %11520 = vst [vmem:[#allocation43_spill] sm:$0xff] %v9862_v51  ;;  %v3691_v43 = vmul.f32 0.1, %v9862_v51  ;;  %vm3672_vm6 = vcmp.ge.f32.partialorder %v9862_v51, 0.0  ;;  %6811 = vmatpush3.bf16.msra.mxu0 %v9806_v8  ;;  %v9919_v27 = vsel %vm3671_vm12, %v9859_v54, %v3690_v7 }
 0x54a   : > { %11522 = vst [vmem:[#allocation37_spill] sm:$0xff] %v9865_v36  ;;  %vm3670_vm4 = vcmp.ge.f32.partialorder %v9865_v36, 0.0  ;;  %v3689_v18 = vmul.f32 0.1, %v9865_v36  ;;  %v6764_v5 = vpop.f32.mrb[36].mxu1  ;;  %v9888_v28 = vsel %vm3669_vm8, %v9856_v34, %v3688_v44  ;;  %6812 = vmatprep.subr.bf16.mxu0 %v7319_v10  ;;  %v11577_v34 = vld [vmem:[#allocation34_spill] sm:$0xff] }
 0x54b   : > { %v3637_v14 = vadd.f32 %v6764_v5, %v9818_v63  ;;  %v3554_v17 = vpop.f32.mrb[37].mxu1  ;;  %v9904_v31 = vsel %vm3672_vm6, %v9862_v51, %v3691_v43 }
 0x54c   : > { %v9891_v42 = vsel %vm3670_vm4, %v9865_v36, %v3689_v18  ;;  %v3635_v40 = vadd.f32 %v9818_v63, %v3554_v17  ;;  %v6765_v56 = vpop.f32.mrb[38].mxu1  ;;  %v5807_v62 = vpack.c.bf16 %v9904_v31, %v9919_v27  ;;  %v11573_v36 = vld [vmem:[#allocation36_spill] sm:$0xff] }
 0x54d   : > { %v5804_v24 = vpack.c.bf16 %v9891_v42, %v9888_v28  ;;  %v3638_v8 = vadd.f32 %v6765_v56, %v9818_v63  ;;  %v3557_v38 = vpop.f32.mrb[39].mxu1  ;;  %v9913_v20 = vadd.f32 %v3637_v14, %v11525_v9  ;;  %6813 = vmatpush3.bf16.msra.mxu0 %v7319_v10  ;;  %v11531_v56 = vld [vmem:[#allocation17_spill] sm:$0xff]  ;;  %v11535_v9 = vld [vmem:[#allocation22_spill] sm:$0xff] }
 0x54e   : > { %v9907_v23 = vadd.f32 %v3635_v40, %v11523_v57  ;;  %v3636_v11 = vadd.f32 %v9818_v63, %v3557_v38  ;;  %6814 = vmatprep.subr.bf16.mxu0 %v7320_v15  ;;  %v7322_v40 = vld [vmem:[%s10842_s1 + $0x1a0] sm:$0xff]   ;;  %v11533_v57 = vld [vmem:[#allocation23_spill] sm:$0xff] }
 0x54f   : > { %6794 = vmatprep.mubr.msk.bf16.mxu0 %vm11251_vm7, %v5804_v24  ;;  %11526 = vst [vmem:[#allocation44_spill] sm:$0xff] %v9913_v20  ;;  %v9916_v22 = vadd.f32 %v3638_v8, %v11527_v59  ;;  %v3694_v44 = vmul.f32 0.1, %v9913_v20  ;;  %vm3675_vm6 = vcmp.ge.f32.partialorder %v9913_v20, 0.0  ;;  %vm11574_vm7 = vnez %v11573_v36 }
 0x550   : > { %11524 = vst [vmem:[#allocation38_spill] sm:$0xff] %v9907_v23  ;;  %v3692_v32 = vmul.f32 0.1, %v9907_v23  ;;  %v9923_v25 = vadd.f32 %v3636_v11, %v11529_v13  ;;  %vm3673_vm2 = vcmp.ge.f32.partialorder %v9907_v23, 0.0  ;;  %6795 = vmatmul.mubr.msk.bf16.gmra.mrb[60].mxu0 %vm11420_vm11, %v5807_v62  ;;  %v11537_v13 = vld [vmem:[#allocation19_spill] sm:$0xff] }
 0x551   : > { %11528 = vst [vmem:[#allocation45_spill] sm:$0xff] %v9916_v22  ;;  %v3695_v53 = vmul.f32 0.1, %v9916_v22  ;;  %vm3676_vm8 = vcmp.ge.f32.partialorder %v9916_v22, 0.0  ;;  %6815 = vmatpush3.bf16.msra.mxu0 %v7320_v15 }
 0x552   : > { %11530 = vst [vmem:[#allocation7_spill] sm:$0xff] %v9923_v25  ;;  %v6768_v2 = vpop.f32.mrb[40].mxu1  ;;  %vm3674_vm4 = vcmp.ge.f32.partialorder %v9923_v25, 0.0  ;;  %v3693_v12 = vmul.f32 0.1, %v9923_v25  ;;  %v9945_v14 = vsel %vm3673_vm2, %v9907_v23, %v3692_v32  ;;  %6816 = vmatprep.subr.bf16.mxu0 %v7321_v61 }
 0x553   : > { %v3570_v35 = vpop.f32.mrb[41].mxu1  ;;  %v3641_v10 = vadd.f32 %v6768_v2, %v9818_v63  ;;  %v9962_v38 = vsel %vm3676_vm8, %v9916_v22, %v3695_v53  ;;  %v9979_v2 = vsel %vm3675_vm6, %v9913_v20, %v3694_v44 }
 0x554   : > { %v3639_v43 = vadd.f32 %v9818_v63, %v3570_v35  ;;  %v6769_v18 = vpop.f32.mrb[42].mxu1  ;;  %v9948_v17 = vsel %vm3674_vm4, %v9923_v25, %v3693_v12  ;;  %v5813_v53 = vpack.c.bf16 %v9962_v38, %v9979_v2  ;;  %v7323_v12 = vld [vmem:[%s10842_s1 + $0x1a8] sm:$0xff]  }
 0x555   : > { %v3642_v5 = vadd.f32 %v6769_v18, %v9818_v63  ;;  %v3573_v7 = vpop.f32.mrb[43].mxu1  ;;  %v5810_v8 = vpack.c.bf16 %v9948_v17, %v9945_v14  ;;  %v9968_v59 = vadd.f32 %v3641_v10, %v11535_v9  ;;  %6817 = vmatpush3.bf16.msra.mxu0 %v7321_v61 }
 0x556   : > { %v9954_v24 = vadd.f32 %v3639_v43, %v11531_v56  ;;  %v3640_v15 = vadd.f32 %v9818_v63, %v3573_v7  ;;  %6818 = vmatprep.subr.bf16.mxu0 %v7322_v40 }
 0x557   : > { %v9965_v11 = vadd.f32 %v3642_v5, %v11533_v57  ;;  %11536 = vst [vmem:[#allocation8_spill] sm:$0xff] %v9968_v59  ;;  %6798 = vmatprep.mubr.msk.bf16.mxu0 %vm11424_vm9, %v5810_v8  ;;  %v3698_v18 = vmul.f32 0.1, %v9968_v59  ;;  %vm3679_vm4 = vcmp.ge.f32.partialorder %v9968_v59, 0.0 }
 0x558   : > { %11532 = vst [vmem:[#allocation9_spill] sm:$0xff] %v9954_v24  ;;  %v3696_v32 = vmul.f32 0.1, %v9954_v24  ;;  %v9972_v62 = vadd.f32 %v3640_v15, %v11537_v13  ;;  %vm3677_vm12 = vcmp.ge.f32.partialorder %v9954_v24, 0.0  ;;  %6799 = vmatmul.mubr.msk.bf16.gmra.mrb[64].mxu0 %vm11426_vm5, %v5813_v53  ;;  %v11539_v13 = vld [vmem:[#allocation29_spill] sm:$0xff] }
 0x559   : > { %11534 = vst [vmem:[#allocation10_spill] sm:$0xff] %v9965_v11  ;;  %v3699_v35 = vmul.f32 0.1, %v9965_v11  ;;  %vm3680_vm8 = vcmp.ge.f32.partialorder %v9965_v11, 0.0  ;;  %6819 = vmatpush3.bf16.msra.mxu0 %v7322_v40 }
 0x55a   : > { %11538 = vst [vmem:[#allocation11_spill] sm:$0xff] %v9972_v62  ;;  %vm3678_vm2 = vcmp.ge.f32.partialorder %v9972_v62, 0.0  ;;  %v3697_v10 = vmul.f32 0.1, %v9972_v62  ;;  %v6772_v43 = vpop.f32.mrb[52].mxu1  ;;  %v9997_v56 = vsel %vm3677_vm12, %v9954_v24, %v3696_v32  ;;  %6820 = vmatprep.subr.bf16.mxu0 %v7323_v12  ;;  %vm11544_vm12 = vnez %v11284_v37  ;;  %v11563_v24 = vld [vmem:[#allocation21_spill] sm:$0xff] }
 0x55b   : > { %v3618_v61 = vadd.f32 %v6772_v43, %v9809_v39  ;;  %v3586_v44 = vpop.f32.mrb[53].mxu1  ;;  %v10014_v40 = vsel %vm3680_vm8, %v9965_v11, %v3699_v35  ;;  %v11540_v43 = vld [vmem:[#allocation25_spill] sm:$0xff]  ;;  %vm11564_vm9 = vnez %v11563_v24 }
 0x55c   : > { %v3616_v5 = vadd.f32 %v3586_v44, %v9811_v47  ;;  %v6773_v7 = vpop.f32.mrb[54].mxu1  ;;  %v10000_v15 = vsel %vm3678_vm2, %v9972_v62, %v3697_v10  ;;  %v7324_v47 = vld [vmem:[%s10842_s1 + $0x1b0] sm:$0xff]   ;;  %v10022_v10 = vsel %vm11372_vm10, %v9848_v6, 0.0  ;;  %v10029_v44 = vsel %vm3679_vm4, %v9968_v59, %v3698_v18  ;;  %v7325_v6 = vld [vmem:[%s10842_s1 + $0x1b8] sm:$0xff]  }
 0x55d   : > { %v3645_v8 = vadd.f32 %v9818_v63, %v3618_v61  ;;  %v3589_v57 = vpop.f32.mrb[55].mxu1  ;;  %v5816_v39 = vpack.c.bf16 %v10000_v15, %v9997_v56  ;;  %6821 = vmatpush3.bf16.msra.mxu0 %v7323_v12  ;;  %v10039_v7 = vsel %vm11375_vm13, %v9853_v16, 0.0  ;;  %v11542_v18 = vld [vmem:[#allocation30_spill] sm:$0xff]  ;;  %v10121_v59 = vsel %vm11564_vm9, %v9919_v27, 0.0 }
 0x55e   : > { %v3643_v9 = vadd.f32 %v9818_v63, %v3616_v5  ;;  %v3617_v32 = vadd.f32 %v3589_v57, %v9813_v41  ;;  %v5819_v5 = vpack.c.bf16 %v10014_v40, %v10029_v44  ;;  %6822 = vmatprep.subr.bf16.mxu0 %v7324_v47  ;;  %v3742_v57 = vrot.slane %v10022_v10, 3 }
 0x55f   : > { %v3664_v53 = vadd.f32 %v3645_v8, %v11539_v13  ;;  %6802 = vmatprep.mubr.msk.bf16.mxu0 %vm11443_vm3, %v5816_v39  ;;  %v7326_v13 = vld [vmem:[%s10842_s1 + $0x200] sm:$0xff]   ;;  %v11048_v20 = vrot.slane %v10039_v7, 5  ;;  %v10164_v51 = vsel %vm11574_vm7, %v10000_v15, 0.0 }
 0x560   : > { %v10025_v61 = vadd.f32 %v3643_v9, %v11540_v43  ;;  %v3644_v41 = vadd.f32 %v9818_v63, %v3617_v32  ;;  %6803 = vmatmul.mubr.msk.bf16.gmra.mrb[68].mxu0 %vm11544_vm12, %v5819_v5  ;;  %v3741_v9 = vrot.slane %v10039_v7, 3 }
 0x561   : > { %vm3683_vm6 = vcmp.ge.f32.partialorder %v3664_v53, 0.0  ;;  %v3702_v35 = vmul.f32 0.1, %v3664_v53  ;;  %6823 = vmatpush3.bf16.msra.mxu0 %v7324_v47  ;;  %v11545_v47 = vld [vmem:[#allocation14_spill] sm:$0xff] }
 0x562   : > { %11541 = vst [vmem:[#allocation15_spill] sm:$0xff] %v10025_v61  ;;  %v3700_v63 = vmul.f32 0.1, %v10025_v61  ;;  %v10043_v8 = vadd.f32 %v3644_v41, %v11542_v18  ;;  %vm3681_vm2 = vcmp.ge.f32.partialorder %v10025_v61, 0.0  ;;  %6824 = vmatprep.subr.bf16.mxu0 %v7325_v6  ;;  %vm11546_vm4 = vnez %v11545_v47  ;;  %v11549_v18 = vld [vmem:[#allocation20_spill] sm:$0xff] }
 0x563   : > { %v3721_v12 = vsel %vm3683_vm6, %v3664_v53, %v3702_v35  ;;  %v10069_v41 = vsel %vm11546_vm4, %v9843_v49, 0.0  ;;  %vm11547_vm6 = vcmp.lt.s32.totalorder %v7489_v21, 5  ;;  %v11551_v49 = vld [vmem:[#allocation13_spill] sm:$0xff] }
 0x564   : > { %11543 = vst [vmem:[#allocation16_spill] sm:$0xff] %v10043_v8  ;;  %v3701_v39 = vmul.f32 0.1, %v10043_v8  ;;  %vm3682_vm8 = vcmp.ge.f32.partialorder %v10043_v8, 0.0  ;;  %v10053_v16 = vsel %vm11451_vm15, %v3721_v12, 0.0  ;;  %v10061_v53 = vsel %vm3681_vm2, %v10025_v61, %v3700_v63  ;;  %vm11548_vm15 = vmmov %vm11547_vm6 }
 0x565   : > { %v11032_v32 = vrot.slane %v10053_v16, 3  ;;  %v3777_v5 = vsel %vm11547_vm6, %v3741_v9, %v3742_v57  ;;  %vm11550_vm2 = vnez %v11549_v18  ;;  %6825 = vmatpush3.bf16.msra.mxu0 %v7325_v6  ;;  %v5825_v62 = vpack.c.bf16 %v3721_v12, %v3721_v12 }
 0x566   : > { %v10064_v43 = vsel %vm3682_vm8, %v10043_v8, %v3701_v39  ;;  %v10082_v39 = vsel %vm11550_vm2, %v9891_v42, 0.0  ;;  %vm11552_vm8 = vnez %v11551_v49  ;;  %6846 = vmatprep.subr.bf16.mxu0 %v7326_v13  ;;  %v3744_v11 = vrot.slane %v10069_v41, 3 }
 0x567   : > { %v5822_v35 = vpack.c.bf16 %v10064_v43, %v10061_v53  ;;  %v3778_v63 = vsel %vm11548_vm15, %v11032_v32, %v3741_v9  ;;  %v10087_v61 = vsel %vm11552_vm8, %v9851_v45, 0.0  ;;  %v11553_v9 = vld [vmem:[#allocation18_spill] sm:$0xff]  ;;  %vm11555_vm6 = vnez %v11323_v50 }
 0x568   : > { %v3779_v8 = vpack.c.bf16 %v3777_v5, %v3778_v63  ;;  %vm11554_vm15 = vnez %v11553_v9  ;;  %v3746_v42 = vrot.slane %v10082_v39, 3  ;;  %v3743_v45 = vrot.slane %v10087_v61, 3  ;;  %v11558_v5 = vld [vmem:[#allocation24_spill] sm:$0xff] }
 0x569   : > { %6806 = vmatprep.mubr.msk.bf16.mxu0 %vm11457_vm14, %v5822_v35  ;;  %v10095_v32 = vsel %vm11554_vm15, %v9888_v28, 0.0  ;;  %vm11556_vm14 = vcmp.lt.s32.totalorder %v7489_v21, 5  ;;  %vm11559_vm3 = vnez %v11558_v5  ;;  %v11561_v63 = vld [vmem:[#allocation28_spill] sm:$0xff]  ;;  %v3800_v50 = vrot.slane %v10022_v10, 5 }
 0x56a   : > { %6807 = vmatmul.mubr.msk.bf16.gmra.mrb[72].mxu0 %vm11555_vm6, %v5825_v62  ;;  %v3745_v6 = vrot.slane %v10095_v32, 3  ;;  %v3775_v12 = vsel %vm11556_vm14, %v3743_v45, %v3744_v11  ;;  %vm11557_vm12 = vmmov %vm11556_vm14  ;;  %v10109_v28 = vsel %vm11559_vm3, %v9904_v31, 0.0  ;;  %vm11562_vm5 = vnez %v11561_v63  ;;  %v7327_v31 = vld [vmem:[%s10842_s1 + $0x208] sm:$0xff]  }
 0x56b   : > { %6826 = vmatprep.mubr.bf16.mxu0 %v3779_v8  ;;  %v3776_v35 = vsel %vm11557_vm12, %v3742_v57, %v3743_v45  ;;  %vm11560_vm6 = vmmov %vm11557_vm12  ;;  %v10116_v8 = vsel %vm11562_vm5, %v9948_v17, 0.0  ;;  %v11566_v45 = vld [vmem:[#allocation27_spill] sm:$0xff]  ;;  %v3748_v23 = vrot.slane %v10109_v28, 3 }
 0x56c   : > { %v3773_v62 = vsel %vm11560_vm6, %v3745_v6, %v3746_v42  ;;  %v3780_v25 = vpack.c.bf16 %v3775_v12, %v3776_v35  ;;  %vm11565_vm14 = vmmov %vm11560_vm6  ;;  %vm11567_vm12 = vnez %v11566_v45  ;;  %v3750_v27 = vrot.slane %v10116_v8, 3 }
 0x56d   : > { %v3774_v57 = vsel %vm11565_vm14, %v3744_v11, %v3745_v6  ;;  %v10131_v22 = vsel %vm11567_vm12, %v9945_v14, 0.0  ;;  %v11047_v12 = vrot.slane %v10053_v16, 5  ;;  %v3747_v11 = vrot.slane %v10121_v59, 3  ;;  %v7328_v14 = vld [vmem:[%s10842_s1 + $0x210] sm:$0xff]   ;;  %vm11569_vm5 = vmmov %vm11565_vm14 }
 0x56e   : > { %v3781_v17 = vpack.c.bf16 %v3773_v62, %v3774_v57  ;;  %v3749_v6 = vrot.slane %v10131_v22, 3  ;;  %vm11568_vm6 = vcmp.lt.s32.totalorder %v7489_v21, 3  ;;  %v11570_v62 = vld [vmem:[#allocation32_spill] sm:$0xff]  ;;  %vm11572_vm11 = vmmov %vm11569_vm5 }
 0x56f   : > { %v3772_v35 = vsel %vm11569_vm5, %v3746_v42, %v3747_v11  ;;  %vm11571_vm12 = vnez %v11570_v62 }
 0x570   : > { %v10157_v57 = vsel %vm11571_vm12, %v9962_v38, 0.0  ;;  %v7329_v38 = vld [vmem:[%s10842_s1 + $0x218] sm:$0xff]   ;;  %vm11583_vm12 = vnez %v11405_v58 }
 0x571   : > { %v3752_v54 = vrot.slane %v10157_v57, 3 }
 0x572   : > { %6827 = vmatmul.mubr.bf16.vlgmr.msra.gmra.mrb[56].mxu0 %v3780_v25  ;;  %v10148_v25 = vsel %vm11568_vm6, %v11047_v12, %v11048_v20  ;;  %v11575_v12 = vld [vmem:[#allocation31_spill] sm:$0xff] }
 0x573   : > { %6830 = vmatprep.mubr.bf16.mxu0 %v3781_v17  ;;  %6847 = vmatpush3.bf16.msra.mxu0 %v7326_v13  ;;  %v3771_v13 = vsel %vm11565_vm14, %v3747_v11, %v3748_v23  ;;  %v3769_v17 = vsel %vm11572_vm11, %v3749_v6, %v3750_v27  ;;  %vm11576_vm6 = vnez %v11575_v12  ;;  %v3770_v11 = vsel %vm11569_vm5, %v3748_v23, %v3749_v6  ;;  %vm11579_vm14 = vmmov %vm11569_vm5 }
 0x574   : > { %6848 = vmatprep.subr.bf16.mxu0 %v7327_v31  ;;  %v10169_v20 = vsel %vm11576_vm6, %v9979_v2, 0.0  ;;  %v3782_v42 = vpack.c.bf16 %v3771_v13, %v3772_v35  ;;  %vm11578_vm11 = vnez %v11577_v34  ;;  %v3754_v2 = vrot.slane %v10164_v51, 3  ;;  %v7330_v13 = vld [vmem:[%s10842_s1 + $0x220] sm:$0xff]  }
 0x575   : > { %v10179_v15 = vsel %vm11578_vm11, %v9997_v56, 0.0  ;;  %v3751_v23 = vrot.slane %v10169_v20, 3  ;;  %vm11582_vm11 = vmmov %vm11569_vm5 }
 0x576   : > { %v3753_v6 = vrot.slane %v10179_v15, 3 }
 0x577   : > { %6849 = vmatpush3.bf16.msra.mxu0 %v7327_v31  ;;  %v3783_v31 = vpack.c.bf16 %v3769_v17, %v3770_v11  ;;  %v3767_v56 = vsel %vm11579_vm14, %v3751_v23, %v3752_v54  ;;  %v3768_v35 = vsel %vm11569_vm5, %v3750_v27, %v3751_v23  ;;  %v11580_v17 = vld [vmem:[#allocation41_spill] sm:$0xff]  ;;  %v10202_v11 = vsel %vm11583_vm12, %v10064_v43, 0.0  ;;  %vm11588_vm12 = vmmov %vm11569_vm5 }
 0x578   : > { %6850 = vmatprep.subr.bf16.mxu0 %v7328_v14  ;;  %vm11581_vm7 = vnez %v11580_v17  ;;  %v3784_v27 = vpack.c.bf16 %v3767_v56, %v3768_v35  ;;  %v3766_v23 = vsel %vm11569_vm5, %v3752_v54, %v3753_v6  ;;  %v7332_v56 = vld [vmem:[%s10842_s1 + $0x230] sm:$0xff]  }
 0x57a   : > { %6831 = vmatmul.mubr.bf16.gmra.mrb[60].mxu0 %v3782_v42  ;;  %v10195_v42 = vsel %vm11581_vm7, %v10014_v40, 0.0  ;;  %v7331_v40 = vld [vmem:[%s10842_s1 + $0x228] sm:$0xff]   ;;  %vm11590_vm7 = vmmov %vm11569_vm5 }
 0x57b   : > { %6834 = vmatprep.mubr.bf16.mxu0 %v3783_v31  ;;  %6851 = vmatpush3.bf16.msra.mxu0 %v7328_v14  ;;  %v3765_v14 = vsel %vm11582_vm11, %v3753_v6, %v3754_v2  ;;  %v11584_v31 = vld [vmem:[#allocation40_spill] sm:$0xff]  ;;  %vm11587_vm11 = vnez %v11586_v0  ;;  %v3756_v4 = vrot.slane %v10195_v42, 3 }
 0x57c   : > { %6852 = vmatprep.subr.bf16.mxu0 %v7329_v38  ;;  %vm11585_vm14 = vnez %v11584_v31  ;;  %v10217_v43 = vsel %vm11587_vm11, %v10061_v53, 0.0  ;;  %vm11589_vm11 = vmmov %vm11569_vm5 }
 0x57d   : > { %v10207_v26 = vsel %vm11585_vm14, %v10029_v44, 0.0  ;;  %v3758_v44 = vrot.slane %v10202_v11, 3  ;;  %v3757_v6 = vrot.slane %v10217_v43, 3 }
 0x57e   : > { %v3755_v54 = vrot.slane %v10207_v26, 3 }
 0x57f   : > { %6853 = vmatpush3.bf16.msra.mxu0 %v7329_v38  ;;  %v3785_v38 = vpack.c.bf16 %v3765_v14, %v3766_v23  ;;  %v3761_v14 = vsel %vm11589_vm11, %v3757_v6, %v3758_v44  ;;  %v7333_v23 = vld [vmem:[%s10842_s1 + $0x238] sm:$0xff]  }
 0x580   : > { %6854 = vmatprep.subr.bf16.mxu0 %v7330_v13  ;;  %v3763_v53 = vsel %vm11569_vm5, %v3755_v54, %v3756_v4  ;;  %v3764_v35 = vsel %vm11588_vm12, %v3754_v2, %v3755_v54  ;;  %v3801_v2 = vrot.slane %v10087_v61, 5  ;;  %vm11592_vm12 = vmmov %vm11569_vm5  ;;  %v3804_v61 = vrot.slane %v10082_v39, 5 }
 0x581   : > { %v3807_v39 = vrot.slane %v10131_v22, 5 }
 0x582   : > { %6835 = vmatmul.mubr.bf16.gmra.mrb[64].mxu0 %v3784_v27  ;;  %v3762_v27 = vsel %vm11590_vm7, %v3756_v4, %v3757_v6  ;;  %vm11593_vm7 = vcmp.lt.s32.totalorder %v7489_v21, 3  ;;  %v11594_v6 = vrot.slane %v10039_v7, 5 }
 0x583   : > { %6838 = vmatprep.mubr.bf16.mxu0 %v3785_v38  ;;  %6855 = vmatpush3.bf16.msra.mxu0 %v7330_v13  ;;  %v3786_v13 = vpack.c.bf16 %v3763_v53, %v3764_v35  ;;  %v3787_v38 = vpack.c.bf16 %v3761_v14, %v3762_v27  ;;  %v3834_v4 = vsel %vm11593_vm7, %v3800_v50, %v3801_v2  ;;  %vm11595_vm11 = vmmov %vm11593_vm7  ;;  %v3802_v14 = vrot.slane %v10069_v41, 5 }
 0x584   : > { %6856 = vmatprep.subr.bf16.mxu0 %v7331_v40  ;;  %v3835_v53 = vsel %vm11595_vm11, %v11594_v6, %v3800_v50  ;;  %vm11596_vm5 = vmmov %vm11593_vm7  ;;  %v3808_v41 = vrot.slane %v10116_v8, 5  ;;  %v3811_v8 = vrot.slane %v10179_v15, 5 }
 0x585   : > { %v3837_v35 = vpack.c.bf16 %v3834_v4, %v3835_v53  ;;  %vm11598_vm7 = vmmov %vm11596_vm5  ;;  %v3813_v53 = vrot.slane %v10207_v26, 5  ;;  %v3814_v26 = vrot.slane %v10195_v42, 5  ;;  %v3846_v42 = vpack.c.bf16 %v10148_v25, %v10148_v25  ;;  %v7337_v25 = vld [vmem:[%s10844_s3 + $0x1d8] sm:$0xff]  }
 0x586   : > { %vm11599_vm11 = vmmov %vm11596_vm5 }
 0x587   : > { %6857 = vmatpush3.bf16.msra.mxu0 %v7331_v40  ;;  %v11591_v40 = vrot.slane %v10053_v16, 3 }
 0x588   : > { %6858 = vmatprep.subr.bf16.mxu0 %v7332_v56 }
 0x589   : > { %v3760_v54 = vsel %vm11592_vm12, %v3758_v44, %v11591_v40  ;;  %v3805_v44 = vrot.slane %v10121_v59, 5  ;;  %vm11597_vm12 = vmmov %vm11596_vm5  ;;  %v3806_v59 = vrot.slane %v10109_v28, 5  ;;  %v3812_v28 = vrot.slane %v10164_v51, 5 }
 0x58a   : > { %6839 = vmatmul.mubr.bf16.gmra.mrb[68].mxu0 %v3786_v13  ;;  %v3788_v10 = vpack.c.bf16 %v3760_v54, %v3760_v54  ;;  %v3815_v51 = vrot.slane %v10217_v43, 5 }
 0x58b   : > { %6842 = vmatprep.mubr.bf16.mxu0 %v3787_v38  ;;  %6859 = vmatpush3.bf16.msra.mxu0 %v7332_v56  ;;  %v3803_v56 = vrot.slane %v10095_v32, 5  ;;  %v3830_v7 = vsel %vm11597_vm12, %v3804_v61, %v3805_v44  ;;  %v3833_v32 = vsel %vm11599_vm11, %v3801_v2, %v3802_v14  ;;  %v3809_v38 = vrot.slane %v10169_v20, 5  ;;  %vm11600_vm12 = vmmov %vm11596_vm5 }
 0x58c   : > { %6860 = vmatprep.subr.bf16.mxu0 %v7333_v23  ;;  %v3828_v40 = vsel %vm11596_vm5, %v3806_v59, %v3807_v39  ;;  %vm11602_vm11 = vmmov %vm11596_vm5  ;;  %v3810_v20 = vrot.slane %v10157_v57, 5  ;;  %v3816_v57 = vrot.slane %v10202_v11, 5  ;;  %v7335_v11 = vld [vmem:[%s10844_s3 + $0x1c8] sm:$0xff]  }
 0x58d   : > { %v3832_v13 = vsel %vm11596_vm5, %v3802_v14, %v3803_v56  ;;  %v3831_v50 = vsel %vm11598_vm7, %v3803_v56, %v3804_v61  ;;  %v3826_v54 = vsel %vm11600_vm12, %v3808_v41, %v3809_v38  ;;  %vm11601_vm7 = vmmov %vm11596_vm5  ;;  %v3829_v22 = vsel %vm11602_vm11, %v3805_v44, %v3806_v59  ;;  %v7340_v59 = vld [vmem:[%s10844_s3 + $0x1f0] sm:$0xff]  }
 0x58e   : > { %v3838_v27 = vpack.c.bf16 %v3832_v13, %v3833_v32  ;;  %v3827_v2 = vsel %vm11601_vm7, %v3807_v39, %v3808_v41  ;;  %v3840_v4 = vpack.c.bf16 %v3828_v40, %v3829_v22  ;;  %vm11603_vm12 = vmmov %vm11596_vm5  ;;  %v3820_v44 = vsel %vm11596_vm5, %v3814_v26, %v3815_v51  ;;  %v7338_v39 = vld [vmem:[%s10844_s3 + $0x1e0] sm:$0xff]   ;;  %v7339_v41 = vld [vmem:[%s10844_s3 + $0x1e8] sm:$0xff]  }
 0x58f   : > { %6861 = vmatpush3.bf16.msra.mxu0 %v7333_v23  ;;  %v3839_v23 = vpack.c.bf16 %v3830_v7, %v3831_v50  ;;  %v3841_v6 = vpack.c.bf16 %v3826_v54, %v3827_v2  ;;  %v3822_v56 = vsel %vm11603_vm12, %v3812_v28, %v3813_v53  ;;  %vm11604_vm7 = vmmov %vm11596_vm5  ;;  %v11606_v13 = vrot.slane %v10053_v16, 5  ;;  %v7334_v16 = vld [vmem:[%s10844_s3 + $0x1c0] sm:$0xff]  }
 0x590   : > { %vm11605_vm11 = vmmov %vm11596_vm5  ;;  %6882 = vmatprep.subr.bf16.mxu1 %v7334_v16  ;;  %v10327_v40 = vld [vmem:[%s10844_s3 + $0x180] sm:$0xff]  }
 0x591   : > { %v3825_v15 = vsel %vm11605_vm11, %v3809_v38, %v3810_v20  ;;  %vm11607_vm12 = vmmov %vm11596_vm5  ;;  %6883 = vmatpush3.bf16.msra.mxu1 %v7334_v16  ;;  %v7341_v38 = vld [vmem:[%s10844_s3 + $0x1f8] sm:$0xff]  }
 0x592   : > { %6843 = vmatmul.mubr.bf16.gmra.mrb[76].mxu0 %v3788_v10  ;;  %v3824_v10 = vsel %vm11596_vm5, %v3810_v20, %v3811_v8  ;;  %v3818_v7 = vsel %vm11607_vm12, %v3816_v57, %v11606_v13  ;;  %vm11609_vm11 = vmmov %vm11596_vm5  ;;  %6884 = vmatprep.subr.bf16.mxu1 %v7335_v11 }
 0x593   : > { %6862 = vmatprep.mubr.bf16.mxu0 %v3837_v35  ;;  %v3823_v35 = vsel %vm11604_vm7, %v3811_v8, %v3812_v28  ;;  %v3842_v61 = vpack.c.bf16 %v3824_v10, %v3825_v15  ;;  %vm11608_vm7 = vmmov %vm11596_vm5  ;;  %v3821_v43 = vsel %vm11609_vm11, %v3813_v53, %v3814_v26 }
 0x594   : > { %v3843_v14 = vpack.c.bf16 %v3822_v56, %v3823_v35  ;;  %v3819_v50 = vsel %vm11608_vm7, %v3815_v51, %v3816_v57  ;;  %v3844_v32 = vpack.c.bf16 %v3820_v44, %v3821_v43  ;;  %v10339_v35 = vld [vmem:[%s10843_s2 + $0x2] ss:$0 sm:$0xff] }
 0x595   : > { %6885 = vmatpush3.bf16.msra.mxu1 %v7335_v11 }
 0x59a   : > { %6863 = vmatmul.mubr.bf16.vlgmr.msra.gmra.mrb[56].mxu0 %v3838_v27  ;;  %v3845_v27 = vpack.c.bf16 %v3818_v7, %v3819_v50 }
 0x59b   : > { %6866 = vmatprep.mubr.bf16.mxu0 %v3839_v23  ;;  %v7336_v23 = vld [vmem:[%s10844_s3 + $0x1d0] sm:$0xff]  }
 0x59c   : > { %6886 = vmatprep.subr.bf16.mxu1 %v7336_v23 }
 0x59d   : > { %6887 = vmatpush3.bf16.msra.mxu1 %v7336_v23 }
 0x59e   : > { %6888 = vmatprep.subr.bf16.mxu1 %v7337_v25 }
 0x5a1   : > { %6889 = vmatpush3.bf16.msra.mxu1 %v7337_v25 }
 0x5a2   : > { %6867 = vmatmul.mubr.bf16.gmra.mrb[60].mxu0 %v3840_v4  ;;  %6890 = vmatprep.subr.bf16.mxu1 %v7338_v39 }
 0x5a3   : > { %6870 = vmatprep.mubr.bf16.mxu0 %v3841_v6 }
 0x5a5   : > { %6891 = vmatpush3.bf16.msra.mxu1 %v7338_v39 }
 0x5a6   : > { %6892 = vmatprep.subr.bf16.mxu1 %v7339_v41 }
 0x5a9   : > { %6893 = vmatpush3.bf16.msra.mxu1 %v7339_v41 }
 0x5aa   : > { %6871 = vmatmul.mubr.bf16.gmra.mrb[64].mxu0 %v3842_v61  ;;  %6894 = vmatprep.subr.bf16.mxu1 %v7340_v59 }
 0x5ab   : > { %6874 = vmatprep.mubr.bf16.mxu0 %v3843_v14 }
 0x5ad   : > { %6895 = vmatpush3.bf16.msra.mxu1 %v7340_v59 }
 0x5ae   : > { %6896 = vmatprep.subr.bf16.mxu1 %v7341_v38 }
 0x5b1   : > { %6897 = vmatpush3.bf16.msra.mxu1 %v7341_v38 }
 0x5b2   : > { %6875 = vmatmul.mubr.bf16.gmra.mrb[68].mxu0 %v3844_v32  ;;  %6918 = vmatprep.subr.bf16.mxu1 %v10327_v40 }
 0x5b3   : > { %6878 = vmatprep.mubr.bf16.mxu0 %v3845_v27 }
 0x5ba   : > { %6879 = vmatmul.mubr.bf16.gmra.mrb[80].mxu0 %v3846_v42 }
 0x63d   : > { %v6808_v54 = vpop.f32.mrb[72].mxu0 }
 0x63e   : > { %v4027_v2 = vpop.f32.mrb[73].mxu0 }
 0x63f   : > { %v6809_v22 = vpop.f32.mrb[74].mxu0 }
 0x640   : > { %v4030_v4 = vpop.f32.mrb[75].mxu0 }
 0x665   : > { %v6844_v6 = vpop.f32.mrb[76].mxu0 }
 0x666   : > { %v10330_v8 = vadd.f32 %v6844_v6, %v6808_v54  ;;  %v4187_v28 = vpop.f32.mrb[77].mxu0 }
 0x667   : > { %v10332_v20 = vadd.f32 %v4187_v28, %v4027_v2  ;;  %v6845_v53 = vpop.f32.mrb[78].mxu0 }
 0x668   : > { %v4190_v10 = vpop.f32.mrb[79].mxu0 }
 0x669   : > { %v10334_v56 = vadd.f32 %v4190_v10, %v4030_v4 }
 0x66d   : > { %v6864_v15 = vpop.f32.mrb[56].mxu0 }
 0x66e   : > { %v4407_v61 = vadd.f32 %v6864_v15, %v10339_v35  ;;  %v4300_v14 = vpop.f32.mrb[57].mxu0 }
 0x66f   : > { %v4405_v51 = vadd.f32 %v10339_v35, %v4300_v14  ;;  %v6865_v57 = vpop.f32.mrb[58].mxu0 }
 0x670   : > { %vm4426_vm5 = vcmp.ge.f32.partialorder %v4407_v61, 0.0  ;;  %v4445_v26 = vmul.f32 0.1, %v4407_v61  ;;  %v4408_v44 = vadd.f32 %v6865_v57, %v10339_v35  ;;  %v4303_v13 = vpop.f32.mrb[59].mxu0 }
 0x671   : > { %vm4424_vm12 = vcmp.ge.f32.partialorder %v4405_v51, 0.0  ;;  %v4443_v7 = vmul.f32 0.1, %v4405_v51  ;;  %v4406_v50 = vadd.f32 %v10339_v35, %v4303_v13 }
 0x672   : > { %v4464_v43 = vsel %vm4426_vm5, %v4407_v61, %v4445_v26  ;;  %vm4427_vm7 = vcmp.ge.f32.partialorder %v4408_v44, 0.0  ;;  %v4446_v32 = vmul.f32 0.1, %v4408_v44 }
 0x673   : > { %v4483_v27 = vsel %vm11552_vm8, %v4464_v43, 0.0  ;;  %v4462_v42 = vsel %vm4424_vm12, %v4405_v51, %v4443_v7  ;;  %vm4425_vm11 = vcmp.ge.f32.partialorder %v4406_v50, 0.0  ;;  %v4444_v16 = vmul.f32 0.1, %v4406_v50  ;;  %v7343_v51 = vld [vmem:[%s10844_s3 + $0x188] sm:$0xff]  }
 0x674   : > { %v10349_v11 = vsel %vm11375_vm13, %v4462_v42, 0.0  ;;  %v4465_v23 = vsel %vm4427_vm7, %v4408_v44, %v4446_v32  ;;  %v4502_v25 = vrot.slane %v4483_v27, 7  ;;  %v4560_v39 = vrot.slane %v4483_v27, 1 }
 0x675   : > { %v10353_v41 = vsel %vm11546_vm4, %v4465_v23, 0.0  ;;  %v5905_v59 = vpack.c.bf16 %v4465_v23, %v4464_v43  ;;  %v6868_v38 = vpop.f32.mrb[60].mxu0  ;;  %v4463_v2 = vsel %vm4425_vm11, %v4406_v50, %v4444_v16  ;;  %v4500_v46 = vrot.slane %v10349_v11, 7 }
 0x676   : > { %v4503_v54 = vrot.slane %v10353_v41, 7  ;;  %v4561_v49 = vrot.slane %v10353_v41, 1  ;;  %v4411_v22 = vadd.f32 %v6868_v38, %v10339_v35  ;;  %v4316_v4 = vpop.f32.mrb[61].mxu0  ;;  %v10361_v6 = vsel %vm11372_vm10, %v4463_v2, 0.0 }
 0x677   : > { %v5902_v28 = vpack.c.bf16 %v4463_v2, %v4462_v42  ;;  %v4409_v47 = vadd.f32 %v10339_v35, %v4316_v4  ;;  %v6869_v53 = vpop.f32.mrb[62].mxu0  ;;  %vm11610_vm13 = vcmp.lt.s32.totalorder %v7489_v21, 1  ;;  %vm11611_vm4 = vcmp.lt.s32.totalorder %v7489_v21, 7 }
 0x678   : > { %v10368_v10 = vsel %vm11610_vm13, %v4502_v25, %v4503_v54  ;;  %v10372_v15 = vsel %vm11611_vm4, %v4560_v39, %v4561_v49  ;;  %v4501_v61 = vrot.slane %v10361_v6, 7  ;;  %v4559_v48 = vrot.slane %v10361_v6, 1  ;;  %v4319_v14 = vpop.f32.mrb[63].mxu0  ;;  %vm11612_vm5 = vmmov %vm11610_vm13 }
 0x679   : > { %vm4430_vm10 = vcmp.ge.f32.partialorder %v4411_v22, 0.0  ;;  %v4449_v57 = vmul.f32 0.1, %v4411_v22  ;;  %vm4428_vm8 = vcmp.ge.f32.partialorder %v4409_v47, 0.0  ;;  %v4447_v26 = vmul.f32 0.1, %v4409_v47  ;;  %6898 = vmatprep.mubr.msk.bf16.mxu1 %vm11248_vm0, %v5902_v28  ;;  %vm11613_vm12 = vmmov %vm11612_vm5 }
 0x67a   : > { %v10383_v44 = vsel %vm11612_vm5, %v4501_v61, %v4502_v25  ;;  %v4412_v13 = vadd.f32 %v6869_v53, %v10339_v35  ;;  %v4410_v7 = vadd.f32 %v10339_v35, %v4319_v14  ;;  %6899 = vmatmul.mubr.msk.bf16.vlgmr.msra.gmra.mrb[56].mxu1 %vm11353_vm1, %v5905_v59  ;;  %v10393_v50 = vsel %vm11613_vm12, %v4500_v46, %v4501_v61  ;;  %vm11614_vm0 = vmmov %vm11611_vm4 }
 0x67b   : > { %v4468_v43 = vsel %vm4430_vm10, %v4411_v22, %v4449_v57  ;;  %v4466_v60 = vsel %vm4428_vm8, %v4409_v47, %v4447_v26  ;;  %6919 = vmatpush3.bf16.msra.mxu1 %v10327_v40  ;;  %v10402_v27 = vsel %vm11614_vm0, %v4559_v48, %v4560_v39  ;;  %v7344_v40 = vld [vmem:[%s10844_s3 + $0x190] sm:$0xff]   ;;  %v4558_v16 = vrot.slane %v10349_v11, 1  ;;  %vm11615_vm7 = vmmov %vm11614_vm0  ;;  %v7354_v11 = vld [vmem:[%s10844_s3 + $0x220] sm:$0xff]  }
 0x67c   : > { %v10406_v19 = vsel %vm11554_vm15, %v4466_v60, 0.0  ;;  %vm4431_vm1 = vcmp.ge.f32.partialorder %v4412_v13, 0.0  ;;  %v4450_v42 = vmul.f32 0.1, %v4412_v13  ;;  %6920 = vmatprep.subr.bf16.mxu1 %v7343_v51  ;;  %v10414_v23 = vsel %vm11564_vm9, %v4468_v43, 0.0 }
 0x67d   : > { %v4504_v25 = vrot.slane %v10406_v19, 7  ;;  %v11055_v39 = vrot.slane %v10406_v19, 1  ;;  %v6872_v9 = vpop.f32.mrb[64].mxu0  ;;  %vm4429_vm15 = vcmp.ge.f32.partialorder %v4410_v7, 0.0  ;;  %v4448_v38 = vmul.f32 0.1, %v4410_v7 }
 0x67e   : > { %v4469_v59 = vsel %vm4431_vm1, %v4412_v13, %v4450_v42  ;;  %v4415_v2 = vadd.f32 %v6872_v9, %v10339_v35  ;;  %v4332_v22 = vpop.f32.mrb[65].mxu0  ;;  %v4506_v61 = vrot.slane %v10414_v23, 7  ;;  %v4564_v14 = vrot.slane %v10414_v23, 1 }
 0x67f   : > { %v10423_v4 = vsel %vm11615_vm7, %v4561_v49, %v11055_v39  ;;  %v10427_v24 = vsel %vm11559_vm3, %v4469_v59, 0.0  ;;  %v5911_v28 = vpack.c.bf16 %v4469_v59, %v4468_v43  ;;  %v4413_v47 = vadd.f32 %v10339_v35, %v4332_v22  ;;  %v6873_v53 = vpop.f32.mrb[66].mxu0  ;;  %6921 = vmatpush3.bf16.msra.mxu1 %v7343_v51  ;;  %v7345_v49 = vld [vmem:[%s10844_s3 + $0x198] sm:$0xff]  }
 0x680   : > { %v4467_v57 = vsel %vm4429_vm15, %v4410_v7, %v4448_v38  ;;  %vm4434_vm9 = vcmp.ge.f32.partialorder %v4415_v2, 0.0  ;;  %v4335_v26 = vpop.f32.mrb[67].mxu0  ;;  %6922 = vmatprep.subr.bf16.mxu1 %v7344_v40  ;;  %v4453_v43 = vmul.f32 0.1, %v4415_v2  ;;  %v4507_v51 = vrot.slane %v10427_v24, 7 }
 0x681   : > { %v10437_v5 = vsel %vm11550_vm2, %v4467_v57, 0.0  ;;  %v5908_v13 = vpack.c.bf16 %v4467_v57, %v4466_v60  ;;  %vm4432_vm3 = vcmp.ge.f32.partialorder %v4413_v47, 0.0  ;;  %v4451_v9 = vmul.f32 0.1, %v4413_v47  ;;  %vm11617_vm2 = vmmov %vm11612_vm5 }
 0x682   : > { %v4416_v7 = vadd.f32 %v6873_v53, %v10339_v35  ;;  %v4505_v59 = vrot.slane %v10437_v5, 7  ;;  %v4472_v38 = vsel %vm4434_vm9, %v4415_v2, %v4453_v43  ;;  %v4414_v22 = vadd.f32 %v10339_v35, %v4335_v26  ;;  %vm11624_vm9 = vmmov %vm11617_vm2 }
 0x683   : > { %vm11616_vm11 = vnez %v11095_v33  ;;  %6923 = vmatpush3.bf16.msra.mxu1 %v7344_v40  ;;  %v10452_v18 = vsel %vm11617_vm2, %v4503_v54, %v4504_v25  ;;  %v10456_v60 = vsel %vm11576_vm6, %v4472_v38, 0.0  ;;  %v4470_v53 = vsel %vm4432_vm3, %v4413_v47, %v4451_v9  ;;  %v7346_v33 = vld [vmem:[%s10844_s3 + $0x1a0] sm:$0xff]  }
 0x684   : > { %6902 = vmatprep.mubr.msk.bf16.mxu1 %vm11616_vm11, %v5908_v13  ;;  %vm4435_vm13 = vcmp.ge.f32.partialorder %v4416_v7, 0.0  ;;  %v4454_v2 = vmul.f32 0.1, %v4416_v7  ;;  %vm11618_vm4 = vnez %v11110_v29  ;;  %6924 = vmatprep.subr.bf16.mxu1 %v7345_v49  ;;  %v4510_v54 = vrot.slane %v10456_v60, 7 }
 0x685   : > { %6903 = vmatmul.mubr.msk.bf16.gmra.mrb[60].mxu1 %vm11618_vm4, %v5911_v28  ;;  %vm11619_vm10 = vnez %v11566_v45  ;;  %vm4433_vm6 = vcmp.ge.f32.partialorder %v4414_v22, 0.0  ;;  %v6876_v40 = vpop.f32.mrb[68].mxu0  ;;  %v4452_v57 = vmul.f32 0.1, %v4414_v22  ;;  %vm11620_vm8 = vnez %v11570_v62  ;;  %v7347_v62 = vld [vmem:[%s10844_s3 + $0x1a8] sm:$0xff]   ;;  %vm11629_vm4 = vmmov %vm11624_vm9 }
 0x686   : > { %v10467_v12 = vsel %vm11619_vm10, %v4470_v53, 0.0  ;;  %v4473_v28 = vsel %vm4435_vm13, %v4416_v7, %v4454_v2  ;;  %v4348_v26 = vpop.f32.mrb[69].mxu0  ;;  %v4419_v9 = vadd.f32 %v6876_v40, %v10339_v35  ;;  %vm11621_vm5 = vnez %v11561_v63  ;;  %vm11628_vm13 = vmmov %vm11624_vm9 }
 0x687   : > { %v4508_v29 = vrot.slane %v10467_v12, 7  ;;  %v10473_v13 = vsel %vm11620_vm8, %v4473_v28, 0.0  ;;  %v5917_v43 = vpack.c.bf16 %v4473_v28, %v4472_v38  ;;  %v4417_v45 = vadd.f32 %v10339_v35, %v4348_v26  ;;  %v6877_v32 = vpop.f32.mrb[70].mxu0  ;;  %6925 = vmatpush3.bf16.msra.mxu1 %v7345_v49 }
 0x688   : > { %v4511_v47 = vrot.slane %v10473_v13, 7  ;;  %v4471_v39 = vsel %vm4433_vm6, %v4414_v22, %v4452_v57  ;;  %v4420_v7 = vadd.f32 %v6877_v32, %v10339_v35  ;;  %v4351_v2 = vpop.f32.mrb[71].mxu0  ;;  %6926 = vmatprep.subr.bf16.mxu1 %v7346_v33  ;;  %vm4438_vm12 = vcmp.ge.f32.partialorder %v4419_v9, 0.0  ;;  %vm11631_vm6 = vmmov %vm11629_vm4 }
 0x689   : > { %v10485_v38 = vsel %vm11621_vm5, %v4471_v39, 0.0  ;;  %v5914_v40 = vpack.c.bf16 %v4471_v39, %v4470_v53  ;;  %v4457_v49 = vmul.f32 0.1, %v4419_v9  ;;  %vm4436_vm0 = vcmp.ge.f32.partialorder %v4417_v45, 0.0  ;;  %v7348_v53 = vld [vmem:[%s10844_s3 + $0x1b0] sm:$0xff]  }
 0x68a   : > { %v4509_v26 = vrot.slane %v10485_v38, 7  ;;  %v4455_v22 = vmul.f32 0.1, %v4417_v45  ;;  %vm4439_vm1 = vcmp.ge.f32.partialorder %v4420_v7, 0.0  ;;  %v4458_v57 = vmul.f32 0.1, %v4420_v7 }
 0x68b   : > { %v4476_v32 = vsel %vm4438_vm12, %v4419_v9, %v4457_v49  ;;  %v4418_v42 = vadd.f32 %v10339_v35, %v4351_v2  ;;  %vm11622_vm15 = vnez %v11114_v30  ;;  %6927 = vmatpush3.bf16.msra.mxu1 %v7346_v33  ;;  %vm11623_vm7 = vnez %v11263_v55 }
 0x68c   : > { %6906 = vmatprep.mubr.msk.bf16.mxu1 %vm11622_vm15, %v5914_v40  ;;  %v10494_v63 = vsel %vm11585_vm14, %v4476_v32, 0.0  ;;  %v4474_v39 = vsel %vm4436_vm0, %v4417_v45, %v4455_v22  ;;  %6928 = vmatprep.subr.bf16.mxu1 %v7347_v62  ;;  %v10507_v30 = vsel %vm11624_vm9, %v4504_v25, %v4505_v59  ;;  %vm11625_vm14 = vmmov %vm11617_vm2  ;;  %vm11626_vm3 = vnez %v11577_v34 }
 0x68d   : > { %6907 = vmatmul.mubr.msk.bf16.gmra.mrb[64].mxu1 %vm11623_vm7, %v5917_v43  ;;  %v10515_v55 = vsel %vm11625_vm14, %v4506_v61, %v4507_v51  ;;  %v4514_v33 = vrot.slane %v10494_v63, 7  ;;  %v10521_v43 = vsel %vm11626_vm3, %v4474_v39, 0.0  ;;  %v4477_v9 = vsel %vm4439_vm1, %v4420_v7, %v4458_v57  ;;  %v6880_v45 = vpop.f32.mrb[80].mxu0  ;;  %vm11634_vm15 = vmmov %vm11629_vm4 }
 0x68e   : > { %v4512_v2 = vrot.slane %v10521_v43, 7  ;;  %vm11627_vm11 = vnez %v11580_v17  ;;  %v5923_v49 = vpack.c.bf16 %v4477_v9, %v4476_v32  ;;  %v4364_v22 = vpop.f32.mrb[81].mxu0  ;;  %v4570_v28 = vrot.slane %v10521_v43, 1  ;;  %v7349_v17 = vld [vmem:[%s10844_s3 + $0x1b8] sm:$0xff]   ;;  %vm11635_vm7 = vmmov %vm11629_vm4 }
 0x68f   : > { %v10527_v40 = vsel %vm11627_vm11, %v4477_v9, 0.0  ;;  %vm4437_vm2 = vcmp.ge.f32.partialorder %v4418_v42, 0.0  ;;  %v4456_v34 = vmul.f32 0.1, %v4418_v42  ;;  %v6881_v41 = vpop.f32.mrb[82].mxu0  ;;  %6929 = vmatpush3.bf16.msra.mxu1 %v7347_v62  ;;  %v4396_v7 = vadd.f32 %v6880_v45, %v10330_v8  ;;  %vm11636_vm9 = vmmov %vm11629_vm4 }
 0x690   : > { %v4515_v31 = vrot.slane %v10527_v40, 7  ;;  %v4394_v57 = vadd.f32 %v4364_v22, %v10332_v20  ;;  %v4367_v25 = vpop.f32.mrb[83].mxu0  ;;  %6930 = vmatprep.subr.bf16.mxu1 %v7348_v53  ;;  %v4540_v32 = vpack.c.bf16 %v10507_v30, %v10452_v18  ;;  %v10544_v41 = vsel %vm11628_vm13, %v4505_v59, %v4506_v61 }
 0x691   : > { %v4475_v8 = vsel %vm4437_vm2, %v4418_v42, %v4456_v34  ;;  %v4395_v20 = vadd.f32 %v4367_v25, %v10334_v56  ;;  %v4541_v62 = vpack.c.bf16 %v10515_v55, %v10544_v41  ;;  %v10555_v9 = vsel %vm11629_vm4, %v4508_v29, %v4509_v26  ;;  %v10569_v34 = vld [vmem:[%s10844_s3 + $0x200] sm:$0xff]   ;;  %vm11640_vm2 = vmmov %vm11629_vm4 }
 0x692   : > { %vm11630_vm10 = vnez %v11573_v36  ;;  %v5920_v61 = vpack.c.bf16 %v4475_v8, %v4474_v39  ;;  %v4423_v42 = vadd.f32 %v10339_v35, %v4396_v7  ;;  %v4421_v56 = vadd.f32 %v10339_v35, %v4394_v57  ;;  %vm11641_vm13 = vmmov %vm11640_vm2 }
 0x693   : > { %v10559_v45 = vsel %vm11630_vm10, %v4475_v8, 0.0  ;;  %v4573_v59 = vrot.slane %v10527_v40, 1  ;;  %v4422_v22 = vadd.f32 %v10339_v35, %v4395_v20  ;;  %6931 = vmatpush3.bf16.msra.mxu1 %v7348_v53  ;;  %v10577_v36 = vsel %vm11631_vm6, %v4507_v51, %v4508_v29  ;;  %vm11643_vm10 = vmmov %vm11640_vm2 }
 0x694   : > { %v4513_v25 = vrot.slane %v10559_v45, 7  ;;  %vm4442_vm8 = vcmp.ge.f32.partialorder %v4423_v42, 0.0  ;;  %v4461_v39 = vmul.f32 0.1, %v4423_v42  ;;  %vm4440_vm5 = vcmp.ge.f32.partialorder %v4421_v56, 0.0  ;;  %6932 = vmatprep.subr.bf16.mxu1 %v7349_v17  ;;  %vm11644_vm6 = vmmov %vm11640_vm2 }
 0x695   : > { %v4459_v7 = vmul.f32 0.1, %v4421_v56  ;;  %vm11632_vm12 = vnez %v11268_v3  ;;  %vm4441_vm0 = vcmp.ge.f32.partialorder %v4422_v22, 0.0  ;;  %v4460_v35 = vmul.f32 0.1, %v4422_v22 }
 0x696   : > { %6910 = vmatprep.mubr.msk.bf16.mxu1 %vm11632_vm12, %v5920_v61  ;;  %vm11633_vm1 = vnez %v11284_v37  ;;  %v4542_v53 = vpack.c.bf16 %v10555_v9, %v10577_v36  ;;  %v10591_v51 = vsel %vm11634_vm15, %v4510_v54, %v4511_v47  ;;  %v4480_v29 = vsel %vm4442_vm8, %v4423_v42, %v4461_v39  ;;  %vm11645_vm8 = vmmov %vm11640_vm2 }
 0x697   : > { %6911 = vmatmul.mubr.msk.bf16.gmra.mrb[68].mxu1 %vm11633_vm1, %v5923_v49  ;;  %v4478_v3 = vsel %vm4440_vm5, %v4421_v56, %v4459_v7  ;;  %v10599_v37 = vsel %vm11635_vm7, %v4509_v26, %v4510_v54  ;;  %v10603_v49 = vsel %vm11636_vm9, %v4512_v2, %v4513_v25  ;;  %v4571_v57 = vrot.slane %v10559_v45, 1  ;;  %vm11646_vm5 = vmmov %vm11640_vm2 }
 0x698   : > { %vm11637_vm14 = vnez %v11378_v1  ;;  %vm11638_vm3 = vnez %v11586_v0  ;;  %v4479_v61 = vsel %vm4441_vm0, %v4422_v22, %v4460_v35  ;;  %6933 = vmatpush3.bf16.msra.mxu1 %v7349_v17  ;;  %v5929_v7 = vpack.c.bf16 %v4480_v29, %v4480_v29  ;;  %vm11647_vm12 = vmmov %vm11640_vm2 }
 0x699   : > { %v4499_v8 = vsel %vm11637_vm14, %v4480_v29, 0.0  ;;  %v4497_v20 = vsel %vm11638_vm3, %v4478_v3, 0.0  ;;  %6954 = vmatprep.subr.bf16.mxu1 %v10569_v34  ;;  %vm11639_vm11 = vnez %v11405_v58  ;;  %v5926_v26 = vpack.c.bf16 %v4479_v61, %v4478_v3 }
 0x69a   : > { %v4518_v42 = vrot.slane %v4499_v8, 7  ;;  %v4576_v56 = vrot.slane %v4499_v8, 1  ;;  %v4516_v39 = vrot.slane %v4497_v20, 7  ;;  %v4498_v54 = vsel %vm11639_vm11, %v4479_v61, 0.0 }
 0x69b   : > { %v4543_v45 = vpack.c.bf16 %v10591_v51, %v10599_v37  ;;  %v4525_v1 = vsel %vm11640_vm2, %v4511_v47, %v4512_v2  ;;  %v4574_v0 = vrot.slane %v4497_v20, 1  ;;  %v4517_v17 = vrot.slane %v4498_v54, 7 }
 0x69c   : > { %v4537_v22 = vsel %vm11641_vm13, %v4518_v42, %v4500_v46  ;;  %v4544_v35 = vpack.c.bf16 %v10603_v49, %v4525_v1  ;;  %vm11642_vm4 = vnez %v11296_v52  ;;  %v4522_v47 = vsel %vm11643_vm10, %v4514_v33, %v4515_v31 }
 0x69d   : > { %6914 = vmatprep.mubr.msk.bf16.mxu1 %vm11642_vm4, %v5926_v26  ;;  %v4538_v58 = vpack.c.bf16 %v10393_v50, %v4537_v22  ;;  %v4523_v2 = vsel %vm11644_vm6, %v4513_v25, %v4514_v33  ;;  %v4521_v52 = vsel %vm11645_vm8, %v4515_v31, %v4516_v39  ;;  %v4520_v50 = vsel %vm11646_vm5, %v4516_v39, %v4517_v17  ;;  %v11649_v25 = vld [vmem:[#allocation47_spill] sm:$0xff] }
 0x69e   : > { %v4545_v46 = vpack.c.bf16 %v4522_v47, %v4523_v2  ;;  %v4519_v51 = vsel %vm11647_vm12, %v4517_v17, %v4518_v42  ;;  %vm11648_vm0 = vcmp.lt.s32.totalorder %v7489_v21, 7  ;;  %v4575_v33 = vrot.slane %v4498_v54, 1  ;;  %v7353_v21 = vld [vmem:[%s10844_s3 + $0x218] sm:$0xff]  }
 0x69f   : > { %v4594_v29 = vsel %vm11648_vm0, %v4558_v16, %v4559_v48  ;;  %vm11650_vm1 = vnez %v11649_v25  ;;  %v4546_v3 = vpack.c.bf16 %v4520_v50, %v4521_v52  ;;  %v4597_v37 = vpack.c.bf16 %v10423_v4, %v10372_v15  ;;  %vm11652_vm15 = vmmov %vm11648_vm0 }
 0x6a0   : > { %6915 = vmatmul.mubr.msk.bf16.gmra.mrb[72].mxu1 %vm11650_vm1, %v5929_v7  ;;  %v4596_v31 = vpack.c.bf16 %v10402_v27, %v4594_v29  ;;  %v11651_v6 = vrot.slane %v10437_v5, 1  ;;  %v11654_v8 = vrot.slane %v10406_v19, 1  ;;  %vm11655_vm7 = vmmov %vm11648_vm0  ;;  %v11656_v27 = vrot.slane %v10467_v12, 1 }
 0x6a1   : > { %6934 = vmatprep.mubr.bf16.mxu1 %v4538_v58  ;;  %v11657_v61 = vrot.slane %v10427_v24, 1  ;;  %vm11658_vm9 = vmmov %vm11648_vm0  ;;  %v11661_v19 = vrot.slane %v10456_v60, 1  ;;  %v11662_v7 = vrot.slane %v10485_v38, 1  ;;  %v11672_v12 = vrot.slane %v10494_v63, 1 }
 0x6a2   : > { %v4589_v49 = vsel %vm11652_vm15, %v11651_v6, %v4564_v14  ;;  %v11653_v48 = vmov %v11651_v6  ;;  %vm11660_vm14 = vmmov %vm11648_vm0  ;;  %v11665_v1 = vmov %v11656_v27  ;;  %v4595_v63 = vsel %vm11648_vm0, %v4576_v56, %v4558_v16  ;;  %v7357_v16 = vld [vmem:[%s10844_s3 + $0x238] sm:$0xff]  }
 0x6a3   : > { %v4590_v20 = vsel %vm11655_vm7, %v11654_v8, %v11653_v48  ;;  %v4587_v15 = vsel %vm11658_vm9, %v11657_v61, %v11656_v27  ;;  %v11659_v4 = vmov %v11657_v61  ;;  %vm11663_vm3 = vmmov %vm11648_vm0  ;;  %v11664_v26 = vmov %v11662_v7  ;;  %v10771_v27 = vld [vmem:[%s10845_s4 + $0x2] ss:$0 sm:$0xff] }
 0x6a4   : > { %v4588_v42 = vsel %vm11660_vm14, %v4564_v14, %v11659_v4  ;;  %v4598_v5 = vpack.c.bf16 %v4589_v49, %v4590_v20  ;;  %v4585_v54 = vsel %vm11663_vm3, %v11662_v7, %v11661_v19  ;;  %vm11666_vm11 = vmmov %vm11648_vm0  ;;  %v11667_v14 = vrot.slane %v10473_v13, 1  ;;  %v11681_v7 = vld [vmem:[#allocation26_spill] sm:$0xff] }
 0x6a5   : > { %v4599_v39 = vpack.c.bf16 %v4587_v15, %v4588_v42  ;;  %v4586_v24 = vsel %vm11666_vm11, %v11665_v1, %v11664_v26  ;;  %vm11668_vm2 = vmmov %vm11648_vm0  ;;  %v11670_v58 = vmov %v11661_v19  ;;  %v11676_v60 = vmov %v11672_v12 }
 0x6a6   : > { %v4600_v23 = vpack.c.bf16 %v4585_v54, %v4586_v24  ;;  %v4583_v17 = vsel %vm11668_vm2, %v11667_v14, %v4570_v28  ;;  %v11669_v22 = vmov %v11667_v14  ;;  %vm11671_vm13 = vmmov %vm11648_vm0  ;;  %v11680_v40 = vpack.c.bf16 %v10368_v10, %v10383_v44  ;;  %v7355_v10 = vld [vmem:[%s10844_s3 + $0x228] sm:$0xff]   ;;  %v7356_v44 = vld [vmem:[%s10844_s3 + $0x230] sm:$0xff]  }
 0x6a7   : > { %v4584_v38 = vsel %vm11671_vm13, %v11670_v58, %v11669_v22  ;;  %vm11673_vm4 = vmmov %vm11648_vm0  ;;  %v4547_v18 = vpack.c.bf16 %v4519_v51, %v4519_v51  ;;  %v4605_v30 = vpack.c.bf16 %v4595_v63, %v4595_v63  ;;  %v11682_v24 = vld [vmem:[#allocation39_spill] sm:$0xff]  ;;  %v11683_v14 = vld [vmem:[#allocation33_spill] sm:$0xff] }
 0x6a8   : > { %v4581_v47 = vsel %vm11673_vm4, %v4571_v57, %v11672_v12  ;;  %v4601_v2 = vpack.c.bf16 %v4583_v17, %v4584_v38  ;;  %vm11674_vm10 = vmmov %vm11648_vm0  ;;  %6935 = vmatmul.mubr.bf16.vlgmr.msra.gmra.mrb[76].mxu1 %v11680_v40 }
 0x6a9   : > { %v4582_v52 = vsel %vm11674_vm10, %v4570_v28, %v4571_v57  ;;  %vm11675_vm6 = vmmov %vm11648_vm0  ;;  %v7351_v57 = vld [vmem:[%s10844_s3 + $0x208] sm:$0xff]   ;;  %6938 = vmatprep.mubr.bf16.mxu1 %v4540_v32  ;;  %6955 = vmatpush3.bf16.msra.mxu1 %v10569_v34 }
 0x6aa   : > { %v4579_v13 = vsel %vm11675_vm6, %v4573_v59, %v4574_v0  ;;  %vm11677_vm8 = vmmov %vm11648_vm0  ;;  %v4602_v29 = vpack.c.bf16 %v4581_v47, %v4582_v52  ;;  %6956 = vmatprep.subr.bf16.mxu1 %v7351_v57 }
 0x6ab   : > { %v4580_v50 = vsel %vm11677_vm8, %v11676_v60, %v4573_v59  ;;  %vm11678_vm5 = vmmov %vm11648_vm0  ;;  %v7352_v59 = vld [vmem:[%s10844_s3 + $0x210] sm:$0xff]  }
 0x6ac   : > { %v4603_v25 = vpack.c.bf16 %v4579_v13, %v4580_v50  ;;  %v4577_v43 = vsel %vm11678_vm5, %v4575_v33, %v4576_v56  ;;  %vm11679_vm12 = vmmov %vm11648_vm0  ;;  %v11685_v50 = vld [vmem:[#allocation35_spill] sm:$0xff] }
 0x6ad   : > { %v4578_v28 = vsel %vm11679_vm12, %v4574_v0, %v4575_v33  ;;  %6957 = vmatpush3.bf16.msra.mxu1 %v7351_v57  ;;  %v11687_v57 = vld [vmem:[#allocation37_spill] sm:$0xff] }
 0x6ae   : > { %v4604_v6 = vpack.c.bf16 %v4577_v43, %v4578_v28  ;;  %6958 = vmatprep.subr.bf16.mxu1 %v7352_v59  ;;  %v11686_v43 = vld [vmem:[#allocation43_spill] sm:$0xff] }
 0x6b0   : > { %6939 = vmatmul.mubr.bf16.gmra.mrb[60].mxu1 %v4541_v62 }
 0x6b1   : > { %6942 = vmatprep.mubr.bf16.mxu1 %v4542_v53  ;;  %6959 = vmatpush3.bf16.msra.mxu1 %v7352_v59 }
 0x6b2   : > { %6960 = vmatprep.subr.bf16.mxu1 %v7353_v21 }
 0x6b5   : > { %6961 = vmatpush3.bf16.msra.mxu1 %v7353_v21 }
 0x6b6   : > { %6962 = vmatprep.subr.bf16.mxu1 %v7354_v11 }
 0x6b8   : > { %6943 = vmatmul.mubr.bf16.gmra.mrb[64].mxu1 %v4543_v45 }
 0x6b9   : > { %6946 = vmatprep.mubr.bf16.mxu1 %v4544_v35  ;;  %6963 = vmatpush3.bf16.msra.mxu1 %v7354_v11 }
 0x6ba   : > { %6964 = vmatprep.subr.bf16.mxu1 %v7355_v10 }
 0x6bd   : > { %6965 = vmatpush3.bf16.msra.mxu1 %v7355_v10  ;;  %v11688_v10 = vld [vmem:[#allocation44_spill] sm:$0xff] }
 0x6be   : > { %6966 = vmatprep.subr.bf16.mxu1 %v7356_v44 }
 0x6c0   : > { %6947 = vmatmul.mubr.bf16.gmra.mrb[68].mxu1 %v4545_v46 }
 0x6c1   : > { %6950 = vmatprep.mubr.bf16.mxu1 %v4546_v3  ;;  %6967 = vmatpush3.bf16.msra.mxu1 %v7356_v44 }
 0x6c2   : > { %6968 = vmatprep.subr.bf16.mxu1 %v7357_v16 }
 0x6c5   : > { %6969 = vmatpush3.bf16.msra.mxu1 %v7357_v16 }
 0x6c8   : > { %6951 = vmatmul.mubr.bf16.gmra.mrb[80].mxu1 %v4547_v18 }
 0x6c9   : > { %6970 = vmatprep.mubr.bf16.mxu1 %v4596_v31 }
 0x6d0   : > { %6971 = vmatmul.mubr.bf16.vlgmr.msra.gmra.mrb[84].mxu1 %v4597_v37 }
 0x6d1   : > { %6974 = vmatprep.mubr.bf16.mxu1 %v4598_v5 }
 0x6d8   : > { %6975 = vmatmul.mubr.bf16.gmra.mrb[60].mxu1 %v4599_v39 }
 0x6d9   : > { %6978 = vmatprep.mubr.bf16.mxu1 %v4600_v23 }
 0x6e0   : > { %6979 = vmatmul.mubr.bf16.gmra.mrb[64].mxu1 %v4601_v2  ;;  %v11684_v2 = vld [vmem:[#allocation46_spill] sm:$0xff] }
 0x6e1   : > { %6982 = vmatprep.mubr.bf16.mxu1 %v4602_v29 }
 0x6e8   : > { %6983 = vmatmul.mubr.bf16.gmra.mrb[68].mxu1 %v4603_v25 }
 0x6e9   : > { %6986 = vmatprep.mubr.bf16.mxu1 %v4604_v6 }
 0x6f0   : > { %6987 = vmatmul.mubr.bf16.gmra.mrb[88].mxu1 %v4605_v30  ;;  %v11689_v30 = vld [vmem:[#allocation38_spill] sm:$0xff] }
 0x74d   : > { %v6900_v55 = vpop.f32.mrb[56].mxu1 }
 0x74e   : > { %v4722_v32 = vpop.f32.mrb[57].mxu1 }
 0x74f   : > { %v6901_v41 = vpop.f32.mrb[58].mxu1 }
 0x750   : > { %v4724_v62 = vpop.f32.mrb[59].mxu1 }
 0x773   : > { %v6916_v9 = vpop.f32.mrb[72].mxu1 }
 0x774   : > { %v4785_v34 = vpop.f32.mrb[73].mxu1  ;;  %v11691_v9 = vld [vmem:[#allocation7_spill] sm:$0xff] }
 0x775   : > { %v6917_v36 = vpop.f32.mrb[74].mxu1 }
 0x776   : > { %v4788_v53 = vpop.f32.mrb[75].mxu1 }
 0x77b   : > { %v6936_v56 = vpop.f32.mrb[76].mxu1 }
 0x77c   : > { %v4888_v45 = vadd.f32 %v6936_v56, %v6900_v55  ;;  %v4880_v0 = vpop.f32.mrb[77].mxu1 }
 0x77d   : > { %v6937_v35 = vpop.f32.mrb[78].mxu1 }
 0x77e   : > { %v4891_v46 = vadd.f32 %v6937_v35, %v6901_v41  ;;  %v4882_v51 = vpop.f32.mrb[79].mxu1  ;;  %v11690_v41 = vld [vmem:[#allocation45_spill] sm:$0xff]  ;;  %v11692_v35 = vld [vmem:[#allocation8_spill] sm:$0xff] }
 0x77f   : > { %v4883_v33 = vadd.f32 %v4882_v51, %v4724_v62 }
 0x79b   : > { %v6952_v3 = vpop.f32.mrb[80].mxu1 }
 0x79c   : > { %v4943_v31 = vpop.f32.mrb[81].mxu1  ;;  %v11693_v3 = vld [vmem:[#allocation9_spill] sm:$0xff] }
 0x79d   : > { %v10764_v37 = vadd.f32 %v4943_v31, %v4785_v34  ;;  %v6953_v49 = vpop.f32.mrb[82].mxu1 }
 0x79e   : > { %v4946_v48 = vpop.f32.mrb[83].mxu1 }
 0x79f   : > { %v10766_v8 = vadd.f32 %v4946_v48, %v4788_v53  ;;  %v11694_v48 = vld [vmem:[#allocation10_spill] sm:$0xff] }
 0x7a3   : > { %v6972_v20 = vpop.f32.mrb[84].mxu1 }
 0x7a4   : > { %v5132_v61 = vadd.f32 %v6972_v20, %v4888_v45  ;;  %v5055_v15 = vpop.f32.mrb[85].mxu1 }
 0x7a5   : > { %v6973_v4 = vpop.f32.mrb[86].mxu1 }
 0x7a6   : > { %v5157_v42 = vadd.f32 %v10771_v27, %v5132_v61  ;;  %v5133_v5 = vadd.f32 %v6973_v4, %v4891_v46  ;;  %v5057_v39 = vpop.f32.mrb[87].mxu1  ;;  %v11695_v61 = vld [vmem:[#allocation11_spill] sm:$0xff] }
 0x7a7   : > { %v5131_v19 = vadd.f32 %v5057_v39, %v4883_v33 }
 0x7a8   : > { %v5174_v54 = vadd.f32 %v5157_v42, %v11681_v7  ;;  %v5158_v26 = vadd.f32 %v10771_v27, %v5133_v5 }
 0x7a9   : > { %v5156_v1 = vadd.f32 %v10771_v27, %v5131_v19 }
 0x7aa   : > { %5191 = vst [vmem:[%s7470_s7 + $0x4] sm:$0xff] %v5174_v54  ;;  %v5175_v23 = vadd.f32 %v5158_v26, %v11682_v24  ;;  %v11696_v26 = vld [vmem:[#allocation15_spill] sm:$0xff] }
 0x7ab   : > { %v5173_v17 = vadd.f32 %v5156_v1, %v11683_v14  ;;  %v6976_v22 = vpop.f32.mrb[60].mxu1 }
 0x7ac   : > { %5192 = vst [vmem:[%s7470_s7 + $0xc] sm:$0xff] %v5175_v23  ;;  %v5161_v58 = vadd.f32 %v6976_v22, %v10771_v27  ;;  %v5070_v38 = vpop.f32.mrb[61].mxu1  ;;  %v11697_v23 = vld [vmem:[#allocation16_spill] sm:$0xff] }
 0x7ad   : > { %5190 = vst [vmem:[%s7470_s7 - $0x4] sm:$0xf0] %v5173_v17  ;;  %v5159_v12 = vadd.f32 %v10771_v27, %v5070_v38  ;;  %v6977_v47 = vpop.f32.mrb[62].mxu1 }
 0x7ae   : > { %v5178_v52 = vadd.f32 %v5161_v58, %v11684_v2  ;;  %v5162_v13 = vadd.f32 %v6977_v47, %v10771_v27  ;;  %v5073_v60 = vpop.f32.mrb[63].mxu1 }
 0x7af   : > { %v5176_v29 = vadd.f32 %v5159_v12, %v11685_v50  ;;  %v5160_v25 = vadd.f32 %v10771_v27, %v5073_v60 }
 0x7b0   : > { %5195 = vst [vmem:[%s7470_s7 + $0x24] sm:$0xff] %v5178_v52  ;;  %v5179_v28 = vadd.f32 %v5162_v13, %v11686_v43 }
 0x7b1   : > { %5193 = vst [vmem:[%s7470_s7 + $0x14] sm:$0xff] %v5176_v29  ;;  %v5177_v6 = vadd.f32 %v5160_v25, %v11687_v57 }
 0x7b2   : > { %5196 = vst [vmem:[%s7470_s7 + $0x2c] sm:$0xff] %v5179_v28 }
 0x7b3   : > { %5194 = vst [vmem:[%s7470_s7 + $0x1c] sm:$0xff] %v5177_v6  ;;  %v6980_v63 = vpop.f32.mrb[64].mxu1 }
 0x7b4   : > { %v5165_v40 = vadd.f32 %v6980_v63, %v10771_v27  ;;  %v5086_v59 = vpop.f32.mrb[65].mxu1 }
 0x7b5   : > { %v5163_v21 = vadd.f32 %v10771_v27, %v5086_v59  ;;  %v6981_v11 = vpop.f32.mrb[66].mxu1 }
 0x7b6   : > { %v5182_v44 = vadd.f32 %v5165_v40, %v11688_v10  ;;  %v5166_v16 = vadd.f32 %v6981_v11, %v10771_v27  ;;  %v5089_v18 = vpop.f32.mrb[67].mxu1 }
 0x7b7   : > { %v5180_v55 = vadd.f32 %v5163_v21, %v11689_v30  ;;  %v5164_v32 = vadd.f32 %v10771_v27, %v5089_v18 }
 0x7b8   : > { %5199 = vst [vmem:[%s7470_s7 + $0x44] sm:$0xff] %v5182_v44  ;;  %v5183_v62 = vadd.f32 %v5166_v16, %v11690_v41 }
 0x7b9   : > { %5197 = vst [vmem:[%s7470_s7 + $0x34] sm:$0xff] %v5180_v55  ;;  %v5181_v34 = vadd.f32 %v5164_v32, %v11691_v9 }
 0x7ba   : > { %5200 = vst [vmem:[%s7470_s7 + $0x4c] sm:$0xff] %v5183_v62 }
 0x7bb   : > { %5198 = vst [vmem:[%s7470_s7 + $0x3c] sm:$0xff] %v5181_v34  ;;  %v6984_v36 = vpop.f32.mrb[68].mxu1 }
 0x7bc   : > { %v5169_v53 = vadd.f32 %v6984_v36, %v10771_v27  ;;  %v5102_v56 = vpop.f32.mrb[69].mxu1 }
 0x7bd   : > { %v5167_v45 = vadd.f32 %v10771_v27, %v5102_v56  ;;  %v6985_v0 = vpop.f32.mrb[70].mxu1 }
 0x7be   : > { %v5186_v46 = vadd.f32 %v5169_v53, %v11692_v35  ;;  %v5170_v51 = vadd.f32 %v6985_v0, %v10771_v27  ;;  %v5105_v33 = vpop.f32.mrb[71].mxu1 }
 0x7bf   : > { %v5184_v31 = vadd.f32 %v5167_v45, %v11693_v3  ;;  %v5168_v49 = vadd.f32 %v10771_v27, %v5105_v33 }
 0x7c0   : > { %5203 = vst [vmem:[%s7470_s7 + $0x64] sm:$0xff] %v5186_v46  ;;  %v5187_v20 = vadd.f32 %v5170_v51, %v11694_v48 }
 0x7c1   : > { %5201 = vst [vmem:[%s7470_s7 + $0x54] sm:$0xff] %v5184_v31  ;;  %v5185_v15 = vadd.f32 %v5168_v49, %v11695_v61 }
 0x7c2   : > { %5204 = vst [vmem:[%s7470_s7 + $0x6c] sm:$0xff] %v5187_v20 }
 0x7c3   : > { %5202 = vst [vmem:[%s7470_s7 + $0x5c] sm:$0xff] %v5185_v15  ;;  %v6988_v4 = vpop.f32.mrb[88].mxu1 }
 0x7c4   : > { %v5118_v42 = vpop.f32.mrb[89].mxu1 }
 0x7c5   : > { %v5146_v5 = vadd.f32 %v5118_v42, %v10764_v37  ;;  %v6989_v39 = vpop.f32.mrb[90].mxu1 }
 0x7c6   : > { %v5121_v19 = vpop.f32.mrb[91].mxu1 }
 0x7c7   : > { %v5171_v7 = vadd.f32 %v10771_v27, %v5146_v5  ;;  %v5147_v54 = vadd.f32 %v5121_v19, %v10766_v8 }
 0x7c9   : > { %v5188_v1 = vadd.f32 %v5171_v7, %v11696_v26  ;;  %v5172_v24 = vadd.f32 %v10771_v27, %v5147_v54 }
 0x7cb   : > { %5205 = vst [vmem:[%s7470_s7 + $0x74] sm:$0xff] %v5188_v1  ;;  %v5189_v14 = vadd.f32 %v5172_v24, %v11697_v23 }
 0x7cd   : > { %5206 = vst [vmem:[%s7470_s7 + $0x7c] sm:$0xf] %v5189_v14 }
 0x7ce PF: > { %s15_s22 = sadd.s32 1, %s7398_s22   ;;  %s11698_s18 = smov %s7390_s20 }
 0x7cf   : > { %p12_p13 = scmp.ge.s32.totalorder %s15_s22, 6   ;;  %s11699_s19 = smov %s7394_s21 }
 0x7d0   : > { %s11700_s20 = smov %s11703_s23  ;;  %s11701_s21 = smov %s11707_s24 }
 0x7d1   :  { %14 = sbr.rel (!%p12_p13) target bundleno = 3 (0x3), region = 200 }
 0x7d8   :  { %5237 = vsyncmov [#allocation3] }
 0x7db   :  { %s5238_s7 = vpop.sfrf %5237 }
 0x7dc   :  { %p5967_p0 = scmp.ne.s32.totalorder %s5238_s7, 0 }
 0x7de   :  { %5242 = shalt.err (%p5967_p0)  }
 0x7df   :  { %5244 = vsyncmov [#allocation3 + $0x1] }
 0x7e2   :  { %s5245_s17 = vpop.sfrf %5244 }
 0x7e3   :  { %p5968_p1 = scmp.ne.s32.totalorder %s5245_s17, 0 }
 0x7e5   :  { %5249 = shalt.err (%p5968_p1)  }

</bundles_post_ra>
